<compile_context>
chip_gen: v6e
topology: v6e:2x2x1
jax: 0.10.0
libtpu: 0.0.40
codegen_flags: <defaults>
</compile_context>

<pallas_src>
import functools

import jax
import jax.numpy as jnp
from jax.experimental import pallas as pl
from jax.experimental.pallas import tpu as pltpu


def _round_up(x, m):
    return ((x + m - 1) // m) * m


# ----------------------------------------------------------------------------
# Pallas kernel: fused [conv3x3+BN+ReLU] x 2 on one spatial row-tile
# ----------------------------------------------------------------------------
def _fused_up_conv_kernel(x2_ref, x1_ref, w1_ref, b1_ref, w2t_ref, b2_ref,
                          o_ref, *, th, H, W, Wp, C1p, Cout):
    # x2_ref : (1, 1, th+4, C1p+2, C2)  zero-padded x2 row tile (2-halo)
    # x1_ref : (1, 1, th+4, C1p+2, C1)  zero-padded upsampled-x1 row tile
    # w1_ref : (9*Cin, Cout)   conv1 weights, BN1 scale folded, K order (ky,kx,ci)
    # b1_ref : (1, Cout)       folded BN1 bias
    # w2t_ref: (Cout, 9*Cout)  conv2 weights transposed, BN2 scale folded
    # b2_ref : (Cout, 1)       folded BN2 bias
    # o_ref  : (1, Cout, th*Wp)  lane-dense output tile (already "NCHW"-ordered)
    R1 = th + 2

    # channel concat in VMEM  (== torch.cat([x2, x1], dim=1))
    xt = jnp.concatenate([x2_ref[0, 0], x1_ref[0, 0]],
                         axis=-1).astype(w1_ref.dtype)      # (th+4, C1p+2, Cin)
    cin = xt.shape[-1]

    # ---- stage 1: 3x3 conv as ONE (M1, 9*Cin) @ (9*Cin, Cout) matmul --------
    taps1 = jnp.concatenate(
        [xt[dy:dy + R1, dx:dx + C1p, :].reshape(R1 * C1p, cin)
         for dy in range(3) for dx in range(3)],
        axis=-1)                                            # (R1*C1p, 9*Cin)
    y1 = jnp.dot(taps1, w1_ref[...], preferred_element_type=jnp.float32)
    y1 = jnp.maximum(y1 + b1_ref[...], 0.0)                 # (R1*C1p, Cout)
    y1 = y1.reshape(R1, C1p, Cout)

    # zero the halo positions that lie outside the real image
    # (this reproduces conv2's zero padding of the intermediate activation)
    r0 = pl.program_id(1) * th
    rows = r0 - 1 + jax.lax.broadcasted_iota(jnp.int32, (R1, C1p, 1), 0)
    cols = -1 + jax.lax.broadcasted_iota(jnp.int32, (R1, C1p, 1), 1)
    valid = (rows >= 0) & (rows < H) & (cols >= 0) & (cols < W)
    y1 = (y1 * valid.astype(jnp.float32)).astype(w2t_ref.dtype)

    # ---- stage 2: transposed matmul -> lane-dense (Cout, th*Wp) output ------
    taps2 = jnp.concatenate(
        [y1[dy:dy + th, dx:dx + Wp, :].reshape(th * Wp, Cout)
         for dy in range(3) for dx in range(3)],
        axis=-1)                                            # (th*Wp, 9*Cout)
    y2 = jax.lax.dot_general(
        w2t_ref[...], taps2,
        dimension_numbers=(((1,), (1,)), ((), ())),         # contract K with K
        preferred_element_type=jnp.float32)                 # (Cout, th*Wp)
    y2 = jnp.maximum(y2 + b2_ref[...], 0.0)
    o_ref[0] = y2.astype(o_ref.dtype)


# ----------------------------------------------------------------------------
# Wrapper around the fused kernel
# ----------------------------------------------------------------------------
def fold_bn(gamma, beta, mean, var, eps=1e-5):
    scale = gamma / jnp.sqrt(var + eps)
    bias = beta - mean * scale
    return scale, bias


def conv_stack_fused(x2_nhwc, x1up_nhwc, params, *, row_tile=None,
                     compute_dtype=jnp.float32):
    """ReLU(BN(conv3x3( ReLU(BN(conv3x3(cat[x2,x1up])))))) -> NCHW output."""
    N, H, W, C2 = x2_nhwc.shape
    C1 = x1up_nhwc.shape[-1]
    Cin = C1 + C2
    w1, w2 = params["w1"], params["w2"]
    Cout = w1.shape[0]

    # fold BatchNorm (inference) into per-channel scale (into weights) + bias
    s1, b1 = fold_bn(*params["bn1"])
    s2, b2 = fold_bn(*params["bn2"])
    # (Cout, Cin, ky, kx) -> (ky, kx, ci, co) -> (9*Cin, Cout), scale folded
    w1_k = (jnp.transpose(w1, (2, 3, 1, 0)).reshape(9 * Cin, Cout)
            * s1[None, :]).astype(compute_dtype)
    # (Cout, Cout, ky, kx) -> (co, ky, kx, ci) -> (Cout, 9*Cout), scale folded
    w2_t = (jnp.transpose(w2, (0, 2, 3, 1)).reshape(Cout, 9 * Cout)
            * s2[:, None]).astype(compute_dtype)
    b1_r = b1.reshape(1, Cout).astype(jnp.float32)
    b2_r = b2.reshape(Cout, 1).astype(jnp.float32)

    # spatial tiling: rows of the image, full width per tile
    Wp = _round_up(W, 8)            # lane/sublane-friendly inner width
    C1p = Wp + 8                    # stage-1 halo'd width (mult of 8, >= W+2)
    th = H if row_tile is None else max(1, min(row_tile, H))
    if th < H and (th * Wp) % 128 != 0:
        th = H                      # keep the HBM output block lane-dense
    T = -(-H // th)
    Hp = T * th

    def window(x):                  # (N,H,W,C) -> (N, T, th+4, C1p+2, C) glue
        xp = jnp.pad(x, ((0, 0), (2, 2 + Hp - H), (2, C1p - W), (0, 0)))
        if T == 1:
            return xp[:, None]
        starts = (jnp.arange(T) * th)[:, None] + jnp.arange(th + 4)[None, :]
        return xp[:, starts]        # overlapping (halo) row windows

    x2_w = window(x2_nhwc).astype(compute_dtype)
    x1_w = window(x1up_nhwc).astype(compute_dtype)

    kernel = functools.partial(_fused_up_conv_kernel, th=th, H=H, W=W,
                               Wp=Wp, C1p=C1p, Cout=Cout)

    out = pl.pallas_call(
        kernel,
        out_shape=jax.ShapeDtypeStruct((N, Cout, Hp * Wp), jnp.float32),
        grid_spec=pltpu.PrefetchScalarGridSpec(
            num_scalar_prefetch=0,
            grid=(N, T),
            in_specs=[
                pl.BlockSpec((1, 1, th + 4, C1p + 2, C2),
                             lambda n, j: (n, j, 0, 0, 0)),
                pl.BlockSpec((1, 1, th + 4, C1p + 2, C1),
                             lambda n, j: (n, j, 0, 0, 0)),
                pl.BlockSpec((9 * Cin, Cout), lambda n, j: (0, 0)),
                pl.BlockSpec((1, Cout), lambda n, j: (0, 0)),
                pl.BlockSpec((Cout, 9 * Cout), lambda n, j: (0, 0)),
                pl.BlockSpec((Cout, 1), lambda n, j: (0, 0)),
            ],
            out_specs=pl.BlockSpec((1, Cout, th * Wp),
                                   lambda n, j: (n, 0, j)),
        ),
        compiler_params=pltpu.CompilerParams(
            dimension_semantics=("parallel", "parallel")),
    )(x2_w, x1_w, w1_k, b1_r, w2_t, b2_r)

    # output is already channel-major (NCHW) -> just un-pad the spatial dims
    return out.reshape(N, Cout, Hp, Wp)[:, :, :H, :W]


# ----------------------------------------------------------------------------
# Plain-JAX glue: bilinear upsample (align_corners=True), params
# ----------------------------------------------------------------------------
def bilinear_resize_align_corners(x_nhwc, out_h, out_w):
    n, h, w, c = x_nhwc.shape

    def idx_frac(insz, outsz):
        if insz == 1 or outsz == 1:
            z = jnp.zeros((outsz,), jnp.int32)
            return z, z, jnp.zeros((outsz,), jnp.float32)
        src = jnp.arange(outsz, dtype=jnp.float32) * (insz - 1) / (outsz - 1)
        i0 = jnp.clip(jnp.floor(src).astype(jnp.int32), 0, insz - 2)
        return i0, i0 + 1, src - i0.astype(jnp.float32)

    h0, h1, hf = idx_frac(h, out_h)
    w0, w1, wf = idx_frac(w, out_w)
    xr = (x_nhwc[:, h0] * (1.0 - hf)[None, :, None, None]
          + x_nhwc[:, h1] * hf[None, :, None, None])
    out = (xr[:, :, w0] * (1.0 - wf)[None, None, :, None]
           + xr[:, :, w1] * wf[None, None, :, None])
    return out


def init_up_params(key, in_channels, out_channels):
    ks = jax.random.split(key, 4)

    def bn_params(kk, c):
        k0, k1, k2, k3 = jax.random.split(kk, 4)
        gamma = 1.0 + 0.1 * jax.random.normal(k0, (c,), jnp.float32)
        beta = 0.1 * jax.random.normal(k1, (c,), jnp.float32)
        mean = 0.1 * jax.random.normal(k2, (c,), jnp.float32)
        var = 1.0 + 0.1 * jnp.abs(jax.random.normal(k3, (c,), jnp.float32))
        return gamma, beta, mean, var

    w1 = 0.1 * jax.random.normal(ks[0], (out_channels, in_channels, 3, 3),
                                 jnp.float32)
    w2 = 0.1 * jax.random.normal(ks[1], (out_channels, out_channels, 3, 3),
                                 jnp.float32)
    return {
        "w1": w1, "bn1": bn_params(ks[2], out_channels),
        "w2": w2, "bn2": bn_params(ks[3], out_channels),
    }


def up_forward(params, x1_nchw, x2_nchw, *, row_tile=None,
               compute_dtype=jnp.float32):
    """Pallas-backed forward of Up. Inputs/outputs NCHW (PyTorch layout)."""
    x1 = jnp.transpose(x1_nchw, (0, 2, 3, 1))
    x2 = jnp.transpose(x2_nchw, (0, 2, 3, 1))
    # TODO(synk): bilinear upsample is a data-dependent gather; kept as
    #             plain-JAX glue rather than a Pallas kernel.
    x1_up = bilinear_resize_align_corners(x1, x2.shape[1], x2.shape[2])
    return conv_stack_fused(x2, x1_up, params, row_tile=row_tile,
                            compute_dtype=compute_dtype)


# ----------------------------------------------------------------------------
# Pure-JAX reference (for correctness check only)
# ----------------------------------------------------------------------------
def up_forward_ref(params, x1_nchw, x2_nchw):
    x1 = jnp.transpose(x1_nchw, (0, 2, 3, 1))
    x2 = jnp.transpose(x2_nchw, (0, 2, 3, 1))
    x1_up = bilinear_resize_align_corners(x1, x2.shape[1], x2.shape[2])
    x = jnp.concatenate([x2, x1_up], axis=-1)

    def cbr(z, w_oihw, gamma, beta, mean, var):
        y = jax.lax.conv_general_dilated(
            z, jnp.transpose(w_oihw, (2, 3, 1, 0)),
            window_strides=(1, 1), padding="SAME",
            dimension_numbers=("NHWC", "HWIO", "NHWC"))
        s, b = fold_bn(gamma, beta, mean, var)
        return jnp.maximum(y * s + b, 0.0)

    y = cbr(x, params["w1"], *params["bn1"])
    y = cbr(y, params["w2"], *params["bn2"])
    return jnp.transpose(y, (0, 3, 1, 2))


# ----------------------------------------------------------------------------
if __name__ == "__main__":
    key = jax.random.PRNGKey(0)
    k_x1, k_x2, k_p = jax.random.split(key, 3)

    N = 2
    C1, C2 = 4, 4                 # x1 channels (low-res), x2 channels (skip)
    in_channels = C1 + C2         # 8, after concat
    out_channels = 8
    H1, W1 = 8, 8                 # x1 spatial (gets upsampled x2)
    H2, W2 = 16, 16               # x2 spatial

    x1 = jax.random.normal(k_x1, (N, C1, H1, W1), jnp.float32)   # NCHW
    x2 = jax.random.normal(k_x2, (N, C2, H2, W2), jnp.float32)   # NCHW
    params = init_up_params(k_p, in_channels, out_channels)

    out = jax.block_until_ready(jax.jit(up_forward)(params, x1, x2))
    ref = jax.block_until_ready(up_forward_ref(params, x1, x2))

    assert out.shape == (N, out_channels, H2, W2), out.shape
    max_err = float(jnp.max(jnp.abs(out - ref)))
    assert max_err < 2e-4, f"max abs error vs reference: {max_err}"
    print("KERNEL_OK")
</pallas_src>

<mosaic_0001>
module attributes {stable_mosaic.version = 11 : i64} {
  func.func @_fused_up_conv_kernel(%arg0: i32, %arg1: i32, %arg2: memref<1x1x20x26x4xf32, #tpu.memory_space<vmem>>, %arg3: memref<1x1x20x26x4xf32, #tpu.memory_space<vmem>>, %arg4: memref<72x8xf32, #tpu.memory_space<vmem>>, %arg5: memref<1x8xf32, #tpu.memory_space<vmem>>, %arg6: memref<8x72xf32, #tpu.memory_space<vmem>>, %arg7: memref<8x1xf32, #tpu.memory_space<vmem>>, %arg8: memref<1x8x256xf32, #tpu.memory_space<vmem>>) attributes {dimension_semantics = [#tpu.dimension_semantics<parallel>, #tpu.dimension_semantics<parallel>], iteration_bounds = array<i64: 2, 1>, scalar_prefetch = 0 : i64, scratch_operands = 0 : i64, tpu.core_type = #tpu.core_type<tc>, window_params = [{transform_indices = @transform_0, window_bounds = array<i64: 1, 1, 20, 26, 4>}, {transform_indices = @transform_1, window_bounds = array<i64: 1, 1, 20, 26, 4>}, {pipeline_mode = #tpu.pipeline_mode<synchronous>, transform_indices = @transform_2, window_bounds = array<i64: 72, 8>}, {pipeline_mode = #tpu.pipeline_mode<synchronous>, transform_indices = @transform_3, window_bounds = array<i64: 1, 8>}, {pipeline_mode = #tpu.pipeline_mode<synchronous>, transform_indices = @transform_4, window_bounds = array<i64: 8, 72>}, {pipeline_mode = #tpu.pipeline_mode<synchronous>, transform_indices = @transform_5, window_bounds = array<i64: 8, 1>}, {transform_indices = @transform_6, window_bounds = array<i64: 1, 8, 256>}]} {
    %c0 = arith.constant 0 : index
    %c0_0 = arith.constant 0 : index
    %c0_1 = arith.constant 0 : index
    %c0_2 = arith.constant 0 : index
    %c0_3 = arith.constant 0 : index
    %0 = vector.load %arg2[%c0, %c0_0, %c0_1, %c0_2, %c0_3] : memref<1x1x20x26x4xf32, #tpu.memory_space<vmem>>, vector<1x1x20x26x4xf32>
    %1 = vector.shape_cast %0 : vector<1x1x20x26x4xf32> to vector<20x26x4xf32>
    %c0_4 = arith.constant 0 : index
    %c0_5 = arith.constant 0 : index
    %c0_6 = arith.constant 0 : index
    %c0_7 = arith.constant 0 : index
    %c0_8 = arith.constant 0 : index
    %2 = vector.load %arg3[%c0_4, %c0_5, %c0_6, %c0_7, %c0_8] : memref<1x1x20x26x4xf32, #tpu.memory_space<vmem>>, vector<1x1x20x26x4xf32>
    %3 = vector.shape_cast %2 : vector<1x1x20x26x4xf32> to vector<20x26x4xf32>
    %4 = tpu.concatenate %1, %3 in 2 : vector<20x26x4xf32>, vector<20x26x4xf32> -> vector<20x26x8xf32>
    %5 = vector.extract_strided_slice %4 {offsets = [0, 0, 0], sizes = [18, 24, 8], strides = [1, 1, 1]} : vector<20x26x8xf32> to vector<18x24x8xf32>
    %6 = vector.shape_cast %5 : vector<18x24x8xf32> to vector<432x8xf32>
    %7 = vector.extract_strided_slice %4 {offsets = [0, 1, 0], sizes = [18, 24, 8], strides = [1, 1, 1]} : vector<20x26x8xf32> to vector<18x24x8xf32>
    %8 = vector.shape_cast %7 : vector<18x24x8xf32> to vector<432x8xf32>
    %9 = vector.extract_strided_slice %4 {offsets = [0, 2, 0], sizes = [18, 24, 8], strides = [1, 1, 1]} : vector<20x26x8xf32> to vector<18x24x8xf32>
    %10 = vector.shape_cast %9 : vector<18x24x8xf32> to vector<432x8xf32>
    %11 = vector.extract_strided_slice %4 {offsets = [1, 0, 0], sizes = [18, 24, 8], strides = [1, 1, 1]} : vector<20x26x8xf32> to vector<18x24x8xf32>
    %12 = vector.shape_cast %11 : vector<18x24x8xf32> to vector<432x8xf32>
    %13 = vector.extract_strided_slice %4 {offsets = [1, 1, 0], sizes = [18, 24, 8], strides = [1, 1, 1]} : vector<20x26x8xf32> to vector<18x24x8xf32>
    %14 = vector.shape_cast %13 : vector<18x24x8xf32> to vector<432x8xf32>
    %15 = vector.extract_strided_slice %4 {offsets = [1, 2, 0], sizes = [18, 24, 8], strides = [1, 1, 1]} : vector<20x26x8xf32> to vector<18x24x8xf32>
    %16 = vector.shape_cast %15 : vector<18x24x8xf32> to vector<432x8xf32>
    %17 = vector.extract_strided_slice %4 {offsets = [2, 0, 0], sizes = [18, 24, 8], strides = [1, 1, 1]} : vector<20x26x8xf32> to vector<18x24x8xf32>
    %18 = vector.shape_cast %17 : vector<18x24x8xf32> to vector<432x8xf32>
    %19 = vector.extract_strided_slice %4 {offsets = [2, 1, 0], sizes = [18, 24, 8], strides = [1, 1, 1]} : vector<20x26x8xf32> to vector<18x24x8xf32>
    %20 = vector.shape_cast %19 : vector<18x24x8xf32> to vector<432x8xf32>
    %21 = vector.extract_strided_slice %4 {offsets = [2, 2, 0], sizes = [18, 24, 8], strides = [1, 1, 1]} : vector<20x26x8xf32> to vector<18x24x8xf32>
    %22 = vector.shape_cast %21 : vector<18x24x8xf32> to vector<432x8xf32>
    %23 = tpu.concatenate %6, %8, %10, %12, %14, %16, %18, %20, %22 in 1 : vector<432x8xf32>, vector<432x8xf32>, vector<432x8xf32>, vector<432x8xf32>, vector<432x8xf32>, vector<432x8xf32>, vector<432x8xf32>, vector<432x8xf32>, vector<432x8xf32> -> vector<432x72xf32>
    %c0_9 = arith.constant 0 : index
    %c0_10 = arith.constant 0 : index
    %24 = vector.load %arg4[%c0_9, %c0_10] : memref<72x8xf32, #tpu.memory_space<vmem>>, vector<72x8xf32>
    %cst = arith.constant dense<0.000000e+00> : vector<432x8xf32>
    %25 = tpu.matmul %23, %24, %cst {dimension_numbers = #tpu.dot_dimension_numbers<[1], [0], [0], [1], [0, 0, 1, 1], [], []>} : vector<432x72xf32>, vector<72x8xf32>, vector<432x8xf32> -> vector<432x8xf32>
    %c0_11 = arith.constant 0 : index
    %c0_12 = arith.constant 0 : index
    %26 = vector.load %arg5[%c0_11, %c0_12] : memref<1x8xf32, #tpu.memory_space<vmem>>, vector<1x8xf32>
    %27 = vector.broadcast %26 : vector<1x8xf32> to vector<432x8xf32>
    %28 = arith.addf %25, %27 : vector<432x8xf32>
    %cst_13 = arith.constant 0.000000e+00 : f32
    %29 = vector.broadcast %cst_13 : f32 to vector<432x8xf32>
    %30 = arith.maximumf %28, %29 : vector<432x8xf32>
    %31 = vector.shape_cast %30 : vector<432x8xf32> to vector<18x24x8xf32>
    %c16_i32 = arith.constant 16 : i32
    %32 = arith.muli %arg1, %c16_i32 : i32
    %c1_i32 = arith.constant 1 : i32
    %33 = arith.subi %32, %c1_i32 : i32
    %34 = tpu.iota {dimensions = array<i32: 0>} : vector<18x24x1xi32>
    %35 = vector.broadcast %33 : i32 to vector<18x24x1xi32>
    %36 = arith.addi %35, %34 : vector<18x24x1xi32>
    %37 = tpu.iota {dimensions = array<i32: 1>} : vector<18x24x1xi32>
    %c-1_i32 = arith.constant -1 : i32
    %38 = vector.broadcast %c-1_i32 : i32 to vector<18x24x1xi32>
    %39 = arith.addi %38, %37 : vector<18x24x1xi32>
    %c0_i32 = arith.constant 0 : i32
    %40 = vector.broadcast %c0_i32 : i32 to vector<18x24x1xi32>
    %41 = arith.cmpi sge, %36, %40 : vector<18x24x1xi32>
    %c16_i32_14 = arith.constant 16 : i32
    %42 = vector.broadcast %c16_i32_14 : i32 to vector<18x24x1xi32>
    %43 = arith.cmpi slt, %36, %42 : vector<18x24x1xi32>
    %44 = arith.andi %41, %43 : vector<18x24x1xi1>
    %c0_i32_15 = arith.constant 0 : i32
    %45 = vector.broadcast %c0_i32_15 : i32 to vector<18x24x1xi32>
    %46 = arith.cmpi sge, %39, %45 : vector<18x24x1xi32>
    %47 = arith.andi %44, %46 : vector<18x24x1xi1>
    %c16_i32_16 = arith.constant 16 : i32
    %48 = vector.broadcast %c16_i32_16 : i32 to vector<18x24x1xi32>
    %49 = arith.cmpi slt, %39, %48 : vector<18x24x1xi32>
    %50 = arith.andi %47, %49 : vector<18x24x1xi1>
    %51 = arith.extui %50 : vector<18x24x1xi1> to vector<18x24x1xi32>
    %52 = arith.sitofp %51 : vector<18x24x1xi32> to vector<18x24x1xf32>
    %53 = vector.broadcast %52 : vector<18x24x1xf32> to vector<18x24x8xf32>
    %54 = arith.mulf %31, %53 : vector<18x24x8xf32>
    %55 = vector.extract_strided_slice %54 {offsets = [0, 0, 0], sizes = [16, 16, 8], strides = [1, 1, 1]} : vector<18x24x8xf32> to vector<16x16x8xf32>
    %56 = vector.shape_cast %55 : vector<16x16x8xf32> to vector<256x8xf32>
    %57 = vector.extract_strided_slice %54 {offsets = [0, 1, 0], sizes = [16, 16, 8], strides = [1, 1, 1]} : vector<18x24x8xf32> to vector<16x16x8xf32>
    %58 = vector.shape_cast %57 : vector<16x16x8xf32> to vector<256x8xf32>
    %59 = vector.extract_strided_slice %54 {offsets = [0, 2, 0], sizes = [16, 16, 8], strides = [1, 1, 1]} : vector<18x24x8xf32> to vector<16x16x8xf32>
    %60 = vector.shape_cast %59 : vector<16x16x8xf32> to vector<256x8xf32>
    %61 = vector.extract_strided_slice %54 {offsets = [1, 0, 0], sizes = [16, 16, 8], strides = [1, 1, 1]} : vector<18x24x8xf32> to vector<16x16x8xf32>
    %62 = vector.shape_cast %61 : vector<16x16x8xf32> to vector<256x8xf32>
    %63 = vector.extract_strided_slice %54 {offsets = [1, 1, 0], sizes = [16, 16, 8], strides = [1, 1, 1]} : vector<18x24x8xf32> to vector<16x16x8xf32>
    %64 = vector.shape_cast %63 : vector<16x16x8xf32> to vector<256x8xf32>
    %65 = vector.extract_strided_slice %54 {offsets = [1, 2, 0], sizes = [16, 16, 8], strides = [1, 1, 1]} : vector<18x24x8xf32> to vector<16x16x8xf32>
    %66 = vector.shape_cast %65 : vector<16x16x8xf32> to vector<256x8xf32>
    %67 = vector.extract_strided_slice %54 {offsets = [2, 0, 0], sizes = [16, 16, 8], strides = [1, 1, 1]} : vector<18x24x8xf32> to vector<16x16x8xf32>
    %68 = vector.shape_cast %67 : vector<16x16x8xf32> to vector<256x8xf32>
    %69 = vector.extract_strided_slice %54 {offsets = [2, 1, 0], sizes = [16, 16, 8], strides = [1, 1, 1]} : vector<18x24x8xf32> to vector<16x16x8xf32>
    %70 = vector.shape_cast %69 : vector<16x16x8xf32> to vector<256x8xf32>
    %71 = vector.extract_strided_slice %54 {offsets = [2, 2, 0], sizes = [16, 16, 8], strides = [1, 1, 1]} : vector<18x24x8xf32> to vector<16x16x8xf32>
    %72 = vector.shape_cast %71 : vector<16x16x8xf32> to vector<256x8xf32>
    %73 = tpu.concatenate %56, %58, %60, %62, %64, %66, %68, %70, %72 in 1 : vector<256x8xf32>, vector<256x8xf32>, vector<256x8xf32>, vector<256x8xf32>, vector<256x8xf32>, vector<256x8xf32>, vector<256x8xf32>, vector<256x8xf32>, vector<256x8xf32> -> vector<256x72xf32>
    %c0_17 = arith.constant 0 : index
    %c0_18 = arith.constant 0 : index
    %74 = vector.load %arg6[%c0_17, %c0_18] : memref<8x72xf32, #tpu.memory_space<vmem>>, vector<8x72xf32>
    %cst_19 = arith.constant dense<0.000000e+00> : vector<8x256xf32>
    %75 = tpu.matmul %74, %73, %cst_19 {dimension_numbers = #tpu.dot_dimension_numbers<[1], [1], [0], [0], [0, 0, 1, 0], [], []>} : vector<8x72xf32>, vector<256x72xf32>, vector<8x256xf32> -> vector<8x256xf32>
    %c0_20 = arith.constant 0 : index
    %c0_21 = arith.constant 0 : index
    %76 = vector.load %arg7[%c0_20, %c0_21] : memref<8x1xf32, #tpu.memory_space<vmem>>, vector<8x1xf32>
    %77 = vector.broadcast %76 : vector<8x1xf32> to vector<8x256xf32>
    %78 = arith.addf %75, %77 : vector<8x256xf32>
    %cst_22 = arith.constant 0.000000e+00 : f32
    %79 = vector.broadcast %cst_22 : f32 to vector<8x256xf32>
    %80 = arith.maximumf %78, %79 : vector<8x256xf32>
    %c0_23 = arith.constant 0 : index
    %c0_24 = arith.constant 0 : index
    %c0_25 = arith.constant 0 : index
    %81 = vector.load %arg8[%c0_23, %c0_24, %c0_25] : memref<1x8x256xf32, #tpu.memory_space<vmem>>, vector<1x8x256xf32>
    %82 = vector.shape_cast %81 : vector<1x8x256xf32> to vector<8x256xf32>
    %83 = vector.shape_cast %80 : vector<8x256xf32> to vector<1x8x256xf32>
    tpu.vector_store %arg8[%c0_23, %c0_24, %c0_25], %83 {strides = array<i32>} : memref<1x8x256xf32, #tpu.memory_space<vmem>>, vector<1x8x256xf32>,
    return
  }
  func.func @transform_0(%arg0: i32, %arg1: i32) -> (i32, i32, i32, i32, i32) {
    %c0_i32 = arith.constant 0 : i32
    %c0_i32_0 = arith.constant 0 : i32
    %c0_i32_1 = arith.constant 0 : i32
    %c0_i32_2 = arith.constant 0 : i32
    return %arg0, %arg1, %c0_i32, %c0_i32_0, %c0_i32_1 : i32, i32, i32, i32, i32
  }
  func.func @transform_1(%arg0: i32, %arg1: i32) -> (i32, i32, i32, i32, i32) {
    %c0_i32 = arith.constant 0 : i32
    %c0_i32_0 = arith.constant 0 : i32
    %c0_i32_1 = arith.constant 0 : i32
    %c0_i32_2 = arith.constant 0 : i32
    return %arg0, %arg1, %c0_i32, %c0_i32_0, %c0_i32_1 : i32, i32, i32, i32, i32
  }
  func.func @transform_2(%arg0: i32, %arg1: i32) -> (i32, i32) {
    %c0_i32 = arith.constant 0 : i32
    %c0_i32_0 = arith.constant 0 : i32
    %c0_i32_1 = arith.constant 0 : i32
    return %c0_i32, %c0_i32_0 : i32, i32
  }
  func.func @transform_3(%arg0: i32, %arg1: i32) -> (i32, i32) {
    %c0_i32 = arith.constant 0 : i32
    %c0_i32_0 = arith.constant 0 : i32
    %c0_i32_1 = arith.constant 0 : i32
    return %c0_i32, %c0_i32_0 : i32, i32
  }
  func.func @transform_4(%arg0: i32, %arg1: i32) -> (i32, i32) {
    %c0_i32 = arith.constant 0 : i32
    %c0_i32_0 = arith.constant 0 : i32
    %c0_i32_1 = arith.constant 0 : i32
    return %c0_i32, %c0_i32_0 : i32, i32
  }
  func.func @transform_5(%arg0: i32, %arg1: i32) -> (i32, i32) {
    %c0_i32 = arith.constant 0 : i32
    %c0_i32_0 = arith.constant 0 : i32
    %c0_i32_1 = arith.constant 0 : i32
    return %c0_i32, %c0_i32_0 : i32, i32
  }
  func.func @transform_6(%arg0: i32, %arg1: i32) -> (i32, i32, i32) {
    %c0_i32 = arith.constant 0 : i32
    %c0_i32_0 = arith.constant 0 : i32
    return %arg0, %c0_i32, %arg1 : i32, i32, i32
  }
}

</mosaic_0001>

<bundles_post_ra>
// kernel: up_forward.1
= control target key start
LH: loop header
LB: loop body
LE: loop exit
PB: predicated region body
PF: predicated region fallthrough
CT: control target
= control target key end

     0   :  { %s5893_s21 = smov 0   ;;  %s5895_s22 = smov 0   ;;  %s11129_s0 = inlined_call_operand.vmem [shape: f32[2,1,20,26,4], index: 0, kind: input, shape index: {}]   ;;  %s11130_s1 = inlined_call_operand.vmem [shape: f32[2,1,20,26,4], index: 1, kind: input, shape index: {}]   ;;  %s11131_s2 = inlined_call_operand.vmem [shape: f32[72,8], index: 2, kind: input, shape index: {}]   ;;  %s11132_s3 = inlined_call_operand.vmem [shape: f32[1,8], index: 3, kind: input, shape index: {}]   ;;  %s11133_s4 = inlined_call_operand.vmem [shape: f32[8,72], index: 4, kind: input, shape index: {}]   ;;  %s11134_s5 = inlined_call_operand.vmem [shape: f32[8,1], index: 5, kind: input, shape index: {}]   ;;  %s11135_s6 = inlined_call_operand.vmem [shape: f32[2,8,256], index: 6, kind: output, shape index: {}]  }
   0x1   :  { %s5897_s23 = smov 0  }
   0x2 LB: > { %s28_s24 = sadd.s32 1, %s5841_s22  ;;  %p5461_p0 = scmp.ge.s32.totalorder %s5845_s23, 1  ;;  %s5845_s23 = sphi %s5897_s23, %s16_s23   ;;  %s5841_s22 = sphi %s5895_s22, %s12866_s22   ;;  %s5837_s21 = sphi %s5893_s21, %s12865_s21  }
   0x3   : > { %p30_p1 = scmp.ge.s32.totalorder %s28_s24, 2  ;;  %p248_p2 = scmp.lt.s32.totalorder %s5845_s23, 3 }
   0x5   : > { %s12868_s24 = smov (%p30_p1, %s28_s24), 0  ;;  %p249_p3 = pnand %p5461_p0, %p248_p2 }
   0x7   : > { %252 = sbr.rel (%p249_p3) target bundleno = 2103 (0x837), region = 44 }
   0xc   : > { %p295_p4 = scmp.lt.s32.totalorder %s5837_s21, 1  ;;  %s5847_s29 = smov 4   ;;  %vm803_vm0 = vcmask 31744   ;;  %vm956_vm1 = vcmask 1046528   ;;  %vm1083_vm2 = vcmask 1045504   ;;  %vm2542_vm3 = vcmask 64512  }
   0xd   : > { %s5848_s9 = smov 8   ;;  %s5849_s10 = smov 16   ;;  %vm2597_vm4 = vcmask 130048   ;;  %vm2652_vm5 = vcmask 195584   ;;  %vm2707_vm6 = vcmask 261120   ;;  %vm2762_vm7 = vcmask 326656  }
   0xe   : > { %s12870_s21 = smov (!%p295_p4, %s5837_s21), 1  ;;  %s5850_s11 = smov 24   ;;  %vm2817_vm8 = vcmask 392192   ;;  %vm2872_vm9 = vcmask 457728   ;;  %vm2927_vm10 = vcmask 523264   ;;  %vm2998_vm11 = vcmask 588800  }
   0xf   : > { %s5785_s25 = smul.u32 640, %s12870_s21  ;;  %s5851_s12 = smov 32  }
  0x10   : > { %s5852_s13 = smov 40   ;;  %s5853_s14 = smov 48  }
  0x11   : > { %s5919_s28 = scalar_lea.vmem %s11130_s1, %s5785_s25  ;;  %s6110_s8 = scalar_lea.vmem %s11129_s0, %s5785_s25 }
  0x12   : > { %v405_v0 = vld [vmem:[%s5919_s28 + $0x10] sm:$0xff]  ;;  %v403_v1 = vld [vmem:[%s5919_s28] sm:$0xff]  ;;  %v406_v2 = vld [vmem:[%s5919_s28 + $0x18] sm:$0x3]  ;;  %s5854_s15 = smov 56   ;;  %s5855_s26 = smov 64  }
  0x13   : > { %567 = vrot.lane.b32.xlu1 %v405_v0, %s5847_s29  ;;  %563 = vrot.lane.b32.xlu0 %v403_v1, %s5847_s29  ;;  %v404_v3 = vld [vmem:[%s5919_s28 + $0x8] sm:$0xff]  ;;  %v407_v5 = vld [vmem:[%s5919_s28 + $0x20] sm:$0xff] }
  0x14   : > { %v408_v4 = vld [vmem:[%s5919_s28 + $0x28] sm:$0xff]  ;;  %v410_v6 = vld [vmem:[%s5919_s28 + $0x38] sm:$0x3]  ;;  %v409_v7 = vld [vmem:[%s5919_s28 + $0x30] sm:$0xff] }
  0x15   : > { %v412_v8 = vld [vmem:[%s5919_s28 + $0x48] sm:$0xff]  ;;  %v411_v9 = vld [vmem:[%s5919_s28 + $0x40] sm:$0xff]  ;;  %v414_v10 = vld [vmem:[%s5919_s28 + $0x58] sm:$0x3] }
  0x16   : > { %v413_v11 = vld [vmem:[%s5919_s28 + $0x50] sm:$0xff]  ;;  %v416_v12 = vld [vmem:[%s5919_s28 + $0x68] sm:$0xff]  ;;  %v415_v13 = vld [vmem:[%s5919_s28 + $0x60] sm:$0xff] }
  0x17   : > { %569 = vrot.lane.b32.xlu1 %v406_v2, %s5847_s29  ;;  %565 = vrot.lane.b32.xlu0 %v404_v3, %s5847_s29  ;;  %v418_v14 = vld [vmem:[%s5919_s28 + $0x78] sm:$0x3]  ;;  %v417_v15 = vld [vmem:[%s5919_s28 + $0x70] sm:$0xff] }
  0x18   : > { %v420_v16 = vld [vmem:[%s5919_s28 + $0x88] sm:$0xff]  ;;  %v419_v17 = vld [vmem:[%s5919_s28 + $0x80] sm:$0xff]  ;;  %v422_v18 = vld [vmem:[%s5919_s28 + $0x98] sm:$0x3] }
  0x19   : > { %v421_v19 = vld [vmem:[%s5919_s28 + $0x90] sm:$0xff]  ;;  %v424_v20 = vld [vmem:[%s5919_s28 + $0xa8] sm:$0xff]  ;;  %v423_v21 = vld [vmem:[%s5919_s28 + $0xa0] sm:$0xff] }
  0x1a   : > { %v426_v22 = vld [vmem:[%s5919_s28 + $0xb8] sm:$0x3]  ;;  %v425_v23 = vld [vmem:[%s5919_s28 + $0xb0] sm:$0xff]  ;;  %v428_v24 = vld [vmem:[%s5919_s28 + $0xc8] sm:$0xff] }
  0x1b   : > { %573 = vrot.lane.b32.xlu1 %v408_v4, %s5847_s29  ;;  %571 = vrot.lane.b32.xlu0 %v407_v5, %s5847_s29  ;;  %v427_v25 = vld [vmem:[%s5919_s28 + $0xc0] sm:$0xff]  ;;  %v430_v26 = vld [vmem:[%s5919_s28 + $0xd8] sm:$0x3] }
  0x1c   : > { %v429_v27 = vld [vmem:[%s5919_s28 + $0xd0] sm:$0xff]  ;;  %v432_v28 = vld [vmem:[%s5919_s28 + $0xe8] sm:$0xff]  ;;  %v431_v29 = vld [vmem:[%s5919_s28 + $0xe0] sm:$0xff] }
  0x1d   : > { %v434_v30 = vld [vmem:[%s5919_s28 + $0xf8] sm:$0x3]  ;;  %v433_v31 = vld [vmem:[%s5919_s28 + $0xf0] sm:$0xff]  ;;  %v436_v32 = vld [vmem:[%s5919_s28 + $0x108] sm:$0xff] }
  0x1e   : > { %v435_v33 = vld [vmem:[%s5919_s28 + $0x100] sm:$0xff]  ;;  %v438_v34 = vld [vmem:[%s5919_s28 + $0x118] sm:$0x3]  ;;  %v437_v35 = vld [vmem:[%s5919_s28 + $0x110] sm:$0xff] }
  0x1f   : > { %577 = vrot.lane.b32.xlu1 %v410_v6, %s5847_s29  ;;  %575 = vrot.lane.b32.xlu0 %v409_v7, %s5847_s29  ;;  %v440_v36 = vld [vmem:[%s5919_s28 + $0x128] sm:$0xff]  ;;  %v439_v37 = vld [vmem:[%s5919_s28 + $0x120] sm:$0xff] }
  0x20   : > { %v442_v38 = vld [vmem:[%s5919_s28 + $0x138] sm:$0x3]  ;;  %v441_v39 = vld [vmem:[%s5919_s28 + $0x130] sm:$0xff]  ;;  %v444_v40 = vld [vmem:[%s5919_s28 + $0x148] sm:$0xff] }
  0x21   : > { %v443_v41 = vld [vmem:[%s5919_s28 + $0x140] sm:$0xff]  ;;  %v446_v42 = vld [vmem:[%s5919_s28 + $0x158] sm:$0x3]  ;;  %v445_v43 = vld [vmem:[%s5919_s28 + $0x150] sm:$0xff] }
  0x22   : > { %v448_v44 = vld [vmem:[%s5919_s28 + $0x168] sm:$0xff]  ;;  %v447_v45 = vld [vmem:[%s5919_s28 + $0x160] sm:$0xff]  ;;  %v450_v46 = vld [vmem:[%s5919_s28 + $0x178] sm:$0x3] }
  0x23   : > { %581 = vrot.lane.b32.xlu1 %v412_v8, %s5847_s29  ;;  %579 = vrot.lane.b32.xlu0 %v411_v9, %s5847_s29  ;;  %v449_v47 = vld [vmem:[%s5919_s28 + $0x170] sm:$0xff]  ;;  %v452_v48 = vld [vmem:[%s5919_s28 + $0x188] sm:$0xff] }
  0x24   : > { %v451_v49 = vld [vmem:[%s5919_s28 + $0x180] sm:$0xff]  ;;  %v454_v50 = vld [vmem:[%s5919_s28 + $0x198] sm:$0x3]  ;;  %v453_v51 = vld [vmem:[%s5919_s28 + $0x190] sm:$0xff] }
  0x25   : > { %v456_v52 = vld [vmem:[%s5919_s28 + $0x1a8] sm:$0xff]  ;;  %v455_v53 = vld [vmem:[%s5919_s28 + $0x1a0] sm:$0xff]  ;;  %v458_v54 = vld [vmem:[%s5919_s28 + $0x1b8] sm:$0x3] }
  0x26   : > { %v457_v55 = vld [vmem:[%s5919_s28 + $0x1b0] sm:$0xff]  ;;  %v460_v56 = vld [vmem:[%s5919_s28 + $0x1c8] sm:$0xff]  ;;  %v459_v57 = vld [vmem:[%s5919_s28 + $0x1c0] sm:$0xff] }
  0x27   : > { %585 = vrot.lane.b32.xlu1 %v414_v10, %s5847_s29  ;;  %583 = vrot.lane.b32.xlu0 %v413_v11, %s5847_s29  ;;  %v462_v58 = vld [vmem:[%s5919_s28 + $0x1d8] sm:$0x3]  ;;  %v461_v59 = vld [vmem:[%s5919_s28 + $0x1d0] sm:$0xff] }
  0x28   : > { %v464_v62 = vld [vmem:[%s5919_s28 + $0x1e8] sm:$0xff]  ;;  %v463_v63 = vld [vmem:[%s5919_s28 + $0x1e0] sm:$0xff]  ;;  %v466_v2 = vld [vmem:[%s5919_s28 + $0x1f8] sm:$0x3] }
  0x29   : > { %v465_v3 = vld [vmem:[%s5919_s28 + $0x1f0] sm:$0xff]  ;;  %v468_v6 = vld [vmem:[%s5919_s28 + $0x208] sm:$0xff]  ;;  %v467_v7 = vld [vmem:[%s5919_s28 + $0x200] sm:$0xff] }
  0x2a   : > { %v470_v10 = vld [vmem:[%s5919_s28 + $0x218] sm:$0x3]  ;;  %v469_v11 = vld [vmem:[%s5919_s28 + $0x210] sm:$0xff] }
  0x2b   : > { %589 = vrot.lane.b32.xlu1 %v416_v12, %s5847_s29  ;;  %587 = vrot.lane.b32.xlu0 %v415_v13, %s5847_s29 }
  0x2f   : > { %593 = vrot.lane.b32.xlu1 %v418_v14, %s5847_s29  ;;  %591 = vrot.lane.b32.xlu0 %v417_v15, %s5847_s29  ;;  %v472_v14 = vld [vmem:[%s5919_s28 + $0x228] sm:$0xff]  ;;  %v471_v15 = vld [vmem:[%s5919_s28 + $0x220] sm:$0xff] }
  0x33   : > { %597 = vrot.lane.b32.xlu1 %v420_v16, %s5847_s29  ;;  %595 = vrot.lane.b32.xlu0 %v419_v17, %s5847_s29 }
  0x37   : > { %601 = vrot.lane.b32.xlu1 %v422_v18, %s5847_s29  ;;  %599 = vrot.lane.b32.xlu0 %v421_v19, %s5847_s29  ;;  %v474_v18 = vld [vmem:[%s5919_s28 + $0x238] sm:$0x3]  ;;  %v473_v19 = vld [vmem:[%s5919_s28 + $0x230] sm:$0xff] }
  0x3b   : > { %605 = vrot.lane.b32.xlu1 %v424_v20, %s5847_s29  ;;  %603 = vrot.lane.b32.xlu0 %v423_v21, %s5847_s29 }
  0x3f   : > { %609 = vrot.lane.b32.xlu1 %v426_v22, %s5847_s29  ;;  %607 = vrot.lane.b32.xlu0 %v425_v23, %s5847_s29  ;;  %v476_v22 = vld [vmem:[%s5919_s28 + $0x248] sm:$0xff]  ;;  %v475_v23 = vld [vmem:[%s5919_s28 + $0x240] sm:$0xff] }
  0x43   : > { %613 = vrot.lane.b32.xlu1 %v428_v24, %s5847_s29  ;;  %611 = vrot.lane.b32.xlu0 %v427_v25, %s5847_s29 }
  0x47   : > { %617 = vrot.lane.b32.xlu1 %v430_v26, %s5847_s29  ;;  %615 = vrot.lane.b32.xlu0 %v429_v27, %s5847_s29  ;;  %v478_v26 = vld [vmem:[%s5919_s28 + $0x258] sm:$0x3]  ;;  %v477_v27 = vld [vmem:[%s5919_s28 + $0x250] sm:$0xff] }
  0x4b   : > { %621 = vrot.lane.b32.xlu1 %v432_v28, %s5847_s29  ;;  %619 = vrot.lane.b32.xlu0 %v431_v29, %s5847_s29 }
  0x4f   : > { %625 = vrot.lane.b32.xlu1 %v434_v30, %s5847_s29  ;;  %623 = vrot.lane.b32.xlu0 %v433_v31, %s5847_s29  ;;  %v324_v30 = vld [vmem:[%s6110_s8 + $0x8] sm:$0xff] }
  0x50   : > { %v480_v31 = vld [vmem:[%s5919_s28 + $0x268] sm:$0xff] }
  0x53   : > { %629 = vrot.lane.b32.xlu1 %v436_v32, %s5847_s29  ;;  %627 = vrot.lane.b32.xlu0 %v435_v33, %s5847_s29  ;;  %v479_v32 = vld [vmem:[%s5919_s28 + $0x260] sm:$0xff]  ;;  %v325_v33 = vld [vmem:[%s6110_s8 + $0x10] sm:$0xff] }
  0x57   : > { %633 = vrot.lane.b32.xlu1 %v438_v34, %s5847_s29  ;;  %631 = vrot.lane.b32.xlu0 %v437_v35, %s5847_s29  ;;  %v323_v34 = vld [vmem:[%s6110_s8] sm:$0xff] }
  0x5b   : > { %637 = vrot.lane.b32.xlu1 %v440_v36, %s5847_s29  ;;  %635 = vrot.lane.b32.xlu0 %v439_v37, %s5847_s29 }
  0x5f   : > { %641 = vrot.lane.b32.xlu1 %v442_v38, %s5847_s29  ;;  %639 = vrot.lane.b32.xlu0 %v441_v39, %s5847_s29  ;;  %v326_v38 = vld [vmem:[%s6110_s8 + $0x18] sm:$0x3]  ;;  %v328_v39 = vld [vmem:[%s6110_s8 + $0x28] sm:$0xff] }
  0x63   : > { %645 = vrot.lane.b32.xlu1 %v444_v40, %s5847_s29  ;;  %643 = vrot.lane.b32.xlu0 %v443_v41, %s5847_s29 }
  0x67   : > { %649 = vrot.lane.b32.xlu1 %v446_v42, %s5847_s29  ;;  %647 = vrot.lane.b32.xlu0 %v445_v43, %s5847_s29  ;;  %v327_v42 = vld [vmem:[%s6110_s8 + $0x20] sm:$0xff]  ;;  %v482_v43 = vld [vmem:[%s5919_s28 + $0x278] sm:$0x3] }
  0x6b   : > { %653 = vrot.lane.b32.xlu1 %v448_v44, %s5847_s29  ;;  %651 = vrot.lane.b32.xlu0 %v447_v45, %s5847_s29  ;;  %v481_v44 = vld [vmem:[%s5919_s28 + $0x270] sm:$0xff] }
  0x6f   : > { %657 = vrot.lane.b32.xlu1 %v450_v46, %s5847_s29  ;;  %655 = vrot.lane.b32.xlu0 %v449_v47, %s5847_s29 }
  0x73   : > { %661 = vrot.lane.b32.xlu1 %v452_v48, %s5847_s29  ;;  %659 = vrot.lane.b32.xlu0 %v451_v49, %s5847_s29 }
  0x77   : > { %665 = vrot.lane.b32.xlu1 %v454_v50, %s5847_s29  ;;  %663 = vrot.lane.b32.xlu0 %v453_v51, %s5847_s29 }
  0x7b   : > { %669 = vrot.lane.b32.xlu1 %v456_v52, %s5847_s29  ;;  %667 = vrot.lane.b32.xlu0 %v455_v53, %s5847_s29  ;;  %v330_v53 = vld [vmem:[%s6110_s8 + $0x38] sm:$0x3] }
  0x7f   : > { %673 = vrot.lane.b32.xlu1 %v458_v54, %s5847_s29  ;;  %671 = vrot.lane.b32.xlu0 %v457_v55, %s5847_s29  ;;  %v329_v54 = vld [vmem:[%s6110_s8 + $0x30] sm:$0xff] }
  0x83   : > { %677 = vrot.lane.b32.xlu1 %v460_v56, %s5847_s29  ;;  %675 = vrot.lane.b32.xlu0 %v459_v57, %s5847_s29 }
  0x85   : > { %v6039_v60 = vpop.permute.xlu1 %567  ;;  %v6041_v61 = vpop.permute.xlu0 %563 }
  0x86   : > { %v6132_v40 = vsel %vm803_vm0, %v325_v33, %v6039_v60  ;;  %v6136_v41 = vsel %vm803_vm0, %v323_v34, %v6041_v61 }
  0x87   : > { %681 = vrot.lane.b32.xlu1 %v462_v58, %s5847_s29  ;;  %679 = vrot.lane.b32.xlu0 %v461_v59, %s5847_s29  ;;  %11532 = vst [vmem:[#allocation3_spill] sm:$0xff] %v6132_v40  ;;  %11533 = vst [vmem:[#allocation4_spill] sm:$0xff] %v6136_v41  ;;  %v960_v49 = vrot.slane %v6132_v40, 1  ;;  %v957_v50 = vrot.slane %v6136_v41, 1 }
  0x89   : > { %v6047_v0 = vpop.permute.xlu1 %569  ;;  %v566_v1 = vpop.permute.xlu0 %565 }
  0x8a   : > { %v6124_v37 = vsel %vm803_vm0, %v324_v30, %v566_v1  ;;  %v6148_v48 = vsel %vm803_vm0, %v326_v38, %v6047_v0  ;;  %v332_v0 = vld [vmem:[%s6110_s8 + $0x48] sm:$0xff]  ;;  %v331_v1 = vld [vmem:[%s6110_s8 + $0x40] sm:$0xff] }
  0x8b   : > { %685 = vrot.lane.b32.xlu1 %v464_v62, %s5847_s29  ;;  %683 = vrot.lane.b32.xlu0 %v463_v63, %s5847_s29  ;;  %11531 = vst [vmem:[#allocation2_spill] sm:$0xff] %v6124_v37  ;;  %v958_v45 = vrot.slane %v6124_v37, 1  ;;  %v962_v55 = vrot.slane %v6148_v48, 1 }
  0x8d   : > { %v6053_v4 = vpop.permute.xlu1 %573  ;;  %v6055_v5 = vpop.permute.xlu0 %571  ;;  %v961_v58 = vsel %vm956_vm1, %v958_v45, %v960_v49  ;;  %v959_v59 = vsel %vm956_vm1, %v957_v50, %v958_v45  ;;  %v341_v50 = vld [vmem:[%s6110_s8 + $0x90] sm:$0xff] }
  0x8e   : > { %v6154_v51 = vsel %vm803_vm0, %v328_v39, %v6053_v4  ;;  %v6158_v52 = vsel %vm803_vm0, %v327_v42, %v6055_v5  ;;  %v340_v42 = vld [vmem:[%s6110_s8 + $0x88] sm:$0xff] }
  0x8f   : > { %689 = vrot.lane.b32.xlu1 %v466_v2, %s5847_s29  ;;  %687 = vrot.lane.b32.xlu0 %v465_v3, %s5847_s29  ;;  %11534 = vst [vmem:[#allocation5_spill] sm:$0xff] %v6154_v51  ;;  %11535 = vst [vmem:[#allocation6_spill] sm:$0xff] %v6158_v52  ;;  %v965_v60 = vrot.slane %v6154_v51, 1  ;;  %v964_v61 = vrot.slane %v6158_v52, 1  ;;  %v333_v2 = vld [vmem:[%s6110_s8 + $0x50] sm:$0xff] }
  0x91   : > { %v6061_v8 = vpop.permute.xlu1 %577  ;;  %v6063_v9 = vpop.permute.xlu0 %575 }
  0x92   : > { %v6175_v62 = vsel %vm803_vm0, %v330_v53, %v6061_v8  ;;  %v6179_v63 = vsel %vm803_vm0, %v329_v54, %v6063_v9  ;;  %v334_v9 = vld [vmem:[%s6110_s8 + $0x58] sm:$0x3] }
  0x93   : > { %693 = vrot.lane.b32.xlu1 %v468_v6, %s5847_s29  ;;  %691 = vrot.lane.b32.xlu0 %v467_v7, %s5847_s29  ;;  %11536 = vst [vmem:[#allocation7_spill] sm:$0xff] %v6179_v63  ;;  %v969_v3 = vrot.slane %v6175_v62, 1  ;;  %v967_v4 = vrot.slane %v6179_v63, 1 }
  0x95   : > { %v6069_v12 = vpop.permute.xlu1 %581  ;;  %v6071_v13 = vpop.permute.xlu0 %579 }
  0x96   : > { %v6194_v7 = vsel %vm803_vm0, %v332_v0, %v6069_v12  ;;  %v6198_v8 = vsel %vm803_vm0, %v331_v1, %v6071_v13  ;;  %v342_v0 = vld [vmem:[%s6110_s8 + $0x98] sm:$0x3]  ;;  %v343_v1 = vld [vmem:[%s6110_s8 + $0xa0] sm:$0xff] }
  0x97   : > { %697 = vrot.lane.b32.xlu1 %v470_v10, %s5847_s29  ;;  %695 = vrot.lane.b32.xlu0 %v469_v11, %s5847_s29  ;;  %v6202_v10 = vsel %vm956_vm1, %v964_v61, %v965_v60  ;;  %v963_v11 = vsel %vm956_vm1, %v960_v49, %v962_v55  ;;  %v339_v49 = vld [vmem:[%s6110_s8 + $0x80] sm:$0xff] }
  0x98   : > { %11537 = vst [vmem:[#allocation8_spill] sm:$0xff] %v6202_v10 }
  0x99   : > { %v6077_v16 = vpop.permute.xlu1 %585  ;;  %v6079_v17 = vpop.permute.xlu0 %583 }
  0x9b   : > { %701 = vrot.lane.b32.xlu1 %v472_v14, %s5847_s29  ;;  %699 = vrot.lane.b32.xlu0 %v471_v15, %s5847_s29  ;;  %v6207_v14 = vsel %vm803_vm0, %v333_v2, %v6079_v17  ;;  %v336_v15 = vld [vmem:[%s6110_s8 + $0x68] sm:$0xff]  ;;  %v972_v17 = vrot.slane %v6194_v7, 1 }
  0x9d   : > { %v6085_v20 = vpop.permute.xlu1 %589  ;;  %v6087_v21 = vpop.permute.xlu0 %587 }
  0x9f   : > { %705 = vrot.lane.b32.xlu1 %v474_v18, %s5847_s29  ;;  %703 = vrot.lane.b32.xlu0 %v473_v19, %s5847_s29  ;;  %v335_v18 = vld [vmem:[%s6110_s8 + $0x60] sm:$0xff]  ;;  %v6219_v19 = vsel %vm956_vm1, %v967_v4, %v969_v3 }
  0xa0   : > { %11538 = vst [vmem:[#allocation9_spill] sm:$0xff] %v6219_v19  ;;  %v6236_v30 = vsel %vm803_vm0, %v335_v18, %v6087_v21 }
  0xa1   : > { %v6093_v24 = vpop.permute.xlu1 %593  ;;  %v6095_v25 = vpop.permute.xlu0 %591  ;;  %v978_v21 = vrot.slane %v6236_v30, 1 }
  0xa3   : > { %709 = vrot.lane.b32.xlu1 %v476_v22, %s5847_s29  ;;  %707 = vrot.lane.b32.xlu0 %v475_v23, %s5847_s29  ;;  %v6222_v22 = vsel %vm956_vm1, %v965_v60, %v967_v4  ;;  %v971_v23 = vrot.slane %v6198_v8, 1 }
  0xa4   : > { %11539 = vst [vmem:[#allocation10_spill] sm:$0xff] %v6222_v22 }
  0xa5   : > { %v6101_v28 = vpop.permute.xlu1 %597  ;;  %v6103_v29 = vpop.permute.xlu0 %595 }
  0xa7   : > { %713 = vrot.lane.b32.xlu1 %v478_v26, %s5847_s29  ;;  %711 = vrot.lane.b32.xlu0 %v477_v27, %s5847_s29  ;;  %v6228_v26 = vsel %vm803_vm0, %v334_v9, %v6077_v16  ;;  %v6232_v27 = vsel %vm803_vm0, %v336_v15, %v6085_v20  ;;  %v337_v16 = vld [vmem:[%s6110_s8 + $0x70] sm:$0xff] }
  0xa8   : > { %v976_v33 = vrot.slane %v6228_v26, 1  ;;  %v979_v38 = vrot.slane %v6232_v27, 1  ;;  %v6265_v45 = vsel %vm803_vm0, %v337_v16, %v6095_v25 }
  0xa9   : > { %v6119_v35 = vpop.permute.xlu1 %601  ;;  %v6121_v36 = vpop.permute.xlu0 %599  ;;  %v981_v61 = vrot.slane %v6265_v45, 1 }
  0xaa   : > { %v6279_v55 = vsel %vm956_vm1, %v978_v21, %v979_v38  ;;  %v6294_v60 = vsel %vm803_vm0, %v341_v50, %v6121_v36  ;;  %v6313_v9 = vsel %vm803_vm0, %v342_v0, %v6119_v35  ;;  %v347_v50 = vld [vmem:[%s6110_s8 + $0xc0] sm:$0xff] }
  0xab   : > { %717 = vrot.lane.b32.xlu1 %v480_v31, %s5847_s29  ;;  %715 = vrot.lane.b32.xlu0 %v479_v32, %s5847_s29  ;;  %v974_v31 = vrot.slane %v6207_v14, 1  ;;  %v338_v32 = vld [vmem:[%s6110_s8 + $0x78] sm:$0x3]  ;;  %11542 = vst [vmem:[#allocation13_spill] sm:$0xff] %v6279_v55  ;;  %v988_v3 = vrot.slane %v6294_v60, 1  ;;  %v6319_v15 = vsel %vm956_vm1, %v979_v38, %v981_v61  ;;  %v990_v35 = vrot.slane %v6313_v9, 1 }
  0xac   : > { %v6254_v39 = vsel %vm803_vm0, %v338_v32, %v6093_v24  ;;  %11545 = vst [vmem:[#allocation16_spill] sm:$0xff] %v6319_v15 }
  0xad   : > { %v6142_v46 = vpop.permute.xlu1 %605  ;;  %v6144_v47 = vpop.permute.xlu0 %603  ;;  %v983_v24 = vrot.slane %v6254_v39, 1  ;;  %v6282_v25 = vsel %vm956_vm1, %v974_v31, %v976_v33 }
  0xae   : > { %11543 = vst [vmem:[#allocation14_spill] sm:$0xff] %v6282_v25 }
  0xaf   : > { %721 = vrot.lane.b32.xlu1 %v482_v43, %s5847_s29  ;;  %719 = vrot.lane.b32.xlu0 %v481_v44, %s5847_s29  ;;  %v6258_v43 = vsel %vm956_vm1, %v972_v17, %v974_v31  ;;  %v6261_v44 = vsel %vm956_vm1, %v971_v23, %v972_v17  ;;  %v6327_v17 = vsel %vm803_vm0, %v343_v1, %v6144_v47  ;;  %v346_v23 = vld [vmem:[%s6110_s8 + $0xb8] sm:$0x3]  ;;  %v345_v31 = vld [vmem:[%s6110_s8 + $0xb0] sm:$0xff] }
  0xb0   : > { %11540 = vst [vmem:[#allocation11_spill] sm:$0xff] %v6258_v43  ;;  %11541 = vst [vmem:[#allocation12_spill] sm:$0xff] %v6261_v44  ;;  %v992_v38 = vrot.slane %v6327_v17, 1 }
  0xb1   : > { %v6165_v56 = vpop.permute.xlu1 %609  ;;  %v6167_v57 = vpop.permute.xlu0 %607 }
  0xb2   : > { %v6346_v33 = vsel %vm803_vm0, %v346_v23, %v6165_v56  ;;  %v6350_v21 = vsel %vm803_vm0, %v345_v31, %v6167_v57  ;;  %v349_v56 = vld [vmem:[%s6110_s8 + $0xd0] sm:$0xff]  ;;  %v6380_v23 = vsel %vm956_vm1, %v988_v3, %v990_v35 }
  0xb3   : > { %1248 = vrot.lane.b32.xlu1 %v961_v58, %s5848_s9  ;;  %1246 = vrot.lane.b32.xlu0 %v959_v59, %s5848_s9  ;;  %v6286_v58 = vsel %vm803_vm0, %v340_v42, %v6101_v28  ;;  %v6290_v59 = vsel %vm803_vm0, %v339_v49, %v6103_v29  ;;  %v344_v28 = vld [vmem:[%s6110_s8 + $0xa8] sm:$0xff]  ;;  %11549 = vst [vmem:[#allocation20_spill] sm:$0xff] %v6350_v21  ;;  %v995_v0 = vrot.slane %v6350_v21, 1  ;;  %11553 = vst [vmem:[#allocation24_spill] sm:$0xff] %v6380_v23 }
  0xb4   : > { %v986_v36 = vrot.slane %v6286_v58, 1  ;;  %v985_v4 = vrot.slane %v6290_v59, 1  ;;  %v6323_v18 = vsel %vm803_vm0, %v344_v28, %v6142_v46  ;;  %v348_v49 = vld [vmem:[%s6110_s8 + $0xc8] sm:$0xff] }
  0xb5   : > { %v6188_v5 = vpop.permute.xlu1 %613  ;;  %v6190_v6 = vpop.permute.xlu0 %611  ;;  %11546 = vst [vmem:[#allocation17_spill] sm:$0xff] %v6323_v18  ;;  %v993_v42 = vrot.slane %v6323_v18, 1 }
  0xb6   : > { %v6339_v16 = vsel %vm956_vm1, %v986_v36, %v988_v3  ;;  %v6342_v47 = vsel %vm956_vm1, %v985_v4, %v986_v36  ;;  %v6369_v28 = vsel %vm803_vm0, %v348_v49, %v6188_v5  ;;  %v6373_v1 = vsel %vm803_vm0, %v347_v50, %v6190_v6  ;;  %v350_v36 = vld [vmem:[%s6110_s8 + $0xd8] sm:$0x3] }
  0xb7   : > { %1252 = vrot.lane.b32.xlu1 %v6202_v10, %s5848_s9  ;;  %1250 = vrot.lane.b32.xlu0 %v963_v11, %s5848_s9  ;;  %v6316_v11 = vsel %vm956_vm1, %v981_v61, %v983_v24  ;;  %11547 = vst [vmem:[#allocation18_spill] sm:$0xff] %v6339_v16  ;;  %11548 = vst [vmem:[#allocation19_spill] sm:$0xff] %v6342_v47  ;;  %v997_v24 = vrot.slane %v6346_v33, 1  ;;  %v6377_v4 = vsel %vm956_vm1, %v992_v38, %v993_v42 }
  0xb8   : > { %11544 = vst [vmem:[#allocation15_spill] sm:$0xff] %v6316_v11  ;;  %11550 = vst [vmem:[#allocation21_spill] sm:$0xff] %v6369_v28  ;;  %v6396_v3 = vsel %vm956_vm1, %v993_v42, %v995_v0  ;;  %v999_v35 = vrot.slane %v6373_v1, 1 }
  0xb9   : > { %v6214_v12 = vpop.permute.xlu1 %617  ;;  %v6216_v13 = vpop.permute.xlu0 %615  ;;  %11551 = vst [vmem:[#allocation22_spill] sm:$0xff] %v6373_v1  ;;  %11552 = vst [vmem:[#allocation23_spill] sm:$0xff] %v6377_v4  ;;  %v6393_v38 = vsel %vm956_vm1, %v995_v0, %v997_v24  ;;  %v354_v24 = vld [vmem:[%s6110_s8 + $0xf8] sm:$0x3] }
  0xba   : > { %v6384_v31 = vsel %vm803_vm0, %v349_v56, %v6216_v13  ;;  %11555 = vst [vmem:[#allocation26_spill] sm:$0xff] %v6393_v38  ;;  %11556 = vst [vmem:[#allocation27_spill] sm:$0xff] %v6396_v3  ;;  %v1000_v13 = vrot.slane %v6369_v28, 1  ;;  %v6402_v49 = vsel %vm803_vm0, %v350_v36, %v6214_v12  ;;  %v353_v12 = vld [vmem:[%s6110_s8 + $0xf0] sm:$0xff] }
  0xbb   : > { %1256 = vrot.lane.b32.xlu1 %v6219_v19, %s5848_s9  ;;  %1254 = vrot.lane.b32.xlu0 %v6222_v22, %s5848_s9  ;;  %11554 = vst [vmem:[#allocation25_spill] sm:$0xff] %v6384_v31  ;;  %v1002_v42 = vrot.slane %v6384_v31, 1  ;;  %v1004_v0 = vrot.slane %v6402_v49, 1  ;;  %v362_v19 = vld [vmem:[%s6110_s8 + $0x138] sm:$0x3] }
  0xbc   : > { %v366_v22 = vld [vmem:[%s6110_s8 + $0x158] sm:$0x3] }
  0xbd   : > { %v6246_v20 = vpop.permute.xlu1 %621  ;;  %v6248_v34 = vpop.permute.xlu0 %619 }
  0xbf   : > { %1260 = vrot.lane.b32.xlu1 %v6258_v43, %s5848_s9  ;;  %1258 = vrot.lane.b32.xlu0 %v6261_v44, %s5848_s9  ;;  %v358_v43 = vld [vmem:[%s6110_s8 + $0x118] sm:$0x3]  ;;  %v361_v44 = vld [vmem:[%s6110_s8 + $0x130] sm:$0xff] }
  0xc1   : > { %v6274_v53 = vpop.permute.xlu1 %625  ;;  %v6276_v54 = vpop.permute.xlu0 %623 }
  0xc3   : > { %1264 = vrot.lane.b32.xlu1 %v6279_v55, %s5848_s9  ;;  %1262 = vrot.lane.b32.xlu0 %v6282_v25, %s5848_s9  ;;  %v357_v55 = vld [vmem:[%s6110_s8 + $0x110] sm:$0xff] }
  0xc5   : > { %v6304_v2 = vpop.permute.xlu1 %629  ;;  %v6306_v29 = vpop.permute.xlu0 %627 }
  0xc7   : > { %1268 = vrot.lane.b32.xlu1 %v6316_v11, %s5848_s9  ;;  %1266 = vrot.lane.b32.xlu0 %v6319_v15, %s5848_s9  ;;  %v351_v11 = vld [vmem:[%s6110_s8 + $0xe0] sm:$0xff] }
  0xc8   : > { %v6410_v56 = vsel %vm803_vm0, %v351_v11, %v6248_v34  ;;  %v6424_v11 = vsel %vm803_vm0, %v354_v24, %v6274_v53 }
  0xc9   : > { %v6336_v32 = vpop.permute.xlu1 %633  ;;  %v632_v46 = vpop.permute.xlu0 %631  ;;  %11558 = vst [vmem:[#allocation29_spill] sm:$0xff] %v6410_v56  ;;  %v1006_v36 = vrot.slane %v6410_v56, 1  ;;  %v1011_v53 = vrot.slane %v6424_v11, 1 }
  0xcb   : > { %1272 = vrot.lane.b32.xlu1 %v6339_v16, %s5848_s9  ;;  %1270 = vrot.lane.b32.xlu0 %v6342_v47, %s5848_s9  ;;  %v352_v16 = vld [vmem:[%s6110_s8 + $0xe8] sm:$0xff]  ;;  %v355_v47 = vld [vmem:[%s6110_s8 + $0x100] sm:$0xff] }
  0xcc   : > { %v6406_v50 = vsel %vm803_vm0, %v352_v16, %v6246_v20 }
  0xcd   : > { %v6362_v61 = vpop.permute.xlu1 %637  ;;  %v6364_v57 = vpop.permute.xlu0 %635  ;;  %11557 = vst [vmem:[#allocation28_spill] sm:$0xff] %v6406_v50  ;;  %v1007_v34 = vrot.slane %v6406_v50, 1 }
  0xcf   : > { %1276 = vrot.lane.b32.xlu1 %v6377_v4, %s5848_s9  ;;  %1274 = vrot.lane.b32.xlu0 %v6380_v23, %s5848_s9  ;;  %v356_v4 = vld [vmem:[%s6110_s8 + $0x108] sm:$0xff]  ;;  %v6428_v23 = vsel %vm956_vm1, %v1000_v13, %v1002_v42 }
  0xd0   : > { %11559 = vst [vmem:[#allocation30_spill] sm:$0xff] %v6428_v23 }
  0xd1   : > { %v642_v5 = vpop.permute.xlu1 %641  ;;  %v640_v6 = vpop.permute.xlu0 %639 }
  0xd3   : > { %1280 = vrot.lane.b32.xlu1 %v6393_v38, %s5848_s9  ;;  %1278 = vrot.lane.b32.xlu0 %v6396_v3, %s5848_s9  ;;  %v6431_v38 = vsel %vm956_vm1, %v999_v35, %v1000_v13  ;;  %v6435_v3 = vsel %vm803_vm0, %v353_v12, %v6276_v54  ;;  %v6445_v13 = vsel %vm956_vm1, %v1006_v36, %v1007_v34 }
  0xd4   : > { %11560 = vst [vmem:[#allocation31_spill] sm:$0xff] %v6431_v38  ;;  %11561 = vst [vmem:[#allocation32_spill] sm:$0xff] %v6435_v3  ;;  %v6448_v54 = vsel %vm956_vm1, %v1002_v42, %v1004_v0  ;;  %v6452_v35 = vsel %vm803_vm0, %v356_v4, %v6304_v2  ;;  %v6456_v12 = vsel %vm803_vm0, %v355_v47, %v6306_v29  ;;  %v360_v2 = vld [vmem:[%s6110_s8 + $0x128] sm:$0xff]  ;;  %v359_v4 = vld [vmem:[%s6110_s8 + $0x120] sm:$0xff] }
  0xd5   : > { %v646_v20 = vpop.permute.xlu1 %645  ;;  %v644_v16 = vpop.permute.xlu0 %643  ;;  %11562 = vst [vmem:[#allocation33_spill] sm:$0xff] %v6445_v13  ;;  %11563 = vst [vmem:[#allocation34_spill] sm:$0xff] %v6448_v54  ;;  %v1014_v29 = vrot.slane %v6452_v35, 1  ;;  %v6474_v47 = vsel %vm803_vm0, %v358_v43, %v6336_v32  ;;  %v6488_v25 = vsel %vm803_vm0, %v359_v4, %v6364_v57  ;;  %v6504_v57 = vsel %vm803_vm0, %v362_v19, %v642_v5 }
  0xd6   : > { %11564 = vst [vmem:[#allocation35_spill] sm:$0xff] %v6452_v35  ;;  %11565 = vst [vmem:[#allocation36_spill] sm:$0xff] %v6456_v12  ;;  %v1018_v43 = vrot.slane %v6474_v47, 1  ;;  %v1025_v19 = vrot.slane %v6504_v57, 1 }
  0xd7   : > { %1284 = vrot.lane.b32.xlu1 %v6428_v23, %s5848_s9  ;;  %1282 = vrot.lane.b32.xlu0 %v6431_v38, %s5848_s9  ;;  %v6459_v23 = vsel %vm803_vm0, %v357_v55, %v632_v46  ;;  %v1009_v38 = vrot.slane %v6435_v3, 1  ;;  %v1013_v46 = vrot.slane %v6456_v12, 1  ;;  %11570 = vst [vmem:[#allocation41_spill] sm:$0xff] %v6488_v25  ;;  %11573 = vst [vmem:[#allocation44_spill] sm:$0xff] %v6504_v57  ;;  %v368_v57 = vld [vmem:[%s6110_s8 + $0x168] sm:$0xff] }
  0xd8   : > { %11566 = vst [vmem:[#allocation37_spill] sm:$0xff] %v6459_v23  ;;  %v1016_v55 = vrot.slane %v6459_v23, 1 }
  0xd9   : > { %v650_v24 = vpop.permute.xlu1 %649  ;;  %v648_v15 = vpop.permute.xlu0 %647  ;;  %v6477_v36 = vsel %vm956_vm1, %v1009_v38, %v1011_v53  ;;  %v6507_v53 = vsel %vm803_vm0, %v361_v44, %v640_v6 }
  0xda   : > { %11567 = vst [vmem:[#allocation38_spill] sm:$0xff] %v6477_v36  ;;  %11574 = vst [vmem:[#allocation45_spill] sm:$0xff] %v6507_v53  ;;  %v1023_v6 = vrot.slane %v6507_v53, 1 }
  0xdb   : > { %1288 = vrot.lane.b32.xlu1 %v6445_v13, %s5848_s9  ;;  %1286 = vrot.lane.b32.xlu0 %v6448_v54, %s5848_s9  ;;  %v6480_v13 = vsel %vm956_vm1, %v1007_v34, %v1009_v38  ;;  %v6484_v54 = vsel %vm803_vm0, %v360_v2, %v6362_v61  ;;  %v6498_v61 = vsel %vm956_vm1, %v1014_v29, %v1016_v55  ;;  %v1020_v2 = vrot.slane %v6488_v25, 1  ;;  %v367_v25 = vld [vmem:[%s6110_s8 + $0x160] sm:$0xff] }
  0xdc   : > { %11568 = vst [vmem:[#allocation39_spill] sm:$0xff] %v6480_v13  ;;  %11569 = vst [vmem:[#allocation40_spill] sm:$0xff] %v6484_v54  ;;  %v6501_v34 = vsel %vm956_vm1, %v1013_v46, %v1014_v29  ;;  %v1021_v4 = vrot.slane %v6484_v54, 1  ;;  %v365_v29 = vld [vmem:[%s6110_s8 + $0x150] sm:$0xff] }
  0xdd   : > { %v654_v42 = vpop.permute.xlu1 %653  ;;  %v652_v0 = vpop.permute.xlu0 %651  ;;  %11571 = vst [vmem:[#allocation42_spill] sm:$0xff] %v6498_v61  ;;  %11572 = vst [vmem:[#allocation43_spill] sm:$0xff] %v6501_v34 }
  0xde   : > { %v6528_v54 = vsel %vm956_vm1, %v1020_v2, %v1021_v4  ;;  %v6554_v2 = vsel %vm803_vm0, %v368_v57, %v654_v42 }
  0xdf   : > { %1292 = vrot.lane.b32.xlu1 %v6477_v36, %s5848_s9  ;;  %1290 = vrot.lane.b32.xlu0 %v6480_v13, %s5848_s9  ;;  %v364_v36 = vld [vmem:[%s6110_s8 + $0x148] sm:$0xff]  ;;  %v363_v13 = vld [vmem:[%s6110_s8 + $0x140] sm:$0xff]  ;;  %11577 = vst [vmem:[#allocation48_spill] sm:$0xff] %v6528_v54  ;;  %11583 = vst [vmem:[#allocation54_spill] sm:$0xff] %v6554_v2 }
  0xe0   : > { %v6521_v46 = vsel %vm803_vm0, %v364_v36, %v646_v20  ;;  %v6524_v10 = vsel %vm803_vm0, %v363_v13, %v644_v16  ;;  %v6543_v13 = vsel %vm956_vm1, %v1023_v6, %v1025_v19 }
  0xe1   : > { %v658_v32 = vpop.permute.xlu1 %657  ;;  %v656_v38 = vpop.permute.xlu0 %655  ;;  %11575 = vst [vmem:[#allocation46_spill] sm:$0xff] %v6521_v46  ;;  %11576 = vst [vmem:[#allocation47_spill] sm:$0xff] %v6524_v10  ;;  %v1027_v36 = vrot.slane %v6524_v10, 1 }
  0xe2   : > { %11580 = vst [vmem:[#allocation51_spill] sm:$0xff] %v6543_v13 }
  0xe3   : > { %1296 = vrot.lane.b32.xlu1 %v6498_v61, %s5848_s9  ;;  %1294 = vrot.lane.b32.xlu0 %v6501_v34, %s5848_s9  ;;  %v6531_v61 = vsel %vm956_vm1, %v1016_v55, %v1018_v43  ;;  %v6534_v34 = vsel %vm803_vm0, %v365_v29, %v648_v15  ;;  %v6546_v55 = vsel %vm956_vm1, %v1021_v4, %v1023_v6  ;;  %v1028_v15 = vrot.slane %v6521_v46, 1  ;;  %v370_v4 = vld [vmem:[%s6110_s8 + $0x178] sm:$0x3]  ;;  %v369_v6 = vld [vmem:[%s6110_s8 + $0x170] sm:$0xff] }
  0xe4   : > { %11578 = vst [vmem:[#allocation49_spill] sm:$0xff] %v6531_v61  ;;  %11579 = vst [vmem:[#allocation50_spill] sm:$0xff] %v6534_v34  ;;  %v6551_v43 = vsel %vm803_vm0, %v366_v22, %v650_v24  ;;  %v6557_v29 = vsel %vm803_vm0, %v367_v25, %v652_v0  ;;  %v1030_v19 = vrot.slane %v6534_v34, 1  ;;  %v1035_v25 = vrot.slane %v6554_v2, 1  ;;  %v373_v34 = vld [vmem:[%s6110_s8 + $0x190] sm:$0xff] }
  0xe5   : > { %v662_v5 = vpop.permute.xlu1 %661  ;;  %v660_v44 = vpop.permute.xlu0 %659  ;;  %11581 = vst [vmem:[#allocation52_spill] sm:$0xff] %v6546_v55  ;;  %11582 = vst [vmem:[#allocation53_spill] sm:$0xff] %v6551_v43  ;;  %v1032_v22 = vrot.slane %v6551_v43, 1  ;;  %v1034_v57 = vrot.slane %v6557_v29, 1  ;;  %v6570_v0 = vsel %vm803_vm0, %v370_v4, %v658_v32  ;;  %v371_v43 = vld [vmem:[%s6110_s8 + $0x180] sm:$0xff] }
  0xe6   : > { %11584 = vst [vmem:[#allocation55_spill] sm:$0xff] %v6557_v29  ;;  %11585 = vst [vmem:[#allocation56_spill] sm:$0xff] %v6570_v0  ;;  %v1039_v32 = vrot.slane %v6570_v0, 1  ;;  %v374_v0 = vld [vmem:[%s6110_s8 + $0x198] sm:$0x3] }
  0xe7   : > { %1300 = vrot.lane.b32.xlu1 %v6528_v54, %s5848_s9  ;;  %1298 = vrot.lane.b32.xlu0 %v6531_v61, %s5848_s9  ;;  %v372_v54 = vld [vmem:[%s6110_s8 + $0x188] sm:$0xff]  ;;  %v6574_v61 = vsel %vm956_vm1, %v1028_v15, %v1030_v19 }
  0xe8   : > { %11586 = vst [vmem:[#allocation57_spill] sm:$0xff] %v6574_v61 }
  0xe9   : > { %v666_v20 = vpop.permute.xlu1 %665  ;;  %v664_v16 = vpop.permute.xlu0 %663 }
  0xeb   : > { %1304 = vrot.lane.b32.xlu1 %v6543_v13, %s5848_s9  ;;  %1302 = vrot.lane.b32.xlu0 %v6546_v55, %s5848_s9  ;;  %v6577_v13 = vsel %vm956_vm1, %v1027_v36, %v1028_v15  ;;  %v6580_v55 = vsel %vm803_vm0, %v369_v6, %v656_v38  ;;  %v6590_v15 = vsel %vm956_vm1, %v1034_v57, %v1035_v25 }
  0xec   : > { %11587 = vst [vmem:[#allocation58_spill] sm:$0xff] %v6577_v13  ;;  %11588 = vst [vmem:[#allocation59_spill] sm:$0xff] %v6580_v55  ;;  %v6593_v38 = vsel %vm956_vm1, %v1030_v19, %v1032_v22  ;;  %v6596_v36 = vsel %vm803_vm0, %v372_v54, %v662_v5  ;;  %v6599_v6 = vsel %vm803_vm0, %v371_v43, %v660_v44  ;;  %v376_v19 = vld [vmem:[%s6110_s8 + $0x1a8] sm:$0xff]  ;;  %v375_v54 = vld [vmem:[%s6110_s8 + $0x1a0] sm:$0xff] }
  0xed   : > { %v670_v24 = vpop.permute.xlu1 %669  ;;  %v668_v42 = vpop.permute.xlu0 %667  ;;  %11589 = vst [vmem:[#allocation60_spill] sm:$0xff] %v6590_v15  ;;  %11590 = vst [vmem:[#allocation61_spill] sm:$0xff] %v6593_v38  ;;  %v1042_v44 = vrot.slane %v6596_v36, 1  ;;  %v6616_v43 = vsel %vm803_vm0, %v374_v0, %v666_v20 }
  0xee   : > { %11591 = vst [vmem:[#allocation62_spill] sm:$0xff] %v6596_v36  ;;  %11592 = vst [vmem:[#allocation63_spill] sm:$0xff] %v6599_v6  ;;  %v6628_v36 = vsel %vm803_vm0, %v375_v54, %v668_v42  ;;  %v1046_v20 = vrot.slane %v6616_v43, 1 }
  0xef   : > { %1308 = vrot.lane.b32.xlu1 %v6574_v61, %s5848_s9  ;;  %1306 = vrot.lane.b32.xlu0 %v6577_v13, %s5848_s9  ;;  %v6602_v61 = vsel %vm803_vm0, %v373_v34, %v664_v16  ;;  %v1037_v13 = vrot.slane %v6580_v55, 1  ;;  %v1041_v16 = vrot.slane %v6599_v6, 1  ;;  %11594 = vst [vmem:[#allocation65_spill] sm:$0xff] %v6616_v43  ;;  %11598 = vst [vmem:[#allocation69_spill] sm:$0xff] %v6628_v36  ;;  %v377_v55 = vld [vmem:[%s6110_s8 + $0x1b0] sm:$0xff]  ;;  %v383_v6 = vld [vmem:[%s6110_s8 + $0x1e0] sm:$0xff] }
  0xf0   : > { %11593 = vst [vmem:[#allocation64_spill] sm:$0xff] %v6602_v61  ;;  %v1044_v34 = vrot.slane %v6602_v61, 1  ;;  %v378_v61 = vld [vmem:[%s6110_s8 + $0x1b8] sm:$0x3] }
  0xf1   : > { %v674_v4 = vpop.permute.xlu1 %673  ;;  %v672_v2 = vpop.permute.xlu0 %671  ;;  %v6619_v57 = vsel %vm956_vm1, %v1037_v13, %v1039_v32  ;;  %v6641_v0 = vsel %vm956_vm1, %v1041_v16, %v1042_v44 }
  0xf2   : > { %11595 = vst [vmem:[#allocation66_spill] sm:$0xff] %v6619_v57  ;;  %11600 = vst [vmem:[#allocation71_spill] sm:$0xff] %v6641_v0  ;;  %v6644_v42 = vsel %vm803_vm0, %v378_v61, %v674_v4  ;;  %v6647_v32 = vsel %vm803_vm0, %v377_v55, %v672_v2 }
  0xf3   : > { %1312 = vrot.lane.b32.xlu1 %v6590_v15, %s5848_s9  ;;  %1310 = vrot.lane.b32.xlu0 %v6593_v38, %s5848_s9  ;;  %v6622_v15 = vsel %vm956_vm1, %v1035_v25, %v1037_v13  ;;  %v6625_v38 = vsel %vm803_vm0, %v376_v19, %v670_v24  ;;  %v6638_v24 = vsel %vm956_vm1, %v1042_v44, %v1044_v34  ;;  %v1048_v19 = vrot.slane %v6628_v36, 1  ;;  %v381_v44 = vld [vmem:[%s6110_s8 + $0x1d0] sm:$0xff]  ;;  %v382_v36 = vld [vmem:[%s6110_s8 + $0x1d8] sm:$0x3] }
  0xf4   : > { %11596 = vst [vmem:[#allocation67_spill] sm:$0xff] %v6622_v15  ;;  %11597 = vst [vmem:[#allocation68_spill] sm:$0xff] %v6625_v38  ;;  %v1049_v54 = vrot.slane %v6625_v38, 1  ;;  %v1053_v61 = vrot.slane %v6644_v42, 1  ;;  %v1051_v2 = vrot.slane %v6647_v32, 1 }
  0xf5   : > { %v678_v5 = vpop.permute.xlu1 %677  ;;  %v676_v22 = vpop.permute.xlu0 %675  ;;  %11599 = vst [vmem:[#allocation70_spill] sm:$0xff] %v6638_v24  ;;  %11601 = vst [vmem:[#allocation72_spill] sm:$0xff] %v6644_v42  ;;  %v384_v42 = vld [vmem:[%s6110_s8 + $0x1e8] sm:$0xff] }
  0xf6   : > { %11602 = vst [vmem:[#allocation73_spill] sm:$0xff] %v6647_v32  ;;  %v6668_v43 = vsel %vm956_vm1, %v1048_v19, %v1049_v54 }
  0xf7   : > { %1316 = vrot.lane.b32.xlu1 %v6619_v57, %s5848_s9  ;;  %1314 = vrot.lane.b32.xlu0 %v6622_v15, %s5848_s9  ;;  %v380_v57 = vld [vmem:[%s6110_s8 + $0x1c8] sm:$0xff]  ;;  %v379_v15 = vld [vmem:[%s6110_s8 + $0x1c0] sm:$0xff]  ;;  %11605 = vst [vmem:[#allocation76_spill] sm:$0xff] %v6668_v43 }
  0xf8   : > { %v6661_v16 = vsel %vm803_vm0, %v380_v57, %v678_v5  ;;  %v6664_v38 = vsel %vm803_vm0, %v379_v15, %v676_v22  ;;  %v6683_v22 = vsel %vm956_vm1, %v1051_v2, %v1053_v61 }
  0xf9   : > { %v682_v13 = vpop.permute.xlu1 %681  ;;  %v680_v25 = vpop.permute.xlu0 %679  ;;  %11603 = vst [vmem:[#allocation74_spill] sm:$0xff] %v6661_v16  ;;  %11604 = vst [vmem:[#allocation75_spill] sm:$0xff] %v6664_v38  ;;  %v1056_v57 = vrot.slane %v6661_v16, 1 }
  0xfa   : > { %11608 = vst [vmem:[#allocation79_spill] sm:$0xff] %v6683_v22 }
  0xfb   : > { %1320 = vrot.lane.b32.xlu1 %v6638_v24, %s5848_s9  ;;  %1318 = vrot.lane.b32.xlu0 %v6641_v0, %s5848_s9  ;;  %v6671_v24 = vsel %vm956_vm1, %v1044_v34, %v1046_v20  ;;  %v6674_v0 = vsel %vm803_vm0, %v381_v44, %v680_v25  ;;  %v6686_v34 = vsel %vm956_vm1, %v1049_v54, %v1051_v2  ;;  %v1055_v20 = vrot.slane %v6664_v38, 1  ;;  %v386_v54 = vld [vmem:[%s6110_s8 + $0x1f8] sm:$0x3] }
  0xfc   : > { %11606 = vst [vmem:[#allocation77_spill] sm:$0xff] %v6671_v24  ;;  %11607 = vst [vmem:[#allocation78_spill] sm:$0xff] %v6674_v0  ;;  %v6691_v25 = vsel %vm803_vm0, %v382_v36, %v682_v13  ;;  %v1058_v61 = vrot.slane %v6674_v0, 1  ;;  %v385_v36 = vld [vmem:[%s6110_s8 + $0x1f0] sm:$0xff] }
  0xfd   : > { %v686_v4 = vpop.permute.xlu1 %685  ;;  %v684_v55 = vpop.permute.xlu0 %683  ;;  %11609 = vst [vmem:[#allocation80_spill] sm:$0xff] %v6686_v34  ;;  %11610 = vst [vmem:[#allocation81_spill] sm:$0xff] %v6691_v25  ;;  %v1060_v13 = vrot.slane %v6691_v25, 1  ;;  %v387_v25 = vld [vmem:[%s6110_s8 + $0x200] sm:$0xff] }
  0xfe   : > { %v6694_v19 = vsel %vm803_vm0, %v384_v42, %v686_v4  ;;  %v6697_v44 = vsel %vm803_vm0, %v383_v6, %v684_v55  ;;  %v6710_v55 = vsel %vm956_vm1, %v1056_v57, %v1058_v61 }
  0xff   : > { %1324 = vrot.lane.b32.xlu1 %v6668_v43, %s5848_s9  ;;  %1322 = vrot.lane.b32.xlu0 %v6671_v24, %s5848_s9  ;;  %11611 = vst [vmem:[#allocation82_spill] sm:$0xff] %v6694_v19  ;;  %11612 = vst [vmem:[#allocation83_spill] sm:$0xff] %v6697_v44  ;;  %v1062_v2 = vrot.slane %v6697_v44, 1  ;;  %v1063_v6 = vrot.slane %v6694_v19, 1  ;;  %v6713_v43 = vsel %vm956_vm1, %v1055_v20, %v1056_v57  ;;  %v388_v24 = vld [vmem:[%s6110_s8 + $0x208] sm:$0xff]  ;;  %v389_v19 = vld [vmem:[%s6110_s8 + $0x210] sm:$0xff] }
 0x100   : > { %11613 = vst [vmem:[#allocation84_spill] sm:$0xff] %v6710_v55  ;;  %11614 = vst [vmem:[#allocation85_spill] sm:$0xff] %v6713_v43 }
 0x101   : > { %v690_v15 = vpop.permute.xlu1 %689  ;;  %v688_v5 = vpop.permute.xlu0 %687 }
 0x103   : > { %1328 = vrot.lane.b32.xlu1 %v6683_v22, %s5848_s9  ;;  %1326 = vrot.lane.b32.xlu0 %v6686_v34, %s5848_s9  ;;  %v6716_v22 = vsel %vm803_vm0, %v386_v54, %v690_v15  ;;  %v6719_v34 = vsel %vm803_vm0, %v385_v36, %v688_v5  ;;  %v6729_v15 = vsel %vm956_vm1, %v1062_v2, %v1063_v6 }
 0x104   : > { %11615 = vst [vmem:[#allocation86_spill] sm:$0xff] %v6716_v22  ;;  %11616 = vst [vmem:[#allocation87_spill] sm:$0xff] %v6719_v34  ;;  %v6732_v5 = vsel %vm956_vm1, %v1058_v61, %v1060_v13  ;;  %v1067_v54 = vrot.slane %v6716_v22, 1  ;;  %v1065_v44 = vrot.slane %v6719_v34, 1  ;;  %v390_v61 = vld [vmem:[%s6110_s8 + $0x218] sm:$0x3] }
 0x105   : > { %v694_v42 = vpop.permute.xlu1 %693  ;;  %v692_v4 = vpop.permute.xlu0 %691  ;;  %11617 = vst [vmem:[#allocation88_spill] sm:$0xff] %v6729_v15  ;;  %11618 = vst [vmem:[#allocation89_spill] sm:$0xff] %v6732_v5  ;;  %v392_v13 = vld [vmem:[%s6110_s8 + $0x228] sm:$0xff] }
 0x106   : > { %v6736_v36 = vsel %vm803_vm0, %v388_v24, %v694_v42  ;;  %v391_v24 = vld [vmem:[%s6110_s8 + $0x220] sm:$0xff] }
 0x107   : > { %1332 = vrot.lane.b32.xlu1 %v6710_v55, %s5848_s9  ;;  %1330 = vrot.lane.b32.xlu0 %v6713_v43, %s5848_s9  ;;  %11619 = vst [vmem:[#allocation90_spill] sm:$0xff] %v6736_v36  ;;  %v6739_v55 = vsel %vm803_vm0, %v387_v25, %v692_v4  ;;  %v1070_v25 = vrot.slane %v6736_v36, 1 }
 0x108   : > { %11620 = vst [vmem:[#allocation91_spill] sm:$0xff] %v6739_v55  ;;  %v1069_v4 = vrot.slane %v6739_v55, 1 }
 0x109   : > { %v698_v57 = vpop.permute.xlu1 %697  ;;  %v696_v20 = vpop.permute.xlu0 %695 }
 0x10a   : > { %v6743_v43 = vsel %vm803_vm0, %v389_v19, %v696_v20  ;;  %v6755_v19 = vsel %vm956_vm1, %v1065_v44, %v1067_v54  ;;  %v6758_v20 = vsel %vm956_vm1, %v1063_v6, %v1065_v44  ;;  %v394_v54 = vld [vmem:[%s6110_s8 + $0x238] sm:$0x3]  ;;  %v393_v44 = vld [vmem:[%s6110_s8 + $0x230] sm:$0xff] }
 0x10b   : > { %11621 = vst [vmem:[#allocation92_spill] sm:$0xff] %v6743_v43  ;;  %1336 = vrot.lane.b32.xlu1 %v6729_v15, %s5848_s9  ;;  %1334 = vrot.lane.b32.xlu0 %v6732_v5, %s5848_s9  ;;  %11622 = vst [vmem:[#allocation93_spill] sm:$0xff] %v6755_v19  ;;  %v1072_v15 = vrot.slane %v6743_v43, 1  ;;  %v6762_v5 = vsel %vm803_vm0, %v390_v61, %v698_v57  ;;  %v6777_v43 = vsel %vm956_vm1, %v1069_v4, %v1070_v25 }
 0x10c   : > { %11623 = vst [vmem:[#allocation94_spill] sm:$0xff] %v6758_v20  ;;  %11626 = vst [vmem:[#allocation97_spill] sm:$0xff] %v6777_v43  ;;  %v1074_v57 = vrot.slane %v6762_v5, 1 }
 0x10d   : > { %v702_v42 = vpop.permute.xlu1 %701  ;;  %v700_v2 = vpop.permute.xlu0 %699  ;;  %v6781_v61 = vsel %vm956_vm1, %v1070_v25, %v1072_v15 }
 0x10e   : > { %v6765_v34 = vsel %vm803_vm0, %v392_v13, %v702_v42  ;;  %v6768_v22 = vsel %vm803_vm0, %v391_v24, %v700_v2  ;;  %11627 = vst [vmem:[#allocation98_spill] sm:$0xff] %v6781_v61 }
 0x10f   : > { %11624 = vst [vmem:[#allocation95_spill] sm:$0xff] %v6765_v34  ;;  %11625 = vst [vmem:[#allocation96_spill] sm:$0xff] %v6768_v22  ;;  %1340 = vrot.lane.b32.xlu1 %v6755_v19, %s5848_s9  ;;  %1338 = vrot.lane.b32.xlu0 %v6758_v20, %s5848_s9  ;;  %v1076_v13 = vrot.slane %v6768_v22, 1  ;;  %v1077_v24 = vrot.slane %v6765_v34, 1 }
 0x111   : > { %v706_v6 = vpop.permute.xlu1 %705  ;;  %v704_v55 = vpop.permute.xlu0 %703  ;;  %v6801_v20 = vsel %vm956_vm1, %v1076_v13, %v1077_v24 }
 0x112   : > { %v6786_v42 = vsel %vm803_vm0, %v394_v54, %v706_v6  ;;  %v6789_v2 = vsel %vm803_vm0, %v393_v44, %v704_v55  ;;  %11631 = vst [vmem:[#allocation102_spill] sm:$0xff] %v6801_v20  ;;  %v6804_v54 = vsel %vm956_vm1, %v1072_v15, %v1074_v57  ;;  %v1087_v57 = vrot.slane %v6132_v40, 2 }
 0x113   : > { %11628 = vst [vmem:[#allocation99_spill] sm:$0xff] %v6789_v2  ;;  %1344 = vrot.lane.b32.xlu1 %v6781_v61, %s5848_s9  ;;  %1342 = vrot.lane.b32.xlu0 %v6777_v43, %s5848_s9  ;;  %v1081_v19 = vrot.slane %v6786_v42, 1  ;;  %11632 = vst [vmem:[#allocation103_spill] sm:$0xff] %v6804_v54  ;;  %v1079_v55 = vrot.slane %v6789_v2, 1  ;;  %v1085_v61 = vrot.slane %v6124_v37, 2 }
 0x115   : > { %v6795_v4 = vpop.permute.xlu1 %709  ;;  %v6797_v25 = vpop.permute.xlu0 %707  ;;  %v6817_v13 = vsel %vm956_vm1, %v1079_v55, %v1081_v19  ;;  %v6820_v15 = vsel %vm956_vm1, %v1077_v24, %v1079_v55  ;;  %v1092_v24 = vrot.slane %v6154_v51, 2  ;;  %v1091_v55 = vrot.slane %v6158_v52, 2 }
 0x116   : > { %11629 = vst [vmem:[#allocation100_spill] sm:$0xff] %v6795_v4  ;;  %11630 = vst [vmem:[#allocation101_spill] sm:$0xff] %v6797_v25 }
 0x117   : > { %1348 = vrot.lane.b32.xlu1 %v6801_v20, %s5848_s9  ;;  %1346 = vrot.lane.b32.xlu0 %v6804_v54, %s5848_s9  ;;  %11635 = vst [vmem:[#allocation106_spill] sm:$0xff] %v6817_v13  ;;  %11636 = vst [vmem:[#allocation107_spill] sm:$0xff] %v6820_v15  ;;  %v1084_v20 = vrot.slane %v6136_v41, 2  ;;  %v1096_v41 = vrot.slane %v6175_v62, 2  ;;  %v1098_v62 = vrot.slane %v6198_v8, 2 }
 0x119   : > { %v6811_v44 = vpop.permute.xlu1 %713  ;;  %v6813_v6 = vpop.permute.xlu0 %711  ;;  %v1086_v54 = vsel %vm1083_vm2, %v1084_v20, %v1085_v61 }
 0x11a   : > { %11633 = vst [vmem:[#allocation104_spill] sm:$0xff] %v6811_v44  ;;  %11634 = vst [vmem:[#allocation105_spill] sm:$0xff] %v6813_v6  ;;  %v1089_v44 = vrot.slane %v6148_v48, 2  ;;  %v11739_v6 = vld [vmem:[#allocation82_spill] sm:$0xff] }
 0x11b   : > { %1352 = vrot.lane.b32.xlu1 %v6817_v13, %s5848_s9  ;;  %1350 = vrot.lane.b32.xlu0 %v6820_v15, %s5848_s9  ;;  %v1088_v13 = vsel %vm1083_vm2, %v1085_v61, %v1087_v57  ;;  %v1190_v4 = vrot.slane %v11739_v6, 2 }
 0x11c   : > { %v1090_v15 = vsel %vm1083_vm2, %v1087_v57, %v1089_v44  ;;  %v1101_v44 = vrot.slane %v6207_v14, 2 }
 0x11d   : > { %v6829_v37 = vpop.permute.xlu1 %717  ;;  %v6831_v19 = vpop.permute.xlu0 %715 }
 0x11e   : > { %11637 = vst [vmem:[#allocation108_spill] sm:$0xff] %v6829_v37  ;;  %11638 = vst [vmem:[#allocation109_spill] sm:$0xff] %v6831_v19  ;;  %v1094_v37 = vrot.slane %v6179_v63, 2  ;;  %v6846_v19 = vsel %vm1083_vm2, %v1091_v55, %v1092_v24 }
 0x11f   : > { %1410 = vrot.lane.b32.xlu1 %v1088_v13, %s5849_s10  ;;  %1408 = vrot.lane.b32.xlu0 %v1086_v54, %s5849_s10  ;;  %11641 = vst [vmem:[#allocation112_spill] sm:$0xff] %v6846_v19  ;;  %v1099_v54 = vrot.slane %v6194_v7, 2 }
 0x120   : > { %v6859_v13 = vsel %vm1083_vm2, %v1094_v37, %v1096_v41  ;;  %v6862_v55 = vsel %vm1083_vm2, %v1092_v24, %v1094_v37  ;;  %v1103_v41 = vrot.slane %v6228_v26, 2  ;;  %v1105_v24 = vrot.slane %v6236_v30, 2 }
 0x121   : > { %v6839_v40 = vpop.permute.xlu1 %721  ;;  %v6841_v48 = vpop.permute.xlu0 %719  ;;  %11644 = vst [vmem:[#allocation115_spill] sm:$0xff] %v6859_v13  ;;  %11645 = vst [vmem:[#allocation116_spill] sm:$0xff] %v6862_v55  ;;  %v6878_v37 = vsel %vm1083_vm2, %v1099_v54, %v1101_v44 }
 0x122   : > { %11639 = vst [vmem:[#allocation110_spill] sm:$0xff] %v6839_v40  ;;  %11640 = vst [vmem:[#allocation111_spill] sm:$0xff] %v6841_v48  ;;  %v6874_v40 = vsel %vm1083_vm2, %v1098_v62, %v1099_v54  ;;  %v1110_v62 = vrot.slane %v6254_v39, 2  ;;  %v6895_v54 = vsel %vm1083_vm2, %v1101_v44, %v1103_v41  ;;  %v1113_v39 = vrot.slane %v6286_v58, 2 }
 0x123   : > { %1414 = vrot.lane.b32.xlu1 %v6846_v19, %s5849_s10  ;;  %1412 = vrot.lane.b32.xlu0 %v1090_v15, %s5849_s10  ;;  %11648 = vst [vmem:[#allocation119_spill] sm:$0xff] %v6874_v40  ;;  %11649 = vst [vmem:[#allocation120_spill] sm:$0xff] %v6878_v37  ;;  %v1115_v41 = vrot.slane %v6294_v60, 2 }
 0x124   : > { %11653 = vst [vmem:[#allocation124_spill] sm:$0xff] %v6895_v54 }
 0x125   : > { %v6852_v20 = vpop.permute.xlu1 %1248  ;;  %v6854_v61 = vpop.permute.xlu0 %1246 }
 0x126   : > { %11642 = vst [vmem:[#allocation113_spill] sm:$0xff] %v6852_v20  ;;  %11643 = vst [vmem:[#allocation114_spill] sm:$0xff] %v6854_v61  ;;  %v1106_v20 = vrot.slane %v6232_v27, 2  ;;  %v1108_v61 = vrot.slane %v6265_v45, 2 }
 0x127   : > { %1418 = vrot.lane.b32.xlu1 %v6859_v13, %s5849_s10  ;;  %1416 = vrot.lane.b32.xlu0 %v6862_v55, %s5849_s10  ;;  %v11723_v55 = vld [vmem:[#allocation68_spill] sm:$0xff] }
 0x128   : > { %v6892_v26 = vsel %vm1083_vm2, %v1105_v24, %v1106_v20  ;;  %v1112_v24 = vrot.slane %v6290_v59, 2  ;;  %v6912_v44 = vsel %vm1083_vm2, %v1106_v20, %v1108_v61  ;;  %v6928_v20 = vsel %vm1083_vm2, %v1113_v39, %v1115_v41 }
 0x129   : > { %v6869_v15 = vpop.permute.xlu1 %1252  ;;  %v6871_v57 = vpop.permute.xlu0 %1250  ;;  %11652 = vst [vmem:[#allocation123_spill] sm:$0xff] %v6892_v26  ;;  %11657 = vst [vmem:[#allocation128_spill] sm:$0xff] %v6912_v44  ;;  %v1176_v43 = vrot.slane %v11723_v55, 2 }
 0x12a   : > { %11646 = vst [vmem:[#allocation117_spill] sm:$0xff] %v6869_v15  ;;  %11647 = vst [vmem:[#allocation118_spill] sm:$0xff] %v6871_v57 }
 0x12b   : > { %1422 = vrot.lane.b32.xlu1 %v6878_v37, %s5849_s10  ;;  %1420 = vrot.lane.b32.xlu0 %v6874_v40, %s5849_s10  ;;  %11661 = vst [vmem:[#allocation132_spill] sm:$0xff] %v6928_v20  ;;  %v1120_v37 = vrot.slane %v6323_v18, 2 }
 0x12d   : > { %v6886_v15 = vpop.permute.xlu1 %1256  ;;  %v6888_v57 = vpop.permute.xlu0 %1254 }
 0x12e   : > { %11650 = vst [vmem:[#allocation121_spill] sm:$0xff] %v6886_v15  ;;  %11651 = vst [vmem:[#allocation122_spill] sm:$0xff] %v6888_v57  ;;  %v6909_v57 = vsel %vm1083_vm2, %v1108_v61, %v1110_v62  ;;  %v1117_v62 = vrot.slane %v6313_v9, 2  ;;  %v1119_v61 = vrot.slane %v6327_v17, 2 }
 0x12f   : > { %1426 = vrot.lane.b32.xlu1 %v6892_v26, %s5849_s10  ;;  %1424 = vrot.lane.b32.xlu0 %v6895_v54, %s5849_s10  ;;  %11656 = vst [vmem:[#allocation127_spill] sm:$0xff] %v6909_v57  ;;  %v6924_v26 = vsel %vm1083_vm2, %v1112_v24, %v1113_v39  ;;  %v1124_v24 = vrot.slane %v6346_v33, 2  ;;  %v1127_v33 = vrot.slane %v6369_v28, 2 }
 0x130   : > { %11660 = vst [vmem:[#allocation131_spill] sm:$0xff] %v6924_v26  ;;  %v6942_v9 = vsel %vm1083_vm2, %v1119_v61, %v1120_v37  ;;  %v6945_v39 = vsel %vm1083_vm2, %v1115_v41, %v1117_v62  ;;  %v1126_v61 = vrot.slane %v6373_v1, 2  ;;  %v1129_v62 = vrot.slane %v6384_v31, 2 }
 0x131   : > { %v6902_v48 = vpop.permute.xlu1 %1260  ;;  %v6904_v15 = vpop.permute.xlu0 %1258  ;;  %11664 = vst [vmem:[#allocation135_spill] sm:$0xff] %v6942_v9  ;;  %11665 = vst [vmem:[#allocation136_spill] sm:$0xff] %v6945_v39 }
 0x132   : > { %11654 = vst [vmem:[#allocation125_spill] sm:$0xff] %v6902_v48  ;;  %11655 = vst [vmem:[#allocation126_spill] sm:$0xff] %v6904_v15 }
 0x133   : > { %1430 = vrot.lane.b32.xlu1 %v6909_v57, %s5849_s10  ;;  %1428 = vrot.lane.b32.xlu0 %v6912_v44, %s5849_s10  ;;  %v1122_v57 = vrot.slane %v6350_v21, 2 }
 0x135   : > { %v6919_v48 = vpop.permute.xlu1 %1264  ;;  %v6921_v15 = vpop.permute.xlu0 %1262  ;;  %v6962_v41 = vsel %vm1083_vm2, %v1120_v37, %v1122_v57  ;;  %v1133_v37 = vrot.slane %v6410_v56, 2 }
 0x136   : > { %11658 = vst [vmem:[#allocation129_spill] sm:$0xff] %v6919_v48  ;;  %11659 = vst [vmem:[#allocation130_spill] sm:$0xff] %v6921_v15 }
 0x137   : > { %1434 = vrot.lane.b32.xlu1 %v6928_v20, %s5849_s10  ;;  %1432 = vrot.lane.b32.xlu0 %v6924_v26, %s5849_s10  ;;  %11669 = vst [vmem:[#allocation140_spill] sm:$0xff] %v6962_v41  ;;  %v11703_v26 = vld [vmem:[#allocation54_spill] sm:$0xff] }
 0x138   : > { %v1162_v44 = vrot.slane %v11703_v26, 2 }
 0x139   : > { %v6936_v48 = vpop.permute.xlu1 %1268  ;;  %v6938_v15 = vpop.permute.xlu0 %1266 }
 0x13a   : > { %11662 = vst [vmem:[#allocation133_spill] sm:$0xff] %v6936_v48  ;;  %11663 = vst [vmem:[#allocation134_spill] sm:$0xff] %v6938_v15  ;;  %v6959_v15 = vsel %vm1083_vm2, %v1122_v57, %v1124_v24  ;;  %v1131_v24 = vrot.slane %v6402_v49, 2  ;;  %v6978_v57 = vsel %vm1083_vm2, %v1127_v33, %v1129_v62 }
 0x13b   : > { %1438 = vrot.lane.b32.xlu1 %v6942_v9, %s5849_s10  ;;  %1436 = vrot.lane.b32.xlu0 %v6945_v39, %s5849_s10  ;;  %11668 = vst [vmem:[#allocation139_spill] sm:$0xff] %v6959_v15  ;;  %v6974_v9 = vsel %vm1083_vm2, %v1126_v61, %v1127_v33  ;;  %11673 = vst [vmem:[#allocation144_spill] sm:$0xff] %v6978_v57  ;;  %v1134_v39 = vrot.slane %v6406_v50, 2  ;;  %v1138_v61 = vrot.slane %v6424_v11, 2  ;;  %v1141_v11 = vrot.slane %v6452_v35, 2 }
 0x13c   : > { %11672 = vst [vmem:[#allocation143_spill] sm:$0xff] %v6974_v9  ;;  %v6995_v33 = vsel %vm1083_vm2, %v1129_v62, %v1131_v24  ;;  %v1143_v24 = vrot.slane %v6459_v23, 2 }
 0x13d   : > { %v6952_v20 = vpop.permute.xlu1 %1272  ;;  %v6954_v48 = vpop.permute.xlu0 %1270  ;;  %v6992_v49 = vsel %vm1083_vm2, %v1133_v37, %v1134_v39  ;;  %11677 = vst [vmem:[#allocation148_spill] sm:$0xff] %v6995_v33  ;;  %v1140_v37 = vrot.slane %v6456_v12, 2 }
 0x13e   : > { %11666 = vst [vmem:[#allocation137_spill] sm:$0xff] %v6952_v20  ;;  %11667 = vst [vmem:[#allocation138_spill] sm:$0xff] %v6954_v48 }
 0x13f   : > { %1442 = vrot.lane.b32.xlu1 %v6959_v15, %s5849_s10  ;;  %1440 = vrot.lane.b32.xlu0 %v6962_v41, %s5849_s10  ;;  %11676 = vst [vmem:[#allocation147_spill] sm:$0xff] %v6992_v49  ;;  %v1136_v15 = vrot.slane %v6435_v3, 2 }
 0x141   : > { %v6969_v20 = vpop.permute.xlu1 %1276  ;;  %v6971_v48 = vpop.permute.xlu0 %1274  ;;  %v7012_v62 = vsel %vm1083_vm2, %v1134_v39, %v1136_v15  ;;  %v11686_v39 = vld [vmem:[#allocation41_spill] sm:$0xff] }
 0x142   : > { %11670 = vst [vmem:[#allocation141_spill] sm:$0xff] %v6969_v20  ;;  %11671 = vst [vmem:[#allocation142_spill] sm:$0xff] %v6971_v48 }
 0x143   : > { %1446 = vrot.lane.b32.xlu1 %v6978_v57, %s5849_s10  ;;  %1444 = vrot.lane.b32.xlu0 %v6974_v9, %s5849_s10  ;;  %11681 = vst [vmem:[#allocation152_spill] sm:$0xff] %v7012_v62  ;;  %v11687_v9 = vld [vmem:[#allocation40_spill] sm:$0xff] }
 0x144   : > { %v1148_v41 = vrot.slane %v11687_v9, 2 }
 0x145   : > { %v6986_v20 = vpop.permute.xlu1 %1280  ;;  %v6988_v48 = vpop.permute.xlu0 %1278 }
 0x146   : > { %11674 = vst [vmem:[#allocation145_spill] sm:$0xff] %v6986_v20  ;;  %11675 = vst [vmem:[#allocation146_spill] sm:$0xff] %v6988_v48  ;;  %v7009_v48 = vsel %vm1083_vm2, %v1136_v15, %v1138_v61  ;;  %v1145_v61 = vrot.slane %v6474_v47, 2  ;;  %v7028_v15 = vsel %vm1083_vm2, %v1141_v11, %v1143_v24 }
 0x147   : > { %1450 = vrot.lane.b32.xlu1 %v6992_v49, %s5849_s10  ;;  %1448 = vrot.lane.b32.xlu0 %v6995_v33, %s5849_s10  ;;  %11680 = vst [vmem:[#allocation151_spill] sm:$0xff] %v7009_v48  ;;  %v7024_v49 = vsel %vm1083_vm2, %v1140_v37, %v1141_v11  ;;  %11685 = vst [vmem:[#allocation156_spill] sm:$0xff] %v7028_v15  ;;  %v1147_v33 = vrot.slane %v11686_v39, 2  ;;  %v11690_v37 = vld [vmem:[#allocation44_spill] sm:$0xff] }
 0x148   : > { %11684 = vst [vmem:[#allocation155_spill] sm:$0xff] %v7024_v49  ;;  %v7045_v11 = vsel %vm1083_vm2, %v1143_v24, %v1145_v61  ;;  %v11697_v61 = vld [vmem:[#allocation50_spill] sm:$0xff] }
 0x149   : > { %v7002_v57 = vpop.permute.xlu1 %1284  ;;  %v7004_v20 = vpop.permute.xlu0 %1282  ;;  %v7042_v47 = vsel %vm1083_vm2, %v1147_v33, %v1148_v41  ;;  %11692 = vst [vmem:[#allocation159_spill] sm:$0xff] %v7045_v11  ;;  %v1154_v33 = vrot.slane %v6524_v10, 2 }
 0x14a   : > { %11678 = vst [vmem:[#allocation149_spill] sm:$0xff] %v7002_v57  ;;  %11679 = vst [vmem:[#allocation150_spill] sm:$0xff] %v7004_v20 }
 0x14b   : > { %1454 = vrot.lane.b32.xlu1 %v7009_v48, %s5849_s10  ;;  %1452 = vrot.lane.b32.xlu0 %v7012_v62, %s5849_s10  ;;  %v1152_v48 = vrot.slane %v11690_v37, 2  ;;  %11691 = vst [vmem:[#allocation44_spill] sm:$0xff] %v7042_v47  ;;  %v1150_v62 = vrot.slane %v6507_v53, 2  ;;  %v1155_v37 = vrot.slane %v6521_v46, 2 }
 0x14d   : > { %v7019_v57 = vpop.permute.xlu1 %1288  ;;  %v7021_v20 = vpop.permute.xlu0 %1286  ;;  %v7062_v24 = vsel %vm1083_vm2, %v1148_v41, %v1150_v62 }
 0x14e   : > { %11682 = vst [vmem:[#allocation153_spill] sm:$0xff] %v7019_v57  ;;  %11683 = vst [vmem:[#allocation154_spill] sm:$0xff] %v7021_v20 }
 0x14f   : > { %1458 = vrot.lane.b32.xlu1 %v7028_v15, %s5849_s10  ;;  %1456 = vrot.lane.b32.xlu0 %v7024_v49, %s5849_s10  ;;  %11696 = vst [vmem:[#allocation163_spill] sm:$0xff] %v7062_v24  ;;  %v1157_v49 = vrot.slane %v11697_v61, 2 }
 0x151   : > { %v7036_v57 = vpop.permute.xlu1 %1292  ;;  %v7038_v20 = vpop.permute.xlu0 %1290  ;;  %v7078_v41 = vsel %vm1083_vm2, %v1155_v37, %v1157_v49 }
 0x152   : > { %11688 = vst [vmem:[#allocation157_spill] sm:$0xff] %v7036_v57  ;;  %11689 = vst [vmem:[#allocation158_spill] sm:$0xff] %v7038_v20  ;;  %v7059_v20 = vsel %vm1083_vm2, %v1150_v62, %v1152_v48  ;;  %v11701_v48 = vld [vmem:[#allocation53_spill] sm:$0xff]  ;;  %v1161_v62 = vrot.slane %v6557_v29, 2 }
 0x153   : > { %1462 = vrot.lane.b32.xlu1 %v7042_v47, %s5849_s10  ;;  %1460 = vrot.lane.b32.xlu0 %v7045_v11, %s5849_s10  ;;  %11695 = vst [vmem:[#allocation162_spill] sm:$0xff] %v7059_v20  ;;  %v7074_v47 = vsel %vm1083_vm2, %v1154_v33, %v1155_v37  ;;  %v1159_v11 = vrot.slane %v11701_v48, 2  ;;  %11702 = vst [vmem:[#allocation53_spill] sm:$0xff] %v7078_v41  ;;  %v11706_v33 = vld [vmem:[#allocation56_spill] sm:$0xff] }
 0x154   : > { %11700 = vst [vmem:[#allocation166_spill] sm:$0xff] %v7074_v47  ;;  %v7092_v48 = vsel %vm1083_vm2, %v1161_v62, %v1162_v44 }
 0x155   : > { %v7052_v15 = vpop.permute.xlu1 %1296  ;;  %v7054_v57 = vpop.permute.xlu0 %1294  ;;  %11707 = vst [vmem:[#allocation56_spill] sm:$0xff] %v7092_v48  ;;  %v7095_v37 = vsel %vm1083_vm2, %v1157_v49, %v1159_v11  ;;  %v11716_v11 = vld [vmem:[#allocation64_spill] sm:$0xff] }
 0x156   : > { %11693 = vst [vmem:[#allocation160_spill] sm:$0xff] %v7052_v15  ;;  %11694 = vst [vmem:[#allocation161_spill] sm:$0xff] %v7054_v57  ;;  %v1171_v40 = vrot.slane %v11716_v11, 2 }
 0x157   : > { %1466 = vrot.lane.b32.xlu1 %v7059_v20, %s5849_s10  ;;  %1464 = vrot.lane.b32.xlu0 %v7062_v24, %s5849_s10  ;;  %v1166_v20 = vrot.slane %v11706_v33, 2  ;;  %11708 = vst [vmem:[#allocation169_spill] sm:$0xff] %v7095_v37  ;;  %v11709_v24 = vld [vmem:[#allocation59_spill] sm:$0xff] }
 0x158   : > { %v1164_v54 = vrot.slane %v11709_v24, 2 }
 0x159   : > { %v7069_v15 = vpop.permute.xlu1 %1300  ;;  %v7071_v57 = vpop.permute.xlu0 %1298 }
 0x15a   : > { %11698 = vst [vmem:[#allocation164_spill] sm:$0xff] %v7069_v15  ;;  %11699 = vst [vmem:[#allocation165_spill] sm:$0xff] %v7071_v57  ;;  %v7109_v13 = vsel %vm1083_vm2, %v1164_v54, %v1166_v20  ;;  %v7112_v49 = vsel %vm1083_vm2, %v1162_v44, %v1164_v54  ;;  %v11720_v20 = vld [vmem:[#allocation65_spill] sm:$0xff] }
 0x15b   : > { %1470 = vrot.lane.b32.xlu1 %v7078_v41, %s5849_s10  ;;  %1468 = vrot.lane.b32.xlu0 %v7074_v47, %s5849_s10  ;;  %v11713_v47 = vld [vmem:[#allocation63_spill] sm:$0xff]  ;;  %11714 = vst [vmem:[#allocation172_spill] sm:$0xff] %v7109_v13  ;;  %11715 = vst [vmem:[#allocation173_spill] sm:$0xff] %v7112_v49  ;;  %v11722_v44 = vld [vmem:[#allocation69_spill] sm:$0xff] }
 0x15c   : > { %v1168_v62 = vrot.slane %v11713_v47, 2  ;;  %v1175_v19 = vrot.slane %v11722_v44, 2 }
 0x15d   : > { %v7086_v15 = vpop.permute.xlu1 %1304  ;;  %v7088_v57 = vpop.permute.xlu0 %1302 }
 0x15e   : > { %11704 = vst [vmem:[#allocation167_spill] sm:$0xff] %v7086_v15  ;;  %11705 = vst [vmem:[#allocation168_spill] sm:$0xff] %v7088_v57  ;;  %v11712_v57 = vld [vmem:[#allocation62_spill] sm:$0xff] }
 0x15f   : > { %1474 = vrot.lane.b32.xlu1 %v7092_v48, %s5849_s10  ;;  %1472 = vrot.lane.b32.xlu0 %v7095_v37, %s5849_s10  ;;  %v1169_v33 = vrot.slane %v11712_v57, 2  ;;  %v1173_v37 = vrot.slane %v11720_v20, 2  ;;  %v7142_v20 = vsel %vm1083_vm2, %v1175_v19, %v1176_v43  ;;  %v1182_v19 = vrot.slane %v6664_v38, 2 }
 0x161   : > { %v7102_v41 = vpop.permute.xlu1 %1308  ;;  %v7104_v15 = vpop.permute.xlu0 %1306  ;;  %v7124_v48 = vsel %vm1083_vm2, %v1168_v62, %v1169_v33  ;;  %v7128_v54 = vsel %vm1083_vm2, %v1169_v33, %v1171_v40  ;;  %v11726_v62 = vld [vmem:[#allocation72_spill] sm:$0xff]  ;;  %v7145_v33 = vsel %vm1083_vm2, %v1171_v40, %v1173_v37  ;;  %v1185_v37 = vrot.slane %v6674_v0, 2 }
 0x162   : > { %11710 = vst [vmem:[#allocation170_spill] sm:$0xff] %v7102_v41  ;;  %11711 = vst [vmem:[#allocation171_spill] sm:$0xff] %v7104_v15 }
 0x163   : > { %1478 = vrot.lane.b32.xlu1 %v7109_v13, %s5849_s10  ;;  %1476 = vrot.lane.b32.xlu0 %v7112_v49, %s5849_s10  ;;  %11719 = vst [vmem:[#allocation176_spill] sm:$0xff] %v7124_v48  ;;  %11721 = vst [vmem:[#allocation65_spill] sm:$0xff] %v7128_v54  ;;  %v1180_v13 = vrot.slane %v11726_v62, 2  ;;  %v1178_v49 = vrot.slane %v6647_v32, 2  ;;  %v1183_v62 = vrot.slane %v6661_v16, 2 }
 0x164   : > { %11727 = vst [vmem:[#allocation72_spill] sm:$0xff] %v7142_v20  ;;  %11728 = vst [vmem:[#allocation179_spill] sm:$0xff] %v7145_v33 }
 0x165   : > { %v7119_v41 = vpop.permute.xlu1 %1312  ;;  %v7121_v15 = vpop.permute.xlu0 %1310  ;;  %v7162_v40 = vsel %vm1083_vm2, %v1176_v43, %v1178_v49  ;;  %v7178_v43 = vsel %vm1083_vm2, %v1183_v62, %v1185_v37 }
 0x166   : > { %11717 = vst [vmem:[#allocation174_spill] sm:$0xff] %v7119_v41  ;;  %11718 = vst [vmem:[#allocation175_spill] sm:$0xff] %v7121_v15 }
 0x167   : > { %1482 = vrot.lane.b32.xlu1 %v7128_v54, %s5849_s10  ;;  %1480 = vrot.lane.b32.xlu0 %v7124_v48, %s5849_s10  ;;  %11732 = vst [vmem:[#allocation183_spill] sm:$0xff] %v7162_v40 }
 0x169   : > { %v7136_v41 = vpop.permute.xlu1 %1316  ;;  %v7138_v15 = vpop.permute.xlu0 %1314 }
 0x16a   : > { %11724 = vst [vmem:[#allocation177_spill] sm:$0xff] %v7136_v41  ;;  %11725 = vst [vmem:[#allocation178_spill] sm:$0xff] %v7138_v15  ;;  %v7159_v15 = vsel %vm1083_vm2, %v1178_v49, %v1180_v13  ;;  %v11736_v13 = vld [vmem:[#allocation81_spill] sm:$0xff]  ;;  %v11738_v49 = vld [vmem:[#allocation83_spill] sm:$0xff] }
 0x16b   : > { %1486 = vrot.lane.b32.xlu1 %v7142_v20, %s5849_s10  ;;  %1484 = vrot.lane.b32.xlu0 %v7145_v33, %s5849_s10  ;;  %11731 = vst [vmem:[#allocation182_spill] sm:$0xff] %v7159_v15  ;;  %v7174_v20 = vsel %vm1083_vm2, %v1182_v19, %v1183_v62  ;;  %v1187_v33 = vrot.slane %v11736_v13, 2  ;;  %11737 = vst [vmem:[#allocation81_spill] sm:$0xff] %v7178_v43  ;;  %v1189_v48 = vrot.slane %v11738_v49, 2  ;;  %v11742_v19 = vld [vmem:[#allocation86_spill] sm:$0xff] }
 0x16c   : > { %11735 = vst [vmem:[#allocation186_spill] sm:$0xff] %v7174_v20 }
 0x16d   : > { %v7152_v54 = vpop.permute.xlu1 %1320  ;;  %v7154_v41 = vpop.permute.xlu0 %1318  ;;  %v7192_v13 = vsel %vm1083_vm2, %v1189_v48, %v1190_v4  ;;  %v7195_v62 = vsel %vm1083_vm2, %v1185_v37, %v1187_v33  ;;  %v11751_v37 = vld [vmem:[#allocation92_spill] sm:$0xff] }
 0x16e   : > { %11729 = vst [vmem:[#allocation180_spill] sm:$0xff] %v7152_v54  ;;  %11730 = vst [vmem:[#allocation181_spill] sm:$0xff] %v7154_v41 }
 0x16f   : > { %1490 = vrot.lane.b32.xlu1 %v7159_v15, %s5849_s10  ;;  %1488 = vrot.lane.b32.xlu0 %v7162_v40, %s5849_s10  ;;  %v1194_v15 = vrot.slane %v11742_v19, 2  ;;  %11743 = vst [vmem:[#allocation86_spill] sm:$0xff] %v7192_v13  ;;  %11744 = vst [vmem:[#allocation189_spill] sm:$0xff] %v7195_v62  ;;  %v11745_v40 = vld [vmem:[#allocation87_spill] sm:$0xff]  ;;  %v1197_v19 = vrot.slane %v6736_v36, 2 }
 0x170   : > { %v1192_v25 = vrot.slane %v11745_v40, 2  ;;  %v1199_v40 = vrot.slane %v11751_v37, 2 }
 0x171   : > { %v7169_v54 = vpop.permute.xlu1 %1324  ;;  %v7171_v41 = vpop.permute.xlu0 %1322 }
 0x172   : > { %11733 = vst [vmem:[#allocation184_spill] sm:$0xff] %v7169_v54  ;;  %11734 = vst [vmem:[#allocation185_spill] sm:$0xff] %v7171_v41  ;;  %v7212_v33 = vsel %vm1083_vm2, %v1190_v4, %v1192_v25  ;;  %v7228_v4 = vsel %vm1083_vm2, %v1197_v19, %v1199_v40 }
 0x173   : > { %1494 = vrot.lane.b32.xlu1 %v7178_v43, %s5849_s10  ;;  %1492 = vrot.lane.b32.xlu0 %v7174_v20, %s5849_s10  ;;  %v7209_v20 = vsel %vm1083_vm2, %v1192_v25, %v1194_v15  ;;  %11750 = vst [vmem:[#allocation193_spill] sm:$0xff] %v7212_v33  ;;  %v1201_v15 = vrot.slane %v6762_v5, 2  ;;  %11755 = vst [vmem:[#allocation197_spill] sm:$0xff] %v7228_v4  ;;  %v1203_v25 = vrot.slane %v6768_v22, 2 }
 0x174   : > { %11749 = vst [vmem:[#allocation192_spill] sm:$0xff] %v7209_v20 }
 0x175   : > { %v7186_v54 = vpop.permute.xlu1 %1328  ;;  %v7188_v41 = vpop.permute.xlu0 %1326 }
 0x176   : > { %11740 = vst [vmem:[#allocation187_spill] sm:$0xff] %v7186_v54  ;;  %11741 = vst [vmem:[#allocation188_spill] sm:$0xff] %v7188_v41  ;;  %v11748_v41 = vld [vmem:[#allocation91_spill] sm:$0xff] }
 0x177   : > { %1498 = vrot.lane.b32.xlu1 %v7192_v13, %s5849_s10  ;;  %1496 = vrot.lane.b32.xlu0 %v7195_v62, %s5849_s10  ;;  %v1196_v48 = vrot.slane %v11748_v41, 2  ;;  %v1204_v62 = vrot.slane %v6765_v34, 2 }
 0x179   : > { %v7202_v43 = vpop.permute.xlu1 %1332  ;;  %v7204_v54 = vpop.permute.xlu0 %1330  ;;  %v7224_v13 = vsel %vm1083_vm2, %v1196_v48, %v1197_v19  ;;  %v1208_v48 = vrot.slane %v6786_v42, 2  ;;  %v7242_v5 = vsel %vm1083_vm2, %v1203_v25, %v1204_v62  ;;  %v7245_v19 = vsel %vm1083_vm2, %v1199_v40, %v1201_v15 }
 0x17a   : > { %11746 = vst [vmem:[#allocation190_spill] sm:$0xff] %v7202_v43  ;;  %11747 = vst [vmem:[#allocation191_spill] sm:$0xff] %v7204_v54 }
 0x17b   : > { %1502 = vrot.lane.b32.xlu1 %v7209_v20, %s5849_s10  ;;  %1500 = vrot.lane.b32.xlu0 %v7212_v33, %s5849_s10  ;;  %11754 = vst [vmem:[#allocation196_spill] sm:$0xff] %v7224_v13  ;;  %11758 = vst [vmem:[#allocation200_spill] sm:$0xff] %v7242_v5  ;;  %v1206_v20 = vrot.slane %v6789_v2, 2 }
 0x17c   : > { %11759 = vst [vmem:[#allocation201_spill] sm:$0xff] %v7245_v19 }
 0x17d   : > { %v7219_v43 = vpop.permute.xlu1 %1336  ;;  %v7221_v54 = vpop.permute.xlu0 %1334  ;;  %v7257_v42 = vsel %vm1083_vm2, %v1206_v20, %v1208_v48  ;;  %v7260_v25 = vsel %vm1083_vm2, %v1204_v62, %v1206_v20 }
 0x17e   : > { %11752 = vst [vmem:[#allocation194_spill] sm:$0xff] %v7219_v43  ;;  %11753 = vst [vmem:[#allocation195_spill] sm:$0xff] %v7221_v54 }
 0x17f   : > { %1506 = vrot.lane.b32.xlu1 %v7228_v4, %s5849_s10  ;;  %1504 = vrot.lane.b32.xlu0 %v7224_v13, %s5849_s10  ;;  %11762 = vst [vmem:[#allocation204_spill] sm:$0xff] %v7257_v42  ;;  %11763 = vst [vmem:[#allocation205_spill] sm:$0xff] %v7260_v25 }
 0x181   : > { %v7236_v43 = vpop.permute.xlu1 %1340  ;;  %v7238_v54 = vpop.permute.xlu0 %1338 }
 0x182   : > { %11756 = vst [vmem:[#allocation198_spill] sm:$0xff] %v7236_v43  ;;  %11757 = vst [vmem:[#allocation199_spill] sm:$0xff] %v7238_v54 }
 0x183   : > { %1510 = vrot.lane.b32.xlu1 %v7242_v5, %s5849_s10  ;;  %1508 = vrot.lane.b32.xlu0 %v7245_v19, %s5849_s10 }
 0x185   : > { %v7252_v4 = vpop.permute.xlu1 %1344  ;;  %v7254_v43 = vpop.permute.xlu0 %1342 }
 0x186   : > { %11760 = vst [vmem:[#allocation202_spill] sm:$0xff] %v7252_v4  ;;  %11761 = vst [vmem:[#allocation203_spill] sm:$0xff] %v7254_v43 }
 0x187   : > { %1514 = vrot.lane.b32.xlu1 %v7257_v42, %s5849_s10  ;;  %1512 = vrot.lane.b32.xlu0 %v7260_v25, %s5849_s10 }
 0x189   : > { %v7266_v40 = vpop.permute.xlu1 %1348  ;;  %v7268_v15 = vpop.permute.xlu0 %1346 }
 0x18a   : > { %11764 = vst [vmem:[#allocation206_spill] sm:$0xff] %v7266_v40  ;;  %11765 = vst [vmem:[#allocation207_spill] sm:$0xff] %v7268_v15 }
 0x18b   : > { %1572 = vrot.lane.b32.xlu1 %v6154_v51, %s5850_s11  ;;  %1570 = vrot.lane.b32.xlu0 %v6158_v52, %s5850_s11  ;;  %v11820_v52 = vld [vmem:[#allocation100_spill] sm:$0xff] }
 0x18d   : > { %v7274_v48 = vpop.permute.xlu1 %1352  ;;  %v7276_v20 = vpop.permute.xlu0 %1350 }
 0x18e   : > { %11766 = vst [vmem:[#allocation208_spill] sm:$0xff] %v7274_v48  ;;  %11767 = vst [vmem:[#allocation209_spill] sm:$0xff] %v7276_v20 }
 0x18f   : > { %1576 = vrot.lane.b32.xlu1 %v6198_v8, %s5850_s11  ;;  %1574 = vrot.lane.b32.xlu0 %v6179_v63, %s5850_s11  ;;  %v396_v63 = vld [vmem:[%s6110_s8 + $0x248] sm:$0xff] }
 0x191   : > { %v7282_v62 = vpop.permute.xlu1 %1410  ;;  %v7284_v15 = vpop.permute.xlu0 %1408 }
 0x192   : > { %11768 = vst [vmem:[#allocation210_spill] sm:$0xff] %v7282_v62  ;;  %11769 = vst [vmem:[#allocation211_spill] sm:$0xff] %v7284_v15  ;;  %v11817_v62 = vld [vmem:[#allocation101_spill] sm:$0xff]  ;;  %v397_v15 = vld [vmem:[%s6110_s8 + $0x250] sm:$0xff] }
 0x193   : > { %1580 = vrot.lane.b32.xlu1 %v6207_v14, %s5850_s11  ;;  %1578 = vrot.lane.b32.xlu0 %v6194_v7, %s5850_s11 }
 0x195   : > { %v7290_v40 = vpop.permute.xlu1 %1414  ;;  %v7292_v48 = vpop.permute.xlu0 %1412 }
 0x196   : > { %11770 = vst [vmem:[#allocation212_spill] sm:$0xff] %v7290_v40  ;;  %11771 = vst [vmem:[#allocation213_spill] sm:$0xff] %v7292_v48  ;;  %v395_v48 = vld [vmem:[%s6110_s8 + $0x240] sm:$0xff] }
 0x197   : > { %1584 = vrot.lane.b32.xlu1 %v6232_v27, %s5850_s11  ;;  %1582 = vrot.lane.b32.xlu0 %v6236_v30, %s5850_s11  ;;  %v7473_v51 = vsel %vm803_vm0, %v395_v48, %v11817_v62 }
 0x199   : > { %v7298_v20 = vpop.permute.xlu1 %1418  ;;  %v7300_v43 = vpop.permute.xlu0 %1416 }
 0x19a   : > { %11772 = vst [vmem:[#allocation214_spill] sm:$0xff] %v7298_v20  ;;  %11773 = vst [vmem:[#allocation215_spill] sm:$0xff] %v7300_v43 }
 0x19b   : > { %1588 = vrot.lane.b32.xlu1 %v6290_v59, %s5850_s11  ;;  %1586 = vrot.lane.b32.xlu0 %v6265_v45, %s5850_s11 }
 0x19d   : > { %v7306_v4 = vpop.permute.xlu1 %1422  ;;  %v7308_v54 = vpop.permute.xlu0 %1420 }
 0x19e   : > { %11774 = vst [vmem:[#allocation216_spill] sm:$0xff] %v7306_v4  ;;  %11775 = vst [vmem:[#allocation217_spill] sm:$0xff] %v7308_v54 }
 0x19f   : > { %1592 = vrot.lane.b32.xlu1 %v6294_v60, %s5850_s11  ;;  %1590 = vrot.lane.b32.xlu0 %v6286_v58, %s5850_s11 }
 0x1a1   : > { %v7314_v40 = vpop.permute.xlu1 %1426  ;;  %v7316_v20 = vpop.permute.xlu0 %1424 }
 0x1a2   : > { %11776 = vst [vmem:[#allocation218_spill] sm:$0xff] %v7314_v40  ;;  %11777 = vst [vmem:[#allocation219_spill] sm:$0xff] %v7316_v20 }
 0x1a3   : > { %1596 = vrot.lane.b32.xlu1 %v6323_v18, %s5850_s11  ;;  %1594 = vrot.lane.b32.xlu0 %v6327_v17, %s5850_s11 }
 0x1a5   : > { %v7322_v43 = vpop.permute.xlu1 %1430  ;;  %v7324_v4 = vpop.permute.xlu0 %1428 }
 0x1a6   : > { %11778 = vst [vmem:[#allocation220_spill] sm:$0xff] %v7322_v43  ;;  %11779 = vst [vmem:[#allocation221_spill] sm:$0xff] %v7324_v4 }
 0x1a7   : > { %1600 = vrot.lane.b32.xlu1 %v6373_v1, %s5850_s11  ;;  %1598 = vrot.lane.b32.xlu0 %v6350_v21, %s5850_s11 }
 0x1a9   : > { %v7330_v54 = vpop.permute.xlu1 %1434  ;;  %v7332_v40 = vpop.permute.xlu0 %1432 }
 0x1aa   : > { %11780 = vst [vmem:[#allocation222_spill] sm:$0xff] %v7330_v54  ;;  %11781 = vst [vmem:[#allocation223_spill] sm:$0xff] %v7332_v40 }
 0x1ab   : > { %1604 = vrot.lane.b32.xlu1 %v6384_v31, %s5850_s11  ;;  %1602 = vrot.lane.b32.xlu0 %v6369_v28, %s5850_s11 }
 0x1ad   : > { %v7338_v20 = vpop.permute.xlu1 %1438  ;;  %v7340_v43 = vpop.permute.xlu0 %1436 }
 0x1ae   : > { %11782 = vst [vmem:[#allocation224_spill] sm:$0xff] %v7338_v20  ;;  %11783 = vst [vmem:[#allocation225_spill] sm:$0xff] %v7340_v43 }
 0x1af   : > { %1608 = vrot.lane.b32.xlu1 %v6406_v50, %s5850_s11  ;;  %1606 = vrot.lane.b32.xlu0 %v6410_v56, %s5850_s11 }
 0x1b1   : > { %v7346_v4 = vpop.permute.xlu1 %1442  ;;  %v7348_v54 = vpop.permute.xlu0 %1440 }
 0x1b2   : > { %11784 = vst [vmem:[#allocation226_spill] sm:$0xff] %v7346_v4  ;;  %11785 = vst [vmem:[#allocation227_spill] sm:$0xff] %v7348_v54 }
 0x1b3   : > { %1612 = vrot.lane.b32.xlu1 %v6456_v12, %s5850_s11  ;;  %1610 = vrot.lane.b32.xlu0 %v6435_v3, %s5850_s11 }
 0x1b5   : > { %v7354_v40 = vpop.permute.xlu1 %1446  ;;  %v7356_v20 = vpop.permute.xlu0 %1444 }
 0x1b6   : > { %11786 = vst [vmem:[#allocation228_spill] sm:$0xff] %v7354_v40  ;;  %11787 = vst [vmem:[#allocation229_spill] sm:$0xff] %v7356_v20 }
 0x1b7   : > { %1616 = vrot.lane.b32.xlu1 %v6459_v23, %s5850_s11  ;;  %1614 = vrot.lane.b32.xlu0 %v6452_v35, %s5850_s11 }
 0x1b9   : > { %v7362_v43 = vpop.permute.xlu1 %1450  ;;  %v7364_v4 = vpop.permute.xlu0 %1448 }
 0x1ba   : > { %11788 = vst [vmem:[#allocation230_spill] sm:$0xff] %v7362_v43  ;;  %11789 = vst [vmem:[#allocation231_spill] sm:$0xff] %v7364_v4 }
 0x1bb   : > { %1620 = vrot.lane.b32.xlu1 %v11687_v9, %s5850_s11  ;;  %1618 = vrot.lane.b32.xlu0 %v11686_v39, %s5850_s11 }
 0x1bd   : > { %v7370_v54 = vpop.permute.xlu1 %1454  ;;  %v7372_v40 = vpop.permute.xlu0 %1452 }
 0x1be   : > { %11790 = vst [vmem:[#allocation232_spill] sm:$0xff] %v7370_v54  ;;  %11791 = vst [vmem:[#allocation233_spill] sm:$0xff] %v7372_v40 }
 0x1bf   : > { %1624 = vrot.lane.b32.xlu1 %v6524_v10, %s5850_s11  ;;  %1622 = vrot.lane.b32.xlu0 %v6507_v53, %s5850_s11 }
 0x1c1   : > { %v7378_v20 = vpop.permute.xlu1 %1458  ;;  %v7380_v43 = vpop.permute.xlu0 %1456 }
 0x1c2   : > { %11792 = vst [vmem:[#allocation234_spill] sm:$0xff] %v7378_v20  ;;  %11793 = vst [vmem:[#allocation235_spill] sm:$0xff] %v7380_v43 }
 0x1c3   : > { %1628 = vrot.lane.b32.xlu1 %v11697_v61, %s5850_s11  ;;  %1626 = vrot.lane.b32.xlu0 %v6521_v46, %s5850_s11 }
 0x1c5   : > { %v7386_v4 = vpop.permute.xlu1 %1462  ;;  %v7388_v54 = vpop.permute.xlu0 %1460 }
 0x1c6   : > { %11794 = vst [vmem:[#allocation236_spill] sm:$0xff] %v7386_v4  ;;  %11795 = vst [vmem:[#allocation237_spill] sm:$0xff] %v7388_v54 }
 0x1c7   : > { %1632 = vrot.lane.b32.xlu1 %v11703_v26, %s5850_s11  ;;  %1630 = vrot.lane.b32.xlu0 %v6557_v29, %s5850_s11 }
 0x1c9   : > { %v7394_v40 = vpop.permute.xlu1 %1466  ;;  %v7396_v20 = vpop.permute.xlu0 %1464 }
 0x1ca   : > { %11796 = vst [vmem:[#allocation238_spill] sm:$0xff] %v7394_v40  ;;  %11797 = vst [vmem:[#allocation239_spill] sm:$0xff] %v7396_v20 }
 0x1cb   : > { %1636 = vrot.lane.b32.xlu1 %v11713_v47, %s5850_s11  ;;  %1634 = vrot.lane.b32.xlu0 %v11709_v24, %s5850_s11 }
 0x1cd   : > { %v7402_v43 = vpop.permute.xlu1 %1470  ;;  %v7404_v4 = vpop.permute.xlu0 %1468 }
 0x1ce   : > { %11798 = vst [vmem:[#allocation240_spill] sm:$0xff] %v7402_v43  ;;  %11799 = vst [vmem:[#allocation241_spill] sm:$0xff] %v7404_v4 }
 0x1cf   : > { %1640 = vrot.lane.b32.xlu1 %v11716_v11, %s5850_s11  ;;  %1638 = vrot.lane.b32.xlu0 %v11712_v57, %s5850_s11 }
 0x1d1   : > { %v7410_v54 = vpop.permute.xlu1 %1474  ;;  %v7412_v40 = vpop.permute.xlu0 %1472 }
 0x1d2   : > { %11800 = vst [vmem:[#allocation242_spill] sm:$0xff] %v7410_v54  ;;  %11801 = vst [vmem:[#allocation243_spill] sm:$0xff] %v7412_v40  ;;  %v11810_v40 = vld [vmem:[#allocation87_spill] sm:$0xff] }
 0x1d3   : > { %1644 = vrot.lane.b32.xlu1 %v11723_v55, %s5850_s11  ;;  %1642 = vrot.lane.b32.xlu0 %v11722_v44, %s5850_s11 }
 0x1d5   : > { %v7418_v20 = vpop.permute.xlu1 %1478  ;;  %v7420_v43 = vpop.permute.xlu0 %1476 }
 0x1d6   : > { %11802 = vst [vmem:[#allocation244_spill] sm:$0xff] %v7418_v20  ;;  %11803 = vst [vmem:[#allocation245_spill] sm:$0xff] %v7420_v43 }
 0x1d7   : > { %1648 = vrot.lane.b32.xlu1 %v6664_v38, %s5850_s11  ;;  %1646 = vrot.lane.b32.xlu0 %v6647_v32, %s5850_s11 }
 0x1d9   : > { %v7426_v4 = vpop.permute.xlu1 %1482  ;;  %v7428_v54 = vpop.permute.xlu0 %1480 }
 0x1da   : > { %11804 = vst [vmem:[#allocation246_spill] sm:$0xff] %v7426_v4  ;;  %11805 = vst [vmem:[#allocation247_spill] sm:$0xff] %v7428_v54 }
 0x1db   : > { %1652 = vrot.lane.b32.xlu1 %v6674_v0, %s5850_s11  ;;  %1650 = vrot.lane.b32.xlu0 %v6661_v16, %s5850_s11 }
 0x1dd   : > { %v7434_v20 = vpop.permute.xlu1 %1486  ;;  %v7436_v43 = vpop.permute.xlu0 %1484 }
 0x1de   : > { %11806 = vst [vmem:[#allocation248_spill] sm:$0xff] %v7434_v20  ;;  %11807 = vst [vmem:[#allocation249_spill] sm:$0xff] %v7436_v43 }
 0x1df   : > { %1656 = vrot.lane.b32.xlu1 %v11739_v6, %s5850_s11  ;;  %1654 = vrot.lane.b32.xlu0 %v11738_v49, %s5850_s11 }
 0x1e1   : > { %v7442_v4 = vpop.permute.xlu1 %1490  ;;  %v7444_v54 = vpop.permute.xlu0 %1488 }
 0x1e2   : > { %11808 = vst [vmem:[#allocation250_spill] sm:$0xff] %v7442_v4  ;;  %11809 = vst [vmem:[#allocation251_spill] sm:$0xff] %v7444_v54 }
 0x1e3   : > { %1660 = vrot.lane.b32.xlu1 %v11748_v41, %s5850_s11  ;;  %1658 = vrot.lane.b32.xlu0 %v11810_v40, %s5850_s11 }
 0x1e5   : > { %v7450_v20 = vpop.permute.xlu1 %1494  ;;  %v7452_v43 = vpop.permute.xlu0 %1492 }
 0x1e6   : > { %11811 = vst [vmem:[#allocation252_spill] sm:$0xff] %v7450_v20  ;;  %11812 = vst [vmem:[#allocation253_spill] sm:$0xff] %v7452_v43 }
 0x1e7   : > { %1664 = vrot.lane.b32.xlu1 %v11751_v37, %s5850_s11  ;;  %1662 = vrot.lane.b32.xlu0 %v6736_v36, %s5850_s11  ;;  %v1214_v37 = vrot.slane %v7473_v51, 1 }
 0x1e9   : > { %v7458_v4 = vpop.permute.xlu1 %1498  ;;  %v7460_v54 = vpop.permute.xlu0 %1496 }
 0x1ea   : > { %11813 = vst [vmem:[#allocation254_spill] sm:$0xff] %v7458_v4  ;;  %11814 = vst [vmem:[#allocation255_spill] sm:$0xff] %v7460_v54 }
 0x1eb   : > { %1668 = vrot.lane.b32.xlu1 %v6765_v34, %s5850_s11  ;;  %1666 = vrot.lane.b32.xlu0 %v6768_v22, %s5850_s11 }
 0x1ed   : > { %v7467_v20 = vpop.permute.xlu1 %1502  ;;  %v7469_v43 = vpop.permute.xlu0 %1500 }
 0x1ee   : > { %11815 = vst [vmem:[#allocation256_spill] sm:$0xff] %v7467_v20  ;;  %11816 = vst [vmem:[#allocation257_spill] sm:$0xff] %v7469_v43  ;;  %v7487_v20 = vsel %vm803_vm0, %v396_v63, %v11820_v52  ;;  %v11821_v43 = vld [vmem:[#allocation105_spill] sm:$0xff]  ;;  %v11825_v52 = vld [vmem:[#allocation8_spill] sm:$0xff] }
 0x1ef   : > { %1672 = vrot.lane.b32.xlu1 %v7473_v51, %s5850_s11  ;;  %1670 = vrot.lane.b32.xlu0 %v6789_v2, %s5850_s11  ;;  %v7491_v48 = vsel %vm803_vm0, %v397_v15, %v11821_v43  ;;  %v11828_v15 = vld [vmem:[#allocation12_spill] sm:$0xff]  ;;  %v11832_v2 = vld [vmem:[#allocation14_spill] sm:$0xff] }
 0x1f1   : > { %v7481_v54 = vpop.permute.xlu1 %1506  ;;  %v7483_v4 = vpop.permute.xlu0 %1504 }
 0x1f2   : > { %11818 = vst [vmem:[#allocation101_spill] sm:$0xff] %v7481_v54  ;;  %11819 = vst [vmem:[#allocation258_spill] sm:$0xff] %v7483_v4  ;;  %v11824_v4 = vld [vmem:[#allocation10_spill] sm:$0xff]  ;;  %v11829_v54 = vld [vmem:[#allocation9_spill] sm:$0xff] }
 0x1f3   : > { %1676 = vrot.lane.b32.xlu1 %v7491_v48, %s5850_s11  ;;  %1674 = vrot.lane.b32.xlu0 %v7487_v20, %s5850_s11 }
 0x1f5   : > { %v7497_v62 = vpop.permute.xlu1 %1510  ;;  %v7499_v34 = vpop.permute.xlu0 %1508 }
 0x1f6   : > { %11822 = vst [vmem:[#allocation100_spill] sm:$0xff] %v7497_v62  ;;  %11823 = vst [vmem:[#allocation105_spill] sm:$0xff] %v7499_v34 }
 0x1f7   : > { %1734 = vrot.lane.b32.xlu1 %v11824_v4, %s5851_s12  ;;  %1732 = vrot.lane.b32.xlu0 %v11825_v52, %s5851_s12  ;;  %v11833_v4 = vld [vmem:[#allocation11_spill] sm:$0xff] }
 0x1f9   : > { %v7505_v63 = vpop.permute.xlu1 %1514  ;;  %v7507_v43 = vpop.permute.xlu0 %1512 }
 0x1fa   : > { %11826 = vst [vmem:[#allocation10_spill] sm:$0xff] %v7505_v63  ;;  %11827 = vst [vmem:[#allocation8_spill] sm:$0xff] %v7507_v43  ;;  %v11836_v43 = vld [vmem:[#allocation16_spill] sm:$0xff] }
 0x1fb   : > { %1738 = vrot.lane.b32.xlu1 %v11828_v15, %s5851_s12  ;;  %1736 = vrot.lane.b32.xlu0 %v11829_v54, %s5851_s12  ;;  %v11837_v15 = vld [vmem:[#allocation13_spill] sm:$0xff] }
 0x1fd   : > { %v7513_v62 = vpop.permute.xlu1 %1572  ;;  %v7515_v34 = vpop.permute.xlu0 %1570 }
 0x1fe   : > { %11830 = vst [vmem:[#allocation9_spill] sm:$0xff] %v7513_v62  ;;  %11831 = vst [vmem:[#allocation259_spill] sm:$0xff] %v7515_v34  ;;  %v11840_v34 = vld [vmem:[#allocation19_spill] sm:$0xff] }
 0x1ff   : > { %1742 = vrot.lane.b32.xlu1 %v11832_v2, %s5851_s12  ;;  %1740 = vrot.lane.b32.xlu0 %v11833_v4, %s5851_s12  ;;  %v11841_v2 = vld [vmem:[#allocation15_spill] sm:$0xff] }
 0x201   : > { %v7521_v52 = vpop.permute.xlu1 %1576  ;;  %v7523_v63 = vpop.permute.xlu0 %1574 }
 0x202   : > { %11834 = vst [vmem:[#allocation260_spill] sm:$0xff] %v7521_v52  ;;  %11835 = vst [vmem:[#allocation261_spill] sm:$0xff] %v7523_v63  ;;  %v11844_v63 = vld [vmem:[#allocation24_spill] sm:$0xff] }
 0x203   : > { %1746 = vrot.lane.b32.xlu1 %v11836_v43, %s5851_s12  ;;  %1744 = vrot.lane.b32.xlu0 %v11837_v15, %s5851_s12  ;;  %v11845_v43 = vld [vmem:[#allocation18_spill] sm:$0xff] }
 0x205   : > { %v7529_v54 = vpop.permute.xlu1 %1580  ;;  %v7531_v62 = vpop.permute.xlu0 %1578 }
 0x206   : > { %11838 = vst [vmem:[#allocation262_spill] sm:$0xff] %v7529_v54  ;;  %11839 = vst [vmem:[#allocation263_spill] sm:$0xff] %v7531_v62  ;;  %v11848_v62 = vld [vmem:[#allocation27_spill] sm:$0xff] }
 0x207   : > { %1750 = vrot.lane.b32.xlu1 %v11840_v34, %s5851_s12  ;;  %1748 = vrot.lane.b32.xlu0 %v11841_v2, %s5851_s12  ;;  %v11849_v34 = vld [vmem:[#allocation23_spill] sm:$0xff] }
 0x209   : > { %v7537_v4 = vpop.permute.xlu1 %1584  ;;  %v7539_v52 = vpop.permute.xlu0 %1582 }
 0x20a   : > { %11842 = vst [vmem:[#allocation264_spill] sm:$0xff] %v7537_v4  ;;  %11843 = vst [vmem:[#allocation265_spill] sm:$0xff] %v7539_v52  ;;  %v11852_v52 = vld [vmem:[#allocation31_spill] sm:$0xff] }
 0x20b   : > { %1754 = vrot.lane.b32.xlu1 %v11844_v63, %s5851_s12  ;;  %1752 = vrot.lane.b32.xlu0 %v11845_v43, %s5851_s12  ;;  %v11853_v63 = vld [vmem:[#allocation26_spill] sm:$0xff] }
 0x20d   : > { %v7545_v15 = vpop.permute.xlu1 %1588  ;;  %v7547_v54 = vpop.permute.xlu0 %1586 }
 0x20e   : > { %11846 = vst [vmem:[#allocation266_spill] sm:$0xff] %v7545_v15  ;;  %11847 = vst [vmem:[#allocation267_spill] sm:$0xff] %v7547_v54  ;;  %v11856_v54 = vld [vmem:[#allocation34_spill] sm:$0xff] }
 0x20f   : > { %1758 = vrot.lane.b32.xlu1 %v11848_v62, %s5851_s12  ;;  %1756 = vrot.lane.b32.xlu0 %v11849_v34, %s5851_s12  ;;  %v11857_v62 = vld [vmem:[#allocation30_spill] sm:$0xff] }
 0x211   : > { %v7553_v2 = vpop.permute.xlu1 %1592  ;;  %v7555_v4 = vpop.permute.xlu0 %1590 }
 0x212   : > { %11850 = vst [vmem:[#allocation268_spill] sm:$0xff] %v7553_v2  ;;  %11851 = vst [vmem:[#allocation269_spill] sm:$0xff] %v7555_v4  ;;  %v11860_v4 = vld [vmem:[#allocation39_spill] sm:$0xff] }
 0x213   : > { %1762 = vrot.lane.b32.xlu1 %v11852_v52, %s5851_s12  ;;  %1760 = vrot.lane.b32.xlu0 %v11853_v63, %s5851_s12  ;;  %v11861_v52 = vld [vmem:[#allocation33_spill] sm:$0xff] }
 0x215   : > { %v7561_v43 = vpop.permute.xlu1 %1596  ;;  %v7563_v15 = vpop.permute.xlu0 %1594 }
 0x216   : > { %11854 = vst [vmem:[#allocation270_spill] sm:$0xff] %v7561_v43  ;;  %11855 = vst [vmem:[#allocation271_spill] sm:$0xff] %v7563_v15  ;;  %v11864_v15 = vld [vmem:[#allocation43_spill] sm:$0xff] }
 0x217   : > { %1766 = vrot.lane.b32.xlu1 %v11856_v54, %s5851_s12  ;;  %1764 = vrot.lane.b32.xlu0 %v11857_v62, %s5851_s12  ;;  %v11865_v54 = vld [vmem:[#allocation38_spill] sm:$0xff] }
 0x219   : > { %v7569_v34 = vpop.permute.xlu1 %1600  ;;  %v7571_v2 = vpop.permute.xlu0 %1598 }
 0x21a   : > { %11858 = vst [vmem:[#allocation272_spill] sm:$0xff] %v7569_v34  ;;  %11859 = vst [vmem:[#allocation273_spill] sm:$0xff] %v7571_v2  ;;  %v11868_v2 = vld [vmem:[#allocation49_spill] sm:$0xff] }
 0x21b   : > { %1770 = vrot.lane.b32.xlu1 %v11860_v4, %s5851_s12  ;;  %1768 = vrot.lane.b32.xlu0 %v11861_v52, %s5851_s12  ;;  %v11869_v4 = vld [vmem:[#allocation42_spill] sm:$0xff] }
 0x21d   : > { %v7577_v63 = vpop.permute.xlu1 %1604  ;;  %v7579_v43 = vpop.permute.xlu0 %1602 }
 0x21e   : > { %11862 = vst [vmem:[#allocation274_spill] sm:$0xff] %v7577_v63  ;;  %11863 = vst [vmem:[#allocation275_spill] sm:$0xff] %v7579_v43  ;;  %v11872_v43 = vld [vmem:[#allocation52_spill] sm:$0xff] }
 0x21f   : > { %1774 = vrot.lane.b32.xlu1 %v11864_v15, %s5851_s12  ;;  %1772 = vrot.lane.b32.xlu0 %v11865_v54, %s5851_s12  ;;  %v11873_v15 = vld [vmem:[#allocation48_spill] sm:$0xff] }
 0x221   : > { %v7585_v62 = vpop.permute.xlu1 %1608  ;;  %v7587_v34 = vpop.permute.xlu0 %1606 }
 0x222   : > { %11866 = vst [vmem:[#allocation276_spill] sm:$0xff] %v7585_v62  ;;  %11867 = vst [vmem:[#allocation277_spill] sm:$0xff] %v7587_v34  ;;  %v11876_v34 = vld [vmem:[#allocation58_spill] sm:$0xff] }
 0x223   : > { %1778 = vrot.lane.b32.xlu1 %v11868_v2, %s5851_s12  ;;  %1776 = vrot.lane.b32.xlu0 %v11869_v4, %s5851_s12  ;;  %v11877_v2 = vld [vmem:[#allocation51_spill] sm:$0xff] }
 0x225   : > { %v7593_v52 = vpop.permute.xlu1 %1612  ;;  %v7595_v63 = vpop.permute.xlu0 %1610 }
 0x226   : > { %11870 = vst [vmem:[#allocation278_spill] sm:$0xff] %v7593_v52  ;;  %11871 = vst [vmem:[#allocation279_spill] sm:$0xff] %v7595_v63  ;;  %v11880_v63 = vld [vmem:[#allocation61_spill] sm:$0xff] }
 0x227   : > { %1782 = vrot.lane.b32.xlu1 %v11872_v43, %s5851_s12  ;;  %1780 = vrot.lane.b32.xlu0 %v11873_v15, %s5851_s12  ;;  %v11881_v43 = vld [vmem:[#allocation57_spill] sm:$0xff] }
 0x229   : > { %v7601_v54 = vpop.permute.xlu1 %1616  ;;  %v7603_v62 = vpop.permute.xlu0 %1614 }
 0x22a   : > { %11874 = vst [vmem:[#allocation280_spill] sm:$0xff] %v7601_v54  ;;  %11875 = vst [vmem:[#allocation281_spill] sm:$0xff] %v7603_v62  ;;  %v11884_v62 = vld [vmem:[#allocation67_spill] sm:$0xff] }
 0x22b   : > { %1786 = vrot.lane.b32.xlu1 %v11876_v34, %s5851_s12  ;;  %1784 = vrot.lane.b32.xlu0 %v11877_v2, %s5851_s12  ;;  %v11885_v34 = vld [vmem:[#allocation60_spill] sm:$0xff] }
 0x22d   : > { %v7609_v4 = vpop.permute.xlu1 %1620  ;;  %v7611_v52 = vpop.permute.xlu0 %1618 }
 0x22e   : > { %11878 = vst [vmem:[#allocation282_spill] sm:$0xff] %v7609_v4  ;;  %11879 = vst [vmem:[#allocation283_spill] sm:$0xff] %v7611_v52  ;;  %v11888_v52 = vld [vmem:[#allocation71_spill] sm:$0xff] }
 0x22f   : > { %1790 = vrot.lane.b32.xlu1 %v11880_v63, %s5851_s12  ;;  %1788 = vrot.lane.b32.xlu0 %v11881_v43, %s5851_s12  ;;  %v11889_v63 = vld [vmem:[#allocation66_spill] sm:$0xff] }
 0x231   : > { %v7617_v15 = vpop.permute.xlu1 %1624  ;;  %v7619_v54 = vpop.permute.xlu0 %1622 }
 0x232   : > { %11882 = vst [vmem:[#allocation284_spill] sm:$0xff] %v7617_v15  ;;  %11883 = vst [vmem:[#allocation285_spill] sm:$0xff] %v7619_v54  ;;  %v11892_v54 = vld [vmem:[#allocation77_spill] sm:$0xff] }
 0x233   : > { %1794 = vrot.lane.b32.xlu1 %v11884_v62, %s5851_s12  ;;  %1792 = vrot.lane.b32.xlu0 %v11885_v34, %s5851_s12  ;;  %v11893_v62 = vld [vmem:[#allocation70_spill] sm:$0xff] }
 0x235   : > { %v7625_v2 = vpop.permute.xlu1 %1628  ;;  %v7627_v4 = vpop.permute.xlu0 %1626 }
 0x236   : > { %11886 = vst [vmem:[#allocation286_spill] sm:$0xff] %v7625_v2  ;;  %11887 = vst [vmem:[#allocation287_spill] sm:$0xff] %v7627_v4  ;;  %v11896_v4 = vld [vmem:[#allocation80_spill] sm:$0xff] }
 0x237   : > { %1798 = vrot.lane.b32.xlu1 %v11888_v52, %s5851_s12  ;;  %1796 = vrot.lane.b32.xlu0 %v11889_v63, %s5851_s12  ;;  %v11897_v52 = vld [vmem:[#allocation76_spill] sm:$0xff] }
 0x239   : > { %v7633_v43 = vpop.permute.xlu1 %1632  ;;  %v7635_v15 = vpop.permute.xlu0 %1630 }
 0x23a   : > { %11890 = vst [vmem:[#allocation288_spill] sm:$0xff] %v7633_v43  ;;  %11891 = vst [vmem:[#allocation289_spill] sm:$0xff] %v7635_v15  ;;  %v11900_v15 = vld [vmem:[#allocation85_spill] sm:$0xff] }
 0x23b   : > { %1802 = vrot.lane.b32.xlu1 %v11892_v54, %s5851_s12  ;;  %1800 = vrot.lane.b32.xlu0 %v11893_v62, %s5851_s12  ;;  %v11901_v54 = vld [vmem:[#allocation79_spill] sm:$0xff] }
 0x23d   : > { %v7641_v34 = vpop.permute.xlu1 %1636  ;;  %v7643_v2 = vpop.permute.xlu0 %1634 }
 0x23e   : > { %11894 = vst [vmem:[#allocation290_spill] sm:$0xff] %v7641_v34  ;;  %11895 = vst [vmem:[#allocation291_spill] sm:$0xff] %v7643_v2  ;;  %v11904_v34 = vld [vmem:[#allocation89_spill] sm:$0xff] }
 0x23f   : > { %1806 = vrot.lane.b32.xlu1 %v11896_v4, %s5851_s12  ;;  %1804 = vrot.lane.b32.xlu0 %v11897_v52, %s5851_s12  ;;  %v11905_v4 = vld [vmem:[#allocation84_spill] sm:$0xff] }
 0x241   : > { %v7649_v63 = vpop.permute.xlu1 %1640  ;;  %v7651_v43 = vpop.permute.xlu0 %1638 }
 0x242   : > { %11898 = vst [vmem:[#allocation292_spill] sm:$0xff] %v7649_v63  ;;  %11899 = vst [vmem:[#allocation293_spill] sm:$0xff] %v7651_v43 }
 0x243   : > { %1810 = vrot.lane.b32.xlu1 %v11900_v15, %s5851_s12  ;;  %1808 = vrot.lane.b32.xlu0 %v11901_v54, %s5851_s12  ;;  %v11908_v15 = vld [vmem:[#allocation94_spill] sm:$0xff]  ;;  %v11909_v54 = vld [vmem:[#allocation88_spill] sm:$0xff] }
 0x245   : > { %v7657_v62 = vpop.permute.xlu1 %1644  ;;  %v7659_v2 = vpop.permute.xlu0 %1642 }
 0x246   : > { %11902 = vst [vmem:[#allocation294_spill] sm:$0xff] %v7657_v62  ;;  %11903 = vst [vmem:[#allocation295_spill] sm:$0xff] %v7659_v2  ;;  %v11912_v2 = vld [vmem:[#allocation97_spill] sm:$0xff] }
 0x247   : > { %1814 = vrot.lane.b32.xlu1 %v11904_v34, %s5851_s12  ;;  %1812 = vrot.lane.b32.xlu0 %v11905_v4, %s5851_s12  ;;  %v11913_v34 = vld [vmem:[#allocation93_spill] sm:$0xff] }
 0x249   : > { %v7665_v63 = vpop.permute.xlu1 %1648  ;;  %v7667_v43 = vpop.permute.xlu0 %1646 }
 0x24a   : > { %11906 = vst [vmem:[#allocation296_spill] sm:$0xff] %v7665_v63  ;;  %11907 = vst [vmem:[#allocation297_spill] sm:$0xff] %v7667_v43  ;;  %v11916_v43 = vld [vmem:[#allocation103_spill] sm:$0xff] }
 0x24b   : > { %1818 = vrot.lane.b32.xlu1 %v11908_v15, %s5851_s12  ;;  %1816 = vrot.lane.b32.xlu0 %v11909_v54, %s5851_s12  ;;  %v11917_v15 = vld [vmem:[#allocation98_spill] sm:$0xff]  ;;  %v398_v54 = vld [vmem:[%s6110_s8 + $0x258] sm:$0x3] }
 0x24d   : > { %v7673_v62 = vpop.permute.xlu1 %1652  ;;  %v7675_v52 = vpop.permute.xlu0 %1650 }
 0x24e   : > { %11910 = vst [vmem:[#allocation298_spill] sm:$0xff] %v7673_v62  ;;  %11911 = vst [vmem:[#allocation299_spill] sm:$0xff] %v7675_v52 }
 0x24f   : > { %1822 = vrot.lane.b32.xlu1 %v11912_v2, %s5851_s12  ;;  %1820 = vrot.lane.b32.xlu0 %v11913_v34, %s5851_s12  ;;  %v1215_v2 = vrot.slane %v7487_v20, 1  ;;  %v11920_v34 = vld [vmem:[#allocation104_spill] sm:$0xff] }
 0x251   : > { %v7681_v4 = vpop.permute.xlu1 %1656  ;;  %v7683_v63 = vpop.permute.xlu0 %1654  ;;  %v7711_v41 = vsel %vm956_vm1, %v1214_v37, %v1215_v2 }
 0x252   : > { %11914 = vst [vmem:[#allocation300_spill] sm:$0xff] %v7681_v4  ;;  %11915 = vst [vmem:[#allocation301_spill] sm:$0xff] %v7683_v63  ;;  %v7698_v4 = vsel %vm803_vm0, %v398_v54, %v11920_v34  ;;  %v11921_v63 = vld [vmem:[#allocation107_spill] sm:$0xff]  ;;  %v11926_v34 = vld [vmem:[#allocation106_spill] sm:$0xff] }
 0x253   : > { %1826 = vrot.lane.b32.xlu1 %v11916_v43, %s5851_s12  ;;  %1824 = vrot.lane.b32.xlu0 %v11917_v15, %s5851_s12  ;;  %v11922_v43 = vld [vmem:[#allocation102_spill] sm:$0xff]  ;;  %11925 = vst [vmem:[#allocation305_spill] sm:$0xff] %v7711_v41 }
 0x255   : > { %v7690_v62 = vpop.permute.xlu1 %1660  ;;  %v7692_v52 = vpop.permute.xlu0 %1658 }
 0x256   : > { %11918 = vst [vmem:[#allocation302_spill] sm:$0xff] %v7690_v62  ;;  %11919 = vst [vmem:[#allocation303_spill] sm:$0xff] %v7692_v52  ;;  %v1219_v52 = vrot.slane %v7698_v4, 1  ;;  %v1217_v62 = vrot.slane %v7491_v48, 1 }
 0x257   : > { %1830 = vrot.lane.b32.xlu1 %v11921_v63, %s5851_s12  ;;  %1828 = vrot.lane.b32.xlu0 %v11922_v43, %s5851_s12 }
 0x259   : > { %v7704_v15 = vpop.permute.xlu1 %1664  ;;  %v7706_v22 = vpop.permute.xlu0 %1662 }
 0x25a   : > { %11923 = vst [vmem:[#allocation104_spill] sm:$0xff] %v7704_v15  ;;  %11924 = vst [vmem:[#allocation304_spill] sm:$0xff] %v7706_v22  ;;  %v7722_v15 = vsel %vm956_vm1, %v1217_v62, %v1219_v52  ;;  %v7725_v22 = vsel %vm956_vm1, %v1215_v2, %v1217_v62  ;;  %v11934_v52 = vld [vmem:[#allocation112_spill] sm:$0xff]  ;;  %v11937_v62 = vld [vmem:[#allocation119_spill] sm:$0xff] }
 0x25b   : > { %1834 = vrot.lane.b32.xlu1 %v7711_v41, %s5851_s12  ;;  %1832 = vrot.lane.b32.xlu0 %v11926_v34, %s5851_s12  ;;  %11929 = vst [vmem:[#allocation308_spill] sm:$0xff] %v7722_v15  ;;  %11930 = vst [vmem:[#allocation309_spill] sm:$0xff] %v7725_v22  ;;  %v11946_v34 = vld [vmem:[#allocation123_spill] sm:$0xff] }
 0x25d   : > { %v7717_v54 = vpop.permute.xlu1 %1668  ;;  %v7719_v63 = vpop.permute.xlu0 %1666 }
 0x25e   : > { %11927 = vst [vmem:[#allocation306_spill] sm:$0xff] %v7717_v54  ;;  %11928 = vst [vmem:[#allocation307_spill] sm:$0xff] %v7719_v63  ;;  %v11933_v54 = vld [vmem:[#allocation116_spill] sm:$0xff] }
 0x25f   : > { %1838 = vrot.lane.b32.xlu1 %v7722_v15, %s5851_s12  ;;  %1836 = vrot.lane.b32.xlu0 %v7725_v22, %s5851_s12  ;;  %v11938_v15 = vld [vmem:[#allocation115_spill] sm:$0xff]  ;;  %v11941_v22 = vld [vmem:[#allocation124_spill] sm:$0xff] }
 0x261   : > { %v7731_v37 = vpop.permute.xlu1 %1672  ;;  %v7733_v41 = vpop.permute.xlu0 %1670 }
 0x262   : > { %11931 = vst [vmem:[#allocation310_spill] sm:$0xff] %v7731_v37  ;;  %11932 = vst [vmem:[#allocation311_spill] sm:$0xff] %v7733_v41 }
 0x263   : > { %1896 = vrot.lane.b32.xlu1 %v11933_v54, %s5852_s13  ;;  %1894 = vrot.lane.b32.xlu0 %v11934_v52, %s5852_s13  ;;  %v11942_v54 = vld [vmem:[#allocation120_spill] sm:$0xff] }
 0x265   : > { %v7739_v63 = vpop.permute.xlu1 %1676  ;;  %v7741_v2 = vpop.permute.xlu0 %1674 }
 0x266   : > { %11935 = vst [vmem:[#allocation116_spill] sm:$0xff] %v7739_v63  ;;  %11936 = vst [vmem:[#allocation112_spill] sm:$0xff] %v7741_v2  ;;  %v11945_v2 = vld [vmem:[#allocation128_spill] sm:$0xff] }
 0x267   : > { %1900 = vrot.lane.b32.xlu1 %v11937_v62, %s5852_s13  ;;  %1898 = vrot.lane.b32.xlu0 %v11938_v15, %s5852_s13 }
 0x269   : > { %v7747_v37 = vpop.permute.xlu1 %1734  ;;  %v7749_v41 = vpop.permute.xlu0 %1732 }
 0x26a   : > { %11939 = vst [vmem:[#allocation119_spill] sm:$0xff] %v7747_v37  ;;  %11940 = vst [vmem:[#allocation115_spill] sm:$0xff] %v7749_v41  ;;  %v11949_v37 = vld [vmem:[#allocation131_spill] sm:$0xff] }
 0x26b   : > { %1904 = vrot.lane.b32.xlu1 %v11941_v22, %s5852_s13  ;;  %1902 = vrot.lane.b32.xlu0 %v11942_v54, %s5852_s13  ;;  %v11950_v41 = vld [vmem:[#allocation127_spill] sm:$0xff] }
 0x26d   : > { %v7755_v52 = vpop.permute.xlu1 %1738  ;;  %v7757_v63 = vpop.permute.xlu0 %1736 }
 0x26e   : > { %11943 = vst [vmem:[#allocation124_spill] sm:$0xff] %v7755_v52  ;;  %11944 = vst [vmem:[#allocation312_spill] sm:$0xff] %v7757_v63  ;;  %v11953_v63 = vld [vmem:[#allocation136_spill] sm:$0xff] }
 0x26f   : > { %1908 = vrot.lane.b32.xlu1 %v11945_v2, %s5852_s13  ;;  %1906 = vrot.lane.b32.xlu0 %v11946_v34, %s5852_s13  ;;  %v11954_v2 = vld [vmem:[#allocation132_spill] sm:$0xff] }
 0x271   : > { %v7763_v15 = vpop.permute.xlu1 %1742  ;;  %v7765_v43 = vpop.permute.xlu0 %1740 }
 0x272   : > { %11947 = vst [vmem:[#allocation313_spill] sm:$0xff] %v7763_v15  ;;  %11948 = vst [vmem:[#allocation314_spill] sm:$0xff] %v7765_v43  ;;  %v11957_v43 = vld [vmem:[#allocation140_spill] sm:$0xff] }
 0x273   : > { %1912 = vrot.lane.b32.xlu1 %v11949_v37, %s5852_s13  ;;  %1910 = vrot.lane.b32.xlu0 %v11950_v41, %s5852_s13  ;;  %v11958_v37 = vld [vmem:[#allocation135_spill] sm:$0xff] }
 0x275   : > { %v7771_v54 = vpop.permute.xlu1 %1746  ;;  %v7773_v52 = vpop.permute.xlu0 %1744 }
 0x276   : > { %11951 = vst [vmem:[#allocation315_spill] sm:$0xff] %v7771_v54  ;;  %11952 = vst [vmem:[#allocation316_spill] sm:$0xff] %v7773_v52  ;;  %v11961_v52 = vld [vmem:[#allocation143_spill] sm:$0xff] }
 0x277   : > { %1916 = vrot.lane.b32.xlu1 %v11953_v63, %s5852_s13  ;;  %1914 = vrot.lane.b32.xlu0 %v11954_v2, %s5852_s13  ;;  %v11962_v63 = vld [vmem:[#allocation139_spill] sm:$0xff] }
 0x279   : > { %v7779_v34 = vpop.permute.xlu1 %1750  ;;  %v7781_v15 = vpop.permute.xlu0 %1748 }
 0x27a   : > { %11955 = vst [vmem:[#allocation317_spill] sm:$0xff] %v7779_v34  ;;  %11956 = vst [vmem:[#allocation318_spill] sm:$0xff] %v7781_v15  ;;  %v11965_v15 = vld [vmem:[#allocation148_spill] sm:$0xff] }
 0x27b   : > { %1920 = vrot.lane.b32.xlu1 %v11957_v43, %s5852_s13  ;;  %1918 = vrot.lane.b32.xlu0 %v11958_v37, %s5852_s13  ;;  %v11966_v43 = vld [vmem:[#allocation144_spill] sm:$0xff] }
 0x27d   : > { %v7787_v41 = vpop.permute.xlu1 %1754  ;;  %v7789_v54 = vpop.permute.xlu0 %1752 }
 0x27e   : > { %11959 = vst [vmem:[#allocation319_spill] sm:$0xff] %v7787_v41  ;;  %11960 = vst [vmem:[#allocation320_spill] sm:$0xff] %v7789_v54  ;;  %v11969_v54 = vld [vmem:[#allocation152_spill] sm:$0xff] }
 0x27f   : > { %1924 = vrot.lane.b32.xlu1 %v11961_v52, %s5852_s13  ;;  %1922 = vrot.lane.b32.xlu0 %v11962_v63, %s5852_s13  ;;  %v11970_v52 = vld [vmem:[#allocation147_spill] sm:$0xff] }
 0x281   : > { %v7795_v2 = vpop.permute.xlu1 %1758  ;;  %v7797_v34 = vpop.permute.xlu0 %1756 }
 0x282   : > { %11963 = vst [vmem:[#allocation321_spill] sm:$0xff] %v7795_v2  ;;  %11964 = vst [vmem:[#allocation322_spill] sm:$0xff] %v7797_v34  ;;  %v11973_v34 = vld [vmem:[#allocation155_spill] sm:$0xff] }
 0x283   : > { %1928 = vrot.lane.b32.xlu1 %v11965_v15, %s5852_s13  ;;  %1926 = vrot.lane.b32.xlu0 %v11966_v43, %s5852_s13  ;;  %v11974_v15 = vld [vmem:[#allocation151_spill] sm:$0xff] }
 0x285   : > { %v7803_v37 = vpop.permute.xlu1 %1762  ;;  %v7805_v41 = vpop.permute.xlu0 %1760 }
 0x286   : > { %11967 = vst [vmem:[#allocation323_spill] sm:$0xff] %v7803_v37  ;;  %11968 = vst [vmem:[#allocation324_spill] sm:$0xff] %v7805_v41  ;;  %v11977_v41 = vld [vmem:[#allocation159_spill] sm:$0xff] }
 0x287   : > { %1932 = vrot.lane.b32.xlu1 %v11969_v54, %s5852_s13  ;;  %1930 = vrot.lane.b32.xlu0 %v11970_v52, %s5852_s13  ;;  %v11978_v54 = vld [vmem:[#allocation156_spill] sm:$0xff] }
 0x289   : > { %v7811_v63 = vpop.permute.xlu1 %1766  ;;  %v7813_v2 = vpop.permute.xlu0 %1764 }
 0x28a   : > { %11971 = vst [vmem:[#allocation325_spill] sm:$0xff] %v7811_v63  ;;  %11972 = vst [vmem:[#allocation326_spill] sm:$0xff] %v7813_v2  ;;  %v11981_v2 = vld [vmem:[#allocation163_spill] sm:$0xff] }
 0x28b   : > { %1936 = vrot.lane.b32.xlu1 %v11973_v34, %s5852_s13  ;;  %1934 = vrot.lane.b32.xlu0 %v11974_v15, %s5852_s13  ;;  %v11982_v34 = vld [vmem:[#allocation44_spill] sm:$0xff] }
 0x28d   : > { %v7819_v43 = vpop.permute.xlu1 %1770  ;;  %v7821_v37 = vpop.permute.xlu0 %1768 }
 0x28e   : > { %11975 = vst [vmem:[#allocation327_spill] sm:$0xff] %v7819_v43  ;;  %11976 = vst [vmem:[#allocation328_spill] sm:$0xff] %v7821_v37  ;;  %v11985_v37 = vld [vmem:[#allocation166_spill] sm:$0xff] }
 0x28f   : > { %1940 = vrot.lane.b32.xlu1 %v11977_v41, %s5852_s13  ;;  %1938 = vrot.lane.b32.xlu0 %v11978_v54, %s5852_s13  ;;  %v11986_v41 = vld [vmem:[#allocation162_spill] sm:$0xff] }
 0x291   : > { %v7827_v52 = vpop.permute.xlu1 %1774  ;;  %v7829_v63 = vpop.permute.xlu0 %1772 }
 0x292   : > { %11979 = vst [vmem:[#allocation329_spill] sm:$0xff] %v7827_v52  ;;  %11980 = vst [vmem:[#allocation330_spill] sm:$0xff] %v7829_v63  ;;  %v11989_v63 = vld [vmem:[#allocation169_spill] sm:$0xff] }
 0x293   : > { %1944 = vrot.lane.b32.xlu1 %v11981_v2, %s5852_s13  ;;  %1942 = vrot.lane.b32.xlu0 %v11982_v34, %s5852_s13  ;;  %v11990_v2 = vld [vmem:[#allocation53_spill] sm:$0xff] }
 0x295   : > { %v7835_v15 = vpop.permute.xlu1 %1778  ;;  %v7837_v43 = vpop.permute.xlu0 %1776 }
 0x296   : > { %11983 = vst [vmem:[#allocation331_spill] sm:$0xff] %v7835_v15  ;;  %11984 = vst [vmem:[#allocation332_spill] sm:$0xff] %v7837_v43  ;;  %v11993_v43 = vld [vmem:[#allocation173_spill] sm:$0xff] }
 0x297   : > { %1948 = vrot.lane.b32.xlu1 %v11985_v37, %s5852_s13  ;;  %1946 = vrot.lane.b32.xlu0 %v11986_v41, %s5852_s13  ;;  %v11994_v37 = vld [vmem:[#allocation56_spill] sm:$0xff] }
 0x299   : > { %v7843_v54 = vpop.permute.xlu1 %1782  ;;  %v7845_v52 = vpop.permute.xlu0 %1780 }
 0x29a   : > { %11987 = vst [vmem:[#allocation333_spill] sm:$0xff] %v7843_v54  ;;  %11988 = vst [vmem:[#allocation334_spill] sm:$0xff] %v7845_v52  ;;  %v11997_v52 = vld [vmem:[#allocation176_spill] sm:$0xff] }
 0x29b   : > { %1952 = vrot.lane.b32.xlu1 %v11989_v63, %s5852_s13  ;;  %1950 = vrot.lane.b32.xlu0 %v11990_v2, %s5852_s13  ;;  %v11998_v63 = vld [vmem:[#allocation172_spill] sm:$0xff] }
 0x29d   : > { %v7851_v34 = vpop.permute.xlu1 %1786  ;;  %v7853_v15 = vpop.permute.xlu0 %1784 }
 0x29e   : > { %11991 = vst [vmem:[#allocation335_spill] sm:$0xff] %v7851_v34  ;;  %11992 = vst [vmem:[#allocation336_spill] sm:$0xff] %v7853_v15  ;;  %v12001_v15 = vld [vmem:[#allocation179_spill] sm:$0xff] }
 0x29f   : > { %1956 = vrot.lane.b32.xlu1 %v11993_v43, %s5852_s13  ;;  %1954 = vrot.lane.b32.xlu0 %v11994_v37, %s5852_s13  ;;  %v12002_v43 = vld [vmem:[#allocation65_spill] sm:$0xff] }
 0x2a1   : > { %v7859_v41 = vpop.permute.xlu1 %1790  ;;  %v7861_v54 = vpop.permute.xlu0 %1788 }
 0x2a2   : > { %11995 = vst [vmem:[#allocation337_spill] sm:$0xff] %v7859_v41  ;;  %11996 = vst [vmem:[#allocation338_spill] sm:$0xff] %v7861_v54  ;;  %v12005_v54 = vld [vmem:[#allocation183_spill] sm:$0xff] }
 0x2a3   : > { %1960 = vrot.lane.b32.xlu1 %v11997_v52, %s5852_s13  ;;  %1958 = vrot.lane.b32.xlu0 %v11998_v63, %s5852_s13  ;;  %v12006_v52 = vld [vmem:[#allocation72_spill] sm:$0xff] }
 0x2a5   : > { %v7867_v2 = vpop.permute.xlu1 %1794  ;;  %v7869_v34 = vpop.permute.xlu0 %1792 }
 0x2a6   : > { %11999 = vst [vmem:[#allocation339_spill] sm:$0xff] %v7867_v2  ;;  %12000 = vst [vmem:[#allocation340_spill] sm:$0xff] %v7869_v34  ;;  %v12009_v34 = vld [vmem:[#allocation186_spill] sm:$0xff] }
 0x2a7   : > { %1964 = vrot.lane.b32.xlu1 %v12001_v15, %s5852_s13  ;;  %1962 = vrot.lane.b32.xlu0 %v12002_v43, %s5852_s13  ;;  %v12010_v15 = vld [vmem:[#allocation182_spill] sm:$0xff] }
 0x2a9   : > { %v7875_v37 = vpop.permute.xlu1 %1798  ;;  %v7877_v41 = vpop.permute.xlu0 %1796 }
 0x2aa   : > { %12003 = vst [vmem:[#allocation341_spill] sm:$0xff] %v7875_v37  ;;  %12004 = vst [vmem:[#allocation342_spill] sm:$0xff] %v7877_v41  ;;  %v12013_v41 = vld [vmem:[#allocation189_spill] sm:$0xff] }
 0x2ab   : > { %1968 = vrot.lane.b32.xlu1 %v12005_v54, %s5852_s13  ;;  %1966 = vrot.lane.b32.xlu0 %v12006_v52, %s5852_s13  ;;  %v12014_v54 = vld [vmem:[#allocation81_spill] sm:$0xff] }
 0x2ad   : > { %v7883_v63 = vpop.permute.xlu1 %1802  ;;  %v7885_v2 = vpop.permute.xlu0 %1800 }
 0x2ae   : > { %12007 = vst [vmem:[#allocation343_spill] sm:$0xff] %v7883_v63  ;;  %12008 = vst [vmem:[#allocation344_spill] sm:$0xff] %v7885_v2  ;;  %v12017_v2 = vld [vmem:[#allocation86_spill] sm:$0xff] }
 0x2af   : > { %1972 = vrot.lane.b32.xlu1 %v12009_v34, %s5852_s13  ;;  %1970 = vrot.lane.b32.xlu0 %v12010_v15, %s5852_s13 }
 0x2b1   : > { %v7891_v43 = vpop.permute.xlu1 %1806  ;;  %v7893_v37 = vpop.permute.xlu0 %1804 }
 0x2b2   : > { %12011 = vst [vmem:[#allocation182_spill] sm:$0xff] %v7891_v43  ;;  %12012 = vst [vmem:[#allocation345_spill] sm:$0xff] %v7893_v37  ;;  %v12020_v37 = vld [vmem:[#allocation192_spill] sm:$0xff] }
 0x2b3   : > { %1976 = vrot.lane.b32.xlu1 %v12013_v41, %s5852_s13  ;;  %1974 = vrot.lane.b32.xlu0 %v12014_v54, %s5852_s13 }
 0x2b5   : > { %v7899_v52 = vpop.permute.xlu1 %1810  ;;  %v7901_v63 = vpop.permute.xlu0 %1808 }
 0x2b6   : > { %12015 = vst [vmem:[#allocation81_spill] sm:$0xff] %v7899_v52  ;;  %12016 = vst [vmem:[#allocation346_spill] sm:$0xff] %v7901_v63  ;;  %v12023_v63 = vld [vmem:[#allocation197_spill] sm:$0xff] }
 0x2b7   : > { %1980 = vrot.lane.b32.xlu1 %v7212_v33, %s5852_s13  ;;  %1978 = vrot.lane.b32.xlu0 %v12017_v2, %s5852_s13 }
 0x2b9   : > { %v7907_v34 = vpop.permute.xlu1 %1814  ;;  %v7909_v43 = vpop.permute.xlu0 %1812 }
 0x2ba   : > { %12018 = vst [vmem:[#allocation86_spill] sm:$0xff] %v7907_v34  ;;  %12019 = vst [vmem:[#allocation347_spill] sm:$0xff] %v7909_v43  ;;  %v1222_v43 = vrot.slane %v7487_v20, 2 }
 0x2bb   : > { %1984 = vrot.lane.b32.xlu1 %v7224_v13, %s5852_s13  ;;  %1982 = vrot.lane.b32.xlu0 %v12020_v37, %s5852_s13  ;;  %v1221_v13 = vrot.slane %v7473_v51, 2 }
 0x2bd   : > { %v7915_v41 = vpop.permute.xlu1 %1818  ;;  %v7917_v52 = vpop.permute.xlu0 %1816 }
 0x2be   : > { %12021 = vst [vmem:[#allocation192_spill] sm:$0xff] %v7915_v41  ;;  %12022 = vst [vmem:[#allocation348_spill] sm:$0xff] %v7917_v52 }
 0x2bf   : > { %1988 = vrot.lane.b32.xlu1 %v7245_v19, %s5852_s13  ;;  %1986 = vrot.lane.b32.xlu0 %v12023_v63, %s5852_s13  ;;  %v1226_v19 = vrot.slane %v7698_v4, 2 }
 0x2c1   : > { %v7923_v33 = vpop.permute.xlu1 %1822  ;;  %v7925_v34 = vpop.permute.xlu0 %1820 }
 0x2c2   : > { %12024 = vst [vmem:[#allocation349_spill] sm:$0xff] %v7923_v33  ;;  %12025 = vst [vmem:[#allocation350_spill] sm:$0xff] %v7925_v34  ;;  %v1224_v33 = vrot.slane %v7491_v48, 2  ;;  %v7940_v34 = vsel %vm1083_vm2, %v1221_v13, %v1222_v43 }
 0x2c3   : > { %1992 = vrot.lane.b32.xlu1 %v7260_v25, %s5852_s13  ;;  %1990 = vrot.lane.b32.xlu0 %v7242_v5, %s5852_s13  ;;  %12028 = vst [vmem:[#allocation353_spill] sm:$0xff] %v7940_v34 }
 0x2c4   : > { %v7954_v4 = vsel %vm1083_vm2, %v1222_v43, %v1224_v33 }
 0x2c5   : > { %v7933_v52 = vpop.permute.xlu1 %1826  ;;  %v7935_v41 = vpop.permute.xlu0 %1824  ;;  %12032 = vst [vmem:[#allocation357_spill] sm:$0xff] %v7954_v4 }
 0x2c6   : > { %12026 = vst [vmem:[#allocation351_spill] sm:$0xff] %v7933_v52  ;;  %12027 = vst [vmem:[#allocation352_spill] sm:$0xff] %v7935_v41  ;;  %v7951_v52 = vsel %vm1083_vm2, %v1224_v33, %v1226_v19 }
 0x2c7   : > { %1996 = vrot.lane.b32.xlu1 %v7940_v34, %s5852_s13  ;;  %1994 = vrot.lane.b32.xlu0 %v7257_v42, %s5852_s13  ;;  %12031 = vst [vmem:[#allocation356_spill] sm:$0xff] %v7951_v52 }
 0x2c9   : > { %v7946_v25 = vpop.permute.xlu1 %1830  ;;  %v7948_v5 = vpop.permute.xlu0 %1828 }
 0x2ca   : > { %12029 = vst [vmem:[#allocation354_spill] sm:$0xff] %v7946_v25  ;;  %12030 = vst [vmem:[#allocation355_spill] sm:$0xff] %v7948_v5 }
 0x2cb   : > { %2000 = vrot.lane.b32.xlu1 %v7951_v52, %s5852_s13  ;;  %1998 = vrot.lane.b32.xlu0 %v7954_v4, %s5852_s13 }
 0x2cd   : > { %v7960_v13 = vpop.permute.xlu1 %1834  ;;  %v7962_v41 = vpop.permute.xlu0 %1832 }
 0x2ce   : > { %12033 = vst [vmem:[#allocation358_spill] sm:$0xff] %v7960_v13  ;;  %12034 = vst [vmem:[#allocation359_spill] sm:$0xff] %v7962_v41 }
 0x2cf   : > { %2058 = vrot.lane.b32.xlu1 %v6194_v7, %s5853_s14  ;;  %2056 = vrot.lane.b32.xlu0 %v6198_v8, %s5853_s14 }
 0x2d1   : > { %v7968_v19 = vpop.permute.xlu1 %1838  ;;  %v7970_v33 = vpop.permute.xlu0 %1836 }
 0x2d2   : > { %12035 = vst [vmem:[#allocation360_spill] sm:$0xff] %v7968_v19  ;;  %12036 = vst [vmem:[#allocation361_spill] sm:$0xff] %v7970_v33 }
 0x2d3   : > { %2062 = vrot.lane.b32.xlu1 %v6236_v30, %s5853_s14  ;;  %2060 = vrot.lane.b32.xlu0 %v6207_v14, %s5853_s14 }
 0x2d5   : > { %v7976_v43 = vpop.permute.xlu1 %1896  ;;  %v7978_v41 = vpop.permute.xlu0 %1894 }
 0x2d7   : > { %2066 = vrot.lane.b32.xlu1 %v6265_v45, %s5853_s14  ;;  %2064 = vrot.lane.b32.xlu0 %v6232_v27, %s5853_s14 }
 0x2d9   : > { %v7984_v13 = vpop.permute.xlu1 %1900  ;;  %v7986_v19 = vpop.permute.xlu0 %1898 }
 0x2db   : > { %2070 = vrot.lane.b32.xlu1 %v6286_v58, %s5853_s14  ;;  %2068 = vrot.lane.b32.xlu0 %v6290_v59, %s5853_s14 }
 0x2dd   : > { %v7992_v33 = vpop.permute.xlu1 %1904  ;;  %v7994_v5 = vpop.permute.xlu0 %1902 }
 0x2df   : > { %2074 = vrot.lane.b32.xlu1 %v6327_v17, %s5853_s14  ;;  %2072 = vrot.lane.b32.xlu0 %v6294_v60, %s5853_s14 }
 0x2e1   : > { %v8000_v25 = vpop.permute.xlu1 %1908  ;;  %v8002_v52 = vpop.permute.xlu0 %1906 }
 0x2e3   : > { %2078 = vrot.lane.b32.xlu1 %v6350_v21, %s5853_s14  ;;  %2076 = vrot.lane.b32.xlu0 %v6323_v18, %s5853_s14 }
 0x2e5   : > { %v8008_v34 = vpop.permute.xlu1 %1912  ;;  %v8010_v4 = vpop.permute.xlu0 %1910 }
 0x2e7   : > { %2082 = vrot.lane.b32.xlu1 %v6369_v28, %s5853_s14  ;;  %2080 = vrot.lane.b32.xlu0 %v6373_v1, %s5853_s14 }
 0x2e9   : > { %v8016_v42 = vpop.permute.xlu1 %1916  ;;  %v8018_v63 = vpop.permute.xlu0 %1914 }
 0x2eb   : > { %2086 = vrot.lane.b32.xlu1 %v6410_v56, %s5853_s14  ;;  %2084 = vrot.lane.b32.xlu0 %v6384_v31, %s5853_s14 }
 0x2ed   : > { %v8024_v18 = vpop.permute.xlu1 %1920  ;;  %v8026_v21 = vpop.permute.xlu0 %1918 }
 0x2ee   : > { %12037 = vst [vmem:[#allocation362_spill] sm:$0xff] %v8024_v18  ;;  %12038 = vst [vmem:[#allocation363_spill] sm:$0xff] %v8026_v21 }
 0x2ef   : > { %2090 = vrot.lane.b32.xlu1 %v6435_v3, %s5853_s14  ;;  %2088 = vrot.lane.b32.xlu0 %v6406_v50, %s5853_s14 }
 0x2f1   : > { %v8032_v28 = vpop.permute.xlu1 %1924  ;;  %v8034_v1 = vpop.permute.xlu0 %1922 }
 0x2f2   : > { %12039 = vst [vmem:[#allocation364_spill] sm:$0xff] %v8032_v28  ;;  %12040 = vst [vmem:[#allocation365_spill] sm:$0xff] %v8034_v1  ;;  %v12207_v28 = vld [vmem:[#allocation84_spill] sm:$0xff]  ;;  %v12218_v1 = vld [vmem:[#allocation211_spill] sm:$0xff] }
 0x2f3   : > { %2094 = vrot.lane.b32.xlu1 %v6452_v35, %s5853_s14  ;;  %2092 = vrot.lane.b32.xlu0 %v6456_v12, %s5853_s14 }
 0x2f5   : > { %v8040_v31 = vpop.permute.xlu1 %1928  ;;  %v8042_v56 = vpop.permute.xlu0 %1926 }
 0x2f6   : > { %12041 = vst [vmem:[#allocation366_spill] sm:$0xff] %v8040_v31  ;;  %12042 = vst [vmem:[#allocation367_spill] sm:$0xff] %v8042_v56 }
 0x2f7   : > { %2098 = vrot.lane.b32.xlu1 %v11686_v39, %s5853_s14  ;;  %2096 = vrot.lane.b32.xlu0 %v6459_v23, %s5853_s14 }
 0x2f9   : > { %v8048_v50 = vpop.permute.xlu1 %1932  ;;  %v8050_v3 = vpop.permute.xlu0 %1930 }
 0x2fa   : > { %12043 = vst [vmem:[#allocation368_spill] sm:$0xff] %v8048_v50  ;;  %12044 = vst [vmem:[#allocation369_spill] sm:$0xff] %v8050_v3  ;;  %v12197_v3 = vld [vmem:[#allocation72_spill] sm:$0xff] }
 0x2fb   : > { %2102 = vrot.lane.b32.xlu1 %v6507_v53, %s5853_s14  ;;  %2100 = vrot.lane.b32.xlu0 %v11687_v9, %s5853_s14 }
 0x2fd   : > { %v8056_v12 = vpop.permute.xlu1 %1936  ;;  %v8058_v35 = vpop.permute.xlu0 %1934 }
 0x2fe   : > { %12045 = vst [vmem:[#allocation370_spill] sm:$0xff] %v8056_v12  ;;  %12046 = vst [vmem:[#allocation371_spill] sm:$0xff] %v8058_v35  ;;  %v12123_v35 = vld [vmem:[#allocation128_spill] sm:$0xff] }
 0x2ff   : > { %2106 = vrot.lane.b32.xlu1 %v6521_v46, %s5853_s14  ;;  %2104 = vrot.lane.b32.xlu0 %v6524_v10, %s5853_s14 }
 0x301   : > { %v8064_v23 = vpop.permute.xlu1 %1940  ;;  %v8066_v39 = vpop.permute.xlu0 %1938 }
 0x302   : > { %12047 = vst [vmem:[#allocation372_spill] sm:$0xff] %v8064_v23  ;;  %12048 = vst [vmem:[#allocation373_spill] sm:$0xff] %v8066_v39  ;;  %v12113_v39 = vld [vmem:[#allocation42_spill] sm:$0xff]  ;;  %v12117_v23 = vld [vmem:[#allocation49_spill] sm:$0xff] }
 0x303   : > { %2110 = vrot.lane.b32.xlu1 %v6557_v29, %s5853_s14  ;;  %2108 = vrot.lane.b32.xlu0 %v11697_v61, %s5853_s14 }
 0x305   : > { %v8072_v9 = vpop.permute.xlu1 %1944  ;;  %v8074_v53 = vpop.permute.xlu0 %1942 }
 0x306   : > { %12049 = vst [vmem:[#allocation374_spill] sm:$0xff] %v8072_v9  ;;  %12050 = vst [vmem:[#allocation375_spill] sm:$0xff] %v8074_v53  ;;  %v12109_v53 = vld [vmem:[#allocation38_spill] sm:$0xff]  ;;  %v12110_v9 = vld [vmem:[#allocation39_spill] sm:$0xff] }
 0x307   : > { %2114 = vrot.lane.b32.xlu1 %v11709_v24, %s5853_s14  ;;  %2112 = vrot.lane.b32.xlu0 %v11703_v26, %s5853_s14 }
 0x309   : > { %v8080_v10 = vpop.permute.xlu1 %1948  ;;  %v8082_v46 = vpop.permute.xlu0 %1946 }
 0x30a   : > { %12051 = vst [vmem:[#allocation376_spill] sm:$0xff] %v8080_v10  ;;  %12052 = vst [vmem:[#allocation377_spill] sm:$0xff] %v8082_v46 }
 0x30b   : > { %2118 = vrot.lane.b32.xlu1 %v11712_v57, %s5853_s14  ;;  %2116 = vrot.lane.b32.xlu0 %v11713_v47, %s5853_s14 }
 0x30d   : > { %v8088_v61 = vpop.permute.xlu1 %1952  ;;  %v8090_v29 = vpop.permute.xlu0 %1950 }
 0x30e   : > { %12053 = vst [vmem:[#allocation378_spill] sm:$0xff] %v8088_v61  ;;  %12054 = vst [vmem:[#allocation379_spill] sm:$0xff] %v8090_v29  ;;  %v12102_v29 = vld [vmem:[#allocation30_spill] sm:$0xff]  ;;  %v12103_v61 = vld [vmem:[#allocation31_spill] sm:$0xff] }
 0x30f   : > { %2122 = vrot.lane.b32.xlu1 %v11722_v44, %s5853_s14  ;;  %2120 = vrot.lane.b32.xlu0 %v11716_v11, %s5853_s14 }
 0x311   : > { %v8096_v26 = vpop.permute.xlu1 %1956  ;;  %v8098_v24 = vpop.permute.xlu0 %1954 }
 0x312   : > { %12055 = vst [vmem:[#allocation380_spill] sm:$0xff] %v8096_v26  ;;  %12056 = vst [vmem:[#allocation381_spill] sm:$0xff] %v8098_v24 }
 0x313   : > { %2126 = vrot.lane.b32.xlu1 %v6647_v32, %s5853_s14  ;;  %2124 = vrot.lane.b32.xlu0 %v11723_v55, %s5853_s14 }
 0x315   : > { %v8104_v47 = vpop.permute.xlu1 %1960  ;;  %v8106_v57 = vpop.permute.xlu0 %1958 }
 0x316   : > { %12057 = vst [vmem:[#allocation382_spill] sm:$0xff] %v8104_v47  ;;  %12058 = vst [vmem:[#allocation383_spill] sm:$0xff] %v8106_v57 }
 0x317   : > { %2130 = vrot.lane.b32.xlu1 %v6661_v16, %s5853_s14  ;;  %2128 = vrot.lane.b32.xlu0 %v6664_v38, %s5853_s14 }
 0x319   : > { %v8112_v11 = vpop.permute.xlu1 %1964  ;;  %v8114_v44 = vpop.permute.xlu0 %1962 }
 0x31a   : > { %12059 = vst [vmem:[#allocation384_spill] sm:$0xff] %v8112_v11  ;;  %12060 = vst [vmem:[#allocation385_spill] sm:$0xff] %v8114_v44  ;;  %v12098_v11 = vld [vmem:[#allocation23_spill] sm:$0xff] }
 0x31b   : > { %2134 = vrot.lane.b32.xlu1 %v11738_v49, %s5853_s14  ;;  %2132 = vrot.lane.b32.xlu0 %v6674_v0, %s5853_s14  ;;  %v12065_v0 = vld [vmem:[#allocation91_spill] sm:$0xff] }
 0x31d   : > { %v8120_v55 = vpop.permute.xlu1 %1968  ;;  %v8122_v32 = vpop.permute.xlu0 %1966 }
 0x31e   : > { %12061 = vst [vmem:[#allocation386_spill] sm:$0xff] %v8120_v55  ;;  %12062 = vst [vmem:[#allocation387_spill] sm:$0xff] %v8122_v32  ;;  %v399_v55 = vld [vmem:[%s6110_s8 + $0x260] sm:$0xff] }
 0x31f   : > { %2138 = vrot.lane.b32.xlu1 %v11810_v40, %s5853_s14  ;;  %2136 = vrot.lane.b32.xlu0 %v11739_v6, %s5853_s14  ;;  %v12068_v40 = vld [vmem:[#allocation96_spill] sm:$0xff] }
 0x320   : > { %v12069_v6 = vld [vmem:[#allocation92_spill] sm:$0xff] }
 0x321   : > { %v8128_v38 = vpop.permute.xlu1 %1972  ;;  %v8130_v16 = vpop.permute.xlu0 %1970 }
 0x322   : > { %12063 = vst [vmem:[#allocation388_spill] sm:$0xff] %v8128_v38  ;;  %12064 = vst [vmem:[#allocation389_spill] sm:$0xff] %v8130_v16 }
 0x323   : > { %2142 = vrot.lane.b32.xlu1 %v6736_v36, %s5853_s14  ;;  %2140 = vrot.lane.b32.xlu0 %v12065_v0, %s5853_s14  ;;  %v12072_v36 = vld [vmem:[#allocation99_spill] sm:$0xff] }
 0x324   : > { %v12073_v0 = vld [vmem:[#allocation95_spill] sm:$0xff] }
 0x325   : > { %v8136_v49 = vpop.permute.xlu1 %1976  ;;  %v8138_v32 = vpop.permute.xlu0 %1974 }
 0x326   : > { %12066 = vst [vmem:[#allocation390_spill] sm:$0xff] %v8136_v49  ;;  %12067 = vst [vmem:[#allocation391_spill] sm:$0xff] %v8138_v32 }
 0x327   : > { %2146 = vrot.lane.b32.xlu1 %v12068_v40, %s5853_s14  ;;  %2144 = vrot.lane.b32.xlu0 %v12069_v6, %s5853_s14 }
 0x329   : > { %v8144_v38 = vpop.permute.xlu1 %1980  ;;  %v8146_v16 = vpop.permute.xlu0 %1978 }
 0x32a   : > { %12070 = vst [vmem:[#allocation392_spill] sm:$0xff] %v8144_v38  ;;  %12071 = vst [vmem:[#allocation393_spill] sm:$0xff] %v8146_v16  ;;  %v12078_v16 = vld [vmem:[#allocation109_spill] sm:$0xff]  ;;  %v401_v38 = vld [vmem:[%s6110_s8 + $0x270] sm:$0xff] }
 0x32b   : > { %2150 = vrot.lane.b32.xlu1 %v12072_v36, %s5853_s14  ;;  %2148 = vrot.lane.b32.xlu0 %v12073_v0, %s5853_s14  ;;  %v8167_v36 = vsel %vm803_vm0, %v399_v55, %v12078_v16  ;;  %v400_v0 = vld [vmem:[%s6110_s8 + $0x268] sm:$0xff] }
 0x32c   : > { %12079 = vst [vmem:[#allocation109_spill] sm:$0xff] %v8167_v36 }
 0x32d   : > { %v8152_v49 = vpop.permute.xlu1 %1984  ;;  %v8154_v32 = vpop.permute.xlu0 %1982 }
 0x32e   : > { %12074 = vst [vmem:[#allocation394_spill] sm:$0xff] %v8152_v49  ;;  %12075 = vst [vmem:[#allocation395_spill] sm:$0xff] %v8154_v32  ;;  %v12094_v49 = vld [vmem:[#allocation15_spill] sm:$0xff] }
 0x32f   : > { %2154 = vrot.lane.b32.xlu1 %v7487_v20, %s5853_s14  ;;  %2152 = vrot.lane.b32.xlu0 %v7473_v51, %s5853_s14  ;;  %v12082_v51 = vld [vmem:[#allocation108_spill] sm:$0xff] }
 0x331   : > { %v8161_v6 = vpop.permute.xlu1 %1988  ;;  %v8163_v40 = vpop.permute.xlu0 %1986 }
 0x332   : > { %12076 = vst [vmem:[#allocation396_spill] sm:$0xff] %v8161_v6  ;;  %12077 = vst [vmem:[#allocation397_spill] sm:$0xff] %v8163_v40  ;;  %v8181_v6 = vsel %vm803_vm0, %v400_v0, %v12082_v51  ;;  %v12084_v40 = vld [vmem:[#allocation111_spill] sm:$0xff]  ;;  %v12089_v0 = vld [vmem:[#allocation12_spill] sm:$0xff] }
 0x333   : > { %2158 = vrot.lane.b32.xlu1 %v8167_v36, %s5853_s14  ;;  %2156 = vrot.lane.b32.xlu0 %v7491_v48, %s5853_s14  ;;  %12083 = vst [vmem:[#allocation108_spill] sm:$0xff] %v8181_v6  ;;  %v8185_v16 = vsel %vm803_vm0, %v401_v38, %v12084_v40  ;;  %v12092_v40 = vld [vmem:[#allocation13_spill] sm:$0xff]  ;;  %v12127_v36 = vld [vmem:[#allocation131_spill] sm:$0xff] }
 0x334   : > { %12085 = vst [vmem:[#allocation111_spill] sm:$0xff] %v8185_v16 }
 0x335   : > { %v8175_v20 = vpop.permute.xlu1 %1992  ;;  %v8177_v32 = vpop.permute.xlu0 %1990 }
 0x336   : > { %12080 = vst [vmem:[#allocation398_spill] sm:$0xff] %v8175_v20  ;;  %12081 = vst [vmem:[#allocation399_spill] sm:$0xff] %v8177_v32  ;;  %v12088_v32 = vld [vmem:[#allocation11_spill] sm:$0xff]  ;;  %v12093_v20 = vld [vmem:[#allocation14_spill] sm:$0xff] }
 0x337   : > { %2162 = vrot.lane.b32.xlu1 %v8185_v16, %s5853_s14  ;;  %2160 = vrot.lane.b32.xlu0 %v8181_v6, %s5853_s14 }
 0x339   : > { %v8191_v55 = vpop.permute.xlu1 %1996  ;;  %v8193_v48 = vpop.permute.xlu0 %1994 }
 0x33a   : > { %12086 = vst [vmem:[#allocation400_spill] sm:$0xff] %v8191_v55  ;;  %12087 = vst [vmem:[#allocation401_spill] sm:$0xff] %v8193_v48 }
 0x33b   : > { %2220 = vrot.lane.b32.xlu1 %v12088_v32, %s5854_s15  ;;  %2218 = vrot.lane.b32.xlu0 %v12089_v0, %s5854_s15  ;;  %v12095_v32 = vld [vmem:[#allocation16_spill] sm:$0xff] }
 0x33d   : > { %v8199_v51 = vpop.permute.xlu1 %2000  ;;  %v8201_v38 = vpop.permute.xlu0 %1998 }
 0x33e   : > { %12090 = vst [vmem:[#allocation11_spill] sm:$0xff] %v8199_v51  ;;  %12091 = vst [vmem:[#allocation12_spill] sm:$0xff] %v8201_v38  ;;  %v12096_v38 = vld [vmem:[#allocation18_spill] sm:$0xff] }
 0x33f   : > { %2224 = vrot.lane.b32.xlu1 %v12092_v40, %s5854_s15  ;;  %2222 = vrot.lane.b32.xlu0 %v12093_v20, %s5854_s15  ;;  %v12097_v40 = vld [vmem:[#allocation19_spill] sm:$0xff]  ;;  %v2990_v20 = vld [vmem:[%s11131_s2 + $0x40] sm:$0xff] }
 0x340   : > { %5686 = vmatprep.subr.mxu0 %v2990_v20 }
 0x341   : > { %v8207_v55 = vpop.permute.xlu1 %2058  ;;  %v8209_v48 = vpop.permute.xlu0 %2056  ;;  %5687 = vmatpush3.msra.mxu0 %v2990_v20  ;;  %v2987_v20 = vld [vmem:[%s11131_s2 + $0x28] sm:$0xff] }
 0x343   : > { %2228 = vrot.lane.b32.xlu1 %v12094_v49, %s5854_s15  ;;  %2226 = vrot.lane.b32.xlu0 %v12095_v32, %s5854_s15  ;;  %v2989_v32 = vld [vmem:[%s11131_s2 + $0x38] sm:$0xff] }
 0x344   : > { %5688 = vmatprep.subr.mxu0 %v2989_v32 }
 0x345   : > { %v8215_v0 = vpop.permute.xlu1 %2062  ;;  %v8217_v51 = vpop.permute.xlu0 %2060  ;;  %5689 = vmatpush3.msra.mxu0 %v2989_v32  ;;  %v2986_v32 = vld [vmem:[%s11131_s2 + $0x20] sm:$0xff] }
 0x347   : > { %2232 = vrot.lane.b32.xlu1 %v12096_v38, %s5854_s15  ;;  %2230 = vrot.lane.b32.xlu0 %v12097_v40, %s5854_s15  ;;  %v12099_v38 = vld [vmem:[#allocation24_spill] sm:$0xff] }
 0x348   : > { %v2988_v40 = vld [vmem:[%s11131_s2 + $0x30] sm:$0xff] }
 0x349   : > { %v8226_v44 = vpop.permute.xlu1 %2066  ;;  %v8228_v49 = vpop.permute.xlu0 %2064  ;;  %5690 = vmatprep.subr.mxu0 %v2988_v40 }
 0x34a   : > { %5691 = vmatpush3.msra.mxu0 %v2988_v40  ;;  %v2985_v40 = vld [vmem:[%s11131_s2 + $0x18] sm:$0xff] }
 0x34b   : > { %2236 = vrot.lane.b32.xlu1 %v12098_v11, %s5854_s15  ;;  %2234 = vrot.lane.b32.xlu0 %v12099_v38, %s5854_s15  ;;  %v12100_v11 = vld [vmem:[#allocation26_spill] sm:$0xff]  ;;  %v12101_v38 = vld [vmem:[#allocation27_spill] sm:$0xff] }
 0x34c   : > { %5692 = vmatprep.subr.mxu0 %v2987_v20 }
 0x34d   : > { %v8240_v57 = vpop.permute.xlu1 %2070  ;;  %v8242_v47 = vpop.permute.xlu0 %2068  ;;  %5693 = vmatpush3.msra.mxu0 %v2987_v20  ;;  %v2984_v20 = vld [vmem:[%s11131_s2 + $0x10] sm:$0xff] }
 0x34e   : > { %5694 = vmatprep.subr.mxu0 %v2986_v32 }
 0x34f   : > { %2240 = vrot.lane.b32.xlu1 %v12100_v11, %s5854_s15  ;;  %2238 = vrot.lane.b32.xlu0 %v12101_v38, %s5854_s15 }
 0x350   : > { %5695 = vmatpush3.msra.mxu0 %v2986_v32  ;;  %v2983_v32 = vld [vmem:[%s11131_s2 + $0x8] sm:$0xff] }
 0x351   : > { %v8251_v24 = vpop.permute.xlu1 %2074  ;;  %v8253_v26 = vpop.permute.xlu0 %2072  ;;  %5696 = vmatprep.subr.mxu0 %v2985_v40 }
 0x352   : > { %5697 = vmatpush3.msra.mxu0 %v2985_v40  ;;  %v2982_v40 = vld [vmem:[%s11131_s2] sm:$0xff] }
 0x353   : > { %2244 = vrot.lane.b32.xlu1 %v12102_v29, %s5854_s15  ;;  %2242 = vrot.lane.b32.xlu0 %v12103_v61, %s5854_s15  ;;  %v12105_v29 = vld [vmem:[#allocation33_spill] sm:$0xff]  ;;  %v12106_v61 = vld [vmem:[#allocation34_spill] sm:$0xff] }
 0x354   : > { %5698 = vmatprep.subr.mxu0 %v2984_v20 }
 0x355   : > { %v8265_v11 = vpop.permute.xlu1 %2078  ;;  %v8267_v38 = vpop.permute.xlu0 %2076  ;;  %5699 = vmatpush3.msra.mxu0 %v2984_v20  ;;  %v12114_v20 = vld [vmem:[#allocation43_spill] sm:$0xff] }
 0x356   : > { %12104 = vst [vmem:[#allocation13_spill] sm:$0xff] %v8265_v11  ;;  %5700 = vmatprep.subr.mxu0 %v2983_v32 }
 0x357   : > { %2248 = vrot.lane.b32.xlu1 %v12105_v29, %s5854_s15  ;;  %2246 = vrot.lane.b32.xlu0 %v12106_v61, %s5854_s15 }
 0x358   : > { %5701 = vmatpush3.msra.mxu0 %v2983_v32 }
 0x359   : > { %v8276_v46 = vpop.permute.xlu1 %2082  ;;  %v8278_v10 = vpop.permute.xlu0 %2080  ;;  %5702 = vmatprep.subr.mxu0 %v2982_v40 }
 0x35a   : > { %12107 = vst [vmem:[#allocation14_spill] sm:$0xff] %v8276_v46  ;;  %12108 = vst [vmem:[#allocation15_spill] sm:$0xff] %v8278_v10  ;;  %5703 = vmatpush3.msra.mxu0 %v2982_v40  ;;  %v12216_v46 = vld [vmem:[#allocation117_spill] sm:$0xff]  ;;  %v12223_v10 = vld [vmem:[#allocation259_spill] sm:$0xff] }
 0x35b   : > { %2252 = vrot.lane.b32.xlu1 %v12109_v53, %s5854_s15  ;;  %2250 = vrot.lane.b32.xlu0 %v12110_v9, %s5854_s15 }
 0x35d   : > { %v8290_v29 = vpop.permute.xlu1 %2086  ;;  %v8292_v61 = vpop.permute.xlu0 %2084 }
 0x35e   : > { %12111 = vst [vmem:[#allocation16_spill] sm:$0xff] %v8290_v29  ;;  %12112 = vst [vmem:[#allocation18_spill] sm:$0xff] %v8292_v61  ;;  %v12212_v61 = vld [vmem:[#allocation4_spill] sm:$0xff] }
 0x35f   : > { %2256 = vrot.lane.b32.xlu1 %v12113_v39, %s5854_s15  ;;  %2254 = vrot.lane.b32.xlu0 %v12114_v20, %s5854_s15  ;;  %v12120_v39 = vld [vmem:[#allocation120_spill] sm:$0xff] }
 0x361   : > { %v8298_v53 = vpop.permute.xlu1 %2090  ;;  %v8300_v9 = vpop.permute.xlu0 %2088 }
 0x362   : > { %12115 = vst [vmem:[#allocation19_spill] sm:$0xff] %v8298_v53  ;;  %12116 = vst [vmem:[#allocation23_spill] sm:$0xff] %v8300_v9  ;;  %v12200_v9 = vld [vmem:[#allocation79_spill] sm:$0xff] }
 0x363   : > { %2380 = vrot.lane.b32.xlu1 %v11937_v62, %s5855_s26  ;;  %2258 = vrot.lane.b32.xlu0 %v12117_v23, %s5854_s15  ;;  %v12124_v62 = vld [vmem:[#allocation123_spill] sm:$0xff] }
 0x365   : > { %v8306_v32 = vpop.permute.xlu1 %2094  ;;  %v8308_v16 = vpop.permute.xlu0 %2092 }
 0x366   : > { %12118 = vst [vmem:[#allocation24_spill] sm:$0xff] %v8306_v32  ;;  %12119 = vst [vmem:[#allocation26_spill] sm:$0xff] %v8308_v16  ;;  %v12193_v32 = vld [vmem:[#allocation65_spill] sm:$0xff]  ;;  %v12195_v16 = vld [vmem:[#allocation76_spill] sm:$0xff] }
 0x367   : > { %2384 = vrot.lane.b32.xlu1 %v11941_v22, %s5855_s26  ;;  %2382 = vrot.lane.b32.xlu0 %v12120_v39, %s5855_s26  ;;  %v12128_v22 = vld [vmem:[#allocation127_spill] sm:$0xff] }
 0x369   : > { %v8314_v40 = vpop.permute.xlu1 %2098  ;;  %v8316_v20 = vpop.permute.xlu0 %2096 }
 0x36a   : > { %12121 = vst [vmem:[#allocation27_spill] sm:$0xff] %v8314_v40  ;;  %12122 = vst [vmem:[#allocation30_spill] sm:$0xff] %v8316_v20  ;;  %v12131_v20 = vld [vmem:[#allocation136_spill] sm:$0xff] }
 0x36b   : > { %2388 = vrot.lane.b32.xlu1 %v12123_v35, %s5855_s26  ;;  %2386 = vrot.lane.b32.xlu0 %v12124_v62, %s5855_s26  ;;  %v12132_v35 = vld [vmem:[#allocation132_spill] sm:$0xff] }
 0x36d   : > { %v8322_v23 = vpop.permute.xlu1 %2102  ;;  %v8324_v12 = vpop.permute.xlu0 %2100 }
 0x36e   : > { %12125 = vst [vmem:[#allocation31_spill] sm:$0xff] %v8322_v23  ;;  %12126 = vst [vmem:[#allocation33_spill] sm:$0xff] %v8324_v12  ;;  %v12135_v12 = vld [vmem:[#allocation140_spill] sm:$0xff] }
 0x36f   : > { %2392 = vrot.lane.b32.xlu1 %v12127_v36, %s5855_s26  ;;  %2390 = vrot.lane.b32.xlu0 %v12128_v22, %s5855_s26  ;;  %v12136_v36 = vld [vmem:[#allocation135_spill] sm:$0xff] }
 0x371   : > { %v8330_v39 = vpop.permute.xlu1 %2106  ;;  %v8332_v40 = vpop.permute.xlu0 %2104 }
 0x372   : > { %12129 = vst [vmem:[#allocation34_spill] sm:$0xff] %v8330_v39  ;;  %12130 = vst [vmem:[#allocation38_spill] sm:$0xff] %v8332_v40  ;;  %v12139_v40 = vld [vmem:[#allocation143_spill] sm:$0xff] }
 0x373   : > { %2396 = vrot.lane.b32.xlu1 %v12131_v20, %s5855_s26  ;;  %2394 = vrot.lane.b32.xlu0 %v12132_v35, %s5855_s26  ;;  %v12140_v20 = vld [vmem:[#allocation139_spill] sm:$0xff] }
 0x375   : > { %v8338_v62 = vpop.permute.xlu1 %2110  ;;  %v8340_v23 = vpop.permute.xlu0 %2108 }
 0x376   : > { %12133 = vst [vmem:[#allocation39_spill] sm:$0xff] %v8338_v62  ;;  %12134 = vst [vmem:[#allocation42_spill] sm:$0xff] %v8340_v23  ;;  %v12143_v23 = vld [vmem:[#allocation148_spill] sm:$0xff] }
 0x377   : > { %2400 = vrot.lane.b32.xlu1 %v12135_v12, %s5855_s26  ;;  %2398 = vrot.lane.b32.xlu0 %v12136_v36, %s5855_s26  ;;  %v12144_v12 = vld [vmem:[#allocation144_spill] sm:$0xff] }
 0x379   : > { %v8346_v22 = vpop.permute.xlu1 %2114  ;;  %v8348_v39 = vpop.permute.xlu0 %2112 }
 0x37a   : > { %12137 = vst [vmem:[#allocation43_spill] sm:$0xff] %v8346_v22  ;;  %12138 = vst [vmem:[#allocation49_spill] sm:$0xff] %v8348_v39  ;;  %v12147_v39 = vld [vmem:[#allocation152_spill] sm:$0xff] }
 0x37b   : > { %2404 = vrot.lane.b32.xlu1 %v12139_v40, %s5855_s26  ;;  %2402 = vrot.lane.b32.xlu0 %v12140_v20, %s5855_s26  ;;  %v12148_v40 = vld [vmem:[#allocation147_spill] sm:$0xff] }
 0x37d   : > { %v8354_v35 = vpop.permute.xlu1 %2118  ;;  %v8356_v62 = vpop.permute.xlu0 %2116 }
 0x37e   : > { %12141 = vst [vmem:[#allocation120_spill] sm:$0xff] %v8354_v35  ;;  %12142 = vst [vmem:[#allocation128_spill] sm:$0xff] %v8356_v62  ;;  %v12151_v62 = vld [vmem:[#allocation155_spill] sm:$0xff] }
 0x37f   : > { %2408 = vrot.lane.b32.xlu1 %v12143_v23, %s5855_s26  ;;  %2406 = vrot.lane.b32.xlu0 %v12144_v12, %s5855_s26  ;;  %v12152_v23 = vld [vmem:[#allocation151_spill] sm:$0xff] }
 0x381   : > { %v8362_v36 = vpop.permute.xlu1 %2122  ;;  %v8364_v22 = vpop.permute.xlu0 %2120 }
 0x382   : > { %12145 = vst [vmem:[#allocation123_spill] sm:$0xff] %v8362_v36  ;;  %12146 = vst [vmem:[#allocation131_spill] sm:$0xff] %v8364_v22  ;;  %v12155_v22 = vld [vmem:[#allocation48_spill] sm:$0xff] }
 0x383   : > { %2412 = vrot.lane.b32.xlu1 %v12147_v39, %s5855_s26  ;;  %2410 = vrot.lane.b32.xlu0 %v12148_v40, %s5855_s26  ;;  %v12156_v39 = vld [vmem:[#allocation156_spill] sm:$0xff] }
 0x385   : > { %v8370_v20 = vpop.permute.xlu1 %2126  ;;  %v8372_v35 = vpop.permute.xlu0 %2124 }
 0x386   : > { %12149 = vst [vmem:[#allocation127_spill] sm:$0xff] %v8370_v20  ;;  %12150 = vst [vmem:[#allocation136_spill] sm:$0xff] %v8372_v35  ;;  %v12159_v35 = vld [vmem:[#allocation44_spill] sm:$0xff] }
 0x387   : > { %2416 = vrot.lane.b32.xlu1 %v12151_v62, %s5855_s26  ;;  %2414 = vrot.lane.b32.xlu0 %v12152_v23, %s5855_s26  ;;  %v12160_v62 = vld [vmem:[#allocation159_spill] sm:$0xff] }
 0x389   : > { %v8378_v12 = vpop.permute.xlu1 %2130  ;;  %v8380_v36 = vpop.permute.xlu0 %2128 }
 0x38a   : > { %12153 = vst [vmem:[#allocation132_spill] sm:$0xff] %v8378_v12  ;;  %12154 = vst [vmem:[#allocation140_spill] sm:$0xff] %v8380_v36  ;;  %v12163_v36 = vld [vmem:[#allocation51_spill] sm:$0xff] }
 0x38b   : > { %2260 = vrot.lane.b32.xlu1 %v12155_v22, %s5854_s15  ;;  %2418 = vrot.lane.b32.xlu0 %v12156_v39, %s5855_s26  ;;  %v12164_v22 = vld [vmem:[#allocation52_spill] sm:$0xff] }
 0x38d   : > { %v8386_v40 = vpop.permute.xlu1 %2134  ;;  %v8388_v20 = vpop.permute.xlu0 %2132 }
 0x38e   : > { %12157 = vst [vmem:[#allocation135_spill] sm:$0xff] %v8386_v40  ;;  %12158 = vst [vmem:[#allocation143_spill] sm:$0xff] %v8388_v20  ;;  %v12167_v20 = vld [vmem:[#allocation162_spill] sm:$0xff] }
 0x38f   : > { %2422 = vrot.lane.b32.xlu1 %v12159_v35, %s5855_s26  ;;  %2420 = vrot.lane.b32.xlu0 %v12160_v62, %s5855_s26  ;;  %v12168_v35 = vld [vmem:[#allocation163_spill] sm:$0xff] }
 0x391   : > { %v8394_v23 = vpop.permute.xlu1 %2138  ;;  %v8396_v12 = vpop.permute.xlu0 %2136 }
 0x392   : > { %12161 = vst [vmem:[#allocation139_spill] sm:$0xff] %v8394_v23  ;;  %12162 = vst [vmem:[#allocation148_spill] sm:$0xff] %v8396_v12  ;;  %v12171_v12 = vld [vmem:[#allocation57_spill] sm:$0xff] }
 0x393   : > { %2264 = vrot.lane.b32.xlu1 %v12163_v36, %s5854_s15  ;;  %2262 = vrot.lane.b32.xlu0 %v12164_v22, %s5854_s15  ;;  %v12172_v36 = vld [vmem:[#allocation58_spill] sm:$0xff] }
 0x395   : > { %v8402_v39 = vpop.permute.xlu1 %2142  ;;  %v8404_v40 = vpop.permute.xlu0 %2140 }
 0x396   : > { %12165 = vst [vmem:[#allocation144_spill] sm:$0xff] %v8402_v39  ;;  %12166 = vst [vmem:[#allocation152_spill] sm:$0xff] %v8404_v40  ;;  %v12175_v40 = vld [vmem:[#allocation53_spill] sm:$0xff] }
 0x397   : > { %2426 = vrot.lane.b32.xlu1 %v12167_v20, %s5855_s26  ;;  %2424 = vrot.lane.b32.xlu0 %v12168_v35, %s5855_s26  ;;  %v12176_v20 = vld [vmem:[#allocation166_spill] sm:$0xff] }
 0x399   : > { %v8410_v62 = vpop.permute.xlu1 %2146  ;;  %v8412_v23 = vpop.permute.xlu0 %2144 }
 0x39a   : > { %12169 = vst [vmem:[#allocation147_spill] sm:$0xff] %v8410_v62  ;;  %12170 = vst [vmem:[#allocation155_spill] sm:$0xff] %v8412_v23  ;;  %v12179_v23 = vld [vmem:[#allocation60_spill] sm:$0xff] }
 0x39b   : > { %2268 = vrot.lane.b32.xlu1 %v12171_v12, %s5854_s15  ;;  %2266 = vrot.lane.b32.xlu0 %v12172_v36, %s5854_s15  ;;  %v12180_v12 = vld [vmem:[#allocation61_spill] sm:$0xff] }
 0x39d   : > { %v8418_v22 = vpop.permute.xlu1 %2150  ;;  %v8420_v39 = vpop.permute.xlu0 %2148 }
 0x39e   : > { %12173 = vst [vmem:[#allocation151_spill] sm:$0xff] %v8418_v22  ;;  %12174 = vst [vmem:[#allocation48_spill] sm:$0xff] %v8420_v39  ;;  %v12183_v39 = vld [vmem:[#allocation56_spill] sm:$0xff] }
 0x39f   : > { %2430 = vrot.lane.b32.xlu1 %v12175_v40, %s5855_s26  ;;  %2428 = vrot.lane.b32.xlu0 %v12176_v20, %s5855_s26  ;;  %v12184_v40 = vld [vmem:[#allocation169_spill] sm:$0xff] }
 0x3a1   : > { %v8426_v35 = vpop.permute.xlu1 %2154  ;;  %v8428_v62 = vpop.permute.xlu0 %2152 }
 0x3a2   : > { %12177 = vst [vmem:[#allocation156_spill] sm:$0xff] %v8426_v35  ;;  %12178 = vst [vmem:[#allocation44_spill] sm:$0xff] %v8428_v62  ;;  %v12187_v62 = vld [vmem:[#allocation66_spill] sm:$0xff] }
 0x3a3   : > { %2272 = vrot.lane.b32.xlu1 %v12179_v23, %s5854_s15  ;;  %2270 = vrot.lane.b32.xlu0 %v12180_v12, %s5854_s15  ;;  %v12188_v23 = vld [vmem:[#allocation67_spill] sm:$0xff] }
 0x3a5   : > { %v8434_v36 = vpop.permute.xlu1 %2158  ;;  %v8436_v22 = vpop.permute.xlu0 %2156 }
 0x3a6   : > { %12181 = vst [vmem:[#allocation159_spill] sm:$0xff] %v8434_v36  ;;  %12182 = vst [vmem:[#allocation51_spill] sm:$0xff] %v8436_v22  ;;  %v12189_v22 = vld [vmem:[#allocation172_spill] sm:$0xff] }
 0x3a7   : > { %2434 = vrot.lane.b32.xlu1 %v12183_v39, %s5855_s26  ;;  %2432 = vrot.lane.b32.xlu0 %v12184_v40, %s5855_s26  ;;  %v12190_v39 = vld [vmem:[#allocation173_spill] sm:$0xff] }
 0x3a9   : > { %v8442_v20 = vpop.permute.xlu1 %2162  ;;  %v8444_v35 = vpop.permute.xlu0 %2160 }
 0x3aa   : > { %12185 = vst [vmem:[#allocation52_spill] sm:$0xff] %v8442_v20  ;;  %12186 = vst [vmem:[#allocation162_spill] sm:$0xff] %v8444_v35  ;;  %v12191_v35 = vld [vmem:[#allocation70_spill] sm:$0xff] }
 0x3ab   : > { %2276 = vrot.lane.b32.xlu1 %v12187_v62, %s5854_s15  ;;  %2274 = vrot.lane.b32.xlu0 %v12188_v23, %s5854_s15  ;;  %v12192_v62 = vld [vmem:[#allocation71_spill] sm:$0xff] }
 0x3ad   : > { %v8450_v12 = vpop.permute.xlu1 %2220  ;;  %v8452_v36 = vpop.permute.xlu0 %2218 }
 0x3af   : > { %2438 = vrot.lane.b32.xlu1 %v12189_v22, %s5855_s26  ;;  %2436 = vrot.lane.b32.xlu0 %v12190_v39, %s5855_s26  ;;  %v12194_v22 = vld [vmem:[#allocation176_spill] sm:$0xff] }
 0x3b1   : > { %v8458_v40 = vpop.permute.xlu1 %2224  ;;  %v8460_v20 = vpop.permute.xlu0 %2222 }
 0x3b3   : > { %2280 = vrot.lane.b32.xlu1 %v12191_v35, %s5854_s15  ;;  %2278 = vrot.lane.b32.xlu0 %v12192_v62, %s5854_s15  ;;  %v12196_v35 = vld [vmem:[#allocation77_spill] sm:$0xff] }
 0x3b5   : > { %v8466_v23 = vpop.permute.xlu1 %2228  ;;  %v8468_v6 = vpop.permute.xlu0 %2226 }
 0x3b7   : > { %2442 = vrot.lane.b32.xlu1 %v12193_v32, %s5855_s26  ;;  %2440 = vrot.lane.b32.xlu0 %v12194_v22, %s5855_s26  ;;  %v12198_v32 = vld [vmem:[#allocation179_spill] sm:$0xff] }
 0x3b9   : > { %v8474_v39 = vpop.permute.xlu1 %2232  ;;  %v8476_v50 = vpop.permute.xlu0 %2230 }
 0x3bb   : > { %2284 = vrot.lane.b32.xlu1 %v12195_v16, %s5854_s15  ;;  %2282 = vrot.lane.b32.xlu0 %v12196_v35, %s5854_s15  ;;  %v12201_v16 = vld [vmem:[#allocation80_spill] sm:$0xff] }
 0x3bd   : > { %v8482_v62 = vpop.permute.xlu1 %2236  ;;  %v8484_v53 = vpop.permute.xlu0 %2234 }
 0x3bf   : > { %2446 = vrot.lane.b32.xlu1 %v12197_v3, %s5855_s26  ;;  %2444 = vrot.lane.b32.xlu0 %v12198_v32, %s5855_s26  ;;  %v12204_v3 = vld [vmem:[#allocation183_spill] sm:$0xff] }
 0x3c1   : > { %v8490_v22 = vpop.permute.xlu1 %2240  ;;  %v8492_v31 = vpop.permute.xlu0 %2238 }
 0x3c2   : > { %12199 = vst [vmem:[#allocation163_spill] sm:$0xff] %v8490_v22  ;;  %v12222_v22 = vld [vmem:[#allocation7_spill] sm:$0xff] }
 0x3c3   : > { %2288 = vrot.lane.b32.xlu1 %v12200_v9, %s5854_s15  ;;  %2286 = vrot.lane.b32.xlu0 %v12201_v16, %s5854_s15  ;;  %v12208_v9 = vld [vmem:[#allocation85_spill] sm:$0xff] }
 0x3c5   : > { %v8498_v35 = vpop.permute.xlu1 %2244  ;;  %v8500_v29 = vpop.permute.xlu0 %2242 }
 0x3c6   : > { %12202 = vst [vmem:[#allocation57_spill] sm:$0xff] %v8498_v35  ;;  %12203 = vst [vmem:[#allocation58_spill] sm:$0xff] %v8500_v29 }
 0x3c7   : > { %2450 = vrot.lane.b32.xlu1 %v12010_v15, %s5855_s26  ;;  %2448 = vrot.lane.b32.xlu0 %v12204_v3, %s5855_s26  ;;  %v12211_v15 = vld [vmem:[#allocation114_spill] sm:$0xff] }
 0x3c8   : > { %v2543_v3 = vsel %vm2542_vm3, %v12212_v61, %v12211_v15  ;;  %v12219_v61 = vld [vmem:[#allocation118_spill] sm:$0xff]  ;;  %v12220_v15 = vld [vmem:[#allocation3_spill] sm:$0xff] }
 0x3c9   : > { %v8506_v32 = vpop.permute.xlu1 %2248  ;;  %v8508_v56 = vpop.permute.xlu0 %2246  ;;  %v2598_v18 = vsel %vm2597_vm4, %v2543_v3, %v12218_v1  ;;  %v2545_v29 = vsel %vm2542_vm3, %v12220_v15, %v12219_v61  ;;  %v12228_v3 = vld [vmem:[#allocation125_spill] sm:$0xff]  ;;  %v12229_v15 = vld [vmem:[#allocation115_spill] sm:$0xff] }
 0x3ca   : > { %12205 = vst [vmem:[#allocation53_spill] sm:$0xff] %v8506_v32  ;;  %12206 = vst [vmem:[#allocation166_spill] sm:$0xff] %v8508_v56  ;;  %v12214_v32 = vld [vmem:[#allocation113_spill] sm:$0xff]  ;;  %v2653_v11 = vsel %vm2652_vm5, %v2598_v18, %v12223_v10  ;;  %v8551_v61 = vsel %vm2542_vm3, %v6194_v7, %v12228_v3 }
 0x3cb   : > { %2292 = vrot.lane.b32.xlu1 %v12207_v28, %s5854_s15  ;;  %2290 = vrot.lane.b32.xlu0 %v12208_v9, %s5854_s15  ;;  %v12213_v28 = vld [vmem:[#allocation186_spill] sm:$0xff]  ;;  %v12231_v18 = vld [vmem:[#allocation129_spill] sm:$0xff] }
 0x3cc   : > { %v12215_v9 = vld [vmem:[#allocation2_spill] sm:$0xff]  ;;  %v12233_v7 = vld [vmem:[#allocation89_spill] sm:$0xff] }
 0x3cd   : > { %v8514_v16 = vpop.permute.xlu1 %2252  ;;  %v8516_v35 = vpop.permute.xlu0 %2250  ;;  %v2544_v56 = vsel %vm2542_vm3, %v12215_v9, %v12214_v32 }
 0x3ce   : > { %12209 = vst [vmem:[#allocation60_spill] sm:$0xff] %v8514_v16  ;;  %12210 = vst [vmem:[#allocation61_spill] sm:$0xff] %v8516_v35  ;;  %v12217_v16 = vld [vmem:[#allocation6_spill] sm:$0xff] }
 0x3cf   : > { %2454 = vrot.lane.b32.xlu1 %v12014_v54, %s5855_s26  ;;  %2452 = vrot.lane.b32.xlu0 %v12213_v28, %s5855_s26  ;;  %v2546_v35 = vsel %vm2542_vm3, %v12217_v16, %v12216_v46  ;;  %v12221_v54 = vld [vmem:[#allocation121_spill] sm:$0xff]  ;;  %v12226_v46 = vld [vmem:[#allocation122_spill] sm:$0xff] }
 0x3d0   : > { %v2548_v28 = vsel %vm2542_vm3, %v12222_v22, %v12221_v54  ;;  %v12227_v16 = vld [vmem:[#allocation5_spill] sm:$0xff]  ;;  %v2708_v22 = vsel %vm2707_vm6, %v2653_v11, %v12229_v15  ;;  %v12230_v54 = vld [vmem:[#allocation126_spill] sm:$0xff] }
 0x3d1   : > { %v8541_v32 = vpop.permute.xlu1 %2256  ;;  %v8543_v9 = vpop.permute.xlu0 %2254  ;;  %v2547_v1 = vsel %vm2542_vm3, %v12227_v16, %v12226_v46  ;;  %v2549_v10 = vsel %vm2542_vm3, %v6198_v8, %v12230_v54  ;;  %v2763_v46 = vsel %vm2762_vm7, %v2708_v22, %v7978_v41  ;;  %v12232_v16 = vld [vmem:[#allocation88_spill] sm:$0xff]  ;;  %v12234_v11 = vld [vmem:[#allocation130_spill] sm:$0xff]  ;;  %v12236_v54 = vld [vmem:[#allocation213_spill] sm:$0xff] }
 0x3d2   : > { %12224 = vst [vmem:[#allocation56_spill] sm:$0xff] %v8541_v32  ;;  %12225 = vst [vmem:[#allocation169_spill] sm:$0xff] %v8543_v9  ;;  %v8561_v32 = vsel %vm2542_vm3, %v6236_v30, %v12231_v18  ;;  %v2551_v3 = vsel %vm2542_vm3, %v6207_v14, %v12234_v11  ;;  %v12235_v8 = vld [vmem:[#allocation210_spill] sm:$0xff]  ;;  %v2600_v30 = vsel %vm2597_vm4, %v2545_v29, %v12236_v54  ;;  %v12237_v22 = vld [vmem:[#allocation9_spill] sm:$0xff] }
 0x3d3   : > { %2296 = vrot.lane.b32.xlu1 %v12232_v16, %s5854_s15  ;;  %2294 = vrot.lane.b32.xlu0 %v12233_v7, %s5854_s15  ;;  %v2599_v15 = vsel %vm2597_vm4, %v2544_v56, %v12235_v8  ;;  %v2818_v41 = vsel %vm2817_vm8, %v2763_v46, %v8209_v48  ;;  %v12238_v16 = vld [vmem:[#allocation261_spill] sm:$0xff]  ;;  %v12240_v11 = vld [vmem:[#allocation119_spill] sm:$0xff]  ;;  %v12241_v46 = vld [vmem:[#allocation312_spill] sm:$0xff] }
 0x3d4   : > { %v2654_v18 = vsel %vm2652_vm5, %v2599_v15, %v12237_v22  ;;  %v2655_v7 = vsel %vm2652_vm5, %v2600_v30, %v12238_v16  ;;  %v2873_v9 = vsel %vm2872_vm9, %v2818_v41, %v8452_v36  ;;  %v12239_v56 = vld [vmem:[#allocation133_spill] sm:$0xff]  ;;  %v12242_v54 = vld [vmem:[#allocation134_spill] sm:$0xff]  ;;  %v12244_v22 = vld [vmem:[#allocation212_spill] sm:$0xff] }
 0x3d5   : > { %v2381_v21 = vpop.permute.xlu1 %2380  ;;  %v8584_v14 = vpop.permute.xlu0 %2258  ;;  %v8589_v29 = vsel %vm2542_vm3, %v6265_v45, %v12239_v56  ;;  %v2709_v48 = vsel %vm2707_vm6, %v2654_v18, %v12240_v11  ;;  %v2710_v8 = vsel %vm2707_vm6, %v2655_v7, %v12241_v46  ;;  %v8599_v36 = vsel %vm2542_vm3, %v6232_v27, %v12242_v54  ;;  %v12243_v41 = vld [vmem:[#allocation189_spill] sm:$0xff]  ;;  %v12247_v16 = vld [vmem:[#allocation263_spill] sm:$0xff] }
 0x3d6   : > { %v2928_v15 = vsel %vm2927_vm10, %v2873_v9, %v2381_v21  ;;  %v2764_v30 = vsel %vm2762_vm7, %v2709_v48, %v7976_v43  ;;  %v2765_v45 = vsel %vm2762_vm7, %v2710_v8, %v7986_v19  ;;  %v2601_v21 = vsel %vm2597_vm4, %v2546_v35, %v12244_v22  ;;  %v12245_v9 = vld [vmem:[#allocation215_spill] sm:$0xff]  ;;  %v12246_v19 = vld [vmem:[#allocation260_spill] sm:$0xff]  ;;  %v12250_v54 = vld [vmem:[#allocation137_spill] sm:$0xff] }
 0x3d7   : > { %2458 = vrot.lane.b32.xlu1 %v12017_v2, %s5855_s26  ;;  %2456 = vrot.lane.b32.xlu0 %v12243_v41, %s5855_s26  ;;  %v2602_v18 = vsel %vm2597_vm4, %v2547_v1, %v12245_v9  ;;  %v2819_v27 = vsel %vm2817_vm8, %v2764_v30, %v8207_v55  ;;  %v2820_v43 = vsel %vm2817_vm8, %v2765_v45, %v8217_v51  ;;  %v12248_v55 = vld [vmem:[#allocation124_spill] sm:$0xff]  ;;  %v12249_v51 = vld [vmem:[#allocation314_spill] sm:$0xff]  ;;  %v12251_v45 = vld [vmem:[#allocation93_spill] sm:$0xff] }
 0x3d8   : > { %5704 = vmatprep.mubr.msk.f32.mxu0 %vm2998_vm11, %v2928_v15  ;;  %v2656_v2 = vsel %vm2652_vm5, %v2601_v21, %v12246_v19  ;;  %v2657_v7 = vsel %vm2652_vm5, %v2602_v18, %v12247_v16  ;;  %v2874_v35 = vsel %vm2872_vm9, %v2819_v27, %v8450_v12  ;;  %v2875_v1 = vsel %vm2872_vm9, %v2820_v43, %v8460_v20  ;;  %v12252_v41 = vld [vmem:[#allocation94_spill] sm:$0xff]  ;;  %v12254_v9 = vld [vmem:[#allocation217_spill] sm:$0xff] }
 0x3d9   : > { %v2385_v56 = vpop.permute.xlu1 %2384  ;;  %v2383_v11 = vpop.permute.xlu0 %2382  ;;  %v2711_v48 = vsel %vm2707_vm6, %v2656_v2, %v12248_v55  ;;  %v2712_v46 = vsel %vm2707_vm6, %v2657_v7, %v12249_v51  ;;  %v8635_v30 = vsel %vm2542_vm3, %v6286_v58, %v12250_v54  ;;  %v12253_v22 = vld [vmem:[#allocation214_spill] sm:$0xff]  ;;  %v2604_v18 = vsel %vm2597_vm4, %v2549_v10, %v12254_v9  ;;  %v12256_v43 = vld [vmem:[#allocation265_spill] sm:$0xff]  ;;  %v12258_v7 = vld [vmem:[#allocation316_spill] sm:$0xff] }
 0x3da   : > { %v2930_v8 = vsel %vm2927_vm10, %v2875_v1, %v2385_v56  ;;  %v2929_v15 = vsel %vm2927_vm10, %v2874_v35, %v2383_v11  ;;  %v2766_v20 = vsel %vm2762_vm7, %v2711_v48, %v7984_v13  ;;  %v2767_v12 = vsel %vm2762_vm7, %v2712_v46, %v7994_v5  ;;  %v12255_v5 = vld [vmem:[#allocation262_spill] sm:$0xff]  ;;  %v12257_v16 = vld [vmem:[#allocation313_spill] sm:$0xff]  ;;  %v12261_v51 = vld [vmem:[#allocation216_spill] sm:$0xff] }
 0x3db   : > { %2300 = vrot.lane.b32.xlu1 %v12251_v45, %s5854_s15  ;;  %2298 = vrot.lane.b32.xlu0 %v12252_v41, %s5854_s15  ;;  %v2603_v21 = vsel %vm2597_vm4, %v2548_v28, %v12253_v22  ;;  %v2821_v58 = vsel %vm2817_vm8, %v2766_v20, %v8215_v0  ;;  %v2822_v13 = vsel %vm2817_vm8, %v2767_v12, %v8228_v49  ;;  %v12259_v11 = vld [vmem:[#allocation138_spill] sm:$0xff]  ;;  %v12260_v48 = vld [vmem:[#allocation193_spill] sm:$0xff]  ;;  %v12264_v54 = vld [vmem:[#allocation267_spill] sm:$0xff] }
 0x3dc   : > { %5705 = vmatmul.mubr.msk.f32.vlgmr.msra.gmra.mxu0 %vm2998_vm11, %v2929_v15  ;;  %v2658_v27 = vsel %vm2652_vm5, %v2603_v21, %v12255_v5  ;;  %v2659_v19 = vsel %vm2652_vm5, %v2604_v18, %v12256_v43  ;;  %v2876_v28 = vsel %vm2872_vm9, %v2821_v58, %v8458_v40  ;;  %v2877_v10 = vsel %vm2872_vm9, %v2822_v13, %v8468_v6  ;;  %v12265_v45 = vld [vmem:[#allocation315_spill] sm:$0xff]  ;;  %v12266_v41 = vld [vmem:[#allocation318_spill] sm:$0xff]  ;;  %v12267_v18 = vld [vmem:[#allocation141_spill] sm:$0xff] }
 0x3dd   : > { %5707 = vmatprep.mubr.msk.f32.mxu0 %vm2998_vm11, %v2930_v8  ;;  %v2389_v0 = vpop.permute.xlu1 %2388  ;;  %v2387_v2 = vpop.permute.xlu0 %2386  ;;  %v2713_v49 = vsel %vm2707_vm6, %v2658_v27, %v12257_v16  ;;  %v2714_v35 = vsel %vm2707_vm6, %v2659_v19, %v12258_v7  ;;  %v2555_v40 = vsel %vm2542_vm3, %v6290_v59, %v12259_v11  ;;  %v2605_v46 = vsel %vm2597_vm4, %v8551_v61, %v12261_v51  ;;  %v12262_v8 = vld [vmem:[#allocation219_spill] sm:$0xff]  ;;  %v12268_v13 = vld [vmem:[#allocation98_spill] sm:$0xff]  ;;  %v12269_v5 = vld [vmem:[#allocation97_spill] sm:$0xff] }
 0x3de   : > { %v2932_v1 = vsel %vm2927_vm10, %v2877_v10, %v2389_v0  ;;  %v2931_v56 = vsel %vm2927_vm10, %v2876_v28, %v2387_v2  ;;  %v2768_v6 = vsel %vm2762_vm7, %v2713_v49, %v7992_v33  ;;  %v2769_v55 = vsel %vm2762_vm7, %v2714_v35, %v8002_v52  ;;  %v12263_v52 = vld [vmem:[#allocation264_spill] sm:$0xff]  ;;  %v12270_v27 = vld [vmem:[#allocation218_spill] sm:$0xff]  ;;  %v12271_v19 = vld [vmem:[#allocation221_spill] sm:$0xff] }
 0x3df   : > { %2462 = vrot.lane.b32.xlu1 %v12020_v37, %s5855_s26  ;;  %2460 = vrot.lane.b32.xlu0 %v12260_v48, %s5855_s26  ;;  %v2606_v15 = vsel %vm2597_vm4, %v2551_v3, %v12262_v8  ;;  %v2823_v59 = vsel %vm2817_vm8, %v2768_v6, %v8226_v44  ;;  %v2824_v33 = vsel %vm2817_vm8, %v2769_v55, %v8242_v47  ;;  %v12272_v28 = vld [vmem:[#allocation266_spill] sm:$0xff]  ;;  %v12273_v0 = vld [vmem:[#allocation269_spill] sm:$0xff]  ;;  %v12275_v7 = vld [vmem:[#allocation320_spill] sm:$0xff] }
 0x3e0   : > { %5708 = vmatmul.mubr.msk.f32.gmra.mxu0 %vm2998_vm11, %v2931_v56  ;;  %v2660_v37 = vsel %vm2652_vm5, %v2605_v46, %v12263_v52  ;;  %v2661_v20 = vsel %vm2652_vm5, %v2606_v15, %v12264_v54  ;;  %v2878_v61 = vsel %vm2872_vm9, %v2823_v59, %v8466_v23  ;;  %v2879_v3 = vsel %vm2872_vm9, %v2824_v33, %v8476_v50  ;;  %v12274_v49 = vld [vmem:[#allocation317_spill] sm:$0xff]  ;;  %v12276_v11 = vld [vmem:[#allocation142_spill] sm:$0xff]  ;;  %v12278_v48 = vld [vmem:[#allocation196_spill] sm:$0xff] }
 0x3e1   : > { %5710 = vmatprep.mubr.msk.f32.mxu0 %vm2998_vm11, %v2932_v1  ;;  %v2393_v44 = vpop.permute.xlu1 %2392  ;;  %v2391_v12 = vpop.permute.xlu0 %2390  ;;  %v2715_v47 = vsel %vm2707_vm6, %v2660_v37, %v12265_v45  ;;  %v2716_v22 = vsel %vm2707_vm6, %v2661_v20, %v12266_v41  ;;  %v8708_v23 = vsel %vm2542_vm3, %v6327_v17, %v12267_v18  ;;  %v2607_v43 = vsel %vm2597_vm4, %v8561_v32, %v12270_v27  ;;  %v12277_v55 = vld [vmem:[#allocation197_spill] sm:$0xff]  ;;  %v12279_v51 = vld [vmem:[#allocation220_spill] sm:$0xff]  ;;  %v12280_v8 = vld [vmem:[#allocation223_spill] sm:$0xff] }
 0x3e2   : > { %v2934_v21 = vsel %vm2927_vm10, %v2879_v3, %v2393_v44  ;;  %v2933_v9 = vsel %vm2927_vm10, %v2878_v61, %v2391_v12  ;;  %v2770_v50 = vsel %vm2762_vm7, %v2715_v47, %v8000_v25  ;;  %v2771_v58 = vsel %vm2762_vm7, %v2716_v22, %v8010_v4  ;;  %v12282_v33 = vld [vmem:[#allocation271_spill] sm:$0xff]  ;;  %v12284_v20 = vld [vmem:[#allocation322_spill] sm:$0xff]  ;;  %v12285_v12 = vld [vmem:[#allocation145_spill] sm:$0xff] }
 0x3e3   : > { %2304 = vrot.lane.b32.xlu1 %v12268_v13, %s5854_s15  ;;  %2302 = vrot.lane.b32.xlu0 %v12269_v5, %s5854_s15  ;;  %v2608_v17 = vsel %vm2597_vm4, %v8599_v36, %v12271_v19  ;;  %v2825_v25 = vsel %vm2817_vm8, %v2770_v50, %v8240_v57  ;;  %v2826_v4 = vsel %vm2817_vm8, %v2771_v58, %v8253_v26  ;;  %v12283_v54 = vld [vmem:[#allocation319_spill] sm:$0xff]  ;;  %v12286_v45 = vld [vmem:[#allocation20_spill] sm:$0xff]  ;;  %v12288_v22 = vld [vmem:[#allocation102_spill] sm:$0xff] }
 0x3e4   : > { %5711 = vmatmul.mubr.msk.f32.gmra.mxu0 %vm2998_vm11, %v2933_v9  ;;  %v2662_v10 = vsel %vm2652_vm5, %v2607_v43, %v12272_v28  ;;  %v2663_v2 = vsel %vm2652_vm5, %v2608_v17, %v12273_v0  ;;  %v2880_v32 = vsel %vm2872_vm9, %v2825_v25, %v8474_v39  ;;  %v2881_v36 = vsel %vm2872_vm9, %v2826_v4, %v8484_v53  ;;  %v12287_v47 = vld [vmem:[#allocation363_spill] sm:$0xff]  ;;  %v12290_v9 = vld [vmem:[#allocation222_spill] sm:$0xff]  ;;  %v12291_v50 = vld [vmem:[#allocation225_spill] sm:$0xff] }
 0x3e5   : > { %5713 = vmatprep.mubr.msk.f32.mxu0 %vm2998_vm11, %v2934_v21  ;;  %v2397_v57 = vpop.permute.xlu1 %2396  ;;  %v2395_v16 = vpop.permute.xlu0 %2394  ;;  %v2717_v26 = vsel %vm2707_vm6, %v2662_v10, %v12274_v49  ;;  %v2718_v35 = vsel %vm2707_vm6, %v2663_v2, %v12275_v7  ;;  %v2557_v39 = vsel %vm2542_vm3, %v6294_v60, %v12276_v11  ;;  %v2609_v46 = vsel %vm2597_vm4, %v8589_v29, %v12279_v51  ;;  %v12289_v21 = vld [vmem:[#allocation103_spill] sm:$0xff]  ;;  %v12292_v13 = vld [vmem:[#allocation13_spill] sm:$0xff]  ;;  %v12294_v43 = vld [vmem:[#allocation270_spill] sm:$0xff] }
 0x3e6   : > { %v2936_v1 = vsel %vm2927_vm10, %v2881_v36, %v2397_v57  ;;  %v2935_v56 = vsel %vm2927_vm10, %v2880_v32, %v2395_v16  ;;  %v2772_v53 = vsel %vm2762_vm7, %v2717_v26, %v8008_v34  ;;  %v2773_v6 = vsel %vm2762_vm7, %v2718_v35, %v8018_v63  ;;  %v12281_v63 = vld [vmem:[#allocation268_spill] sm:$0xff]  ;;  %v12295_v17 = vld [vmem:[#allocation273_spill] sm:$0xff]  ;;  %v12296_v4 = vld [vmem:[#allocation163_spill] sm:$0xff] }
 0x3e7   : > { %2466 = vrot.lane.b32.xlu1 %v12277_v55, %s5855_s26  ;;  %2464 = vrot.lane.b32.xlu0 %v12278_v48, %s5855_s26  ;;  %v2610_v15 = vsel %vm2597_vm4, %v2555_v40, %v12280_v8  ;;  %v2827_v60 = vsel %vm2817_vm8, %v2772_v53, %v8251_v24  ;;  %v2828_v34 = vsel %vm2817_vm8, %v2773_v6, %v8267_v38  ;;  %v12297_v28 = vld [vmem:[#allocation58_spill] sm:$0xff]  ;;  %v12298_v32 = vld [vmem:[#allocation321_spill] sm:$0xff]  ;;  %v12299_v57 = vld [vmem:[#allocation324_spill] sm:$0xff] }
 0x3e8   : > { %5714 = vmatmul.mubr.msk.f32.gmra.mxu0 %vm2998_vm11, %v2935_v56  ;;  %v2664_v59 = vsel %vm2652_vm5, %v2609_v46, %v12281_v63  ;;  %v2665_v52 = vsel %vm2652_vm5, %v2610_v15, %v12282_v33  ;;  %v2882_v29 = vsel %vm2872_vm9, %v2827_v60, %v8482_v62  ;;  %v2883_v40 = vsel %vm2872_vm9, %v2828_v34, %v8492_v31  ;;  %v12300_v7 = vld [vmem:[#allocation146_spill] sm:$0xff]  ;;  %v12301_v35 = vld [vmem:[#allocation17_spill] sm:$0xff]  ;;  %v12304_v6 = vld [vmem:[#allocation200_spill] sm:$0xff] }
 0x3e9   : > { %5716 = vmatprep.mubr.msk.f32.mxu0 %vm2998_vm11, %v2936_v1  ;;  %v2401_v24 = vpop.permute.xlu1 %2400  ;;  %v2399_v37 = vpop.permute.xlu0 %2398  ;;  %v2719_v38 = vsel %vm2707_vm6, %v2664_v59, %v12283_v54  ;;  %v2720_v61 = vsel %vm2707_vm6, %v2665_v52, %v12284_v20  ;;  %v2560_v62 = vsel %vm2542_vm3, %v12286_v45, %v12285_v12  ;;  %v2611_v18 = vsel %vm2597_vm4, %v8635_v30, %v12290_v9  ;;  %v12302_v56 = vld [vmem:[#allocation362_spill] sm:$0xff]  ;;  %v12305_v55 = vld [vmem:[#allocation201_spill] sm:$0xff]  ;;  %v12306_v48 = vld [vmem:[#allocation224_spill] sm:$0xff] }
 0x3ea   : > { %v2938_v3 = vsel %vm2927_vm10, %v2883_v40, %v2401_v24  ;;  %v2937_v44 = vsel %vm2927_vm10, %v2882_v29, %v2399_v37  ;;  %v2774_v31 = vsel %vm2762_vm7, %v2719_v38, %v8016_v42  ;;  %v2775_v41 = vsel %vm2762_vm7, %v2720_v61, %v12287_v47  ;;  %v12293_v42 = vld [vmem:[#allocation15_spill] sm:$0xff]  ;;  %v12308_v15 = vld [vmem:[#allocation14_spill] sm:$0xff]  ;;  %v12310_v59 = vld [vmem:[#allocation272_spill] sm:$0xff] }
 0x3eb   : > { %2308 = vrot.lane.b32.xlu1 %v12288_v22, %s5854_s15  ;;  %2306 = vrot.lane.b32.xlu0 %v12289_v21, %s5854_s15  ;;  %v2612_v58 = vsel %vm2597_vm4, %v2557_v39, %v12291_v50  ;;  %v2829_v5 = vsel %vm2817_vm8, %v2774_v31, %v12292_v13  ;;  %v2830_v27 = vsel %vm2817_vm8, %v2775_v41, %v12293_v42  ;;  %v12303_v39 = vld [vmem:[#allocation365_spill] sm:$0xff]  ;;  %v12307_v46 = vld [vmem:[#allocation227_spill] sm:$0xff]  ;;  %v12309_v34 = vld [vmem:[#allocation18_spill] sm:$0xff] }
 0x3ec   : > { %5717 = vmatmul.mubr.msk.f32.gmra.mxu0 %vm2998_vm11, %v2937_v44  ;;  %v2666_v19 = vsel %vm2652_vm5, %v2611_v18, %v12294_v43  ;;  %v2667_v25 = vsel %vm2652_vm5, %v2612_v58, %v12295_v17  ;;  %v2884_v30 = vsel %vm2872_vm9, %v2829_v5, %v12296_v4  ;;  %v2885_v10 = vsel %vm2872_vm9, %v2830_v27, %v12297_v28  ;;  %v12311_v52 = vld [vmem:[#allocation275_spill] sm:$0xff]  ;;  %v12312_v40 = vld [vmem:[#allocation57_spill] sm:$0xff]  ;;  %v12313_v24 = vld [vmem:[#allocation166_spill] sm:$0xff] }
 0x3ed   : > { %5719 = vmatprep.mubr.msk.f32.mxu0 %vm2998_vm11, %v2938_v3  ;;  %v2405_v0 = vpop.permute.xlu1 %2404  ;;  %v2403_v2 = vpop.permute.xlu0 %2402  ;;  %v2721_v36 = vsel %vm2707_vm6, %v2666_v19, %v12298_v32  ;;  %v2722_v16 = vsel %vm2707_vm6, %v2667_v25, %v12299_v57  ;;  %v2559_v1 = vsel %vm2542_vm3, %v12301_v35, %v12300_v7  ;;  %v2613_v51 = vsel %vm2597_vm4, %v8708_v23, %v12306_v48  ;;  %v12314_v20 = vld [vmem:[#allocation323_spill] sm:$0xff]  ;;  %v12315_v3 = vld [vmem:[#allocation326_spill] sm:$0xff]  ;;  %v12318_v22 = vld [vmem:[#allocation364_spill] sm:$0xff] }
 0x3ee   : > { %v2940_v49 = vsel %vm2927_vm10, %v2885_v10, %v2405_v0  ;;  %v2939_v26 = vsel %vm2927_vm10, %v2884_v30, %v2403_v2  ;;  %v2776_v11 = vsel %vm2762_vm7, %v2721_v36, %v12302_v56  ;;  %v2777_v53 = vsel %vm2762_vm7, %v2722_v16, %v12303_v39  ;;  %v12316_v31 = vld [vmem:[#allocation150_spill] sm:$0xff]  ;;  %v12319_v9 = vld [vmem:[#allocation367_spill] sm:$0xff]  ;;  %v12323_v42 = vld [vmem:[#allocation229_spill] sm:$0xff] }
 0x3ef   : > { %2470 = vrot.lane.b32.xlu1 %v12304_v6, %s5855_s26  ;;  %2468 = vrot.lane.b32.xlu0 %v12305_v55, %s5855_s26  ;;  %v2614_v8 = vsel %vm2597_vm4, %v2559_v1, %v12307_v46  ;;  %v2831_v60 = vsel %vm2817_vm8, %v2776_v11, %v12308_v15  ;;  %v2832_v63 = vsel %vm2817_vm8, %v2777_v53, %v12309_v34  ;;  %v12317_v47 = vld [vmem:[#allocation22_spill] sm:$0xff]  ;;  %v12321_v58 = vld [vmem:[#allocation107_spill] sm:$0xff]  ;;  %v12324_v43 = vld [vmem:[#allocation16_spill] sm:$0xff] }
 0x3f0   : > { %5720 = vmatmul.mubr.msk.f32.gmra.mxu0 %vm2998_vm11, %v2939_v26  ;;  %v2668_v33 = vsel %vm2652_vm5, %v2613_v51, %v12310_v59  ;;  %v2669_v29 = vsel %vm2652_vm5, %v2614_v8, %v12311_v52  ;;  %v2886_v23 = vsel %vm2872_vm9, %v2831_v60, %v12312_v40  ;;  %v2887_v37 = vsel %vm2872_vm9, %v2832_v63, %v12313_v24  ;;  %v12320_v50 = vld [vmem:[#allocation106_spill] sm:$0xff]  ;;  %v12325_v17 = vld [vmem:[#allocation23_spill] sm:$0xff]  ;;  %v12327_v28 = vld [vmem:[#allocation277_spill] sm:$0xff] }
 0x3f1   : > { %5722 = vmatprep.mubr.msk.f32.mxu0 %vm2998_vm11, %v2940_v49  ;;  %v2409_v54 = vpop.permute.xlu1 %2408  ;;  %v2407_v38 = vpop.permute.xlu0 %2406  ;;  %v2723_v61 = vsel %vm2707_vm6, %v2668_v33, %v12314_v20  ;;  %v2724_v44 = vsel %vm2707_vm6, %v2669_v29, %v12315_v3  ;;  %v2561_v41 = vsel %vm2542_vm3, %v12317_v47, %v12316_v31  ;;  %v12322_v13 = vld [vmem:[#allocation226_spill] sm:$0xff]  ;;  %v12328_v0 = vld [vmem:[#allocation53_spill] sm:$0xff]  ;;  %v12331_v26 = vld [vmem:[#allocation328_spill] sm:$0xff] }
 0x3f2   : > { %v2942_v12 = vsel %vm2927_vm10, %v2887_v37, %v2409_v54  ;;  %v2941_v45 = vsel %vm2927_vm10, %v2886_v23, %v2407_v38  ;;  %v2778_v21 = vsel %vm2762_vm7, %v2723_v61, %v12318_v22  ;;  %v2779_v18 = vsel %vm2762_vm7, %v2724_v44, %v12319_v9  ;;  %v12326_v4 = vld [vmem:[#allocation274_spill] sm:$0xff]  ;;  %v12329_v2 = vld [vmem:[#allocation61_spill] sm:$0xff]  ;;  %v12336_v51 = vld [vmem:[#allocation204_spill] sm:$0xff] }
 0x3f3   : > { %2312 = vrot.lane.b32.xlu1 %v12320_v50, %s5854_s15  ;;  %2310 = vrot.lane.b32.xlu0 %v12321_v58, %s5854_s15  ;;  %v2615_v5 = vsel %vm2597_vm4, %v2560_v62, %v12322_v13  ;;  %v2616_v27 = vsel %vm2597_vm4, %v2561_v41, %v12323_v42  ;;  %v2833_v19 = vsel %vm2817_vm8, %v2778_v21, %v12324_v43  ;;  %v12330_v16 = vld [vmem:[#allocation325_spill] sm:$0xff]  ;;  %v12334_v53 = vld [vmem:[#allocation366_spill] sm:$0xff]  ;;  %v12338_v8 = vld [vmem:[#allocation228_spill] sm:$0xff] }
 0x3f4   : > { %v2834_v25 = vsel %vm2817_vm8, %v2779_v18, %v12325_v17  ;;  %5723 = vmatmul.mubr.msk.f32.gmra.mxu0 %vm2998_vm11, %v2941_v45  ;;  %v2670_v30 = vsel %vm2652_vm5, %v2615_v5, %v12326_v4  ;;  %v2671_v10 = vsel %vm2652_vm5, %v2616_v27, %v12327_v28  ;;  %v2888_v62 = vsel %vm2872_vm9, %v2833_v19, %v12328_v0  ;;  %v12332_v56 = vld [vmem:[#allocation149_spill] sm:$0xff]  ;;  %v12339_v60 = vld [vmem:[#allocation19_spill] sm:$0xff]  ;;  %v12340_v63 = vld [vmem:[#allocation26_spill] sm:$0xff] }
 0x3f5   : > { %v2889_v32 = vsel %vm2872_vm9, %v2834_v25, %v12329_v2  ;;  %5725 = vmatprep.mubr.msk.f32.mxu0 %vm2998_vm11, %v2942_v12  ;;  %v2413_v36 = vpop.permute.xlu1 %2412  ;;  %v2411_v57 = vpop.permute.xlu0 %2410  ;;  %v2725_v49 = vsel %vm2707_vm6, %v2670_v30, %v12330_v16  ;;  %v2726_v7 = vsel %vm2707_vm6, %v2671_v10, %v12331_v26  ;;  %v12333_v11 = vld [vmem:[#allocation21_spill] sm:$0xff]  ;;  %v12341_v33 = vld [vmem:[#allocation276_spill] sm:$0xff]  ;;  %v12344_v38 = vld [vmem:[#allocation327_spill] sm:$0xff] }
 0x3f6   : > { %v2944_v35 = vsel %vm2927_vm10, %v2889_v32, %v2413_v36  ;;  %v2943_v1 = vsel %vm2927_vm10, %v2888_v62, %v2411_v57  ;;  %v2562_v39 = vsel %vm2542_vm3, %v12333_v11, %v12332_v56  ;;  %v2780_v6 = vsel %vm2762_vm7, %v2725_v49, %v12334_v53  ;;  %v12335_v55 = vld [vmem:[#allocation369_spill] sm:$0xff]  ;;  %v12342_v29 = vld [vmem:[#allocation60_spill] sm:$0xff]  ;;  %v12347_v31 = vld [vmem:[#allocation154_spill] sm:$0xff] }
 0x3f7   : > { %v2781_v48 = vsel %vm2762_vm7, %v2726_v7, %v12335_v55  ;;  %2474 = vrot.lane.b32.xlu1 %v12336_v51, %s5855_s26  ;;  %v12337_v46 = vld [vmem:[#allocation205_spill] sm:$0xff]  ;;  %v2617_v15 = vsel %vm2597_vm4, %v2562_v39, %v12338_v8  ;;  %v2835_v34 = vsel %vm2817_vm8, %v2780_v6, %v12339_v60  ;;  %v12349_v22 = vld [vmem:[#allocation368_spill] sm:$0xff]  ;;  %v12352_v50 = vld [vmem:[#allocation230_spill] sm:$0xff] }
 0x3f8   : > { %2472 = vrot.lane.b32.xlu0 %v12337_v46, %s5855_s26  ;;  %v2836_v59 = vsel %vm2817_vm8, %v2781_v48, %v12340_v63  ;;  %5726 = vmatmul.mubr.msk.f32.gmra.mxu0 %vm2998_vm11, %v2943_v1  ;;  %v2672_v52 = vsel %vm2652_vm5, %v2617_v15, %v12341_v33  ;;  %v2890_v40 = vsel %vm2872_vm9, %v2835_v34, %v12342_v29  ;;  %v12343_v23 = vld [vmem:[#allocation169_spill] sm:$0xff]  ;;  %v12353_v13 = vld [vmem:[#allocation231_spill] sm:$0xff]  ;;  %v12354_v42 = vld [vmem:[#allocation24_spill] sm:$0xff] }
 0x3f9   : > { %v2891_v24 = vsel %vm2872_vm9, %v2836_v59, %v12343_v23  ;;  %5728 = vmatprep.mubr.msk.f32.mxu0 %vm2998_vm11, %v2944_v35  ;;  %v2417_v37 = vpop.permute.xlu1 %2416  ;;  %v2415_v54 = vpop.permute.xlu0 %2414  ;;  %v2727_v20 = vsel %vm2707_vm6, %v2672_v52, %v12344_v38  ;;  %v12345_v44 = vld [vmem:[#allocation153_spill] sm:$0xff]  ;;  %v12355_v43 = vld [vmem:[#allocation108_spill] sm:$0xff]  ;;  %v12356_v17 = vld [vmem:[#allocation278_spill] sm:$0xff] }
 0x3fa   : > { %v2946_v61 = vsel %vm2927_vm10, %v2891_v24, %v2417_v37  ;;  %v2945_v3 = vsel %vm2927_vm10, %v2890_v40, %v2415_v54  ;;  %v12346_v12 = vld [vmem:[#allocation29_spill] sm:$0xff]  ;;  %v2782_v21 = vsel %vm2762_vm7, %v2727_v20, %v12349_v22  ;;  %v1233_v19 = vrot.slane %v12355_v43, 1  ;;  %v12357_v4 = vld [vmem:[#allocation279_spill] sm:$0xff]  ;;  %v12358_v28 = vld [vmem:[#allocation56_spill] sm:$0xff] }
 0x3fb   : > { %v2564_v45 = vsel %vm2542_vm3, %v12346_v12, %v12345_v44  ;;  %v12348_v47 = vld [vmem:[#allocation25_spill] sm:$0xff]  ;;  %v2837_v27 = vsel %vm2817_vm8, %v2782_v21, %v12354_v42  ;;  %v12361_v16 = vld [vmem:[#allocation330_spill] sm:$0xff]  ;;  %v12363_v1 = vld [vmem:[#allocation371_spill] sm:$0xff]  ;;  %v1240_v46 = vrot.slane %v12355_v43, 2 }
 0x3fc   : > { %v2563_v41 = vsel %vm2542_vm3, %v12348_v47, %v12347_v31  ;;  %v12350_v9 = vld [vmem:[#allocation309_spill] sm:$0xff]  ;;  %v2619_v58 = vsel %vm2597_vm4, %v2564_v45, %v12352_v50  ;;  %5729 = vmatmul.mubr.msk.f32.gmra.mxu0 %vm2998_vm11, %v2945_v3  ;;  %v2892_v10 = vsel %vm2872_vm9, %v2837_v27, %v12358_v28  ;;  %v12362_v7 = vld [vmem:[#allocation370_spill] sm:$0xff]  ;;  %v12366_v6 = vld [vmem:[#allocation27_spill] sm:$0xff] }
 0x3fd   : > { %2316 = vrot.lane.b32.xlu1 %v12350_v9, %s5854_s15  ;;  %v12351_v18 = vld [vmem:[#allocation305_spill] sm:$0xff]  ;;  %v2618_v5 = vsel %vm2597_vm4, %v2563_v41, %v12353_v13  ;;  %v2674_v25 = vsel %vm2652_vm5, %v2619_v58, %v12356_v17  ;;  %5731 = vmatprep.mubr.msk.f32.mxu0 %vm2998_vm11, %v2946_v61  ;;  %v2261_v0 = vpop.permute.xlu1 %2260  ;;  %v2419_v62 = vpop.permute.xlu0 %2418  ;;  %v12367_v48 = vld [vmem:[#allocation30_spill] sm:$0xff]  ;;  %v12370_v24 = vld [vmem:[#allocation32_spill] sm:$0xff] }
 0x3fe   : > { %2314 = vrot.lane.b32.xlu0 %v12351_v18, %s5854_s15  ;;  %v2673_v30 = vsel %vm2652_vm5, %v2618_v5, %v12357_v4  ;;  %v12359_v2 = vld [vmem:[#allocation109_spill] sm:$0xff]  ;;  %v2947_v26 = vsel %vm2927_vm10, %v2892_v10, %v2419_v62  ;;  %v12368_v29 = vld [vmem:[#allocation110_spill] sm:$0xff]  ;;  %v12372_v38 = vld [vmem:[#allocation28_spill] sm:$0xff] }
 0x3ff   : > { %v1232_v32 = vrot.slane %v12359_v2, 1  ;;  %v12360_v36 = vld [vmem:[#allocation329_spill] sm:$0xff]  ;;  %v2728_v49 = vsel %vm2707_vm6, %v2673_v30, %v12361_v16  ;;  %v1239_v8 = vrot.slane %v12359_v2, 2  ;;  %v12371_v54 = vld [vmem:[#allocation158_spill] sm:$0xff]  ;;  %v12373_v20 = vld [vmem:[#allocation308_spill] sm:$0xff] }
 0x400   : > { %v2729_v57 = vsel %vm2707_vm6, %v2674_v25, %v12360_v36  ;;  %v2783_v56 = vsel %vm2762_vm7, %v2728_v49, %v12363_v1  ;;  %v12364_v11 = vld [vmem:[#allocation357_spill] sm:$0xff]  ;;  %5732 = vmatmul.mubr.msk.f32.gmra.mxu0 %vm2998_vm11, %v2947_v26  ;;  %v12374_v61 = vld [vmem:[#allocation232_spill] sm:$0xff]  ;;  %v12378_v50 = vld [vmem:[#allocation111_spill] sm:$0xff] }
 0x401   : > { %v2784_v35 = vsel %vm2762_vm7, %v2729_v57, %v12362_v7  ;;  %2478 = vrot.lane.b32.xlu1 %v12364_v11, %s5855_s26  ;;  %v12365_v39 = vld [vmem:[#allocation353_spill] sm:$0xff]  ;;  %v2838_v51 = vsel %vm2817_vm8, %v2783_v56, %v12367_v48  ;;  %v2423_v34 = vpop.permute.xlu1 %2422  ;;  %v2421_v63 = vpop.permute.xlu0 %2420  ;;  %v1234_v52 = vsel %vm956_vm1, %v1232_v32, %v1233_v19  ;;  %v12376_v45 = vld [vmem:[#allocation280_spill] sm:$0xff]  ;;  %v1241_v9 = vsel %vm1083_vm2, %v1239_v8, %v1240_v46  ;;  %v12379_v13 = vld [vmem:[#allocation331_spill] sm:$0xff] }
 0x402   : > { %2476 = vrot.lane.b32.xlu0 %v12365_v39, %s5855_s26  ;;  %v402_v53 = vld [vmem:[%s6110_s8 + $0x278] sm:$0x3]  ;;  %v2839_v55 = vsel %vm2817_vm8, %v2784_v35, %v12366_v6  ;;  %v2893_v15 = vsel %vm2872_vm9, %v2838_v51, %v8584_v14  ;;  %v2565_v14 = vsel %vm2542_vm3, %v12372_v38, %v12371_v54  ;;  %v1235_v58 = vrot.slane %v12378_v50, 1  ;;  %v12380_v42 = vld [vmem:[#allocation332_spill] sm:$0xff]  ;;  %v12384_v28 = vld [vmem:[#allocation31_spill] sm:$0xff] }
 0x403   : > { %v2894_v60 = vsel %vm2872_vm9, %v2839_v55, %v2261_v0  ;;  %v2948_v33 = vsel %vm2927_vm10, %v2893_v15, %v2421_v63  ;;  %v883_v40 = vsel %vm803_vm0, %v402_v53, %v12368_v29  ;;  %v12369_v23 = vld [vmem:[#allocation157_spill] sm:$0xff]  ;;  %v12381_v43 = vld [vmem:[#allocation372_spill] sm:$0xff]  ;;  %v1242_v32 = vrot.slane %v12378_v50, 2  ;;  %v12387_v11 = vld [vmem:[#allocation35_spill] sm:$0xff] }
 0x404   : > { %v2949_v59 = vsel %vm2927_vm10, %v2894_v60, %v2423_v34  ;;  %v2566_v37 = vsel %vm2542_vm3, %v12370_v24, %v12369_v23  ;;  %v12375_v44 = vld [vmem:[#allocation233_spill] sm:$0xff]  ;;  %5734 = vmatprep.mubr.msk.f32.mxu0 %vm2998_vm11, %v2948_v33  ;;  %v1237_v18 = vrot.slane %v883_v40, 1  ;;  %v12383_v30 = vld [vmem:[#allocation356_spill] sm:$0xff]  ;;  %v1244_v2 = vrot.slane %v883_v40, 2  ;;  %v12390_v48 = vld [vmem:[#allocation234_spill] sm:$0xff] }
 0x405   : > { %2320 = vrot.lane.b32.xlu1 %v1234_v52, %s5854_s15  ;;  %v2621_v3 = vsel %vm2597_vm4, %v2566_v37, %v12374_v61  ;;  %v2620_v12 = vsel %vm2597_vm4, %v2565_v14, %v12375_v44  ;;  %v12377_v47 = vld [vmem:[#allocation281_spill] sm:$0xff]  ;;  %5735 = vmatmul.mubr.msk.f32.gmra.mxu0 %vm2998_vm11, %v2949_v59  ;;  %v2265_v22 = vpop.permute.xlu1 %2264  ;;  %v2263_v21 = vpop.permute.xlu0 %2262  ;;  %v1236_v1 = vsel %vm956_vm1, %v1233_v19, %v1235_v58  ;;  %v12386_v56 = vld [vmem:[#allocation160_spill] sm:$0xff]  ;;  %v12391_v8 = vld [vmem:[#allocation235_spill] sm:$0xff] }
 0x406   : > { %2318 = vrot.lane.b32.xlu0 %v12373_v20, %s5854_s15  ;;  %v2676_v31 = vsel %vm2652_vm5, %v2621_v3, %v12376_v45  ;;  %v2675_v41 = vsel %vm2652_vm5, %v2620_v12, %v12377_v47  ;;  %v12382_v25 = vld [vmem:[#allocation373_spill] sm:$0xff]  ;;  %v1238_v35 = vsel %vm956_vm1, %v1235_v58, %v1237_v18  ;;  %v2568_v39 = vsel %vm2542_vm3, %v12387_v11, %v12386_v56  ;;  %v12389_v6 = vld [vmem:[#allocation36_spill] sm:$0xff]  ;;  %v12392_v19 = vld [vmem:[#allocation282_spill] sm:$0xff] }
 0x407   : > { %v2731_v5 = vsel %vm2707_vm6, %v2676_v31, %v12379_v13  ;;  %v2730_v27 = vsel %vm2707_vm6, %v2675_v41, %v12380_v42  ;;  %v12385_v0 = vld [vmem:[#allocation33_spill] sm:$0xff]  ;;  %v2623_v51 = vsel %vm2597_vm4, %v2568_v39, %v12390_v48  ;;  %v12393_v34 = vld [vmem:[#allocation283_spill] sm:$0xff]  ;;  %v12395_v40 = vld [vmem:[#allocation334_spill] sm:$0xff]  ;;  %v1245_v24 = vsel %vm1083_vm2, %v1242_v32, %v1244_v2 }
 0x408   : > { %v2786_v17 = vsel %vm2762_vm7, %v2731_v5, %v12381_v43  ;;  %v2785_v4 = vsel %vm2762_vm7, %v2730_v27, %v12382_v25  ;;  %v12388_v53 = vld [vmem:[#allocation161_spill] sm:$0xff]  ;;  %v2678_v60 = vsel %vm2652_vm5, %v2623_v51, %v12392_v19  ;;  %v1243_v37 = vsel %vm1083_vm2, %v1240_v46, %v1242_v32  ;;  %v12396_v54 = vld [vmem:[#allocation374_spill] sm:$0xff]  ;;  %v12397_v14 = vld [vmem:[#allocation375_spill] sm:$0xff] }
 0x409   : > { %2482 = vrot.lane.b32.xlu1 %v1241_v9, %s5855_s26  ;;  %v2841_v10 = vsel %vm2817_vm8, %v2786_v17, %v12384_v28  ;;  %v2840_v62 = vsel %vm2817_vm8, %v2785_v4, %v12385_v0  ;;  %v2427_v16 = vpop.permute.xlu1 %2426  ;;  %v2425_v49 = vpop.permute.xlu0 %2424  ;;  %v2567_v55 = vsel %vm2542_vm3, %v12389_v6, %v12388_v53  ;;  %v12394_v52 = vld [vmem:[#allocation333_spill] sm:$0xff]  ;;  %v12398_v61 = vld [vmem:[#allocation34_spill] sm:$0xff]  ;;  %v12404_v5 = vld [vmem:[#allocation236_spill] sm:$0xff] }
 0x40a   : > { %2480 = vrot.lane.b32.xlu0 %v12383_v30, %s5855_s26  ;;  %v2896_v36 = vsel %vm2872_vm9, %v2841_v10, %v2265_v22  ;;  %v2895_v57 = vsel %vm2872_vm9, %v2840_v62, %v2263_v21  ;;  %v2622_v15 = vsel %vm2597_vm4, %v2567_v55, %v12391_v8  ;;  %v2733_v29 = vsel %vm2707_vm6, %v2678_v60, %v12394_v52  ;;  %v12399_v44 = vld [vmem:[#allocation38_spill] sm:$0xff]  ;;  %v12400_v21 = vld [vmem:[#allocation164_spill] sm:$0xff]  ;;  %v12401_v9 = vld [vmem:[#allocation41_spill] sm:$0xff] }
 0x40b   : > { %v2951_v26 = vsel %vm2927_vm10, %v2896_v36, %v2427_v16  ;;  %v2950_v7 = vsel %vm2927_vm10, %v2895_v57, %v2425_v49  ;;  %v2677_v63 = vsel %vm2652_vm5, %v2622_v15, %v12393_v34  ;;  %v2788_v38 = vsel %vm2762_vm7, %v2733_v29, %v12396_v54  ;;  %v12402_v50 = vld [vmem:[#allocation165_spill] sm:$0xff]  ;;  %v12406_v17 = vld [vmem:[#allocation284_spill] sm:$0xff]  ;;  %v12408_v0 = vld [vmem:[#allocation335_spill] sm:$0xff] }
 0x40c   : > { %5737 = vmatprep.mubr.msk.f32.mxu0 %vm2998_vm11, %v2950_v7  ;;  %v2732_v23 = vsel %vm2707_vm6, %v2677_v63, %v12395_v40  ;;  %v2843_v3 = vsel %vm2817_vm8, %v2788_v38, %v12398_v61  ;;  %v2570_v18 = vsel %vm2542_vm3, %v12401_v9, %v12400_v21  ;;  %v12403_v58 = vld [vmem:[#allocation37_spill] sm:$0xff]  ;;  %v12409_v2 = vld [vmem:[#allocation336_spill] sm:$0xff]  ;;  %v12414_v48 = vld [vmem:[#allocation167_spill] sm:$0xff] }
 0x40d   : > { %2324 = vrot.lane.b32.xlu1 %v1238_v35, %s5854_s15  ;;  %5738 = vmatmul.mubr.msk.f32.gmra.mxu0 %vm2998_vm11, %v2951_v26  ;;  %v2269_v59 = vpop.permute.xlu1 %2268  ;;  %v2267_v33 = vpop.permute.xlu0 %2266  ;;  %v2787_v20 = vsel %vm2762_vm7, %v2732_v23, %v12397_v14  ;;  %v2569_v13 = vsel %vm2542_vm3, %v12403_v58, %v12402_v50  ;;  %v2625_v42 = vsel %vm2597_vm4, %v2570_v18, %v12404_v5  ;;  %v12405_v27 = vld [vmem:[#allocation237_spill] sm:$0xff]  ;;  %v12410_v36 = vld [vmem:[#allocation376_spill] sm:$0xff]  ;;  %v12412_v26 = vld [vmem:[#allocation39_spill] sm:$0xff] }
 0x40e   : > { %2322 = vrot.lane.b32.xlu0 %v1236_v1, %s5854_s15  ;;  %v2842_v12 = vsel %vm2817_vm8, %v2787_v20, %v12399_v44  ;;  %v2898_v45 = vsel %vm2872_vm9, %v2843_v3, %v2269_v59  ;;  %v2624_v43 = vsel %vm2597_vm4, %v2569_v13, %v12405_v27  ;;  %v2680_v25 = vsel %vm2652_vm5, %v2625_v42, %v12406_v17  ;;  %v12407_v4 = vld [vmem:[#allocation285_spill] sm:$0xff]  ;;  %v12413_v35 = vld [vmem:[#allocation42_spill] sm:$0xff]  ;;  %v12416_v15 = vld [vmem:[#allocation168_spill] sm:$0xff] }
 0x40f   : > { %v2897_v46 = vsel %vm2872_vm9, %v2842_v12, %v2267_v33  ;;  %v2679_v30 = vsel %vm2652_vm5, %v2624_v43, %v12407_v4  ;;  %v2735_v62 = vsel %vm2707_vm6, %v2680_v25, %v12408_v0  ;;  %v12411_v16 = vld [vmem:[#allocation377_spill] sm:$0xff]  ;;  %v12417_v19 = vld [vmem:[#allocation40_spill] sm:$0xff]  ;;  %v12418_v34 = vld [vmem:[#allocation238_spill] sm:$0xff] }
 0x410   : > { %v2734_v32 = vsel %vm2707_vm6, %v2679_v30, %v12409_v2  ;;  %v2790_v57 = vsel %vm2762_vm7, %v2735_v62, %v12410_v36  ;;  %v12415_v51 = vld [vmem:[#allocation45_spill] sm:$0xff]  ;;  %v2571_v60 = vsel %vm2542_vm3, %v12417_v19, %v12416_v15  ;;  %v12419_v59 = vld [vmem:[#allocation239_spill] sm:$0xff]  ;;  %v12420_v52 = vld [vmem:[#allocation286_spill] sm:$0xff] }
 0x411   : > { %2486 = vrot.lane.b32.xlu1 %v1245_v24, %s5855_s26  ;;  %v2431_v31 = vpop.permute.xlu1 %2430  ;;  %v2429_v47 = vpop.permute.xlu0 %2428  ;;  %v2789_v49 = vsel %vm2762_vm7, %v2734_v32, %v12411_v16  ;;  %v2845_v7 = vsel %vm2817_vm8, %v2790_v57, %v12412_v26  ;;  %v2572_v8 = vsel %vm2542_vm3, %v12415_v51, %v12414_v48  ;;  %v2626_v33 = vsel %vm2597_vm4, %v2571_v60, %v12419_v59  ;;  %v12421_v40 = vld [vmem:[#allocation287_spill] sm:$0xff]  ;;  %v12422_v54 = vld [vmem:[#allocation337_spill] sm:$0xff]  ;;  %v12423_v14 = vld [vmem:[#allocation338_spill] sm:$0xff] }
 0x412   : > { %2484 = vrot.lane.b32.xlu0 %v1243_v37, %s5855_s26  ;;  %v2953_v41 = vsel %vm2927_vm10, %v2898_v45, %v2431_v31  ;;  %v2952_v22 = vsel %vm2927_vm10, %v2897_v46, %v2429_v47  ;;  %v2844_v1 = vsel %vm2817_vm8, %v2789_v49, %v12413_v35  ;;  %v2627_v63 = vsel %vm2597_vm4, %v2572_v8, %v12418_v34  ;;  %v12424_v61 = vld [vmem:[#allocation378_spill] sm:$0xff]  ;;  %v12425_v44 = vld [vmem:[#allocation379_spill] sm:$0xff]  ;;  %v12427_v31 = vld [vmem:[#allocation49_spill] sm:$0xff] }
 0x413   : > { %5740 = vmatprep.mubr.msk.f32.mxu0 %vm2998_vm11, %v2952_v22  ;;  %v2682_v29 = vsel %vm2652_vm5, %v2627_v63, %v12420_v52  ;;  %v2681_v23 = vsel %vm2652_vm5, %v2626_v33, %v12421_v40  ;;  %v12426_v45 = vld [vmem:[#allocation43_spill] sm:$0xff]  ;;  %v12428_v58 = vld [vmem:[#allocation170_spill] sm:$0xff]  ;;  %v12432_v17 = vld [vmem:[#allocation240_spill] sm:$0xff] }
 0x414   : > { %5741 = vmatmul.mubr.msk.f32.gmra.mxu0 %vm2998_vm11, %v2953_v41  ;;  %v2737_v38 = vsel %vm2707_vm6, %v2682_v29, %v12422_v54  ;;  %v2736_v20 = vsel %vm2707_vm6, %v2681_v23, %v12423_v14  ;;  %v12429_v13 = vld [vmem:[#allocation46_spill] sm:$0xff]  ;;  %v12430_v42 = vld [vmem:[#allocation171_spill] sm:$0xff]  ;;  %v12433_v4 = vld [vmem:[#allocation241_spill] sm:$0xff] }
 0x415   : > { %v2273_v28 = vpop.permute.xlu1 %2272  ;;  %v2271_v10 = vpop.permute.xlu0 %2270  ;;  %v2792_v3 = vsel %vm2762_vm7, %v2737_v38, %v12424_v61  ;;  %v2791_v12 = vsel %vm2762_vm7, %v2736_v20, %v12425_v44  ;;  %v2574_v5 = vsel %vm2542_vm3, %v12429_v13, %v12428_v58  ;;  %v12431_v27 = vld [vmem:[#allocation47_spill] sm:$0xff]  ;;  %v12435_v0 = vld [vmem:[#allocation289_spill] sm:$0xff]  ;;  %v12437_v16 = vld [vmem:[#allocation340_spill] sm:$0xff] }
 0x416   : > { %v2900_v56 = vsel %vm2872_vm9, %v2845_v7, %v2273_v28  ;;  %v2899_v11 = vsel %vm2872_vm9, %v2844_v1, %v2271_v10  ;;  %v2847_v46 = vsel %vm2817_vm8, %v2792_v3, %v12426_v45  ;;  %v2846_v47 = vsel %vm2817_vm8, %v2791_v12, %v12427_v31  ;;  %v12434_v28 = vld [vmem:[#allocation288_spill] sm:$0xff]  ;;  %v12436_v36 = vld [vmem:[#allocation339_spill] sm:$0xff]  ;;  %v12439_v35 = vld [vmem:[#allocation381_spill] sm:$0xff] }
 0x417   : > { %v2573_v43 = vsel %vm2542_vm3, %v12431_v27, %v12430_v42  ;;  %v2629_v25 = vsel %vm2597_vm4, %v2574_v5, %v12432_v17  ;;  %v12438_v26 = vld [vmem:[#allocation380_spill] sm:$0xff]  ;;  %v12442_v19 = vld [vmem:[#allocation174_spill] sm:$0xff]  ;;  %v12443_v60 = vld [vmem:[#allocation55_spill] sm:$0xff] }
 0x418   : > { %v2628_v30 = vsel %vm2597_vm4, %v2573_v43, %v12433_v4  ;;  %v2684_v10 = vsel %vm2652_vm5, %v2629_v25, %v12434_v28  ;;  %v2576_v34 = vsel %vm2542_vm3, %v12443_v60, %v12442_v19  ;;  %v12444_v63 = vld [vmem:[#allocation175_spill] sm:$0xff]  ;;  %v12445_v59 = vld [vmem:[#allocation50_spill] sm:$0xff]  ;;  %v12450_v61 = vld [vmem:[#allocation341_spill] sm:$0xff] }
 0x419   : > { %v2435_v39 = vpop.permute.xlu1 %2434  ;;  %v2433_v53 = vpop.permute.xlu0 %2432  ;;  %v2683_v62 = vsel %vm2652_vm5, %v2628_v30, %v12435_v0  ;;  %v2739_v57 = vsel %vm2707_vm6, %v2684_v10, %v12436_v36  ;;  %v2575_v33 = vsel %vm2542_vm3, %v12445_v59, %v12444_v63  ;;  %v12446_v52 = vld [vmem:[#allocation242_spill] sm:$0xff]  ;;  %v12447_v40 = vld [vmem:[#allocation243_spill] sm:$0xff]  ;;  %v12456_v27 = vld [vmem:[#allocation177_spill] sm:$0xff] }
 0x41a   : > { %v2955_v6 = vsel %vm2927_vm10, %v2900_v56, %v2435_v39  ;;  %v2954_v55 = vsel %vm2927_vm10, %v2899_v11, %v2433_v53  ;;  %v2738_v49 = vsel %vm2707_vm6, %v2683_v62, %v12437_v16  ;;  %v2794_v7 = vsel %vm2762_vm7, %v2739_v57, %v12438_v26  ;;  %v12440_v56 = vld [vmem:[#allocation120_spill] sm:$0xff]  ;;  %v12449_v54 = vld [vmem:[#allocation291_spill] sm:$0xff]  ;;  %v12451_v44 = vld [vmem:[#allocation342_spill] sm:$0xff] }
 0x41b   : > { %5743 = vmatprep.mubr.msk.f32.mxu0 %vm2998_vm11, %v2954_v55  ;;  %v2793_v1 = vsel %vm2762_vm7, %v2738_v49, %v12439_v35  ;;  %v2849_v11 = vsel %vm2817_vm8, %v2794_v7, %v12440_v56  ;;  %v12441_v39 = vld [vmem:[#allocation128_spill] sm:$0xff]  ;;  %v2631_v29 = vsel %vm2597_vm4, %v2576_v34, %v12446_v52  ;;  %v2630_v23 = vsel %vm2597_vm4, %v2575_v33, %v12447_v40  ;;  %v12452_v45 = vld [vmem:[#allocation382_spill] sm:$0xff]  ;;  %v12453_v31 = vld [vmem:[#allocation383_spill] sm:$0xff] }
 0x41c   : > { %5744 = vmatmul.mubr.msk.f32.gmra.mxu0 %vm2998_vm11, %v2955_v6  ;;  %v2848_v53 = vsel %vm2817_vm8, %v2793_v1, %v12441_v39  ;;  %v2685_v38 = vsel %vm2652_vm5, %v2630_v23, %v12449_v54  ;;  %v12457_v43 = vld [vmem:[#allocation59_spill] sm:$0xff]  ;;  %v12458_v25 = vld [vmem:[#allocation178_spill] sm:$0xff]  ;;  %v12460_v28 = vld [vmem:[#allocation244_spill] sm:$0xff] }
 0x41d   : > { %v2277_v24 = vpop.permute.xlu1 %2276  ;;  %v2275_v37 = vpop.permute.xlu0 %2274  ;;  %v2740_v12 = vsel %vm2707_vm6, %v2685_v38, %v12451_v44  ;;  %v2578_v17 = vsel %vm2542_vm3, %v12457_v43, %v12456_v27  ;;  %v12459_v4 = vld [vmem:[#allocation54_spill] sm:$0xff]  ;;  %v12461_v0 = vld [vmem:[#allocation245_spill] sm:$0xff]  ;;  %v12464_v26 = vld [vmem:[#allocation343_spill] sm:$0xff] }
 0x41e   : > { %v2902_v41 = vsel %vm2872_vm9, %v2847_v46, %v2277_v24  ;;  %v2901_v22 = vsel %vm2872_vm9, %v2846_v47, %v2275_v37  ;;  %v12448_v24 = vld [vmem:[#allocation290_spill] sm:$0xff]  ;;  %v2795_v47 = vsel %vm2762_vm7, %v2740_v12, %v12453_v31  ;;  %v2577_v30 = vsel %vm2542_vm3, %v12459_v4, %v12458_v25  ;;  %v12463_v36 = vld [vmem:[#allocation293_spill] sm:$0xff]  ;;  %v12465_v35 = vld [vmem:[#allocation344_spill] sm:$0xff] }
 0x41f   : > { %v2686_v37 = vsel %vm2652_vm5, %v2631_v29, %v12448_v24  ;;  %v2633_v10 = vsel %vm2597_vm4, %v2578_v17, %v12460_v28  ;;  %v2632_v62 = vsel %vm2597_vm4, %v2577_v30, %v12461_v0  ;;  %v12466_v56 = vld [vmem:[#allocation384_spill] sm:$0xff]  ;;  %v12467_v39 = vld [vmem:[#allocation385_spill] sm:$0xff]  ;;  %v12471_v33 = vld [vmem:[#allocation62_spill] sm:$0xff] }
 0x420   : > { %v2741_v3 = vsel %vm2707_vm6, %v2686_v37, %v12450_v61  ;;  %v2687_v57 = vsel %vm2652_vm5, %v2632_v62, %v12463_v36  ;;  %v12470_v59 = vld [vmem:[#allocation180_spill] sm:$0xff]  ;;  %v12472_v29 = vld [vmem:[#allocation181_spill] sm:$0xff]  ;;  %v12473_v40 = vld [vmem:[#allocation63_spill] sm:$0xff] }
 0x421   : > { %v2439_v21 = vpop.permute.xlu1 %2438  ;;  %v2437_v9 = vpop.permute.xlu0 %2436  ;;  %v2796_v46 = vsel %vm2762_vm7, %v2741_v3, %v12452_v45  ;;  %v2742_v1 = vsel %vm2707_vm6, %v2687_v57, %v12465_v35  ;;  %v2580_v52 = vsel %vm2542_vm3, %v12471_v33, %v12470_v59  ;;  %v2579_v23 = vsel %vm2542_vm3, %v12473_v40, %v12472_v29  ;;  %v12474_v24 = vld [vmem:[#allocation246_spill] sm:$0xff]  ;;  %v12475_v54 = vld [vmem:[#allocation247_spill] sm:$0xff]  ;;  %v12479_v31 = vld [vmem:[#allocation345_spill] sm:$0xff] }
 0x422   : > { %v2957_v18 = vsel %vm2927_vm10, %v2902_v41, %v2439_v21  ;;  %v2956_v50 = vsel %vm2927_vm10, %v2901_v22, %v2437_v9  ;;  %v12454_v41 = vld [vmem:[#allocation123_spill] sm:$0xff]  ;;  %v2635_v37 = vsel %vm2597_vm4, %v2580_v52, %v12474_v24  ;;  %v2634_v38 = vsel %vm2597_vm4, %v2579_v23, %v12475_v54  ;;  %v12478_v45 = vld [vmem:[#allocation182_spill] sm:$0xff]  ;;  %v12484_v4 = vld [vmem:[#allocation184_spill] sm:$0xff] }
 0x423   : > { %5746 = vmatprep.mubr.msk.f32.mxu0 %vm2998_vm11, %v2956_v50  ;;  %v2851_v22 = vsel %vm2817_vm8, %v2796_v46, %v12454_v41  ;;  %v12455_v21 = vld [vmem:[#allocation131_spill] sm:$0xff]  ;;  %v12480_v41 = vld [vmem:[#allocation386_spill] sm:$0xff]  ;;  %v12485_v30 = vld [vmem:[#allocation69_spill] sm:$0xff] }
 0x424   : > { %5747 = vmatmul.mubr.msk.f32.gmra.mxu0 %vm2998_vm11, %v2957_v18  ;;  %v2850_v9 = vsel %vm2817_vm8, %v2795_v47, %v12455_v21  ;;  %v12477_v61 = vld [vmem:[#allocation295_spill] sm:$0xff]  ;;  %v2582_v28 = vsel %vm2542_vm3, %v12485_v30, %v12484_v4  ;;  %v12487_v0 = vld [vmem:[#allocation64_spill] sm:$0xff]  ;;  %v12489_v36 = vld [vmem:[#allocation249_spill] sm:$0xff] }
 0x425   : > { %v2281_v2 = vpop.permute.xlu1 %2280  ;;  %v2279_v32 = vpop.permute.xlu0 %2278  ;;  %v2689_v3 = vsel %vm2652_vm5, %v2634_v38, %v12477_v61  ;;  %v12481_v21 = vld [vmem:[#allocation387_spill] sm:$0xff]  ;;  %v12499_v23 = vld [vmem:[#allocation73_spill] sm:$0xff]  ;;  %v12501_v54 = vld [vmem:[#allocation68_spill] sm:$0xff] }
 0x426   : > { %v2904_v6 = vsel %vm2872_vm9, %v2849_v11, %v2281_v2  ;;  %v2903_v55 = vsel %vm2872_vm9, %v2848_v53, %v2279_v32  ;;  %v12462_v2 = vld [vmem:[#allocation292_spill] sm:$0xff]  ;;  %v2797_v53 = vsel %vm2762_vm7, %v2742_v1, %v12467_v39  ;;  %v2744_v47 = vsel %vm2707_vm6, %v2689_v3, %v12479_v31  ;;  %v12493_v39 = vld [vmem:[#allocation346_spill] sm:$0xff]  ;;  %v12498_v40 = vld [vmem:[#allocation187_spill] sm:$0xff] }
 0x427   : > { %v2688_v32 = vsel %vm2652_vm5, %v2633_v10, %v12462_v2  ;;  %v12486_v10 = vld [vmem:[#allocation185_spill] sm:$0xff]  ;;  %v12488_v2 = vld [vmem:[#allocation248_spill] sm:$0xff]  ;;  %v2584_v24 = vsel %vm2542_vm3, %v12499_v23, %v12498_v40  ;;  %v12503_v61 = vld [vmem:[#allocation251_spill] sm:$0xff] }
 0x428   : > { %v2743_v7 = vsel %vm2707_vm6, %v2688_v32, %v12464_v26  ;;  %v2581_v62 = vsel %vm2542_vm3, %v12487_v0, %v12486_v10  ;;  %v2637_v32 = vsel %vm2597_vm4, %v2582_v28, %v12488_v2  ;;  %v12491_v26 = vld [vmem:[#allocation297_spill] sm:$0xff]  ;;  %v12512_v0 = vld [vmem:[#allocation190_spill] sm:$0xff] }
 0x429   : > { %v2443_v48 = vpop.permute.xlu1 %2442  ;;  %v2441_v51 = vpop.permute.xlu0 %2440  ;;  %v2798_v11 = vsel %vm2762_vm7, %v2743_v7, %v12466_v56  ;;  %v2636_v57 = vsel %vm2597_vm4, %v2581_v62, %v12489_v36  ;;  %v12492_v56 = vld [vmem:[#allocation81_spill] sm:$0xff]  ;;  %v12513_v62 = vld [vmem:[#allocation74_spill] sm:$0xff]  ;;  %v12515_v36 = vld [vmem:[#allocation75_spill] sm:$0xff] }
 0x42a   : > { %v2959_v8 = vsel %vm2927_vm10, %v2904_v6, %v2443_v48  ;;  %v2958_v15 = vsel %vm2927_vm10, %v2903_v55, %v2441_v51  ;;  %v12468_v6 = vld [vmem:[#allocation127_spill] sm:$0xff]  ;;  %v12469_v48 = vld [vmem:[#allocation136_spill] sm:$0xff]  ;;  %v2691_v7 = vsel %vm2652_vm5, %v2636_v57, %v12491_v26  ;;  %v2586_v2 = vsel %vm2542_vm3, %v12513_v62, %v12512_v0  ;;  %v12517_v26 = vld [vmem:[#allocation253_spill] sm:$0xff] }
 0x42b   : > { %5749 = vmatprep.mubr.msk.f32.mxu0 %vm2998_vm11, %v2958_v15  ;;  %v2853_v55 = vsel %vm2817_vm8, %v2798_v11, %v12468_v6  ;;  %v2852_v51 = vsel %vm2817_vm8, %v2797_v53, %v12469_v48  ;;  %v2746_v53 = vsel %vm2707_vm6, %v2691_v7, %v12493_v39  ;;  %v12494_v6 = vld [vmem:[#allocation388_spill] sm:$0xff]  ;;  %v12495_v48 = vld [vmem:[#allocation389_spill] sm:$0xff] }
 0x42c   : > { %5750 = vmatmul.mubr.msk.f32.gmra.mxu0 %vm2998_vm11, %v2959_v8 }
 0x42d   : > { %v2285_v14 = vpop.permute.xlu1 %2284  ;;  %v2283_v20 = vpop.permute.xlu0 %2282 }
 0x42e   : > { %v2906_v18 = vsel %vm2872_vm9, %v2851_v22, %v2285_v14  ;;  %v2905_v50 = vsel %vm2872_vm9, %v2850_v9, %v2283_v20  ;;  %v12476_v14 = vld [vmem:[#allocation294_spill] sm:$0xff]  ;;  %v2799_v9 = vsel %vm2762_vm7, %v2744_v47, %v12481_v21  ;;  %v12507_v21 = vld [vmem:[#allocation347_spill] sm:$0xff] }
 0x42f   : > { %v2690_v20 = vsel %vm2652_vm5, %v2635_v37, %v12476_v14  ;;  %v12500_v37 = vld [vmem:[#allocation188_spill] sm:$0xff]  ;;  %v12502_v14 = vld [vmem:[#allocation250_spill] sm:$0xff] }
 0x430   : > { %v2745_v46 = vsel %vm2707_vm6, %v2690_v20, %v12478_v45  ;;  %v2583_v38 = vsel %vm2542_vm3, %v12501_v54, %v12500_v37  ;;  %v2639_v20 = vsel %vm2597_vm4, %v2584_v24, %v12502_v14  ;;  %v12505_v45 = vld [vmem:[#allocation299_spill] sm:$0xff]  ;;  %v12526_v54 = vld [vmem:[#allocation194_spill] sm:$0xff] }
 0x431   : > { %v2447_v58 = vpop.permute.xlu1 %2446  ;;  %v2445_v13 = vpop.permute.xlu0 %2444  ;;  %v2800_v22 = vsel %vm2762_vm7, %v2745_v46, %v12480_v41  ;;  %v2638_v3 = vsel %vm2597_vm4, %v2583_v38, %v12503_v61  ;;  %v12506_v41 = vld [vmem:[#allocation86_spill] sm:$0xff]  ;;  %v12527_v38 = vld [vmem:[#allocation83_spill] sm:$0xff] }
 0x432   : > { %v2961_v5 = vsel %vm2927_vm10, %v2906_v18, %v2447_v58  ;;  %v2960_v42 = vsel %vm2927_vm10, %v2905_v50, %v2445_v13  ;;  %v12482_v18 = vld [vmem:[#allocation132_spill] sm:$0xff]  ;;  %v2693_v46 = vsel %vm2652_vm5, %v2638_v3, %v12505_v45  ;;  %v2588_v14 = vsel %vm2542_vm3, %v12527_v38, %v12526_v54  ;;  %v12529_v61 = vld [vmem:[#allocation78_spill] sm:$0xff]  ;;  %v12531_v45 = vld [vmem:[#allocation255_spill] sm:$0xff] }
 0x433   : > { %5752 = vmatprep.mubr.msk.f32.mxu0 %vm2998_vm11, %v2960_v42  ;;  %v2855_v50 = vsel %vm2817_vm8, %v2800_v22, %v12482_v18  ;;  %v12483_v58 = vld [vmem:[#allocation140_spill] sm:$0xff]  ;;  %v12508_v18 = vld [vmem:[#allocation390_spill] sm:$0xff] }
 0x434   : > { %5753 = vmatmul.mubr.msk.f32.gmra.mxu0 %vm2998_vm11, %v2961_v5  ;;  %v2854_v13 = vsel %vm2817_vm8, %v2799_v9, %v12483_v58  ;;  %v2748_v9 = vsel %vm2707_vm6, %v2693_v46, %v12507_v21  ;;  %v12509_v58 = vld [vmem:[#allocation391_spill] sm:$0xff] }
 0x435   : > { %v2289_v16 = vpop.permute.xlu1 %2288  ;;  %v2287_v49 = vpop.permute.xlu0 %2286 }
 0x436   : > { %v2908_v8 = vsel %vm2872_vm9, %v2853_v55, %v2289_v16  ;;  %v2907_v15 = vsel %vm2872_vm9, %v2852_v51, %v2287_v49  ;;  %v12490_v16 = vld [vmem:[#allocation296_spill] sm:$0xff]  ;;  %v2801_v51 = vsel %vm2762_vm7, %v2746_v53, %v12495_v48 }
 0x437   : > { %v2692_v49 = vsel %vm2652_vm5, %v2637_v32, %v12490_v16  ;;  %v12514_v32 = vld [vmem:[#allocation191_spill] sm:$0xff]  ;;  %v12516_v16 = vld [vmem:[#allocation252_spill] sm:$0xff] }
 0x438   : > { %v2747_v11 = vsel %vm2707_vm6, %v2692_v49, %v12492_v56  ;;  %v2585_v57 = vsel %vm2542_vm3, %v12515_v36, %v12514_v32  ;;  %v2641_v49 = vsel %vm2597_vm4, %v2586_v2, %v12516_v16  ;;  %v12519_v56 = vld [vmem:[#allocation301_spill] sm:$0xff]  ;;  %v12521_v48 = vld [vmem:[#allocation348_spill] sm:$0xff]  ;;  %v12540_v36 = vld [vmem:[#allocation198_spill] sm:$0xff] }
 0x439   : > { %v2451_v19 = vpop.permute.xlu1 %2450  ;;  %v2449_v60 = vpop.permute.xlu0 %2448  ;;  %v2802_v55 = vsel %vm2762_vm7, %v2747_v11, %v12494_v6  ;;  %v2640_v7 = vsel %vm2597_vm4, %v2585_v57, %v12517_v26  ;;  %v12520_v6 = vld [vmem:[#allocation192_spill] sm:$0xff]  ;;  %v12541_v57 = vld [vmem:[#allocation87_spill] sm:$0xff]  ;;  %v12543_v26 = vld [vmem:[#allocation82_spill] sm:$0xff] }
 0x43a   : > { %v2963_v34 = vsel %vm2927_vm10, %v2908_v8, %v2451_v19  ;;  %v2962_v63 = vsel %vm2927_vm10, %v2907_v15, %v2449_v60  ;;  %v12496_v8 = vld [vmem:[#allocation135_spill] sm:$0xff]  ;;  %v2695_v11 = vsel %vm2652_vm5, %v2640_v7, %v12519_v56  ;;  %v2590_v16 = vsel %vm2542_vm3, %v12541_v57, %v12540_v36  ;;  %v12545_v56 = vld [vmem:[#allocation257_spill] sm:$0xff] }
 0x43b   : > { %5755 = vmatprep.mubr.msk.f32.mxu0 %vm2998_vm11, %v2962_v63  ;;  %v2857_v15 = vsel %vm2817_vm8, %v2802_v55, %v12496_v8  ;;  %v12497_v19 = vld [vmem:[#allocation143_spill] sm:$0xff]  ;;  %v12522_v8 = vld [vmem:[#allocation392_spill] sm:$0xff] }
 0x43c   : > { %5756 = vmatmul.mubr.msk.f32.gmra.mxu0 %vm2998_vm11, %v2963_v34  ;;  %v2856_v60 = vsel %vm2817_vm8, %v2801_v51, %v12497_v19  ;;  %v2750_v51 = vsel %vm2707_vm6, %v2695_v11, %v12521_v48  ;;  %v12523_v19 = vld [vmem:[#allocation393_spill] sm:$0xff] }
 0x43d   : > { %v2293_v44 = vpop.permute.xlu1 %2292  ;;  %v2291_v12 = vpop.permute.xlu0 %2290 }
 0x43e   : > { %v2910_v5 = vsel %vm2872_vm9, %v2855_v50, %v2293_v44  ;;  %v2909_v42 = vsel %vm2872_vm9, %v2854_v13, %v2291_v12  ;;  %v12504_v44 = vld [vmem:[#allocation298_spill] sm:$0xff]  ;;  %v2803_v13 = vsel %vm2762_vm7, %v2748_v9, %v12509_v58 }
 0x43f   : > { %v2694_v12 = vsel %vm2652_vm5, %v2639_v20, %v12504_v44  ;;  %v12528_v20 = vld [vmem:[#allocation195_spill] sm:$0xff]  ;;  %v12530_v44 = vld [vmem:[#allocation254_spill] sm:$0xff] }
 0x440   : > { %v2749_v22 = vsel %vm2707_vm6, %v2694_v12, %v12506_v41  ;;  %v2587_v3 = vsel %vm2542_vm3, %v12529_v61, %v12528_v20  ;;  %v2643_v12 = vsel %vm2597_vm4, %v2588_v14, %v12530_v44  ;;  %v12533_v41 = vld [vmem:[#allocation303_spill] sm:$0xff]  ;;  %v12535_v58 = vld [vmem:[#allocation350_spill] sm:$0xff] }
 0x441   : > { %v2455_v27 = vpop.permute.xlu1 %2454  ;;  %v2453_v43 = vpop.permute.xlu0 %2452  ;;  %v2804_v50 = vsel %vm2762_vm7, %v2749_v22, %v12508_v18  ;;  %v2642_v46 = vsel %vm2597_vm4, %v2587_v3, %v12531_v45  ;;  %v12534_v18 = vld [vmem:[#allocation349_spill] sm:$0xff]  ;;  %v12554_v61 = vld [vmem:[#allocation202_spill] sm:$0xff]  ;;  %v12557_v45 = vld [vmem:[#allocation91_spill] sm:$0xff] }
 0x442   : > { %v2965_v17 = vsel %vm2927_vm10, %v2910_v5, %v2455_v27  ;;  %v2964_v25 = vsel %vm2927_vm10, %v2909_v42, %v2453_v43  ;;  %v12510_v5 = vld [vmem:[#allocation139_spill] sm:$0xff]  ;;  %v12511_v27 = vld [vmem:[#allocation148_spill] sm:$0xff]  ;;  %v2697_v22 = vsel %vm2652_vm5, %v2642_v46, %v12533_v41  ;;  %v12555_v3 = vld [vmem:[#allocation90_spill] sm:$0xff] }
 0x443   : > { %5758 = vmatprep.mubr.msk.f32.mxu0 %vm2998_vm11, %v2964_v25  ;;  %v2859_v42 = vsel %vm2817_vm8, %v2804_v50, %v12510_v5  ;;  %v2858_v43 = vsel %vm2817_vm8, %v2803_v13, %v12511_v27  ;;  %v2752_v13 = vsel %vm2707_vm6, %v2697_v22, %v12535_v58  ;;  %v12536_v5 = vld [vmem:[#allocation394_spill] sm:$0xff]  ;;  %v12537_v27 = vld [vmem:[#allocation395_spill] sm:$0xff]  ;;  %v2592_v44 = vsel %vm2542_vm3, %v12555_v3, %v12554_v61 }
 0x444   : > { %5759 = vmatmul.mubr.msk.f32.gmra.mxu0 %vm2998_vm11, %v2965_v17  ;;  %v12559_v41 = vld [vmem:[#allocation258_spill] sm:$0xff] }
 0x445   : > { %v2297_v35 = vpop.permute.xlu1 %2296  ;;  %v2295_v1 = vpop.permute.xlu0 %2294 }
 0x446   : > { %v2912_v34 = vsel %vm2872_vm9, %v2857_v15, %v2297_v35  ;;  %v2911_v63 = vsel %vm2872_vm9, %v2856_v60, %v2295_v1  ;;  %v12518_v35 = vld [vmem:[#allocation300_spill] sm:$0xff]  ;;  %v2805_v60 = vsel %vm2762_vm7, %v2750_v51, %v12523_v19 }
 0x447   : > { %v2696_v1 = vsel %vm2652_vm5, %v2641_v49, %v12518_v35  ;;  %v12542_v49 = vld [vmem:[#allocation199_spill] sm:$0xff]  ;;  %v12544_v35 = vld [vmem:[#allocation256_spill] sm:$0xff] }
 0x448   : > { %v2751_v55 = vsel %vm2707_vm6, %v2696_v1, %v12520_v6  ;;  %v2589_v7 = vsel %vm2542_vm3, %v12543_v26, %v12542_v49  ;;  %v2645_v1 = vsel %vm2597_vm4, %v2590_v16, %v12544_v35  ;;  %v12547_v6 = vld [vmem:[#allocation304_spill] sm:$0xff]  ;;  %v12568_v26 = vld [vmem:[#allocation206_spill] sm:$0xff] }
 0x449   : > { %v2459_v59 = vpop.permute.xlu1 %2458  ;;  %v2457_v33 = vpop.permute.xlu0 %2456  ;;  %v2806_v15 = vsel %vm2762_vm7, %v2751_v55, %v12522_v8  ;;  %v2644_v11 = vsel %vm2597_vm4, %v2589_v7, %v12545_v56  ;;  %v12548_v8 = vld [vmem:[#allocation351_spill] sm:$0xff]  ;;  %v12549_v19 = vld [vmem:[#allocation352_spill] sm:$0xff] }
 0x44a   : > { %v2967_v52 = vsel %vm2927_vm10, %v2912_v34, %v2459_v59  ;;  %v2966_v29 = vsel %vm2927_vm10, %v2911_v63, %v2457_v33  ;;  %v12524_v34 = vld [vmem:[#allocation144_spill] sm:$0xff]  ;;  %v2699_v55 = vsel %vm2652_vm5, %v2644_v11, %v12547_v6  ;;  %v12573_v6 = vld [vmem:[#allocation105_spill] sm:$0xff] }
 0x44b   : > { %5761 = vmatprep.mubr.msk.f32.mxu0 %vm2998_vm11, %v2966_v29  ;;  %v2861_v63 = vsel %vm2817_vm8, %v2806_v15, %v12524_v34  ;;  %v12525_v59 = vld [vmem:[#allocation152_spill] sm:$0xff] }
 0x44c   : > { %5762 = vmatmul.mubr.msk.f32.gmra.mxu0 %vm2998_vm11, %v2967_v52  ;;  %v2860_v33 = vsel %vm2817_vm8, %v2805_v60, %v12525_v59  ;;  %v2754_v60 = vsel %vm2707_vm6, %v2699_v55, %v12549_v19  ;;  %v12550_v34 = vld [vmem:[#allocation396_spill] sm:$0xff]  ;;  %v12551_v59 = vld [vmem:[#allocation397_spill] sm:$0xff] }
 0x44d   : > { %v2301_v31 = vpop.permute.xlu1 %2300  ;;  %v2299_v47 = vpop.permute.xlu0 %2298  ;;  %v12569_v7 = vld [vmem:[#allocation96_spill] sm:$0xff] }
 0x44e   : > { %v2914_v17 = vsel %vm2872_vm9, %v2859_v42, %v2301_v31  ;;  %v2913_v25 = vsel %vm2872_vm9, %v2858_v43, %v2299_v47  ;;  %v12532_v31 = vld [vmem:[#allocation302_spill] sm:$0xff]  ;;  %v2807_v43 = vsel %vm2762_vm7, %v2752_v13, %v12537_v27  ;;  %v12563_v27 = vld [vmem:[#allocation355_spill] sm:$0xff]  ;;  %v2594_v35 = vsel %vm2542_vm3, %v12569_v7, %v12568_v26  ;;  %v12571_v56 = vld [vmem:[#allocation92_spill] sm:$0xff] }
 0x44f   : > { %v2698_v47 = vsel %vm2652_vm5, %v2643_v12, %v12532_v31  ;;  %v12556_v12 = vld [vmem:[#allocation203_spill] sm:$0xff]  ;;  %v12558_v31 = vld [vmem:[#allocation101_spill] sm:$0xff] }
 0x450   : > { %v2753_v50 = vsel %vm2707_vm6, %v2698_v47, %v12534_v18  ;;  %v2591_v46 = vsel %vm2542_vm3, %v12557_v45, %v12556_v12  ;;  %v2647_v47 = vsel %vm2597_vm4, %v2592_v44, %v12558_v31  ;;  %v12561_v18 = vld [vmem:[#allocation307_spill] sm:$0xff]  ;;  %v12582_v45 = vld [vmem:[#allocation208_spill] sm:$0xff] }
 0x451   : > { %v2463_v4 = vpop.permute.xlu1 %2462  ;;  %v2461_v30 = vpop.permute.xlu0 %2460  ;;  %v2808_v42 = vsel %vm2762_vm7, %v2753_v50, %v12536_v5  ;;  %v2646_v22 = vsel %vm2597_vm4, %v2591_v46, %v12559_v41  ;;  %v12562_v5 = vld [vmem:[#allocation354_spill] sm:$0xff]  ;;  %v12583_v46 = vld [vmem:[#allocation99_spill] sm:$0xff] }
 0x452   : > { %v2969_v28 = vsel %vm2927_vm10, %v2914_v17, %v2463_v4  ;;  %v2968_v10 = vsel %vm2927_vm10, %v2913_v25, %v2461_v30  ;;  %v12538_v17 = vld [vmem:[#allocation147_spill] sm:$0xff]  ;;  %v2701_v50 = vsel %vm2652_vm5, %v2646_v22, %v12561_v18  ;;  %v2596_v31 = vsel %vm2542_vm3, %v12583_v46, %v12582_v45  ;;  %v12587_v18 = vld [vmem:[#allocation8_spill] sm:$0xff] }
 0x453   : > { %5764 = vmatprep.mubr.msk.f32.mxu0 %vm2998_vm11, %v2968_v10  ;;  %v2863_v25 = vsel %vm2817_vm8, %v2808_v42, %v12538_v17  ;;  %v12539_v4 = vld [vmem:[#allocation155_spill] sm:$0xff]  ;;  %v12564_v17 = vld [vmem:[#allocation398_spill] sm:$0xff] }
 0x454   : > { %5765 = vmatmul.mubr.msk.f32.gmra.mxu0 %vm2998_vm11, %v2969_v28  ;;  %v2862_v30 = vsel %vm2817_vm8, %v2807_v43, %v12539_v4  ;;  %v2756_v43 = vsel %vm2707_vm6, %v2701_v50, %v12563_v27  ;;  %v12565_v4 = vld [vmem:[#allocation399_spill] sm:$0xff] }
 0x455   : > { %v2305_v39 = vpop.permute.xlu1 %2304  ;;  %v2303_v53 = vpop.permute.xlu0 %2302  ;;  %v12585_v41 = vld [vmem:[#allocation95_spill] sm:$0xff] }
 0x456   : > { %v2916_v52 = vsel %vm2872_vm9, %v2861_v63, %v2305_v39  ;;  %v2915_v29 = vsel %vm2872_vm9, %v2860_v33, %v2303_v53  ;;  %v12546_v39 = vld [vmem:[#allocation104_spill] sm:$0xff]  ;;  %v2809_v33 = vsel %vm2762_vm7, %v2754_v60, %v12551_v59  ;;  %v12577_v59 = vld [vmem:[#allocation359_spill] sm:$0xff] }
 0x457   : > { %v2700_v53 = vsel %vm2652_vm5, %v2645_v1, %v12546_v39  ;;  %v12570_v1 = vld [vmem:[#allocation207_spill] sm:$0xff]  ;;  %v12572_v39 = vld [vmem:[#allocation100_spill] sm:$0xff] }
 0x458   : > { %v2755_v15 = vsel %vm2707_vm6, %v2700_v53, %v12548_v8  ;;  %v2593_v11 = vsel %vm2542_vm3, %v12571_v56, %v12570_v1  ;;  %v2649_v53 = vsel %vm2597_vm4, %v2594_v35, %v12572_v39  ;;  %v12575_v8 = vld [vmem:[#allocation311_spill] sm:$0xff]  ;;  %v3570_v56 = vlaneseq  ;;  %v9507_v39 = vld [vmem:[%s11132_s3] ss:$0 sm:$0xff] }
 0x459   : > { %v2467_v40 = vpop.permute.xlu1 %2466  ;;  %v2465_v23 = vpop.permute.xlu0 %2464  ;;  %v2810_v63 = vsel %vm2762_vm7, %v2755_v15, %v12550_v34  ;;  %v2648_v55 = vsel %vm2597_vm4, %v2593_v11, %v12573_v6  ;;  %v12576_v34 = vld [vmem:[#allocation358_spill] sm:$0xff] }
 0x45a   : > { %v2971_v24 = vsel %vm2927_vm10, %v2916_v52, %v2467_v40  ;;  %v2970_v37 = vsel %vm2927_vm10, %v2915_v29, %v2465_v23  ;;  %v12552_v52 = vld [vmem:[#allocation151_spill] sm:$0xff]  ;;  %v12553_v40 = vld [vmem:[#allocation48_spill] sm:$0xff]  ;;  %v2703_v15 = vsel %vm2652_vm5, %v2648_v55, %v12575_v8  ;;  %v3571_v11 = vshrl.u32 %v3570_v56, 7 }
 0x45b   : > { %5767 = vmatprep.mubr.msk.f32.mxu0 %vm2998_vm11, %v2970_v37  ;;  %v2865_v29 = vsel %vm2817_vm8, %v2810_v63, %v12552_v52  ;;  %v2864_v23 = vsel %vm2817_vm8, %v2809_v33, %v12553_v40  ;;  %v2758_v33 = vsel %vm2707_vm6, %v2703_v15, %v12577_v59  ;;  %v12578_v52 = vld [vmem:[#allocation400_spill] sm:$0xff]  ;;  %v12579_v40 = vld [vmem:[#allocation401_spill] sm:$0xff] }
 0x45c   : > { %5768 = vmatmul.mubr.msk.f32.gmra.mxu0 %vm2998_vm11, %v2971_v24 }
 0x45d   : > { %v2309_v21 = vpop.permute.xlu1 %2308  ;;  %v2307_v9 = vpop.permute.xlu0 %2306 }
 0x45e   : > { %v2918_v28 = vsel %vm2872_vm9, %v2863_v25, %v2309_v21  ;;  %v2917_v10 = vsel %vm2872_vm9, %v2862_v30, %v2307_v9  ;;  %v12560_v21 = vld [vmem:[#allocation306_spill] sm:$0xff]  ;;  %v2811_v30 = vsel %vm2762_vm7, %v2756_v43, %v12565_v4  ;;  %v12591_v4 = vld [vmem:[#allocation361_spill] sm:$0xff] }
 0x45f   : > { %v2702_v9 = vsel %vm2652_vm5, %v2647_v47, %v12560_v21  ;;  %v12584_v47 = vld [vmem:[#allocation209_spill] sm:$0xff]  ;;  %v12586_v21 = vld [vmem:[#allocation10_spill] sm:$0xff] }
 0x460   : > { %v2757_v42 = vsel %vm2707_vm6, %v2702_v9, %v12562_v5  ;;  %v2595_v22 = vsel %vm2542_vm3, %v12585_v41, %v12584_v47  ;;  %v2651_v9 = vsel %vm2597_vm4, %v2596_v31, %v12586_v21  ;;  %v12589_v5 = vld [vmem:[#allocation112_spill] sm:$0xff] }
 0x461   : > { %v2471_v0 = vpop.permute.xlu1 %2470  ;;  %v2469_v62 = vpop.permute.xlu0 %2468  ;;  %v2812_v25 = vsel %vm2762_vm7, %v2757_v42, %v12564_v17  ;;  %v2650_v50 = vsel %vm2597_vm4, %v2595_v22, %v12587_v18  ;;  %v12590_v17 = vld [vmem:[#allocation360_spill] sm:$0xff] }
 0x462   : > { %v2973_v2 = vsel %vm2927_vm10, %v2918_v28, %v2471_v0  ;;  %v2972_v32 = vsel %vm2927_vm10, %v2917_v10, %v2469_v62  ;;  %v12566_v28 = vld [vmem:[#allocation156_spill] sm:$0xff]  ;;  %v2705_v42 = vsel %vm2652_vm5, %v2650_v50, %v12589_v5 }
 0x463   : > { %5770 = vmatprep.mubr.msk.f32.mxu0 %vm2998_vm11, %v2972_v32  ;;  %v2867_v10 = vsel %vm2817_vm8, %v2812_v25, %v12566_v28  ;;  %v12567_v0 = vld [vmem:[#allocation44_spill] sm:$0xff]  ;;  %v12592_v28 = vld [vmem:[#allocation11_spill] sm:$0xff] }
 0x464   : > { %5771 = vmatmul.mubr.msk.f32.gmra.mxu0 %vm2998_vm11, %v2973_v2  ;;  %v2866_v62 = vsel %vm2817_vm8, %v2811_v30, %v12567_v0  ;;  %v2760_v30 = vsel %vm2707_vm6, %v2705_v42, %v12591_v4  ;;  %v12593_v0 = vld [vmem:[#allocation12_spill] sm:$0xff] }
 0x465   : > { %v2313_v48 = vpop.permute.xlu1 %2312  ;;  %v2311_v51 = vpop.permute.xlu0 %2310 }
 0x466   : > { %v2920_v24 = vsel %vm2872_vm9, %v2865_v29, %v2313_v48  ;;  %v2919_v37 = vsel %vm2872_vm9, %v2864_v23, %v2311_v51  ;;  %v12574_v48 = vld [vmem:[#allocation310_spill] sm:$0xff]  ;;  %v2813_v23 = vsel %vm2762_vm7, %v2758_v33, %v12579_v40 }
 0x467   : > { %v2704_v51 = vsel %vm2652_vm5, %v2649_v53, %v12574_v48  ;;  %v3573_v53 = vadd.s32 16, %v3571_v11 }
 0x468   : > { %v2759_v63 = vsel %vm2707_vm6, %v2704_v51, %v12576_v34  ;;  %v3574_v51 = vadd.s32 4294967295, %v3571_v11 }
 0x469   : > { %v2475_v54 = vpop.permute.xlu1 %2474  ;;  %v2814_v29 = vsel %vm2762_vm7, %v2759_v63, %v12578_v52 }
 0x46a   : > { %v2473_v38 = vpop.permute.xlu0 %2472  ;;  %v2975_v14 = vsel %vm2927_vm10, %v2920_v24, %v2475_v54  ;;  %v12580_v24 = vld [vmem:[#allocation159_spill] sm:$0xff]  ;;  %vm3631_vm12 = vcmp.ge.s32.totalorder %v3574_v51, 0 }
 0x46b   : > { %v2974_v20 = vsel %vm2927_vm10, %v2919_v37, %v2473_v38  ;;  %v2869_v37 = vsel %vm2817_vm8, %v2814_v29, %v12580_v24  ;;  %v12581_v54 = vld [vmem:[#allocation51_spill] sm:$0xff] }
 0x46c   : > { %5773 = vmatprep.mubr.msk.f32.mxu0 %vm2998_vm11, %v2974_v20  ;;  %v2868_v38 = vsel %vm2817_vm8, %v2813_v23, %v12581_v54  ;;  %v5856_v54 = vmov 0.0  }
 0x46d   : > { %5774 = vmatmul.mubr.msk.f32.gmra.mxu0 %vm2998_vm11, %v2975_v14 }
 0x46f   : > { %v2317_v58 = vpop.permute.xlu1 %2316 }
 0x470   : > { %v2315_v13 = vpop.permute.xlu0 %2314  ;;  %v2922_v2 = vsel %vm2872_vm9, %v2867_v10, %v2317_v58  ;;  %v12588_v58 = vld [vmem:[#allocation116_spill] sm:$0xff] }
 0x471   : > { %v2921_v32 = vsel %vm2872_vm9, %v2866_v62, %v2315_v13  ;;  %v2706_v13 = vsel %vm2652_vm5, %v2651_v9, %v12588_v58  ;;  %v2815_v62 = vsel %vm2762_vm7, %v2760_v30, %v12593_v0 }
 0x472   : > { %v2761_v25 = vsel %vm2707_vm6, %v2706_v13, %v12590_v17 }
 0x473   : > { %v2479_v36 = vpop.permute.xlu1 %2478  ;;  %v2816_v10 = vsel %vm2762_vm7, %v2761_v25, %v12592_v28 }
 0x474   : > { %v2477_v57 = vpop.permute.xlu0 %2476  ;;  %v2977_v16 = vsel %vm2927_vm10, %v2922_v2, %v2479_v36  ;;  %v12594_v2 = vld [vmem:[#allocation52_spill] sm:$0xff]  ;;  %v12595_v36 = vld [vmem:[#allocation162_spill] sm:$0xff] }
 0x475   : > { %v2976_v49 = vsel %vm2927_vm10, %v2921_v32, %v2477_v57  ;;  %v2871_v32 = vsel %vm2817_vm8, %v2816_v10, %v12594_v2  ;;  %v2870_v57 = vsel %vm2817_vm8, %v2815_v62, %v12595_v36 }
 0x476   : > { %5776 = vmatprep.mubr.msk.f32.mxu0 %vm2998_vm11, %v2976_v49 }
 0x477   : > { %5777 = vmatmul.mubr.msk.f32.gmra.mxu0 %vm2998_vm11, %v2977_v16  ;;  %v2321_v19 = vpop.permute.xlu1 %2320 }
 0x478   : > { %v2319_v60 = vpop.permute.xlu0 %2318  ;;  %v2924_v14 = vsel %vm2872_vm9, %v2869_v37, %v2321_v19  ;;  %v3576_v19 = vadd.s32 4294967295, %v3573_v53 }
 0x479   : > { %v2923_v20 = vsel %vm2872_vm9, %v2868_v38, %v2319_v60  ;;  %v9519_v38 = vsel %vm3631_vm12, 1.0, %v5856_v54 }
 0x47a   : > { %vm3690_vm13 = vcmp.lt.s32.totalorder %v3576_v19, 16 }
 0x47b   : > { %v2483_v61 = vpop.permute.xlu1 %2482 }
 0x47c   : > { %v2481_v3 = vpop.permute.xlu0 %2480  ;;  %v2979_v44 = vsel %vm2927_vm10, %v2924_v14, %v2483_v61  ;;  %v9522_v61 = vsel %vm3690_vm13, 1.0, %v5856_v54 }
 0x47d   : > { %v2978_v12 = vsel %vm2927_vm10, %v2923_v20, %v2481_v3 }
 0x47e   : > { %5779 = vmatprep.mubr.msk.f32.mxu0 %vm2998_vm11, %v2978_v12 }
 0x47f   : > { %5780 = vmatmul.mubr.msk.f32.gmra.mxu0 %vm2998_vm11, %v2979_v44  ;;  %v2325_v27 = vpop.permute.xlu1 %2324 }
 0x480   : > { %v2323_v43 = vpop.permute.xlu0 %2322  ;;  %v2926_v16 = vsel %vm2872_vm9, %v2871_v32, %v2325_v27 }
 0x481   : > { %v2925_v49 = vsel %vm2872_vm9, %v2870_v57, %v2323_v43 }
 0x483   : > { %v2487_v26 = vpop.permute.xlu1 %2486 }
 0x484   : > { %v2485_v7 = vpop.permute.xlu0 %2484  ;;  %v2981_v35 = vsel %vm2927_vm10, %v2926_v16, %v2487_v26 }
 0x485   : > { %v2980_v1 = vsel %vm2927_vm10, %v2925_v49, %v2485_v7 }
 0x486   : > { %5782 = vmatprep.mubr.msk.f32.mxu0 %vm2998_vm11, %v2980_v1 }
 0x487   : > { %5783 = vmatmul.mubr.msk.f32.gmra.mxu0 %vm2998_vm11, %v2981_v35 }
 0x49c   : > { %v5706_v6 = vpop.f32.mrf.mxu0 }
 0x49d   : > { %v3233_v55 = vadd.f32 %v5706_v6, %v9507_v39 }
 0x49e   : > { %v3227_v48 = vpop.f32.mrf.mxu0 }
 0x49f   : > { %v3497_v8 = vmax.f32 %v3233_v55, 0.0  ;;  %v3228_v15 = vadd.f32 %v9507_v39, %v3227_v48 }
 0x4a0   : > { %v5709_v60 = vpop.f32.mrf.mxu0 }
 0x4a1   : > { %v9511_v34 = vmul.f32 0.0, %v3497_v8  ;;  %v3496_v63 = vmax.f32 %v3228_v15, 0.0  ;;  %v3243_v59 = vadd.f32 %v5709_v60, %v9507_v39 }
 0x4a2   : > { %v3237_v33 = vpop.f32.mrf.mxu0 }
 0x4a3   : > { %12596 = vst [vmem:[#allocation66_spill] sm:$0xff] %v9511_v34  ;;  %v9514_v52 = vmul.f32 0.0, %v3496_v63  ;;  %v3499_v29 = vmax.f32 %v3243_v59, 0.0  ;;  %v3238_v40 = vadd.f32 %v9507_v39, %v3237_v33  ;;  %v3956_v24 = vrot.slane %v9511_v34, 1 }
 0x4a4   : > { %v5712_v23 = vpop.f32.mrf.mxu0 }
 0x4a5   : > { %12597 = vst [vmem:[#allocation67_spill] sm:$0xff] %v9514_v52  ;;  %v3955_v37 = vrot.slane %v9514_v52, 1  ;;  %v3253_v14 = vadd.f32 %v5712_v23, %v9507_v39  ;;  %v3498_v20 = vmax.f32 %v3238_v40, 0.0  ;;  %v9527_v46 = vmul.f32 %v9519_v38, %v3499_v29 }
 0x4a6   : > { %v3247_v3 = vpop.f32.mrf.mxu0 }
 0x4a7   : > { %v3501_v44 = vmax.f32 %v3253_v14, 0.0  ;;  %v3248_v12 = vadd.f32 %v9507_v39, %v3247_v3  ;;  %v3957_v45 = vsel %vm956_vm1, %v3955_v37, %v3956_v24  ;;  %12598 = vst [vmem:[#allocation172_spill] sm:$0xff] %v9527_v46  ;;  %v9529_v31 = vmul.f32 0.0, %v3498_v20 }
 0x4a8   : > { %4141 = vrot.lane.b32.xlu0 %v3957_v45, %s5848_s9  ;;  %v5715_v47 = vpop.f32.mrf.mxu0  ;;  %v3960_v42 = vrot.slane %v9527_v46, 1 }
 0x4a9   : > { %v9533_v41 = vmul.f32 %v9522_v61, %v3501_v44  ;;  %v9535_v22 = vmax.f32 %v3248_v12, 0.0  ;;  %v3263_v21 = vadd.f32 %v5715_v47, %v9507_v39  ;;  %v3958_v9 = vrot.slane %v9529_v31, 1 }
 0x4aa   : > { %v3257_v18 = vpop.f32.mrf.mxu0 }
 0x4ab   : > { %12599 = vst [vmem:[#allocation173_spill] sm:$0xff] %v9535_v22  ;;  %v3258_v50 = vadd.f32 %v9507_v39, %v3257_v18  ;;  %v3963_v58 = vrot.slane %v9533_v41, 1  ;;  %v3959_v13 = vsel %vm956_vm1, %v3956_v24, %v3958_v9  ;;  %v3961_v27 = vrot.slane %v9535_v22, 1 }
 0x4ac   : > { %v5718_v5 = vpop.f32.mrf.mxu0  ;;  %v9544_v43 = vmax.f32 %v3263_v21, 0.0  ;;  %4143 = vrot.lane.b32.xlu1 %v3959_v13, %s5848_s9 }
 0x4ad   : > { %v3502_v17 = vmax.f32 %v3258_v50, 0.0  ;;  %v3273_v25 = vadd.f32 %v5718_v5, %v9507_v39  ;;  %v9549_v4 = vsel %vm956_vm1, %v3960_v42, %v3961_v27  ;;  %v9558_v62 = vsel %vm956_vm1, %v3961_v27, %v3963_v58 }
 0x4ae   : > { %12600 = vst [vmem:[#allocation70_spill] sm:$0xff] %v9544_v43  ;;  %12601 = vst [vmem:[#allocation71_spill] sm:$0xff] %v9549_v4  ;;  %v3267_v30 = vpop.f32.mrf.mxu0  ;;  %4145 = vrot.lane.b32.xlu0 %v9549_v4, %s5848_s9  ;;  %v3966_v16 = vrot.slane %v9544_v43, 1 }
 0x4af   : > { %v9552_v28 = vmul.f32 %v9519_v38, %v3502_v17  ;;  %v3268_v10 = vadd.f32 %v9507_v39, %v3267_v30  ;;  %v3505_v0 = vmax.f32 %v3273_v25, 0.0  ;;  %12603 = vst [vmem:[#allocation176_spill] sm:$0xff] %v9558_v62 }
 0x4b0   : > { %v5721_v2 = vpop.f32.mrf.mxu0  ;;  %4147 = vrot.lane.b32.xlu1 %v9558_v62, %s5848_s9 }
 0x4b1   : > { %12602 = vst [vmem:[#allocation65_spill] sm:$0xff] %v9552_v28  ;;  %v3504_v32 = vmax.f32 %v3268_v10, 0.0  ;;  %v3283_v36 = vadd.f32 %v5721_v2, %v9507_v39  ;;  %v3965_v57 = vrot.slane %v9552_v28, 1  ;;  %v9573_v56 = vmul.f32 %v9519_v38, %v3505_v0 }
 0x4b2   : > { %v3277_v49 = vpop.f32.mrf.mxu0 }
 0x4b3   : > { %v9566_v26 = vmul.f32 %v9522_v61, %v3504_v32  ;;  %v3507_v7 = vmax.f32 %v3283_v36, 0.0  ;;  %v3278_v35 = vadd.f32 %v9507_v39, %v3277_v49  ;;  %v9570_v1 = vsel %vm956_vm1, %v3965_v57, %v3966_v16  ;;  %12605 = vst [vmem:[#allocation77_spill] sm:$0xff] %v9573_v56 }
 0x4b4   : > { %12604 = vst [vmem:[#allocation76_spill] sm:$0xff] %v9570_v1  ;;  %4149 = vrot.lane.b32.xlu0 %v9570_v1, %s5848_s9  ;;  %v5724_v11 = vpop.f32.mrf.mxu0  ;;  %v3970_v63 = vrot.slane %v9573_v56, 1 }
 0x4b5   : > { %v3968_v53 = vrot.slane %v9566_v26, 1  ;;  %v9579_v6 = vmul.f32 %v9522_v61, %v3507_v7  ;;  %v9581_v55 = vmax.f32 %v3278_v35, 0.0  ;;  %v3293_v48 = vadd.f32 %v5724_v11, %v9507_v39 }
 0x4b6   : > { %v3287_v51 = vpop.f32.mrf.mxu0 }
 0x4b7   : > { %12606 = vst [vmem:[#allocation72_spill] sm:$0xff] %v9581_v55  ;;  %v3973_v8 = vrot.slane %v9579_v6, 1  ;;  %v3288_v15 = vadd.f32 %v9507_v39, %v3287_v51  ;;  %v9587_v19 = vsel %vm956_vm1, %v3966_v16, %v3968_v53  ;;  %v3971_v59 = vrot.slane %v9581_v55, 1 }
 0x4b8   : > { %12607 = vst [vmem:[#allocation179_spill] sm:$0xff] %v9587_v19  ;;  %4151 = vrot.lane.b32.xlu1 %v9587_v19, %s5848_s9  ;;  %v5727_v60 = vpop.f32.mrf.mxu0  ;;  %v9593_v33 = vmax.f32 %v3293_v48, 0.0 }
 0x4b9   : > { %v3508_v29 = vmax.f32 %v3288_v15, 0.0  ;;  %v3303_v40 = vadd.f32 %v5727_v60, %v9507_v39  ;;  %v9597_v23 = vsel %vm956_vm1, %v3970_v63, %v3971_v59  ;;  %v9606_v14 = vsel %vm956_vm1, %v3971_v59, %v3973_v8 }
 0x4ba   : > { %12608 = vst [vmem:[#allocation79_spill] sm:$0xff] %v9593_v33  ;;  %12609 = vst [vmem:[#allocation80_spill] sm:$0xff] %v9597_v23  ;;  %v3297_v24 = vpop.f32.mrf.mxu0  ;;  %4153 = vrot.lane.b32.xlu0 %v9597_v23, %s5848_s9  ;;  %v3976_v47 = vrot.slane %v9593_v33, 1 }
 0x4bb   : > { %v9600_v37 = vmul.f32 %v9519_v38, %v3508_v29  ;;  %v3298_v54 = vadd.f32 %v9507_v39, %v3297_v24  ;;  %12611 = vst [vmem:[#allocation84_spill] sm:$0xff] %v9606_v14  ;;  %v3511_v20 = vmax.f32 %v3303_v40, 0.0 }
 0x4bc   : > { %4155 = vrot.lane.b32.xlu1 %v9606_v14, %s5848_s9  ;;  %v5730_v3 = vpop.f32.mrf.mxu0 }
 0x4bd   : > { %12610 = vst [vmem:[#allocation183_spill] sm:$0xff] %v9600_v37  ;;  %v3510_v44 = vmax.f32 %v3298_v54, 0.0  ;;  %v3313_v12 = vadd.f32 %v5730_v3, %v9507_v39  ;;  %v3975_v45 = vrot.slane %v9600_v37, 1  ;;  %v9621_v13 = vmul.f32 %v9519_v38, %v3511_v20 }
 0x4be   : > { %v3307_v21 = vpop.f32.mrf.mxu0 }
 0x4bf   : > { %v9614_v9 = vmul.f32 %v9522_v61, %v3510_v44  ;;  %v3513_v18 = vmax.f32 %v3313_v12, 0.0  ;;  %v3308_v50 = vadd.f32 %v9507_v39, %v3307_v21  ;;  %v9618_v58 = vsel %vm956_vm1, %v3975_v45, %v3976_v47  ;;  %12613 = vst [vmem:[#allocation114_spill] sm:$0xff] %v9621_v13 }
 0x4c0   : > { %12612 = vst [vmem:[#allocation85_spill] sm:$0xff] %v9618_v58  ;;  %4157 = vrot.lane.b32.xlu0 %v9618_v58, %s5848_s9  ;;  %v5733_v5 = vpop.f32.mrf.mxu0  ;;  %v3980_v32 = vrot.slane %v9621_v13, 1 }
 0x4c1   : > { %v3978_v42 = vrot.slane %v9614_v9, 1  ;;  %v9627_v27 = vmul.f32 %v9522_v61, %v3513_v18  ;;  %v9629_v17 = vmax.f32 %v3308_v50, 0.0  ;;  %v3323_v25 = vadd.f32 %v5733_v5, %v9507_v39 }
 0x4c2   : > { %v3317_v30 = vpop.f32.mrf.mxu0 }
 0x4c3   : > { %v3983_v10 = vrot.slane %v9627_v27, 1  ;;  %v3318_v0 = vadd.f32 %v9507_v39, %v3317_v30  ;;  %v9635_v2 = vsel %vm956_vm1, %v3976_v47, %v3978_v42  ;;  %v3981_v36 = vrot.slane %v9629_v17, 1 }
 0x4c4   : > { %12614 = vst [vmem:[#allocation4_spill] sm:$0xff] %v9635_v2  ;;  %4159 = vrot.lane.b32.xlu1 %v9635_v2, %s5848_s9  ;;  %v9641_v57 = vmax.f32 %v3323_v25, 0.0 }
 0x4c5   : > { %v3514_v16 = vmax.f32 %v3318_v0, 0.0  ;;  %v5736_v49 = vpop.f32.mrf.mxu0  ;;  %v9644_v7 = vsel %vm956_vm1, %v3980_v32, %v3981_v36  ;;  %v9652_v53 = vsel %vm956_vm1, %v3981_v36, %v3983_v10 }
 0x4c6   : > { %12615 = vst [vmem:[#allocation186_spill] sm:$0xff] %v9644_v7  ;;  %4161 = vrot.lane.b32.xlu0 %v9644_v7, %s5848_s9  ;;  %12616 = vst [vmem:[#allocation113_spill] sm:$0xff] %v9652_v53  ;;  %v3333_v48 = vadd.f32 %v5736_v49, %v9507_v39  ;;  %v3986_v15 = vrot.slane %v9641_v57, 1 }
 0x4c7   : > { %v9647_v35 = vmul.f32 %v9519_v38, %v3514_v16  ;;  %v3327_v11 = vpop.f32.mrf.mxu0 }
 0x4c8   : > { %v3328_v51 = vadd.f32 %v9507_v39, %v3327_v11  ;;  %4163 = vrot.lane.b32.xlu1 %v9652_v53, %s5848_s9  ;;  %v3517_v59 = vmax.f32 %v3333_v48, 0.0 }
 0x4c9   : > { %v3985_v8 = vrot.slane %v9647_v35, 1 }
 0x4ca   : > { %v3516_v60 = vmax.f32 %v3328_v51, 0.0  ;;  %v9671_v3 = vmul.f32 %v9519_v38, %v3517_v59 }
 0x4cb   : > { %v9661_v63 = vsel %vm956_vm1, %v3985_v8, %v3986_v15 }
 0x4cc   : > { %12617 = vst [vmem:[#allocation2_spill] sm:$0xff] %v9661_v63  ;;  %v9664_v29 = vmul.f32 %v9522_v61, %v3516_v60  ;;  %4165 = vrot.lane.b32.xlu0 %v9661_v63, %s5848_s9  ;;  %v3990_v42 = vrot.slane %v9671_v3, 1 }
 0x4cd   : > { %v5739_v40 = vpop.f32.mrf.mxu0 }
 0x4ce   : > { %v3988_v24 = vrot.slane %v9664_v29, 1  ;;  %v3343_v54 = vadd.f32 %v5739_v40, %v9507_v39 }
 0x4cf   : > { %v3337_v20 = vpop.f32.mrf.mxu0 }
 0x4d0   : > { %v3519_v44 = vmax.f32 %v3343_v54, 0.0  ;;  %v3338_v12 = vadd.f32 %v9507_v39, %v3337_v20  ;;  %v9675_v45 = vsel %vm956_vm1, %v3986_v15, %v3988_v24 }
 0x4d1   : > { %12618 = vst [vmem:[#allocation117_spill] sm:$0xff] %v9675_v45  ;;  %4167 = vrot.lane.b32.xlu1 %v9675_v45, %s5848_s9 }
 0x4d2   : > { %v9680_v47 = vmul.f32 %v9522_v61, %v3519_v44  ;;  %v9682_v21 = vmax.f32 %v3338_v12, 0.0 }
 0x4d4   : > { %v3993_v18 = vrot.slane %v9680_v47, 1  ;;  %v5742_v50 = vpop.f32.mrf.mxu0  ;;  %v3991_v5 = vrot.slane %v9682_v21, 1 }
 0x4d5   : > { %v3353_v25 = vadd.f32 %v5742_v50, %v9507_v39 }
 0x4d6   : > { %v9689_v30 = vsel %vm956_vm1, %v3991_v5, %v3993_v18  ;;  %v9692_v10 = vsel %vm956_vm1, %v3990_v42, %v3991_v5  ;;  %v3347_v0 = vpop.f32.mrf.mxu0 }
 0x4d7   : > { %12619 = vst [vmem:[#allocation6_spill] sm:$0xff] %v9689_v30  ;;  %12620 = vst [vmem:[#allocation211_spill] sm:$0xff] %v9692_v10  ;;  %4171 = vrot.lane.b32.xlu1 %v9689_v30, %s5848_s9  ;;  %4169 = vrot.lane.b32.xlu0 %v9692_v10, %s5848_s9  ;;  %v3348_v32 = vadd.f32 %v9507_v39, %v3347_v0  ;;  %v9699_v36 = vmax.f32 %v3353_v25, 0.0 }
 0x4d9   : > { %12621 = vst [vmem:[#allocation118_spill] sm:$0xff] %v9699_v36  ;;  %v3520_v16 = vmax.f32 %v3348_v32, 0.0  ;;  %v3996_v51 = vrot.slane %v9699_v36, 1 }
 0x4db   : > { %v9702_v49 = vmul.f32 %v9519_v38, %v3520_v16 }
 0x4dc   : > { %v5745_v11 = vpop.f32.mrf.mxu0 }
 0x4dd   : > { %12622 = vst [vmem:[#allocation3_spill] sm:$0xff] %v9702_v49  ;;  %v3995_v48 = vrot.slane %v9702_v49, 1  ;;  %v3363_v15 = vadd.f32 %v5745_v11, %v9507_v39 }
 0x4de   : > { %v3357_v8 = vpop.f32.mrf.mxu0 }
 0x4df   : > { %v3358_v60 = vadd.f32 %v9507_v39, %v3357_v8  ;;  %v9709_v59 = vsel %vm956_vm1, %v3995_v48, %v3996_v51  ;;  %v3523_v24 = vmax.f32 %v3363_v15, 0.0 }
 0x4e0   : > { %12623 = vst [vmem:[#allocation121_spill] sm:$0xff] %v9709_v59  ;;  %4173 = vrot.lane.b32.xlu0 %v9709_v59, %s5848_s9 }
 0x4e1   : > { %v3522_v40 = vmax.f32 %v3358_v60, 0.0  ;;  %v9719_v50 = vmul.f32 %v9519_v38, %v3523_v24 }
 0x4e3   : > { %v9714_v54 = vmul.f32 %v9522_v61, %v3522_v40  ;;  %12624 = vst [vmem:[#allocation7_spill] sm:$0xff] %v9719_v50  ;;  %v4000_v48 = vrot.slane %v9719_v50, 1 }
 0x4e4   : > { %v5748_v20 = vpop.f32.mrf.mxu0 }
 0x4e5   : > { %v3998_v44 = vrot.slane %v9714_v54, 1  ;;  %v3373_v12 = vadd.f32 %v5748_v20, %v9507_v39 }
 0x4e6   : > { %v3367_v18 = vpop.f32.mrf.mxu0 }
 0x4e7   : > { %v3525_v5 = vmax.f32 %v3373_v12, 0.0  ;;  %v3368_v42 = vadd.f32 %v9507_v39, %v3367_v18  ;;  %v9723_v25 = vsel %vm956_vm1, %v3996_v51, %v3998_v44 }
 0x4e8   : > { %4175 = vrot.lane.b32.xlu1 %v9723_v25, %s5848_s9 }
 0x4e9   : > { %v9728_v0 = vmul.f32 %v9522_v61, %v3525_v5  ;;  %v9730_v32 = vmax.f32 %v3368_v42, 0.0 }
 0x4eb   : > { %12625 = vst [vmem:[#allocation259_spill] sm:$0xff] %v9730_v32  ;;  %v4003_v16 = vrot.slane %v9728_v0, 1  ;;  %v4001_v11 = vrot.slane %v9730_v32, 1 }
 0x4ec   : > { %v5751_v8 = vpop.f32.mrf.mxu0 }
 0x4ed   : > { %v3383_v15 = vadd.f32 %v5751_v8, %v9507_v39  ;;  %v9737_v51 = vsel %vm956_vm1, %v4001_v11, %v4003_v16  ;;  %v9740_v60 = vsel %vm956_vm1, %v4000_v48, %v4001_v11 }
 0x4ee   : > { %12626 = vst [vmem:[#allocation122_spill] sm:$0xff] %v9737_v51  ;;  %12627 = vst [vmem:[#allocation5_spill] sm:$0xff] %v9740_v60  ;;  %4179 = vrot.lane.b32.xlu1 %v9737_v51, %s5848_s9  ;;  %4177 = vrot.lane.b32.xlu0 %v9740_v60, %s5848_s9  ;;  %v3377_v40 = vpop.f32.mrf.mxu0 }
 0x4ef   : > { %v3378_v24 = vadd.f32 %v9507_v39, %v3377_v40  ;;  %v9747_v20 = vmax.f32 %v3383_v15, 0.0 }
 0x4f1   : > { %12628 = vst [vmem:[#allocation125_spill] sm:$0xff] %v9747_v20  ;;  %v3526_v44 = vmax.f32 %v3378_v24, 0.0  ;;  %v4006_v42 = vrot.slane %v9747_v20, 1 }
 0x4f3   : > { %v9750_v12 = vmul.f32 %v9519_v38, %v3526_v44 }
 0x4f4   : > { %v5754_v18 = vpop.f32.mrf.mxu0 }
 0x4f5   : > { %12629 = vst [vmem:[#allocation115_spill] sm:$0xff] %v9750_v12  ;;  %v4005_v5 = vrot.slane %v9750_v12, 1  ;;  %v3393_v11 = vadd.f32 %v5754_v18, %v9507_v39 }
 0x4f6   : > { %v3387_v16 = vpop.f32.mrf.mxu0 }
 0x4f7   : > { %v3388_v48 = vadd.f32 %v9507_v39, %v3387_v16  ;;  %v9757_v8 = vsel %vm956_vm1, %v4005_v5, %v4006_v42  ;;  %v3529_v40 = vmax.f32 %v3393_v11, 0.0 }
 0x4f8   : > { %12630 = vst [vmem:[#allocation126_spill] sm:$0xff] %v9757_v8  ;;  %4181 = vrot.lane.b32.xlu0 %v9757_v8, %s5848_s9 }
 0x4f9   : > { %v3528_v15 = vmax.f32 %v3388_v48, 0.0  ;;  %v9767_v18 = vmul.f32 %v9519_v38, %v3529_v40 }
 0x4fb   : > { %v9762_v24 = vmul.f32 %v9522_v61, %v3528_v15  ;;  %12631 = vst [vmem:[#allocation129_spill] sm:$0xff] %v9767_v18  ;;  %v4010_v40 = vrot.slane %v9767_v18, 1 }
 0x4fc   : > { %v5757_v44 = vpop.f32.mrf.mxu0 }
 0x4fd   : > { %v4008_v4 = vrot.slane %v9762_v24, 1  ;;  %v3403_v62 = vadd.f32 %v5757_v44, %v9507_v39 }
 0x4fe   : > { %v3397_v1 = vpop.f32.mrf.mxu0 }
 0x4ff   : > { %v3531_v16 = vmax.f32 %v3403_v62, 0.0  ;;  %v3398_v5 = vadd.f32 %v9507_v39, %v3397_v1  ;;  %v9771_v19 = vsel %vm956_vm1, %v4006_v42, %v4008_v4 }
 0x500   : > { %12632 = vst [vmem:[#allocation88_spill] sm:$0xff] %v9771_v19  ;;  %4183 = vrot.lane.b32.xlu1 %v9771_v19, %s5848_s9 }
 0x501   : > { %v9776_v11 = vmul.f32 %v9522_v61, %v3531_v16  ;;  %v9778_v48 = vmax.f32 %v3398_v5, 0.0 }
 0x503   : > { %12633 = vst [vmem:[#allocation89_spill] sm:$0xff] %v9778_v48  ;;  %v4013_v15 = vrot.slane %v9776_v11, 1  ;;  %v4011_v44 = vrot.slane %v9778_v48, 1 }
 0x504   : > { %v5760_v62 = vpop.f32.mrf.mxu0 }
 0x505   : > { %v3413_v1 = vadd.f32 %v5760_v62, %v9507_v39  ;;  %v9785_v4 = vsel %vm956_vm1, %v4011_v44, %v4013_v15  ;;  %v9788_v42 = vsel %vm956_vm1, %v4010_v40, %v4011_v44 }
 0x506   : > { %12634 = vst [vmem:[#allocation130_spill] sm:$0xff] %v9785_v4  ;;  %12635 = vst [vmem:[#allocation210_spill] sm:$0xff] %v9788_v42  ;;  %4187 = vrot.lane.b32.xlu1 %v9785_v4, %s5848_s9  ;;  %4185 = vrot.lane.b32.xlu0 %v9788_v42, %s5848_s9  ;;  %v3407_v16 = vpop.f32.mrf.mxu0 }
 0x507   : > { %v3408_v5 = vadd.f32 %v9507_v39, %v3407_v16  ;;  %v9795_v8 = vmax.f32 %v3413_v1, 0.0 }
 0x509   : > { %12636 = vst [vmem:[#allocation213_spill] sm:$0xff] %v9795_v8  ;;  %v3532_v19 = vmax.f32 %v3408_v5, 0.0  ;;  %v4016_v44 = vrot.slane %v9795_v8, 1 }
 0x50b   : > { %v9798_v62 = vmul.f32 %v9519_v38, %v3532_v19 }
 0x50c   : > { %v5763_v15 = vpop.f32.mrf.mxu0 }
 0x50d   : > { %12637 = vst [vmem:[#allocation9_spill] sm:$0xff] %v9798_v62  ;;  %v4015_v23 = vrot.slane %v9798_v62, 1  ;;  %v3423_v14 = vadd.f32 %v5763_v15, %v9507_v39 }
 0x50e   : > { %v3417_v40 = vpop.f32.mrf.mxu0 }
 0x50f   : > { %v3418_v4 = vadd.f32 %v9507_v39, %v3417_v40  ;;  %v9805_v42 = vsel %vm956_vm1, %v4015_v23, %v4016_v44  ;;  %v3535_v16 = vmax.f32 %v3423_v14, 0.0 }
 0x510   : > { %12638 = vst [vmem:[#allocation261_spill] sm:$0xff] %v9805_v42  ;;  %4189 = vrot.lane.b32.xlu0 %v9805_v42, %s5848_s9 }
 0x511   : > { %v3534_v1 = vmax.f32 %v3418_v4, 0.0  ;;  %v9815_v15 = vmul.f32 %v9519_v38, %v3535_v16 }
 0x513   : > { %v9810_v19 = vmul.f32 %v9522_v61, %v3534_v1  ;;  %12639 = vst [vmem:[#allocation133_spill] sm:$0xff] %v9815_v15  ;;  %v4020_v16 = vrot.slane %v9815_v15, 1 }
 0x514   : > { %v5766_v5 = vpop.f32.mrf.mxu0 }
 0x515   : > { %v4018_v58 = vrot.slane %v9810_v19, 1  ;;  %v3433_v2 = vadd.f32 %v5766_v5, %v9507_v39 }
 0x516   : > { %v3427_v7 = vpop.f32.mrf.mxu0 }
 0x517   : > { %v3537_v40 = vmax.f32 %v3433_v2, 0.0  ;;  %v3428_v23 = vadd.f32 %v9507_v39, %v3427_v7  ;;  %v9819_v53 = vsel %vm956_vm1, %v4016_v44, %v4018_v58 }
 0x518   : > { %12640 = vst [vmem:[#allocation119_spill] sm:$0xff] %v9819_v53  ;;  %4191 = vrot.lane.b32.xlu1 %v9819_v53, %s5848_s9 }
 0x519   : > { %v9824_v14 = vmul.f32 %v9522_v61, %v3537_v40  ;;  %v9826_v4 = vmax.f32 %v3428_v23, 0.0 }
 0x51b   : > { %v4023_v1 = vrot.slane %v9824_v14, 1  ;;  %v4021_v5 = vrot.slane %v9826_v4, 1 }
 0x51c   : > { %v5769_v2 = vpop.f32.mrf.mxu0 }
 0x51d   : > { %v3443_v7 = vadd.f32 %v5769_v2, %v9507_v39  ;;  %v9833_v58 = vsel %vm956_vm1, %v4021_v5, %v4023_v1  ;;  %v9836_v44 = vsel %vm956_vm1, %v4020_v16, %v4021_v5 }
 0x51e   : > { %12641 = vst [vmem:[#allocation312_spill] sm:$0xff] %v9833_v58  ;;  %12642 = vst [vmem:[#allocation134_spill] sm:$0xff] %v9836_v44  ;;  %4195 = vrot.lane.b32.xlu1 %v9833_v58, %s5848_s9  ;;  %4193 = vrot.lane.b32.xlu0 %v9836_v44, %s5848_s9  ;;  %v3437_v40 = vpop.f32.mrf.mxu0 }
 0x51f   : > { %v3438_v23 = vadd.f32 %v9507_v39, %v3437_v40  ;;  %v9843_v42 = vmax.f32 %v3443_v7, 0.0 }
 0x521   : > { %v3538_v53 = vmax.f32 %v3438_v23, 0.0  ;;  %v4026_v5 = vrot.slane %v9843_v42, 1 }
 0x523   : > { %v9846_v2 = vmul.f32 %v9519_v38, %v3538_v53 }
 0x524   : > { %v5772_v1 = vpop.f32.mrf.mxu0 }
 0x525   : > { %v4025_v63 = vrot.slane %v9846_v2, 1  ;;  %v3453_v58 = vadd.f32 %v5772_v1, %v9507_v39 }
 0x526   : > { %v3447_v16 = vpop.f32.mrf.mxu0 }
 0x527   : > { %v3448_v45 = vadd.f32 %v9507_v39, %v3447_v16  ;;  %v9853_v44 = vsel %vm956_vm1, %v4025_v63, %v4026_v5  ;;  %v3541_v40 = vmax.f32 %v3453_v58, 0.0 }
 0x528   : > { %12643 = vst [vmem:[#allocation189_spill] sm:$0xff] %v9853_v44  ;;  %4197 = vrot.lane.b32.xlu0 %v9853_v44, %s5848_s9 }
 0x529   : > { %v3540_v7 = vmax.f32 %v3448_v45, 0.0  ;;  %v9863_v1 = vmul.f32 %v9519_v38, %v3541_v40 }
 0x52b   : > { %v9858_v53 = vmul.f32 %v9522_v61, %v3540_v7  ;;  %v4030_v40 = vrot.slane %v9863_v1, 1 }
 0x52d   : > { %v5775_v23 = vpop.f32.mrf.mxu0  ;;  %v4028_v10 = vrot.slane %v9858_v53, 1 }
 0x52e   : > { %v3463_v30 = vadd.f32 %v5775_v23, %v9507_v39 }
 0x52f   : > { %v3457_v60 = vpop.f32.mrf.mxu0  ;;  %v9867_v59 = vsel %vm956_vm1, %v4026_v5, %v4028_v10 }
 0x530   : > { %v3543_v16 = vmax.f32 %v3463_v30, 0.0  ;;  %v3458_v63 = vadd.f32 %v9507_v39, %v3457_v60  ;;  %4199 = vrot.lane.b32.xlu1 %v9867_v59, %s5848_s9  ;;  %v4035_v30 = vrot.slane %v9514_v52, 2  ;;  %v4038_v60 = vrot.slane %v9529_v31, 2 }
 0x532   : > { %v9872_v45 = vmul.f32 %v9522_v61, %v3543_v16  ;;  %v9874_v58 = vmax.f32 %v3458_v63, 0.0  ;;  %v4036_v16 = vrot.slane %v9511_v34, 2  ;;  %v4043_v63 = vrot.slane %v9533_v41, 2 }
 0x533   : > { %v4045_v41 = vrot.slane %v9552_v28, 2 }
 0x534   : > { %v4033_v7 = vrot.slane %v9872_v45, 1  ;;  %v4031_v23 = vrot.slane %v9874_v58, 1  ;;  %v4039_v52 = vsel %vm1083_vm2, %v4036_v16, %v4038_v60  ;;  %v4037_v31 = vsel %vm1083_vm2, %v4035_v30, %v4036_v16 }
 0x535   : > { %v4053_v30 = vrot.slane %v9579_v6, 2  ;;  %v4051_v16 = vrot.slane %v9581_v55, 2 }
 0x536   : > { %v9882_v10 = vsel %vm956_vm1, %v4031_v23, %v4033_v7  ;;  %v9885_v5 = vsel %vm956_vm1, %v4030_v40, %v4031_v23  ;;  %v4041_v7 = vrot.slane %v9535_v22, 2  ;;  %v4040_v23 = vrot.slane %v9527_v46, 2 }
 0x537   : > { %4203 = vrot.lane.b32.xlu1 %v9882_v10, %s5848_s9  ;;  %4201 = vrot.lane.b32.xlu0 %v9885_v5, %s5848_s9  ;;  %v4048_v40 = vrot.slane %v9566_v26, 2  ;;  %v9927_v6 = vsel %vm1083_vm2, %v4051_v16, %v4053_v30  ;;  %v4061_v30 = vrot.slane %v9629_v17, 2 }
 0x538   : > { %v9901_v44 = vsel %vm1083_vm2, %v4041_v7, %v4043_v63  ;;  %v9904_v34 = vsel %vm1083_vm2, %v4040_v23, %v4041_v7  ;;  %v4050_v63 = vrot.slane %v9573_v56, 2  ;;  %12648 = vst [vmem:[#allocation124_spill] sm:$0xff] %v9927_v6  ;;  %v4055_v23 = vrot.slane %v9600_v37, 2 }
 0x539   : > { %12644 = vst [vmem:[#allocation212_spill] sm:$0xff] %v9901_v44  ;;  %12645 = vst [vmem:[#allocation215_spill] sm:$0xff] %v9904_v34 }
 0x53a   : > { %v9930_v7 = vsel %vm1083_vm2, %v4050_v63, %v4051_v16  ;;  %v4060_v16 = vrot.slane %v9621_v13, 2  ;;  %v4068_v63 = vrot.slane %v9664_v29, 2 }
 0x53b   : > { %4239 = vrot.lane.b32.xlu1 %v4039_v52, %s5849_s10  ;;  %4237 = vrot.lane.b32.xlu0 %v4037_v31, %s5849_s10  ;;  %v4046_v52 = vrot.slane %v9544_v43, 2  ;;  %v4058_v31 = vrot.slane %v9614_v9, 2  ;;  %12649 = vst [vmem:[#allocation314_spill] sm:$0xff] %v9930_v7 }
 0x53d   : > { %v9914_v26 = vsel %vm1083_vm2, %v4046_v52, %v4048_v40  ;;  %v9917_v60 = vsel %vm1083_vm2, %v4045_v41, %v4046_v52  ;;  %v4056_v40 = vrot.slane %v9593_v33, 2  ;;  %v4063_v41 = vrot.slane %v9627_v27, 2 }
 0x53e   : > { %12646 = vst [vmem:[#allocation260_spill] sm:$0xff] %v9914_v26  ;;  %12647 = vst [vmem:[#allocation263_spill] sm:$0xff] %v9917_v60 }
 0x53f   : > { %4243 = vrot.lane.b32.xlu1 %v9901_v44, %s5849_s10  ;;  %4241 = vrot.lane.b32.xlu0 %v9904_v34, %s5849_s10  ;;  %v9940_v9 = vsel %vm1083_vm2, %v4056_v40, %v4058_v31  ;;  %v9943_v52 = vsel %vm1083_vm2, %v4055_v23, %v4056_v40  ;;  %v9953_v27 = vsel %vm1083_vm2, %v4061_v30, %v4063_v41  ;;  %v4065_v23 = vrot.slane %v9647_v35, 2 }
 0x540   : > { %12650 = vst [vmem:[#allocation137_spill] sm:$0xff] %v9943_v52  ;;  %v9956_v31 = vsel %vm1083_vm2, %v4060_v16, %v4061_v30  ;;  %v4066_v40 = vrot.slane %v9641_v57, 2  ;;  %v4073_v34 = vrot.slane %v9680_v47, 2  ;;  %v4071_v30 = vrot.slane %v9682_v21, 2 }
 0x541   : > { %v4070_v16 = vrot.slane %v9671_v3, 2  ;;  %v4078_v44 = vrot.slane %v9714_v54, 2 }
 0x542   : > { %v9966_v29 = vsel %vm1083_vm2, %v4066_v40, %v4068_v63  ;;  %v9969_v41 = vsel %vm1083_vm2, %v4065_v23, %v4066_v40  ;;  %v9979_v47 = vsel %vm1083_vm2, %v4071_v30, %v4073_v34  ;;  %v4075_v23 = vrot.slane %v9702_v49, 2 }
 0x543   : > { %4247 = vrot.lane.b32.xlu1 %v9914_v26, %s5849_s10  ;;  %4245 = vrot.lane.b32.xlu0 %v9917_v60, %s5849_s10  ;;  %v9982_v63 = vsel %vm1083_vm2, %v4070_v16, %v4071_v30  ;;  %v4076_v40 = vrot.slane %v9699_v36, 2  ;;  %v4083_v60 = vrot.slane %v9728_v0, 2  ;;  %v4081_v30 = vrot.slane %v9730_v32, 2 }
 0x544   : > { %v4080_v16 = vrot.slane %v9719_v50, 2  ;;  %v4088_v26 = vrot.slane %v9762_v24, 2 }
 0x545   : > { %v9992_v54 = vsel %vm1083_vm2, %v4076_v40, %v4078_v44  ;;  %v9995_v34 = vsel %vm1083_vm2, %v4075_v23, %v4076_v40  ;;  %v10005_v0 = vsel %vm1083_vm2, %v4081_v30, %v4083_v60  ;;  %v4085_v23 = vrot.slane %v9750_v12, 2 }
 0x546   : > { %12651 = vst [vmem:[#allocation93_spill] sm:$0xff] %v10005_v0  ;;  %v10008_v44 = vsel %vm1083_vm2, %v4080_v16, %v4081_v30  ;;  %v4086_v40 = vrot.slane %v9747_v20, 2  ;;  %v4091_v30 = vrot.slane %v9778_v48, 2  ;;  %v4090_v16 = vrot.slane %v9767_v18, 2 }
 0x547   : > { %4251 = vrot.lane.b32.xlu1 %v9927_v6, %s5849_s10  ;;  %4249 = vrot.lane.b32.xlu0 %v9930_v7, %s5849_s10  ;;  %12652 = vst [vmem:[#allocation94_spill] sm:$0xff] %v10008_v44  ;;  %v4093_v7 = vrot.slane %v9776_v11, 2  ;;  %v4098_v6 = vrot.slane %v9810_v19, 2  ;;  %v4103_v19 = vrot.slane %v9824_v14, 2  ;;  %v4108_v14 = vrot.slane %v9858_v53, 2 }
 0x548   : > { %v10018_v24 = vsel %vm1083_vm2, %v4086_v40, %v4088_v26  ;;  %v10021_v60 = vsel %vm1083_vm2, %v4085_v23, %v4086_v40  ;;  %v10034_v26 = vsel %vm1083_vm2, %v4090_v16, %v4091_v30  ;;  %v4095_v23 = vrot.slane %v9798_v62, 2  ;;  %v10037_v40 = vpop.permute.xlu1 %4143 }
 0x549   : > { %12653 = vst [vmem:[#allocation214_spill] sm:$0xff] %v10018_v24  ;;  %12654 = vst [vmem:[#allocation217_spill] sm:$0xff] %v10021_v60  ;;  %v10031_v11 = vsel %vm1083_vm2, %v4091_v30, %v4093_v7  ;;  %v4101_v16 = vrot.slane %v9826_v4, 2  ;;  %v4113_v53 = vrot.slane %v9872_v45, 2 }
 0x54a   : > { %12655 = vst [vmem:[#allocation262_spill] sm:$0xff] %v10031_v11  ;;  %12656 = vst [vmem:[#allocation265_spill] sm:$0xff] %v10034_v26 }
 0x54b   : > { %4255 = vrot.lane.b32.xlu1 %v9940_v9, %s5849_s10  ;;  %4253 = vrot.lane.b32.xlu0 %v9943_v52, %s5849_s10  ;;  %12657 = vst [vmem:[#allocation313_spill] sm:$0xff] %v10037_v40  ;;  %v4100_v40 = vrot.slane %v9815_v15, 2 }
 0x54f   : > { %4259 = vrot.lane.b32.xlu1 %v9953_v27, %s5849_s10  ;;  %4257 = vrot.lane.b32.xlu0 %v9956_v31, %s5849_s10 }
 0x553   : > { %4263 = vrot.lane.b32.xlu1 %v9966_v29, %s5849_s10  ;;  %4261 = vrot.lane.b32.xlu0 %v9969_v41, %s5849_s10 }
 0x557   : > { %4267 = vrot.lane.b32.xlu1 %v9979_v47, %s5849_s10  ;;  %4265 = vrot.lane.b32.xlu0 %v9982_v63, %s5849_s10 }
 0x55b   : > { %4271 = vrot.lane.b32.xlu1 %v9992_v54, %s5849_s10  ;;  %4269 = vrot.lane.b32.xlu0 %v9995_v34, %s5849_s10 }
 0x55f   : > { %4275 = vrot.lane.b32.xlu1 %v10005_v0, %s5849_s10  ;;  %4273 = vrot.lane.b32.xlu0 %v10008_v44, %s5849_s10 }
 0x563   : > { %4279 = vrot.lane.b32.xlu1 %v10018_v24, %s5849_s10  ;;  %4277 = vrot.lane.b32.xlu0 %v10021_v60, %s5849_s10  ;;  %v4096_v60 = vrot.slane %v9795_v8, 2  ;;  %v10057_v24 = vpop.permute.xlu0 %4141 }
 0x564   : > { %12658 = vst [vmem:[#allocation316_spill] sm:$0xff] %v10057_v24  ;;  %v4106_v24 = vrot.slane %v9843_v42, 2 }
 0x565   : > { %v10046_v7 = vsel %vm1083_vm2, %v4096_v60, %v4098_v6  ;;  %v10049_v30 = vsel %vm1083_vm2, %v4095_v23, %v4096_v60  ;;  %v10063_v6 = vsel %vm1083_vm2, %v4101_v16, %v4103_v19  ;;  %v10066_v60 = vsel %vm1083_vm2, %v4100_v40, %v4101_v16 }
 0x566   : > { %v4105_v23 = vrot.slane %v9846_v2, 2  ;;  %v10080_v19 = vsel %vm1083_vm2, %v4106_v24, %v4108_v14  ;;  %v4111_v16 = vrot.slane %v9874_v58, 2 }
 0x567   : > { %4283 = vrot.lane.b32.xlu1 %v10031_v11, %s5849_s10  ;;  %4281 = vrot.lane.b32.xlu0 %v10034_v26, %s5849_s10  ;;  %v10059_v26 = vpop.permute.xlu1 %4147  ;;  %v10074_v11 = vpop.permute.xlu0 %4145 }
 0x568   : > { %12659 = vst [vmem:[#allocation138_spill] sm:$0xff] %v10059_v26  ;;  %12660 = vst [vmem:[#allocation193_spill] sm:$0xff] %v10074_v11  ;;  %v10083_v40 = vsel %vm1083_vm2, %v4105_v23, %v4106_v24  ;;  %v4110_v11 = vrot.slane %v9863_v1, 2  ;;  %v10094_v45 = vsel %vm1083_vm2, %v4111_v16, %v4113_v53 }
 0x56a   : > { %v10097_v14 = vsel %vm1083_vm2, %v4110_v11, %v4111_v16 }
 0x56b   : > { %4287 = vrot.lane.b32.xlu1 %v10046_v7, %s5849_s10  ;;  %4285 = vrot.lane.b32.xlu0 %v10049_v30, %s5849_s10  ;;  %v10076_v26 = vpop.permute.xlu1 %4151  ;;  %v10091_v52 = vpop.permute.xlu0 %4149 }
 0x56c   : > { %12661 = vst [vmem:[#allocation216_spill] sm:$0xff] %v10076_v26  ;;  %12662 = vst [vmem:[#allocation219_spill] sm:$0xff] %v10091_v52 }
 0x56f   : > { %4291 = vrot.lane.b32.xlu1 %v10063_v6, %s5849_s10  ;;  %4289 = vrot.lane.b32.xlu0 %v10066_v60, %s5849_s10  ;;  %v10099_v24 = vpop.permute.xlu1 %4155  ;;  %v10105_v23 = vpop.permute.xlu0 %4153 }
 0x570   : > { %12663 = vst [vmem:[#allocation264_spill] sm:$0xff] %v10099_v24  ;;  %12664 = vst [vmem:[#allocation267_spill] sm:$0xff] %v10105_v23 }
 0x573   : > { %4295 = vrot.lane.b32.xlu1 %v10080_v19, %s5849_s10  ;;  %4293 = vrot.lane.b32.xlu0 %v10083_v40, %s5849_s10  ;;  %v10107_v26 = vpop.permute.xlu1 %4159  ;;  %v10113_v11 = vpop.permute.xlu0 %4157 }
 0x574   : > { %12665 = vst [vmem:[#allocation315_spill] sm:$0xff] %v10107_v26  ;;  %12666 = vst [vmem:[#allocation318_spill] sm:$0xff] %v10113_v11 }
 0x577   : > { %4299 = vrot.lane.b32.xlu1 %v10094_v45, %s5849_s10  ;;  %4297 = vrot.lane.b32.xlu0 %v10097_v14, %s5849_s10  ;;  %v10119_v53 = vpop.permute.xlu0 %4161  ;;  %v10121_v16 = vpop.permute.xlu1 %4163 }
 0x578   : > { %12667 = vst [vmem:[#allocation141_spill] sm:$0xff] %v10119_v53  ;;  %12668 = vst [vmem:[#allocation98_spill] sm:$0xff] %v10121_v16 }
 0x57b   : > { %4335 = vrot.lane.b32.xlu1 %v9535_v22, %s5850_s11  ;;  %4333 = vrot.lane.b32.xlu0 %v9527_v46, %s5850_s11  ;;  %v10127_v22 = vpop.permute.xlu0 %4165  ;;  %v10129_v46 = vpop.permute.xlu1 %4167 }
 0x57c   : > { %12669 = vst [vmem:[#allocation97_spill] sm:$0xff] %v10127_v22 }
 0x57f   : > { %4339 = vrot.lane.b32.xlu1 %v9544_v43, %s5850_s11  ;;  %4337 = vrot.lane.b32.xlu0 %v9552_v28, %s5850_s11  ;;  %v10135_v52 = vpop.permute.xlu1 %4171  ;;  %v10137_v23 = vpop.permute.xlu0 %4169 }
 0x583   : > { %4343 = vrot.lane.b32.xlu1 %v9581_v55, %s5850_s11  ;;  %4341 = vrot.lane.b32.xlu0 %v9573_v56, %s5850_s11  ;;  %v10143_v28 = vpop.permute.xlu0 %4173  ;;  %v10145_v24 = vpop.permute.xlu1 %4175 }
 0x584   : > { %12670 = vst [vmem:[#allocation218_spill] sm:$0xff] %v10143_v28  ;;  %12671 = vst [vmem:[#allocation221_spill] sm:$0xff] %v10145_v24 }
 0x587   : > { %4347 = vrot.lane.b32.xlu1 %v9593_v33, %s5850_s11  ;;  %4345 = vrot.lane.b32.xlu0 %v9600_v37, %s5850_s11  ;;  %v10151_v43 = vpop.permute.xlu1 %4179  ;;  %v10153_v11 = vpop.permute.xlu0 %4177 }
 0x588   : > { %12672 = vst [vmem:[#allocation266_spill] sm:$0xff] %v10151_v43  ;;  %12673 = vst [vmem:[#allocation269_spill] sm:$0xff] %v10153_v11  ;;  %v5778_v11 = vpop.f32.mrf.mxu0 }
 0x58b   : > { %4351 = vrot.lane.b32.xlu1 %v9629_v17, %s5850_s11  ;;  %4349 = vrot.lane.b32.xlu0 %v9621_v13, %s5850_s11  ;;  %v10159_v56 = vpop.permute.xlu0 %4181  ;;  %v10161_v28 = vpop.permute.xlu1 %4183 }
 0x58c   : > { %12674 = vst [vmem:[#allocation317_spill] sm:$0xff] %v10159_v56  ;;  %12675 = vst [vmem:[#allocation320_spill] sm:$0xff] %v10161_v28 }
 0x58f   : > { %4355 = vrot.lane.b32.xlu1 %v9641_v57, %s5850_s11  ;;  %4353 = vrot.lane.b32.xlu0 %v9647_v35, %s5850_s11  ;;  %v10167_v24 = vpop.permute.xlu1 %4187  ;;  %v10169_v43 = vpop.permute.xlu0 %4185 }
 0x590   : > { %12676 = vst [vmem:[#allocation142_spill] sm:$0xff] %v10167_v24  ;;  %12677 = vst [vmem:[#allocation197_spill] sm:$0xff] %v10169_v43  ;;  %v3467_v24 = vpop.f32.mrf.mxu0 }
 0x592   : > { %v10187_v55 = vpop.f32.mrf.mxu0 }
 0x593   : > { %4359 = vrot.lane.b32.xlu1 %v9682_v21, %s5850_s11  ;;  %4357 = vrot.lane.b32.xlu0 %v9671_v3, %s5850_s11  ;;  %v10175_v56 = vpop.permute.xlu0 %4189  ;;  %v10177_v28 = vpop.permute.xlu1 %4191 }
 0x594   : > { %12678 = vst [vmem:[#allocation196_spill] sm:$0xff] %v10175_v56  ;;  %12679 = vst [vmem:[#allocation220_spill] sm:$0xff] %v10177_v28 }
 0x597   : > { %4363 = vrot.lane.b32.xlu1 %v9699_v36, %s5850_s11  ;;  %4361 = vrot.lane.b32.xlu0 %v9702_v49, %s5850_s11  ;;  %v10183_v26 = vpop.permute.xlu1 %4195  ;;  %v10185_v43 = vpop.permute.xlu0 %4193 }
 0x598   : > { %12680 = vst [vmem:[#allocation223_spill] sm:$0xff] %v10183_v26  ;;  %12681 = vst [vmem:[#allocation268_spill] sm:$0xff] %v10185_v43 }
 0x59b   : > { %4367 = vrot.lane.b32.xlu1 %v9730_v32, %s5850_s11  ;;  %4365 = vrot.lane.b32.xlu0 %v9719_v50, %s5850_s11  ;;  %v10193_v56 = vpop.permute.xlu0 %4197 }
 0x59c   : > { %12682 = vst [vmem:[#allocation271_spill] sm:$0xff] %v10193_v56 }
 0x59f   : > { %4371 = vrot.lane.b32.xlu1 %v9747_v20, %s5850_s11  ;;  %4369 = vrot.lane.b32.xlu0 %v9750_v12, %s5850_s11  ;;  %v3477_v20 = vpop.f32.mrf.mxu0 }
 0x5a2   : > { %v10195_v28 = vpop.permute.xlu1 %4199 }
 0x5a3   : > { %4375 = vrot.lane.b32.xlu1 %v9778_v48, %s5850_s11  ;;  %4373 = vrot.lane.b32.xlu0 %v9767_v18, %s5850_s11  ;;  %v3478_v48 = vadd.f32 %v9507_v39, %v3477_v20  ;;  %v3468_v18 = vadd.f32 %v9507_v39, %v3467_v24  ;;  %v3473_v20 = vadd.f32 %v5778_v11, %v9507_v39 }
 0x5a5   : > { %v3546_v16 = vmax.f32 %v3478_v48, 0.0  ;;  %v10229_v48 = vmax.f32 %v3473_v20, 0.0 }
 0x5a7   : > { %4379 = vrot.lane.b32.xlu1 %v9795_v8, %s5850_s11  ;;  %4377 = vrot.lane.b32.xlu0 %v9798_v62, %s5850_s11  ;;  %v5784_v62 = vpop.f32.mrf.mxu0  ;;  %v3544_v8 = vmax.f32 %v3468_v18, 0.0  ;;  %v3903_v24 = vmul.f32 %v9522_v61, %v3546_v16  ;;  %v4119_v16 = vrot.slane %v10229_v48, 1 }
 0x5a8   : > { %v3493_v61 = vadd.f32 %v5784_v62, %v9507_v39 }
 0x5a9   : > { %v10201_v12 = vpop.permute.xlu1 %4203  ;;  %v10203_v53 = vpop.permute.xlu0 %4201 }
 0x5ab   : > { %4383 = vrot.lane.b32.xlu1 %v9826_v4, %s5850_s11  ;;  %4381 = vrot.lane.b32.xlu0 %v9815_v15, %s5850_s11 }
 0x5ad   : > { %v10211_v37 = vpop.permute.xlu1 %4239  ;;  %v10213_v43 = vpop.permute.xlu0 %4237 }
 0x5ae   : > { %12683 = vst [vmem:[#allocation319_spill] sm:$0xff] %v10211_v37  ;;  %12684 = vst [vmem:[#allocation322_spill] sm:$0xff] %v10213_v43  ;;  %v3487_v37 = vpop.f32.mrf.mxu0  ;;  %v10232_v43 = vmul.f32 %v9519_v38, %v3544_v8  ;;  %v4126_v8 = vrot.slane %v3903_v24, 2 }
 0x5af   : > { %4387 = vrot.lane.b32.xlu1 %v9843_v42, %s5850_s11  ;;  %4385 = vrot.lane.b32.xlu0 %v9846_v2, %s5850_s11 }
 0x5b1   : > { %v10220_v33 = vpop.permute.xlu1 %4243  ;;  %v10222_v26 = vpop.permute.xlu0 %4241 }
 0x5b2   : > { %12685 = vst [vmem:[#allocation145_spill] sm:$0xff] %v10220_v33  ;;  %12686 = vst [vmem:[#allocation20_spill] sm:$0xff] %v10222_v26  ;;  %v4121_v33 = vrot.slane %v3903_v24, 1  ;;  %v3488_v26 = vadd.f32 %v9507_v39, %v3487_v37  ;;  %v3549_v37 = vmax.f32 %v3493_v61, 0.0  ;;  %v4124_v39 = vrot.slane %v10229_v48, 2 }
 0x5b3   : > { %4391 = vrot.lane.b32.xlu1 %v9874_v58, %s5850_s11  ;;  %4389 = vrot.lane.b32.xlu0 %v9863_v1, %s5850_s11 }
 0x5b4   : > { %v10262_v24 = vsel %vm1083_vm2, %v4124_v39, %v4126_v8 }
 0x5b5   : > { %v10234_v11 = vpop.permute.xlu1 %4247  ;;  %v10236_v18 = vpop.permute.xlu0 %4245 }
 0x5b6   : > { %12687 = vst [vmem:[#allocation363_spill] sm:$0xff] %v10234_v11  ;;  %12688 = vst [vmem:[#allocation102_spill] sm:$0xff] %v10236_v18  ;;  %v3548_v11 = vmax.f32 %v3488_v26, 0.0  ;;  %v10250_v18 = vsel %vm956_vm1, %v4119_v16, %v4121_v33  ;;  %v3906_v33 = vmul.f32 0.0, %v3549_v37 }
 0x5b7   : > { %4395 = vrot.lane.b32.xlu1 %v10229_v48, %s5850_s11  ;;  %4393 = vrot.lane.b32.xlu0 %v10232_v43, %s5850_s11 }
 0x5b9   : > { %v10245_v20 = vpop.permute.xlu1 %4251  ;;  %v10247_v38 = vpop.permute.xlu0 %4249 }
 0x5ba   : > { %12689 = vst [vmem:[#allocation103_spill] sm:$0xff] %v10245_v20  ;;  %12690 = vst [vmem:[#allocation222_spill] sm:$0xff] %v10247_v38  ;;  %v3905_v20 = vmul.f32 0.0, %v3548_v11  ;;  %v4134_v11 = vrot.slane %v3906_v33, 1 }
 0x5bb   : > { %4459 = vrot.lane.b32.xlu1 %v9723_v25, %s5851_s12  ;;  %4491 = vrot.lane.b32.xlu0 %v10250_v18, %s5851_s12 }
 0x5bc   : > { %v4132_v38 = vrot.slane %v3905_v20, 1  ;;  %v4137_v15 = vrot.slane %v3905_v20, 2 }
 0x5bd   : > { %v10257_v62 = vpop.permute.xlu1 %4255  ;;  %v10259_v22 = vpop.permute.xlu0 %4253 }
 0x5be   : > { %12691 = vst [vmem:[#allocation225_spill] sm:$0xff] %v10257_v62  ;;  %12692 = vst [vmem:[#allocation13_spill] sm:$0xff] %v10259_v22  ;;  %v4118_v62 = vrot.slane %v10232_v43, 1 }
 0x5bf   : > { %4555 = vrot.lane.b32.xlu1 %v9992_v54, %s5852_s13  ;;  %4587 = vrot.lane.b32.xlu0 %v10262_v24, %s5852_s13 }
 0x5c0   : > { %v10281_v37 = vsel %vm956_vm1, %v4118_v62, %v4119_v16  ;;  %v5822_v16 = vld [vmem:[%s11132_s3] ss:$0 sm:$0xff] }
 0x5c1   : > { %v10268_v26 = vpop.permute.xlu1 %4259  ;;  %v10270_v61 = vpop.permute.xlu0 %4257 }
 0x5c2   : > { %12693 = vst [vmem:[#allocation15_spill] sm:$0xff] %v10268_v26  ;;  %12694 = vst [vmem:[#allocation270_spill] sm:$0xff] %v10270_v61  ;;  %v4135_v26 = vsel %vm956_vm1, %v4132_v38, %v4134_v11  ;;  %v4139_v61 = vrot.slane %v3906_v33, 2 }
 0x5c3   : > { %4651 = vrot.lane.b32.xlu1 %v9730_v32, %s5853_s14  ;;  %4683 = vrot.lane.b32.xlu0 %v3905_v20, %s5853_s14  ;;  %v3483_v20 = vadd.f32 %v5822_v16, %v10187_v55 }
 0x5c4   : > { %v4140_v56 = vsel %vm1083_vm2, %v4137_v15, %v4139_v61  ;;  %v12698_v61 = vld [vmem:[#allocation121_spill] sm:$0xff] }
 0x5c5   : > { %v10276_v8 = vpop.permute.xlu1 %4263  ;;  %v10278_v22 = vpop.permute.xlu0 %4261 }
 0x5c6   : > { %12695 = vst [vmem:[#allocation273_spill] sm:$0xff] %v10278_v22  ;;  %v4123_v22 = vrot.slane %v10232_v43, 2 }
 0x5c7   : > { %4489 = vrot.lane.b32.xlu1 %v10281_v37, %s5851_s12  ;;  %4779 = vrot.lane.b32.xlu0 %v4135_v26, %s5854_s15 }
 0x5c8   : > { %v4125_v26 = vsel %vm1083_vm2, %v4123_v22, %v4124_v39 }
 0x5c9   : > { %v10287_v32 = vpop.permute.xlu1 %4267  ;;  %v10289_v13 = vpop.permute.xlu0 %4265 }
 0x5cb   : > { %4875 = vrot.lane.b32.xlu1 %v4140_v56, %s5855_s26  ;;  %4747 = vrot.lane.b32.xlu0 %v9737_v51, %s5854_s15  ;;  %v3547_v56 = vmax.f32 %v3483_v20, 0.0 }
 0x5cd   : > { %v10300_v62 = vpop.permute.xlu1 %4271  ;;  %v10302_v33 = vpop.permute.xlu0 %4269  ;;  %v3904_v55 = vmul.f32 0.0, %v3547_v56 }
 0x5ce   : > { %12696 = vst [vmem:[#allocation163_spill] sm:$0xff] %v10300_v62  ;;  %12697 = vst [vmem:[#allocation58_spill] sm:$0xff] %v10302_v33 }
 0x5cf   : > { %4585 = vrot.lane.b32.xlu1 %v4125_v26, %s5852_s13  ;;  %4457 = vrot.lane.b32.xlu0 %v12698_v61, %s5851_s12  ;;  %v4131_v39 = vrot.slane %v3904_v55, 1  ;;  %v4136_v56 = vrot.slane %v3904_v55, 2 }
 0x5d1   : > { %v10308_v11 = vpop.permute.xlu1 %4275  ;;  %v10310_v51 = vpop.permute.xlu0 %4273  ;;  %v4133_v62 = vsel %vm956_vm1, %v4131_v39, %v4132_v38 }
 0x5d2   : > { %12699 = vst [vmem:[#allocation321_spill] sm:$0xff] %v10308_v11  ;;  %12700 = vst [vmem:[#allocation324_spill] sm:$0xff] %v10310_v51 }
 0x5d3   : > { %4553 = vrot.lane.b32.xlu1 %v9995_v34, %s5852_s13  ;;  %4843 = vrot.lane.b32.xlu0 %v10005_v0, %s5855_s26  ;;  %v12737_v0 = vld [vmem:[#allocation312_spill] sm:$0xff] }
 0x5d5   : > { %v10316_v16 = vpop.permute.xlu1 %4279  ;;  %v10318_v22 = vpop.permute.xlu0 %4277 }
 0x5d6   : > { %12701 = vst [vmem:[#allocation146_spill] sm:$0xff] %v10316_v16  ;;  %12702 = vst [vmem:[#allocation17_spill] sm:$0xff] %v10318_v22  ;;  %v12707_v22 = vld [vmem:[#allocation5_spill] sm:$0xff] }
 0x5d7   : > { %4649 = vrot.lane.b32.xlu1 %v9719_v50, %s5853_s14  ;;  %4681 = vrot.lane.b32.xlu0 %v3904_v55, %s5853_s14  ;;  %v4138_v50 = vsel %vm1083_vm2, %v4136_v56, %v4137_v15 }
 0x5d9   : > { %v10323_v20 = vpop.permute.xlu1 %4283  ;;  %v10325_v33 = vpop.permute.xlu0 %4281 }
 0x5da   : > { %12703 = vst [vmem:[#allocation362_spill] sm:$0xff] %v10323_v20  ;;  %12704 = vst [vmem:[#allocation365_spill] sm:$0xff] %v10325_v33 }
 0x5db   : > { %4487 = vrot.lane.b32.xlu1 %v9882_v10, %s5851_s12  ;;  %4777 = vrot.lane.b32.xlu0 %v4133_v62, %s5854_s15  ;;  %v12709_v62 = vld [vmem:[#allocation6_spill] sm:$0xff] }
 0x5dd   : > { %v10331_v51 = vpop.permute.xlu1 %4287  ;;  %v10333_v11 = vpop.permute.xlu0 %4285 }
 0x5de   : > { %12705 = vst [vmem:[#allocation200_spill] sm:$0xff] %v10331_v51  ;;  %12706 = vst [vmem:[#allocation201_spill] sm:$0xff] %v10333_v11 }
 0x5df   : > { %4873 = vrot.lane.b32.xlu1 %v4138_v50, %s5855_s26  ;;  %4745 = vrot.lane.b32.xlu0 %v12707_v22, %s5854_s15 }
 0x5e1   : > { %v10339_v16 = vpop.permute.xlu1 %4291  ;;  %v10341_v38 = vpop.permute.xlu0 %4289 }
 0x5e2   : > { %12708 = vst [vmem:[#allocation224_spill] sm:$0xff] %v10341_v38 }
 0x5e3   : > { %4583 = vrot.lane.b32.xlu1 %v10094_v45, %s5852_s13  ;;  %4455 = vrot.lane.b32.xlu0 %v12709_v62, %s5851_s12 }
 0x5e5   : > { %v10347_v55 = vpop.permute.xlu1 %4295  ;;  %v10349_v39 = vpop.permute.xlu0 %4293 }
 0x5e7   : > { %4551 = vrot.lane.b32.xlu1 %v9979_v47, %s5852_s13  ;;  %4841 = vrot.lane.b32.xlu0 %v10008_v44, %s5855_s26 }
 0x5e9   : > { %v10355_v50 = vpop.permute.xlu1 %4299  ;;  %v10357_v15 = vpop.permute.xlu0 %4297 }
 0x5eb   : > { %4647 = vrot.lane.b32.xlu1 %v9699_v36, %s5853_s14  ;;  %4679 = vrot.lane.b32.xlu0 %v10229_v48, %s5853_s14 }
 0x5ed   : > { %v10363_v56 = vpop.permute.xlu1 %4335  ;;  %v10365_v33 = vpop.permute.xlu0 %4333 }
 0x5ee   : > { %12710 = vst [vmem:[#allocation227_spill] sm:$0xff] %v10363_v56  ;;  %12711 = vst [vmem:[#allocation14_spill] sm:$0xff] %v10365_v33  ;;  %v12716_v33 = vld [vmem:[#allocation211_spill] sm:$0xff] }
 0x5ef   : > { %4485 = vrot.lane.b32.xlu1 %v9885_v5, %s5851_s12  ;;  %4775 = vrot.lane.b32.xlu0 %v10250_v18, %s5854_s15 }
 0x5f1   : > { %v10371_v44 = vpop.permute.xlu1 %4339  ;;  %v10373_v22 = vpop.permute.xlu0 %4337 }
 0x5f2   : > { %12712 = vst [vmem:[#allocation18_spill] sm:$0xff] %v10371_v44  ;;  %12713 = vst [vmem:[#allocation272_spill] sm:$0xff] %v10373_v22 }
 0x5f3   : > { %4871 = vrot.lane.b32.xlu1 %v10262_v24, %s5855_s26  ;;  %4743 = vrot.lane.b32.xlu0 %v9723_v25, %s5854_s15 }
 0x5f5   : > { %v10379_v48 = vpop.permute.xlu1 %4343  ;;  %v10381_v56 = vpop.permute.xlu0 %4341 }
 0x5f6   : > { %12714 = vst [vmem:[#allocation275_spill] sm:$0xff] %v10379_v48  ;;  %12715 = vst [vmem:[#allocation57_spill] sm:$0xff] %v10381_v56  ;;  %v12723_v48 = vld [vmem:[#allocation117_spill] sm:$0xff] }
 0x5f7   : > { %4581 = vrot.lane.b32.xlu1 %v10097_v14, %s5852_s13  ;;  %4453 = vrot.lane.b32.xlu0 %v12716_v33, %s5851_s12 }
 0x5f9   : > { %v10387_v18 = vpop.permute.xlu1 %4347  ;;  %v10389_v36 = vpop.permute.xlu0 %4345 }
 0x5fa   : > { %12717 = vst [vmem:[#allocation166_spill] sm:$0xff] %v10387_v18  ;;  %12718 = vst [vmem:[#allocation323_spill] sm:$0xff] %v10389_v36 }
 0x5fb   : > { %4549 = vrot.lane.b32.xlu1 %v9982_v63, %s5852_s13  ;;  %4839 = vrot.lane.b32.xlu0 %v9992_v54, %s5855_s26 }
 0x5fd   : > { %v10395_v25 = vpop.permute.xlu1 %4351  ;;  %v10397_v24 = vpop.permute.xlu0 %4349 }
 0x5fe   : > { %12719 = vst [vmem:[#allocation326_spill] sm:$0xff] %v10395_v25  ;;  %12720 = vst [vmem:[#allocation150_spill] sm:$0xff] %v10397_v24  ;;  %v12738_v25 = vld [vmem:[#allocation113_spill] sm:$0xff] }
 0x5ff   : > { %4645 = vrot.lane.b32.xlu1 %v9702_v49, %s5853_s14  ;;  %4677 = vrot.lane.b32.xlu0 %v10232_v43, %s5853_s14 }
 0x601   : > { %v10403_v22 = vpop.permute.xlu1 %4355  ;;  %v10405_v44 = vpop.permute.xlu0 %4353 }
 0x602   : > { %12721 = vst [vmem:[#allocation22_spill] sm:$0xff] %v10403_v22  ;;  %12722 = vst [vmem:[#allocation364_spill] sm:$0xff] %v10405_v44 }
 0x603   : > { %4483 = vrot.lane.b32.xlu1 %v9867_v59, %s5851_s12  ;;  %4773 = vrot.lane.b32.xlu0 %v10281_v37, %s5854_s15 }
 0x605   : > { %v10411_v54 = vpop.permute.xlu1 %4359  ;;  %v10413_v56 = vpop.permute.xlu0 %4357 }
 0x607   : > { %4869 = vrot.lane.b32.xlu1 %v4125_v26, %s5855_s26  ;;  %4741 = vrot.lane.b32.xlu0 %v12698_v61, %s5854_s15 }
 0x609   : > { %v10418_v43 = vpop.permute.xlu1 %4363  ;;  %v10420_v49 = vpop.permute.xlu0 %4361 }
 0x60b   : > { %4579 = vrot.lane.b32.xlu1 %v10080_v19, %s5852_s13  ;;  %4451 = vrot.lane.b32.xlu0 %v12723_v48, %s5851_s12 }
 0x60d   : > { %v10426_v37 = vpop.permute.xlu1 %4367  ;;  %v10428_v36 = vpop.permute.xlu0 %4365 }
 0x60e   : > { %12724 = vst [vmem:[#allocation367_spill] sm:$0xff] %v10426_v37  ;;  %12725 = vst [vmem:[#allocation106_spill] sm:$0xff] %v10428_v36  ;;  %v12730_v36 = vld [vmem:[#allocation189_spill] sm:$0xff] }
 0x60f   : > { %4547 = vrot.lane.b32.xlu1 %v9966_v29, %s5852_s13  ;;  %4837 = vrot.lane.b32.xlu0 %v9995_v34, %s5855_s26 }
 0x611   : > { %v10434_v26 = vpop.permute.xlu1 %4371  ;;  %v10436_v61 = vpop.permute.xlu0 %4369 }
 0x612   : > { %12726 = vst [vmem:[#allocation107_spill] sm:$0xff] %v10434_v26  ;;  %12727 = vst [vmem:[#allocation226_spill] sm:$0xff] %v10436_v61 }
 0x613   : > { %4643 = vrot.lane.b32.xlu1 %v9682_v21, %s5853_s14  ;;  %4675 = vrot.lane.b32.xlu0 %v9874_v58, %s5853_s14 }
 0x615   : > { %v10442_v18 = vpop.permute.xlu1 %4375  ;;  %v10444_v37 = vpop.permute.xlu0 %4373 }
 0x616   : > { %12728 = vst [vmem:[#allocation229_spill] sm:$0xff] %v10442_v18  ;;  %12729 = vst [vmem:[#allocation16_spill] sm:$0xff] %v10444_v37  ;;  %v12735_v37 = vld [vmem:[#allocation2_spill] sm:$0xff] }
 0x617   : > { %4481 = vrot.lane.b32.xlu1 %v12730_v36, %s5851_s12  ;;  %4771 = vrot.lane.b32.xlu0 %v9882_v10, %s5854_s15 }
 0x619   : > { %v10450_v34 = vpop.permute.xlu1 %4379  ;;  %v10452_v26 = vpop.permute.xlu0 %4377 }
 0x61a   : > { %12731 = vst [vmem:[#allocation23_spill] sm:$0xff] %v10450_v34  ;;  %12732 = vst [vmem:[#allocation274_spill] sm:$0xff] %v10452_v26 }
 0x61b   : > { %4867 = vrot.lane.b32.xlu1 %v10094_v45, %s5855_s26  ;;  %4739 = vrot.lane.b32.xlu0 %v12709_v62, %s5854_s15 }
 0x61d   : > { %v10458_v61 = vpop.permute.xlu1 %4383  ;;  %v10460_v18 = vpop.permute.xlu0 %4381 }
 0x61e   : > { %12733 = vst [vmem:[#allocation277_spill] sm:$0xff] %v10458_v61  ;;  %12734 = vst [vmem:[#allocation53_spill] sm:$0xff] %v10460_v18 }
 0x61f   : > { %4577 = vrot.lane.b32.xlu1 %v10083_v40, %s5852_s13  ;;  %4449 = vrot.lane.b32.xlu0 %v12735_v37, %s5851_s12 }
 0x621   : > { %v10466_v10 = vpop.permute.xlu1 %4387  ;;  %v10468_v34 = vpop.permute.xlu0 %4385 }
 0x622   : > { %12736 = vst [vmem:[#allocation61_spill] sm:$0xff] %v10468_v34 }
 0x623   : > { %4545 = vrot.lane.b32.xlu1 %v9969_v41, %s5852_s13  ;;  %4835 = vrot.lane.b32.xlu0 %v9979_v47, %s5855_s26 }
 0x625   : > { %v10474_v45 = vpop.permute.xlu1 %4391  ;;  %v10476_v62 = vpop.permute.xlu0 %4389 }
 0x627   : > { %4641 = vrot.lane.b32.xlu1 %v9671_v3, %s5853_s14  ;;  %4673 = vrot.lane.b32.xlu0 %v9863_v1, %s5853_s14 }
 0x629   : > { %v4396_v26 = vpop.permute.xlu1 %4395  ;;  %v4394_v20 = vpop.permute.xlu0 %4393 }
 0x62b   : > { %4479 = vrot.lane.b32.xlu1 %v12737_v0, %s5851_s12  ;;  %4769 = vrot.lane.b32.xlu0 %v9885_v5, %s5854_s15  ;;  %v4940_v5 = vsel %vm2542_vm3, %v9874_v58, %v10201_v12 }
 0x62d   : > { %v4460_v24 = vpop.permute.xlu1 %4459  ;;  %v4492_v47 = vpop.permute.xlu0 %4491 }
 0x62f   : > { %4865 = vrot.lane.b32.xlu1 %v10097_v14, %s5855_s26  ;;  %4737 = vrot.lane.b32.xlu0 %v12716_v33, %s5854_s15  ;;  %v4972_v14 = vsel %vm2597_vm4, %v4940_v5, %v10355_v50 }
 0x630   : > { %v5004_v33 = vsel %vm2652_vm5, %v4972_v14, %v4396_v26 }
 0x631   : > { %v4556_v18 = vpop.permute.xlu1 %4555  ;;  %v4588_v11 = vpop.permute.xlu0 %4587  ;;  %v5036_v38 = vsel %vm2707_vm6, %v5004_v33, %v4492_v47  ;;  %v4924_v47 = vsel %vm2542_vm3, %v9682_v21, %v10135_v52 }
 0x632   : > { %v5068_v22 = vsel %vm2762_vm7, %v5036_v38, %v4588_v11  ;;  %v12739_v11 = vld [vmem:[#allocation134_spill] sm:$0xff]  ;;  %v4956_v38 = vsel %vm2597_vm4, %v4924_v47, %v10287_v32 }
 0x633   : > { %4575 = vrot.lane.b32.xlu1 %v10063_v6, %s5852_s13  ;;  %4447 = vrot.lane.b32.xlu0 %v12738_v25, %s5851_s12 }
 0x635   : > { %v4652_v61 = vpop.permute.xlu1 %4651  ;;  %v4684_v51 = vpop.permute.xlu0 %4683 }
 0x636   : > { %v5100_v12 = vsel %vm2817_vm8, %v5068_v22, %v4684_v51  ;;  %v4988_v51 = vsel %vm2652_vm5, %v4956_v38, %v10418_v43 }
 0x637   : > { %4543 = vrot.lane.b32.xlu1 %v9953_v27, %s5852_s13  ;;  %4833 = vrot.lane.b32.xlu0 %v9982_v63, %s5855_s26  ;;  %v5020_v5 = vsel %vm2707_vm6, %v4988_v51, %v4460_v24  ;;  %v12740_v24 = vld [vmem:[#allocation186_spill] sm:$0xff] }
 0x638   : > { %v5052_v21 = vsel %vm2762_vm7, %v5020_v5, %v4556_v18 }
 0x639   : > { %v4490_v44 = vpop.permute.xlu1 %4489  ;;  %v4780_v34 = vpop.permute.xlu0 %4779 }
 0x63a   : > { %v5132_v58 = vsel %vm2872_vm9, %v5100_v12, %v4780_v34 }
 0x63b   : > { %4639 = vrot.lane.b32.xlu1 %v9641_v57, %s5853_s14  ;;  %4671 = vrot.lane.b32.xlu0 %v9843_v42, %s5853_s14 }
 0x63d   : > { %v4876_v63 = vpop.permute.xlu1 %4875  ;;  %v4748_v50 = vpop.permute.xlu0 %4747 }
 0x63e   : > { %v5164_v26 = vsel %vm2927_vm10, %v5132_v58, %v4876_v63 }
 0x63f   : > { %4477 = vrot.lane.b32.xlu1 %v12739_v11, %s5851_s12  ;;  %4767 = vrot.lane.b32.xlu0 %v9867_v59, %s5854_s15  ;;  %v5084_v59 = vsel %vm2817_vm8, %v5052_v21, %v4652_v61 }
 0x640   : > { %5652 = vmatprep.subr.msk.mxu1 %vm2998_vm11, %v5164_v26  ;;  %v5116_v32 = vsel %vm2872_vm9, %v5084_v59, %v4748_v50  ;;  %v12741_v26 = vld [vmem:[#allocation119_spill] sm:$0xff] }
 0x641   : > { %v4586_v22 = vpop.permute.xlu1 %4585  ;;  %v4458_v34 = vpop.permute.xlu0 %4457 }
 0x643   : > { %4863 = vrot.lane.b32.xlu1 %v10080_v19, %s5855_s26  ;;  %4735 = vrot.lane.b32.xlu0 %v12723_v48, %s5854_s15  ;;  %v4939_v48 = vsel %vm2542_vm3, %v9863_v1, %v10203_v53 }
 0x644   : > { %v4971_v61 = vsel %vm2597_vm4, %v4939_v48, %v10357_v15  ;;  %v4922_v48 = vsel %vm2542_vm3, %v9641_v57, %v10129_v46 }
 0x645   : > { %v4554_v52 = vpop.permute.xlu1 %4553  ;;  %v4844_v14 = vpop.permute.xlu0 %4843  ;;  %v5003_v33 = vsel %vm2652_vm5, %v4971_v61, %v4394_v20  ;;  %v12743_v61 = vld [vmem:[#allocation261_spill] sm:$0xff] }
 0x646   : > { %v5148_v43 = vsel %vm2927_vm10, %v5116_v32, %v4844_v14  ;;  %v5035_v63 = vsel %vm2707_vm6, %v5003_v33, %v4490_v44  ;;  %v4923_v44 = vsel %vm2542_vm3, %v9671_v3, %v10137_v23  ;;  %v4954_v33 = vsel %vm2597_vm4, %v4922_v48, %v10276_v8 }
 0x647   : > { %4573 = vrot.lane.b32.xlu1 %v10066_v60, %s5852_s13  ;;  %4445 = vrot.lane.b32.xlu0 %v12740_v24, %s5851_s12  ;;  %v5067_v50 = vsel %vm2762_vm7, %v5035_v63, %v4586_v22  ;;  %v4955_v47 = vsel %vm2597_vm4, %v4923_v44, %v10289_v13 }
 0x648   : > { %5653 = vmatpush3.xpose.msk.msra.mxu1 %vm2998_vm11, %v5148_v43  ;;  %v4987_v38 = vsel %vm2652_vm5, %v4955_v47, %v10420_v49 }
 0x649   : > { %v4650_v19 = vpop.permute.xlu1 %4649  ;;  %v4682_v18 = vpop.permute.xlu0 %4681  ;;  %v5019_v5 = vsel %vm2707_vm6, %v4987_v38, %v4458_v34  ;;  %v12742_v34 = vld [vmem:[#allocation4_spill] sm:$0xff] }
 0x64a   : > { %v5099_v1 = vsel %vm2817_vm8, %v5067_v50, %v4682_v18  ;;  %v5051_v3 = vsel %vm2762_vm7, %v5019_v5, %v4554_v52 }
 0x64b   : > { %4541 = vrot.lane.b32.xlu1 %v9956_v31, %s5852_s13  ;;  %4831 = vrot.lane.b32.xlu0 %v9966_v29, %s5855_s26 }
 0x64d   : > { %v4488_v12 = vpop.permute.xlu1 %4487  ;;  %v4778_v58 = vpop.permute.xlu0 %4777 }
 0x64e   : > { %v5131_v29 = vsel %vm2872_vm9, %v5099_v1, %v4778_v58 }
 0x64f   : > { %4637 = vrot.lane.b32.xlu1 %v9647_v35, %s5853_s14  ;;  %4669 = vrot.lane.b32.xlu0 %v9846_v2, %s5853_s14 }
 0x651   : > { %v4874_v53 = vpop.permute.xlu1 %4873  ;;  %v4746_v15 = vpop.permute.xlu0 %4745 }
 0x652   : > { %v5163_v20 = vsel %vm2927_vm10, %v5131_v29, %v4874_v53  ;;  %v12744_v29 = vld [vmem:[#allocation85_spill] sm:$0xff] }
 0x653   : > { %4475 = vrot.lane.b32.xlu1 %v12741_v26, %s5851_s12  ;;  %4765 = vrot.lane.b32.xlu0 %v12730_v36, %s5854_s15  ;;  %v5083_v36 = vsel %vm2817_vm8, %v5051_v3, %v4650_v19  ;;  %v12748_v3 = vld [vmem:[#allocation133_spill] sm:$0xff] }
 0x654   : > { %5654 = vmatprep.subr.msk.mxu1 %vm2998_vm11, %v5163_v20  ;;  %v5115_v13 = vsel %vm2872_vm9, %v5083_v36, %v4746_v15  ;;  %v12745_v15 = vld [vmem:[#allocation271_spill] sm:$0xff]  ;;  %v12746_v20 = vld [vmem:[#allocation137_spill] sm:$0xff] }
 0x655   : > { %v4584_v51 = vpop.permute.xlu1 %4583  ;;  %v4456_v22 = vpop.permute.xlu0 %4455 }
 0x657   : > { %4861 = vrot.lane.b32.xlu1 %v10083_v40, %s5855_s26  ;;  %4733 = vrot.lane.b32.xlu0 %v12735_v37, %s5854_s15  ;;  %v4938_v37 = vsel %vm2542_vm3, %v9843_v42, %v10195_v28 }
 0x658   : > { %v4970_v32 = vsel %vm2597_vm4, %v4938_v37, %v10347_v55 }
 0x659   : > { %v4552_v23 = vpop.permute.xlu1 %4551  ;;  %v4842_v21 = vpop.permute.xlu0 %4841  ;;  %v5002_v52 = vsel %vm2652_vm5, %v4970_v32, %v10474_v45 }
 0x65a   : > { %v5147_v49 = vsel %vm2927_vm10, %v5115_v13, %v4842_v21  ;;  %v5034_v19 = vsel %vm2707_vm6, %v5002_v52, %v4488_v12  ;;  %v4986_v12 = vsel %vm2652_vm5, %v4954_v33, %v10411_v54 }
 0x65b   : > { %4571 = vrot.lane.b32.xlu1 %v10046_v7, %s5852_s13  ;;  %4443 = vrot.lane.b32.xlu0 %v12742_v34, %s5851_s12  ;;  %v5066_v18 = vsel %vm2762_vm7, %v5034_v19, %v4584_v51  ;;  %v5018_v50 = vsel %vm2707_vm6, %v4986_v12, %v4456_v22 }
 0x65c   : > { %5655 = vmatpush3.xpose.msk.msra.mxu1 %vm2998_vm11, %v5147_v49  ;;  %v5050_v46 = vsel %vm2762_vm7, %v5018_v50, %v4552_v23  ;;  %v12749_v23 = vld [vmem:[#allocation97_spill] sm:$0xff]  ;;  %v12750_v49 = vld [vmem:[#allocation130_spill] sm:$0xff] }
 0x65d   : > { %v4648_v40 = vpop.permute.xlu1 %4647  ;;  %v4680_v59 = vpop.permute.xlu0 %4679  ;;  %v4921_v21 = vsel %vm2542_vm3, %v9647_v35, %v12749_v23  ;;  %v12765_v23 = vld [vmem:[#allocation314_spill] sm:$0xff] }
 0x65e   : > { %v5098_v28 = vsel %vm2817_vm8, %v5066_v18, %v4680_v59  ;;  %v5082_v57 = vsel %vm2817_vm8, %v5050_v46, %v4648_v40  ;;  %v12751_v40 = vld [vmem:[#allocation273_spill] sm:$0xff] }
 0x65f   : > { %4539 = vrot.lane.b32.xlu1 %v9940_v9, %s5852_s13  ;;  %4829 = vrot.lane.b32.xlu0 %v9969_v41, %s5855_s26  ;;  %v4953_v59 = vsel %vm2597_vm4, %v4921_v21, %v12751_v40  ;;  %v12757_v46 = vld [vmem:[#allocation213_spill] sm:$0xff]  ;;  %v12766_v21 = vld [vmem:[#allocation224_spill] sm:$0xff] }
 0x660   : > { %v4985_v37 = vsel %vm2652_vm5, %v4953_v59, %v10413_v56  ;;  %v12767_v59 = vld [vmem:[#allocation61_spill] sm:$0xff] }
 0x661   : > { %v4486_v14 = vpop.permute.xlu1 %4485  ;;  %v4776_v43 = vpop.permute.xlu0 %4775 }
 0x662   : > { %v5130_v42 = vsel %vm2872_vm9, %v5098_v28, %v4776_v43  ;;  %v12752_v28 = vld [vmem:[#allocation262_spill] sm:$0xff] }
 0x663   : > { %4635 = vrot.lane.b32.xlu1 %v9629_v17, %s5853_s14  ;;  %4667 = vrot.lane.b32.xlu0 %v9826_v4, %s5853_s14 }
 0x665   : > { %v4872_v41 = vpop.permute.xlu1 %4871  ;;  %v4744_v55 = vpop.permute.xlu0 %4743 }
 0x666   : > { %v5162_v45 = vsel %vm2927_vm10, %v5130_v42, %v4872_v41  ;;  %v12753_v42 = vld [vmem:[#allocation84_spill] sm:$0xff] }
 0x667   : > { %4473 = vrot.lane.b32.xlu1 %v12743_v61, %s5851_s12  ;;  %4763 = vrot.lane.b32.xlu0 %v12737_v0, %s5854_s15  ;;  %v5114_v0 = vsel %vm2872_vm9, %v5082_v57, %v4744_v55  ;;  %v12754_v55 = vld [vmem:[#allocation223_spill] sm:$0xff] }
 0x668   : > { %5656 = vmatprep.subr.msk.mxu1 %vm2998_vm11, %v5162_v45  ;;  %v12755_v45 = vld [vmem:[#allocation124_spill] sm:$0xff] }
 0x669   : > { %v4582_v58 = vpop.permute.xlu1 %4581  ;;  %v4454_v63 = vpop.permute.xlu0 %4453 }
 0x66b   : > { %4859 = vrot.lane.b32.xlu1 %v10063_v6, %s5855_s26  ;;  %4731 = vrot.lane.b32.xlu0 %v12738_v25, %s5854_s15  ;;  %v4937_v25 = vsel %vm2542_vm3, %v9846_v2, %v12745_v15  ;;  %v12747_v2 = vld [vmem:[#allocation114_spill] sm:$0xff] }
 0x66c   : > { %v4969_v44 = vsel %vm2597_vm4, %v4937_v25, %v10349_v39  ;;  %v12761_v15 = vld [vmem:[#allocation22_spill] sm:$0xff] }
 0x66d   : > { %v4550_v8 = vpop.permute.xlu1 %4549  ;;  %v4840_v1 = vpop.permute.xlu0 %4839  ;;  %v5001_v47 = vsel %vm2652_vm5, %v4969_v44, %v10476_v62 }
 0x66e   : > { %v5146_v54 = vsel %vm2927_vm10, %v5114_v0, %v4840_v1  ;;  %v5033_v22 = vsel %vm2707_vm6, %v5001_v47, %v4486_v14  ;;  %v5017_v14 = vsel %vm2707_vm6, %v4985_v37, %v4454_v63 }
 0x66f   : > { %4569 = vrot.lane.b32.xlu1 %v10049_v30, %s5852_s13  ;;  %4441 = vrot.lane.b32.xlu0 %v12744_v29, %s5851_s12  ;;  %v5065_v5 = vsel %vm2762_vm7, %v5033_v22, %v4582_v58  ;;  %v5049_v35 = vsel %vm2762_vm7, %v5017_v14, %v4550_v8  ;;  %v12758_v8 = vld [vmem:[#allocation98_spill] sm:$0xff] }
 0x670   : > { %5657 = vmatpush3.xpose.msk.msra.mxu1 %vm2998_vm11, %v5146_v54  ;;  %v4920_v1 = vsel %vm2542_vm3, %v9629_v17, %v12758_v8  ;;  %v12759_v54 = vld [vmem:[#allocation210_spill] sm:$0xff]  ;;  %v12775_v8 = vld [vmem:[#allocation179_spill] sm:$0xff] }
 0x671   : > { %v4646_v6 = vpop.permute.xlu1 %4645  ;;  %v4678_v53 = vpop.permute.xlu0 %4677 }
 0x673   : > { %4537 = vrot.lane.b32.xlu1 %v12746_v20, %s5852_s13  ;;  %4827 = vrot.lane.b32.xlu0 %v9953_v27, %s5855_s26  ;;  %v5097_v27 = vsel %vm2817_vm8, %v5065_v5, %v4678_v53 }
 0x675   : > { %v4484_v38 = vpop.permute.xlu1 %4483  ;;  %v4774_v51 = vpop.permute.xlu0 %4773 }
 0x676   : > { %v5129_v36 = vsel %vm2872_vm9, %v5097_v27, %v4774_v51 }
 0x677   : > { %4633 = vrot.lane.b32.xlu1 %v12747_v2, %s5853_s14  ;;  %4665 = vrot.lane.b32.xlu0 %v12748_v3, %s5853_s14 }
 0x679   : > { %v4870_v39 = vpop.permute.xlu1 %4869  ;;  %v4742_v13 = vpop.permute.xlu0 %4741 }
 0x67a   : > { %v5161_v62 = vsel %vm2927_vm10, %v5129_v36, %v4870_v39  ;;  %v12762_v36 = vld [vmem:[#allocation265_spill] sm:$0xff]  ;;  %v12763_v39 = vld [vmem:[#allocation80_spill] sm:$0xff] }
 0x67b   : > { %4471 = vrot.lane.b32.xlu1 %v12750_v49, %s5851_s12  ;;  %4761 = vrot.lane.b32.xlu0 %v12739_v11, %s5854_s15  ;;  %v5081_v11 = vsel %vm2817_vm8, %v5049_v35, %v4646_v6  ;;  %v12760_v6 = vld [vmem:[#allocation15_spill] sm:$0xff] }
 0x67c   : > { %5658 = vmatprep.subr.msk.mxu1 %vm2998_vm11, %v5161_v62  ;;  %v5113_v43 = vsel %vm2872_vm9, %v5081_v11, %v4742_v13  ;;  %v4952_v53 = vsel %vm2597_vm4, %v4920_v1, %v12760_v6  ;;  %v12764_v62 = vld [vmem:[#allocation268_spill] sm:$0xff]  ;;  %v12769_v11 = vld [vmem:[#allocation9_spill] sm:$0xff] }
 0x67d   : > { %v4580_v32 = vpop.permute.xlu1 %4579  ;;  %v4452_v52 = vpop.permute.xlu0 %4451  ;;  %v4984_v25 = vsel %vm2652_vm5, %v4952_v53, %v12761_v15  ;;  %v12776_v6 = vld [vmem:[#allocation220_spill] sm:$0xff] }
 0x67e   : > { %v12777_v53 = vld [vmem:[#allocation260_spill] sm:$0xff] }
 0x67f   : > { %4857 = vrot.lane.b32.xlu1 %v10066_v60, %s5855_s26  ;;  %4729 = vrot.lane.b32.xlu0 %v12740_v24, %s5854_s15  ;;  %v4936_v24 = vsel %vm2542_vm3, %v9826_v4, %v12754_v55  ;;  %v12756_v4 = vld [vmem:[#allocation79_spill] sm:$0xff]  ;;  %v12771_v55 = vld [vmem:[#allocation88_spill] sm:$0xff] }
 0x680   : > { %v4968_v48 = vsel %vm2597_vm4, %v4936_v24, %v10339_v16  ;;  %v12772_v24 = vld [vmem:[#allocation270_spill] sm:$0xff]  ;;  %v12778_v15 = vld [vmem:[#allocation200_spill] sm:$0xff] }
 0x681   : > { %v4548_v19 = vpop.permute.xlu1 %4547  ;;  %v4838_v18 = vpop.permute.xlu0 %4837  ;;  %v5000_v33 = vsel %vm2652_vm5, %v4968_v48, %v10466_v10 }
 0x682   : > { %v5145_v56 = vsel %vm2927_vm10, %v5113_v43, %v4838_v18  ;;  %v5032_v63 = vsel %vm2707_vm6, %v5000_v33, %v4484_v38  ;;  %v5016_v38 = vsel %vm2707_vm6, %v4984_v25, %v4452_v52  ;;  %v12773_v33 = vld [vmem:[#allocation364_spill] sm:$0xff] }
 0x683   : > { %4567 = vrot.lane.b32.xlu1 %v12752_v28, %s5852_s13  ;;  %4439 = vrot.lane.b32.xlu0 %v12753_v42, %s5851_s12  ;;  %v5064_v50 = vsel %vm2762_vm7, %v5032_v63, %v4580_v32  ;;  %v5048_v17 = vsel %vm2762_vm7, %v5016_v38, %v4548_v19 }
 0x684   : > { %5659 = vmatpush3.xpose.msk.msra.mxu1 %vm2998_vm11, %v5145_v56 }
 0x685   : > { %v4644_v60 = vpop.permute.xlu1 %4643  ;;  %v4676_v41 = vpop.permute.xlu0 %4675 }
 0x687   : > { %4535 = vrot.lane.b32.xlu1 %v12755_v45, %s5852_s13  ;;  %4825 = vrot.lane.b32.xlu0 %v9956_v31, %s5855_s26  ;;  %v5096_v31 = vsel %vm2817_vm8, %v5064_v50, %v4676_v41 }
 0x689   : > { %v4482_v12 = vpop.permute.xlu1 %4481  ;;  %v4772_v58 = vpop.permute.xlu0 %4771 }
 0x68a   : > { %v5128_v57 = vsel %vm2872_vm9, %v5096_v31, %v4772_v58 }
 0x68b   : > { %4631 = vrot.lane.b32.xlu1 %v12756_v4, %s5853_s14  ;;  %4663 = vrot.lane.b32.xlu0 %v12757_v46, %s5853_s14 }
 0x68d   : > { %v4868_v16 = vpop.permute.xlu1 %4867  ;;  %v4740_v0 = vpop.permute.xlu0 %4739 }
 0x68e   : > { %v5160_v10 = vsel %vm2927_vm10, %v5128_v57, %v4868_v16 }
 0x68f   : > { %4469 = vrot.lane.b32.xlu1 %v12759_v54, %s5851_s12  ;;  %4759 = vrot.lane.b32.xlu0 %v12741_v26, %s5854_s15  ;;  %v5080_v26 = vsel %vm2817_vm8, %v5048_v17, %v4644_v60  ;;  %v12770_v60 = vld [vmem:[#allocation141_spill] sm:$0xff] }
 0x690   : > { %5660 = vmatprep.subr.msk.mxu1 %vm2998_vm11, %v5160_v10  ;;  %v5112_v51 = vsel %vm2872_vm9, %v5080_v26, %v4740_v0  ;;  %v4919_v41 = vsel %vm2542_vm3, %v12747_v2, %v12770_v60  ;;  %v12774_v10 = vld [vmem:[#allocation214_spill] sm:$0xff]  ;;  %v12787_v60 = vld [vmem:[#allocation76_spill] sm:$0xff] }
 0x691   : > { %v4578_v44 = vpop.permute.xlu1 %4577  ;;  %v4450_v47 = vpop.permute.xlu0 %4449  ;;  %v4951_v48 = vsel %vm2597_vm4, %v4919_v41, %v12772_v24  ;;  %v12788_v24 = vld [vmem:[#allocation196_spill] sm:$0xff] }
 0x693   : > { %4855 = vrot.lane.b32.xlu1 %v10046_v7, %s5855_s26  ;;  %4727 = vrot.lane.b32.xlu0 %v12742_v34, %s5854_s15  ;;  %v4935_v34 = vsel %vm2542_vm3, %v12748_v3, %v12764_v62  ;;  %v12768_v3 = vld [vmem:[#allocation183_spill] sm:$0xff] }
 0x694   : > { %v4967_v40 = vsel %vm2597_vm4, %v4935_v34, %v12766_v21  ;;  %v12782_v62 = vld [vmem:[#allocation315_spill] sm:$0xff]  ;;  %v12783_v21 = vld [vmem:[#allocation126_spill] sm:$0xff] }
 0x695   : > { %v4546_v22 = vpop.permute.xlu1 %4545  ;;  %v4836_v5 = vpop.permute.xlu0 %4835  ;;  %v4999_v37 = vsel %vm2652_vm5, %v4967_v40, %v12767_v59  ;;  %v4918_v34 = vsel %vm2542_vm3, %v12756_v4, %v12782_v62  ;;  %v12784_v40 = vld [vmem:[#allocation225_spill] sm:$0xff]  ;;  %v12799_v62 = vld [vmem:[#allocation176_spill] sm:$0xff] }
 0x696   : > { %v5144_v27 = vsel %vm2927_vm10, %v5112_v51, %v4836_v5  ;;  %v5031_v14 = vsel %vm2707_vm6, %v4999_v37, %v4482_v12  ;;  %v4983_v12 = vsel %vm2652_vm5, %v4951_v48, %v12773_v33  ;;  %v4950_v59 = vsel %vm2597_vm4, %v4918_v34, %v12784_v40  ;;  %v12785_v37 = vld [vmem:[#allocation326_spill] sm:$0xff]  ;;  %v12789_v48 = vld [vmem:[#allocation263_spill] sm:$0xff]  ;;  %v12790_v33 = vld [vmem:[#allocation201_spill] sm:$0xff] }
 0x697   : > { %4565 = vrot.lane.b32.xlu1 %v12762_v36, %s5852_s13  ;;  %4437 = vrot.lane.b32.xlu0 %v12763_v39, %s5851_s12  ;;  %v5063_v35 = vsel %vm2762_vm7, %v5031_v14, %v4578_v44  ;;  %v5015_v50 = vsel %vm2707_vm6, %v4983_v12, %v4450_v47  ;;  %v12779_v44 = vld [vmem:[#allocation277_spill] sm:$0xff]  ;;  %v12800_v40 = vld [vmem:[#allocation142_spill] sm:$0xff] }
 0x698   : > { %5661 = vmatpush3.xpose.msk.msra.mxu1 %vm2998_vm11, %v5144_v27  ;;  %v5047_v2 = vsel %vm2762_vm7, %v5015_v50, %v4546_v22  ;;  %v12781_v22 = vld [vmem:[#allocation89_spill] sm:$0xff] }
 0x699   : > { %v4642_v7 = vpop.permute.xlu1 %4641  ;;  %v4674_v13 = vpop.permute.xlu0 %4673 }
 0x69b   : > { %4533 = vrot.lane.b32.xlu1 %v12765_v23, %s5852_s13  ;;  %4823 = vrot.lane.b32.xlu0 %v9940_v9, %s5855_s26  ;;  %v5095_v9 = vsel %vm2817_vm8, %v5063_v35, %v4674_v13 }
 0x69d   : > { %v4480_v32 = vpop.permute.xlu1 %4479  ;;  %v4770_v52 = vpop.permute.xlu0 %4769 }
 0x69e   : > { %v5127_v43 = vsel %vm2872_vm9, %v5095_v9, %v4770_v52 }
 0x69f   : > { %4629 = vrot.lane.b32.xlu1 %v12768_v3, %s5853_s14  ;;  %4661 = vrot.lane.b32.xlu0 %v12769_v11, %s5853_s14 }
 0x6a1   : > { %v4866_v19 = vpop.permute.xlu1 %4865  ;;  %v4738_v18 = vpop.permute.xlu0 %4737 }
 0x6a2   : > { %v5159_v56 = vsel %vm2927_vm10, %v5127_v43, %v4866_v19 }
 0x6a3   : > { %4467 = vrot.lane.b32.xlu1 %v12771_v55, %s5851_s12  ;;  %4757 = vrot.lane.b32.xlu0 %v12743_v61, %s5854_s15  ;;  %v5079_v61 = vsel %vm2817_vm8, %v5047_v2, %v4642_v7 }
 0x6a4   : > { %5662 = vmatprep.subr.msk.mxu1 %vm2998_vm11, %v5159_v56  ;;  %v5111_v31 = vsel %vm2872_vm9, %v5079_v61, %v4738_v18  ;;  %v12786_v56 = vld [vmem:[#allocation217_spill] sm:$0xff] }
 0x6a5   : > { %v4576_v58 = vpop.permute.xlu1 %4575  ;;  %v4448_v63 = vpop.permute.xlu0 %4447 }
 0x6a7   : > { %4853 = vrot.lane.b32.xlu1 %v10049_v30, %s5855_s26  ;;  %4725 = vrot.lane.b32.xlu0 %v12744_v29, %s5854_s15  ;;  %v4934_v29 = vsel %vm2542_vm3, %v12757_v46, %v12776_v6  ;;  %v12780_v46 = vld [vmem:[#allocation72_spill] sm:$0xff]  ;;  %v12794_v6 = vld [vmem:[#allocation318_spill] sm:$0xff] }
 0x6a8   : > { %v4966_v25 = vsel %vm2597_vm4, %v4934_v29, %v12778_v15  ;;  %v4917_v29 = vsel %vm2542_vm3, %v12768_v3, %v12794_v6  ;;  %v12795_v15 = vld [vmem:[#allocation122_spill] sm:$0xff]  ;;  %v12811_v6 = vld [vmem:[#allocation71_spill] sm:$0xff] }
 0x6a9   : > { %v4544_v57 = vpop.permute.xlu1 %4543  ;;  %v4834_v16 = vpop.permute.xlu0 %4833  ;;  %v4998_v47 = vsel %vm2652_vm5, %v4966_v25, %v12779_v44  ;;  %v12796_v25 = vld [vmem:[#allocation13_spill] sm:$0xff] }
 0x6aa   : > { %v5143_v0 = vsel %vm2927_vm10, %v5111_v31, %v4834_v16  ;;  %v5030_v26 = vsel %vm2707_vm6, %v4998_v47, %v4480_v32  ;;  %v4982_v32 = vsel %vm2652_vm5, %v4950_v59, %v12785_v37  ;;  %v4949_v44 = vsel %vm2597_vm4, %v4917_v29, %v12796_v25  ;;  %v12797_v47 = vld [vmem:[#allocation150_spill] sm:$0xff]  ;;  %v12801_v59 = vld [vmem:[#allocation212_spill] sm:$0xff]  ;;  %v12813_v25 = vld [vmem:[#allocation215_spill] sm:$0xff] }
 0x6ab   : > { %4563 = vrot.lane.b32.xlu1 %v12774_v10, %s5852_s13  ;;  %4435 = vrot.lane.b32.xlu0 %v12775_v8, %s5851_s12  ;;  %v5062_v51 = vsel %vm2762_vm7, %v5030_v26, %v4576_v58  ;;  %v5014_v35 = vsel %vm2707_vm6, %v4982_v32, %v4448_v63  ;;  %v12791_v58 = vld [vmem:[#allocation53_spill] sm:$0xff]  ;;  %v12802_v37 = vld [vmem:[#allocation362_spill] sm:$0xff] }
 0x6ac   : > { %5663 = vmatpush3.xpose.msk.msra.mxu1 %vm2998_vm11, %v5143_v0  ;;  %v5046_v4 = vsel %vm2762_vm7, %v5014_v35, %v4544_v57  ;;  %v12793_v57 = vld [vmem:[#allocation129_spill] sm:$0xff] }
 0x6ad   : > { %v4640_v30 = vpop.permute.xlu1 %4639  ;;  %v4672_v1 = vpop.permute.xlu0 %4671 }
 0x6af   : > { %4531 = vrot.lane.b32.xlu1 %v12777_v53, %s5852_s13  ;;  %4821 = vrot.lane.b32.xlu0 %v12746_v20, %s5855_s26  ;;  %v5094_v20 = vsel %vm2817_vm8, %v5062_v51, %v4672_v1 }
 0x6b1   : > { %v4478_v38 = vpop.permute.xlu1 %4477  ;;  %v4768_v17 = vpop.permute.xlu0 %4767 }
 0x6b2   : > { %v5126_v5 = vsel %vm2872_vm9, %v5094_v20, %v4768_v17 }
 0x6b3   : > { %4627 = vrot.lane.b32.xlu1 %v12780_v46, %s5853_s14  ;;  %4659 = vrot.lane.b32.xlu0 %v12781_v22, %s5853_s14 }
 0x6b5   : > { %v4864_v27 = vpop.permute.xlu1 %4863  ;;  %v4736_v7 = vpop.permute.xlu0 %4735 }
 0x6b6   : > { %v5158_v13 = vsel %vm2927_vm10, %v5126_v5, %v4864_v27 }
 0x6b7   : > { %4465 = vrot.lane.b32.xlu1 %v12783_v21, %s5851_s12  ;;  %4755 = vrot.lane.b32.xlu0 %v12750_v49, %s5854_s15  ;;  %v5078_v49 = vsel %vm2817_vm8, %v5046_v4, %v4640_v30 }
 0x6b8   : > { %5664 = vmatprep.subr.msk.mxu1 %vm2998_vm11, %v5158_v13  ;;  %v5110_v9 = vsel %vm2872_vm9, %v5078_v49, %v4736_v7  ;;  %v12798_v13 = vld [vmem:[#allocation93_spill] sm:$0xff] }
 0x6b9   : > { %v4574_v52 = vpop.permute.xlu1 %4573  ;;  %v4446_v14 = vpop.permute.xlu0 %4445 }
 0x6bb   : > { %4851 = vrot.lane.b32.xlu1 %v12752_v28, %s5855_s26  ;;  %4723 = vrot.lane.b32.xlu0 %v12753_v42, %s5854_s15  ;;  %v4933_v42 = vsel %vm2542_vm3, %v12769_v11, %v12788_v24  ;;  %v12792_v11 = vld [vmem:[#allocation77_spill] sm:$0xff]  ;;  %v12806_v24 = vld [vmem:[#allocation264_spill] sm:$0xff] }
 0x6bc   : > { %v4965_v12 = vsel %vm2597_vm4, %v4933_v42, %v12790_v33  ;;  %v4916_v42 = vsel %vm2542_vm3, %v12780_v46, %v12806_v24  ;;  %v12807_v33 = vld [vmem:[#allocation5_spill] sm:$0xff] }
 0x6bd   : > { %v4542_v43 = vpop.permute.xlu1 %4541  ;;  %v4832_v19 = vpop.permute.xlu0 %4831  ;;  %v4997_v63 = vsel %vm2652_vm5, %v4965_v12, %v12791_v58  ;;  %v12808_v12 = vld [vmem:[#allocation103_spill] sm:$0xff]  ;;  %v12823_v24 = vld [vmem:[#allocation229_spill] sm:$0xff] }
 0x6be   : > { %v5142_v18 = vsel %vm2927_vm10, %v5110_v9, %v4832_v19  ;;  %v5029_v61 = vsel %vm2707_vm6, %v4997_v63, %v4478_v38  ;;  %v4981_v38 = vsel %vm2652_vm5, %v4949_v44, %v12797_v47  ;;  %v4948_v58 = vsel %vm2597_vm4, %v4916_v42, %v12808_v12  ;;  %v12809_v63 = vld [vmem:[#allocation166_spill] sm:$0xff]  ;;  %v12814_v44 = vld [vmem:[#allocation365_spill] sm:$0xff] }
 0x6bf   : > { %4561 = vrot.lane.b32.xlu1 %v12786_v56, %s5852_s13  ;;  %4433 = vrot.lane.b32.xlu0 %v12787_v60, %s5851_s12  ;;  %v5061_v31 = vsel %vm2762_vm7, %v5029_v61, %v4574_v52  ;;  %v5013_v51 = vsel %vm2707_vm6, %v4981_v38, %v4446_v14  ;;  %v12803_v52 = vld [vmem:[#allocation23_spill] sm:$0xff]  ;;  %v10918_v38 = vld [vmem:[%s11133_s4] sm:$0xff] }
 0x6c0   : > { %5665 = vmatpush3.xpose.msk.msra.mxu1 %vm2998_vm11, %v5142_v18  ;;  %v5045_v3 = vsel %vm2762_vm7, %v5013_v51, %v4542_v43  ;;  %v12805_v43 = vld [vmem:[#allocation125_spill] sm:$0xff]  ;;  %5684 = vmatprep.mubr.msk.f32.mxu1 %vm2998_vm11, %v10918_v38 }
 0x6c1   : > { %v4638_v28 = vpop.permute.xlu1 %4637  ;;  %v4670_v41 = vpop.permute.xlu0 %4669 }
 0x6c3   : > { %4529 = vrot.lane.b32.xlu1 %v12789_v48, %s5852_s13  ;;  %4819 = vrot.lane.b32.xlu0 %v12755_v45, %s5855_s26  ;;  %v5093_v45 = vsel %vm2817_vm8, %v5061_v31, %v4670_v41 }
 0x6c5   : > { %v4476_v50 = vpop.permute.xlu1 %4475  ;;  %v4766_v2 = vpop.permute.xlu0 %4765 }
 0x6c6   : > { %v5125_v16 = vsel %vm2872_vm9, %v5093_v45, %v4766_v2 }
 0x6c7   : > { %4625 = vrot.lane.b32.xlu1 %v12792_v11, %s5853_s14  ;;  %4657 = vrot.lane.b32.xlu0 %v12793_v57, %s5853_s14 }
 0x6c9   : > { %v4862_v0 = vpop.permute.xlu1 %4861  ;;  %v4734_v30 = vpop.permute.xlu0 %4733 }
 0x6ca   : > { %v5157_v1 = vsel %vm2927_vm10, %v5125_v16, %v4862_v0 }
 0x6cb   : > { %4463 = vrot.lane.b32.xlu1 %v12795_v15, %s5851_s12  ;;  %4753 = vrot.lane.b32.xlu0 %v12759_v54, %s5854_s15  ;;  %v5077_v54 = vsel %vm2817_vm8, %v5045_v3, %v4638_v28  ;;  %v12812_v15 = vld [vmem:[#allocation197_spill] sm:$0xff] }
 0x6cc   : > { %5666 = vmatprep.subr.msk.mxu1 %vm2998_vm11, %v5157_v1  ;;  %v5109_v20 = vsel %vm2872_vm9, %v5077_v54, %v4734_v30  ;;  %v12810_v1 = vld [vmem:[#allocation94_spill] sm:$0xff]  ;;  %v12816_v54 = vld [vmem:[#allocation65_spill] sm:$0xff] }
 0x6cd   : > { %v4572_v17 = vpop.permute.xlu1 %4571  ;;  %v4444_v26 = vpop.permute.xlu0 %4443 }
 0x6cf   : > { %4849 = vrot.lane.b32.xlu1 %v12762_v36, %s5855_s26  ;;  %4721 = vrot.lane.b32.xlu0 %v12763_v39, %s5854_s15  ;;  %v4932_v39 = vsel %vm2542_vm3, %v12781_v22, %v12800_v40  ;;  %v12804_v22 = vld [vmem:[#allocation70_spill] sm:$0xff] }
 0x6d0   : > { %v4964_v32 = vsel %vm2597_vm4, %v4932_v39, %v12802_v37  ;;  %v12819_v39 = vld [vmem:[#allocation222_spill] sm:$0xff]  ;;  %v12820_v37 = vld [vmem:[#allocation323_spill] sm:$0xff] }
 0x6d1   : > { %v4540_v5 = vpop.permute.xlu1 %4539  ;;  %v4830_v27 = vpop.permute.xlu0 %4829  ;;  %v4996_v14 = vsel %vm2652_vm5, %v4964_v32, %v12803_v52 }
 0x6d2   : > { %v5141_v7 = vsel %vm2927_vm10, %v5109_v20, %v4830_v27  ;;  %v5028_v49 = vsel %vm2707_vm6, %v4996_v14, %v4476_v50  ;;  %v4980_v50 = vsel %vm2652_vm5, %v4948_v58, %v12809_v63  ;;  %v12817_v20 = vld [vmem:[#allocation115_spill] sm:$0xff]  ;;  %v5857_v27 = vmov 0  }
 0x6d3   : > { %4559 = vrot.lane.b32.xlu1 %v12798_v13, %s5852_s13  ;;  %4431 = vrot.lane.b32.xlu0 %v12799_v62, %s5851_s12  ;;  %v5060_v9 = vsel %vm2762_vm7, %v5028_v49, %v4572_v17  ;;  %v5012_v31 = vsel %vm2707_vm6, %v4980_v50, %v4444_v26  ;;  %v12815_v17 = vld [vmem:[#allocation274_spill] sm:$0xff] }
 0x6d4   : > { %5667 = vmatpush3.xpose.msk.msra.mxu1 %vm2998_vm11, %v5141_v7  ;;  %v5044_v46 = vsel %vm2762_vm7, %v5012_v31, %v4540_v5  ;;  %5821 = vset.pattern.permute.xlu0 %v5857_v27 }
 0x6d5   : > { %v4636_v36 = vpop.permute.xlu1 %4635  ;;  %v4668_v34 = vpop.permute.xlu0 %4667 }
 0x6d7   : > { %4527 = vrot.lane.b32.xlu1 %v12801_v59, %s5852_s13  ;;  %4817 = vrot.lane.b32.xlu0 %v12765_v23, %s5855_s26  ;;  %v5092_v23 = vsel %vm2817_vm8, %v5060_v9, %v4668_v34  ;;  %v12818_v34 = vld [vmem:[#allocation267_spill] sm:$0xff] }
 0x6d8   : > { %v4915_v40 = vsel %vm2542_vm3, %v12792_v11, %v12818_v34 }
 0x6d9   : > { %v4474_v35 = vpop.permute.xlu1 %4473  ;;  %v4764_v4 = vpop.permute.xlu0 %4763  ;;  %v4947_v59 = vsel %vm2597_vm4, %v4915_v40, %v12819_v39 }
 0x6da   : > { %v5124_v19 = vsel %vm2872_vm9, %v5092_v23, %v4764_v4  ;;  %v4979_v32 = vsel %vm2652_vm5, %v4947_v59, %v12820_v37  ;;  %v12830_v59 = vld [vmem:[#allocation219_spill] sm:$0xff] }
 0x6db   : > { %4623 = vrot.lane.b32.xlu1 %v12804_v22, %s5853_s14  ;;  %4655 = vrot.lane.b32.xlu0 %v12805_v43, %s5853_s14  ;;  %v4913_v37 = vsel %vm2542_vm3, %v12816_v54, %v12830_v59 }
 0x6dd   : > { %v4860_v18 = vpop.permute.xlu1 %4859  ;;  %v4732_v28 = vpop.permute.xlu0 %4731 }
 0x6de   : > { %v5156_v41 = vsel %vm2927_vm10, %v5124_v19, %v4860_v18  ;;  %v12821_v18 = vld [vmem:[#allocation320_spill] sm:$0xff] }
 0x6df   : > { %4461 = vrot.lane.b32.xlu1 %v12807_v33, %s5851_s12  ;;  %4751 = vrot.lane.b32.xlu0 %v12771_v55, %s5854_s15  ;;  %v5076_v55 = vsel %vm2817_vm8, %v5044_v46, %v4636_v36  ;;  %v12824_v46 = vld [vmem:[#allocation216_spill] sm:$0xff] }
 0x6e0   : > { %5668 = vmatprep.subr.msk.mxu1 %vm2998_vm11, %v5156_v41  ;;  %v5108_v45 = vsel %vm2872_vm9, %v5076_v55, %v4732_v28  ;;  %v12822_v28 = vld [vmem:[#allocation146_spill] sm:$0xff]  ;;  %v4914_v55 = vsel %vm2542_vm3, %v12804_v22, %v12824_v46 }
 0x6e1   : > { %v4570_v2 = vpop.permute.xlu1 %4569  ;;  %v4442_v61 = vpop.permute.xlu0 %4441 }
 0x6e3   : > { %4847 = vrot.lane.b32.xlu1 %v12774_v10, %s5855_s26  ;;  %4719 = vrot.lane.b32.xlu0 %v12775_v8, %s5854_s15  ;;  %v4931_v8 = vsel %vm2542_vm3, %v12793_v57, %v12812_v15 }
 0x6e4   : > { %v4963_v47 = vsel %vm2597_vm4, %v4931_v8, %v12814_v44 }
 0x6e5   : > { %v4538_v16 = vpop.permute.xlu1 %4537  ;;  %v4828_v0 = vpop.permute.xlu0 %4827  ;;  %v4995_v26 = vsel %vm2652_vm5, %v4963_v47, %v12815_v17 }
 0x6e6   : > { %v5140_v30 = vsel %vm2927_vm10, %v5108_v45, %v4828_v0  ;;  %v5027_v57 = vsel %vm2707_vm6, %v4995_v26, %v4474_v35  ;;  %v5011_v35 = vsel %vm2707_vm6, %v4979_v32, %v4442_v61  ;;  %v12825_v45 = vld [vmem:[#allocation363_spill] sm:$0xff]  ;;  %v12827_v26 = vld [vmem:[#allocation317_spill] sm:$0xff]  ;;  %v12831_v32 = vld [vmem:[#allocation102_spill] sm:$0xff] }
 0x6e7   : > { %4557 = vrot.lane.b32.xlu1 %v12810_v1, %s5852_s13  ;;  %4429 = vrot.lane.b32.xlu0 %v12811_v6, %s5851_s12  ;;  %v5043_v11 = vsel %vm2762_vm7, %v5011_v35, %v4538_v16  ;;  %v4946_v16 = vsel %vm2597_vm4, %v4914_v55, %v12825_v45  ;;  %v12826_v0 = vld [vmem:[#allocation275_spill] sm:$0xff]  ;;  %v12837_v45 = vld [vmem:[#allocation138_spill] sm:$0xff] }
 0x6e8   : > { %5669 = vmatpush3.xpose.msk.msra.mxu1 %vm2998_vm11, %v5140_v30  ;;  %v4978_v30 = vsel %vm2652_vm5, %v4946_v16, %v12826_v0  ;;  %v12838_v16 = vld [vmem:[#allocation173_spill] sm:$0xff] }
 0x6e9   : > { %v4634_v10 = vpop.permute.xlu1 %4633  ;;  %v4666_v29 = vpop.permute.xlu0 %4665  ;;  %v4912_v0 = vsel %vm2542_vm3, %v12838_v16, %v12837_v45 }
 0x6eb   : > { %4525 = vrot.lane.b32.xlu1 %v12813_v25, %s5852_s13  ;;  %4815 = vrot.lane.b32.xlu0 %v12777_v53, %s5855_s26  ;;  %v5059_v53 = vsel %vm2762_vm7, %v5027_v57, %v4570_v2 }
 0x6ec   : > { %v5091_v5 = vsel %vm2817_vm8, %v5059_v53, %v4666_v29  ;;  %v12829_v53 = vld [vmem:[#allocation16_spill] sm:$0xff] }
 0x6ed   : > { %v4472_v51 = vpop.permute.xlu1 %4471  ;;  %v4762_v3 = vpop.permute.xlu0 %4761 }
 0x6ee   : > { %v5123_v7 = vsel %vm2872_vm9, %v5091_v5, %v4762_v3  ;;  %v12828_v3 = vld [vmem:[#allocation17_spill] sm:$0xff] }
 0x6ef   : > { %4621 = vrot.lane.b32.xlu1 %v12816_v54, %s5853_s14  ;;  %4653 = vrot.lane.b32.xlu0 %v12817_v20, %s5853_s14  ;;  %s5588_s14 = sshll.u32 %s12870_s21, 4 }
 0x6f0   : > { %s321_s30 = scalar_lea.vmem %s11135_s6, %s5588_s14 }
 0x6f1   : > { %v4858_v13 = vpop.permute.xlu1 %4857  ;;  %v4730_v62 = vpop.permute.xlu0 %4729 }
 0x6f2   : > { %v5155_v36 = vsel %vm2927_vm10, %v5123_v7, %v4858_v13 }
 0x6f3   : > { %4717 = vrot.lane.b32.xlu1 %v12787_v60, %s5854_s15  ;;  %4749 = vrot.lane.b32.xlu0 %v12783_v21, %s5854_s15  ;;  %v5075_v21 = vsel %vm2817_vm8, %v5043_v11, %v4634_v10  ;;  %v5166_v60 = vld [vmem:[%s11134_s5] sm:$0xff] }
 0x6f4   : > { %5670 = vmatprep.subr.msk.mxu1 %vm2998_vm11, %v5155_v36  ;;  %v5107_v4 = vsel %vm2872_vm9, %v5075_v21, %v4730_v62 }
 0x6f5   : > { %v4568_v52 = vpop.permute.xlu1 %4567  ;;  %v4440_v14 = vpop.permute.xlu0 %4439 }
 0x6f6   : > { %v5010_v10 = vsel %vm2707_vm6, %v4978_v30, %v4440_v14  ;;  %v12832_v14 = vld [vmem:[#allocation57_spill] sm:$0xff] }
 0x6f7   : > { %4813 = vrot.lane.b32.xlu1 %v12789_v48, %s5855_s26  ;;  %4845 = vrot.lane.b32.xlu0 %v12786_v56, %s5855_s26  ;;  %v4930_v56 = vsel %vm2542_vm3, %v12805_v43, %v12821_v18  ;;  %v12839_v30 = vld [vmem:[#allocation145_spill] sm:$0xff] }
 0x6f8   : > { %v4962_v41 = vsel %vm2597_vm4, %v4930_v56, %v12822_v28  ;;  %v12833_v56 = vld [vmem:[#allocation266_spill] sm:$0xff]  ;;  %v12834_v28 = vld [vmem:[#allocation259_spill] sm:$0xff] }
 0x6f9   : > { %v4536_v49 = vpop.permute.xlu1 %4535  ;;  %v4826_v9 = vpop.permute.xlu0 %4825  ;;  %v4994_v42 = vsel %vm2652_vm5, %v4962_v41, %v12823_v24  ;;  %v4928_v41 = vsel %vm2542_vm3, %v12834_v28, %v12833_v56  ;;  %v12835_v24 = vld [vmem:[#allocation321_spill] sm:$0xff] }
 0x6fa   : > { %v5139_v23 = vsel %vm2927_vm10, %v5107_v4, %v4826_v9  ;;  %v5026_v58 = vsel %vm2707_vm6, %v4994_v42, %v4472_v51  ;;  %v5042_v29 = vsel %vm2762_vm7, %v5010_v10, %v4536_v49  ;;  %v4929_v51 = vsel %vm2542_vm3, %v12817_v20, %v12827_v26 }
 0x6fb   : > { %5671 = vmatpush3.xpose.msk.msra.mxu1 %vm2998_vm11, %v5139_v23  ;;  %5169 = vperm.xlu0 %5821, %v5166_v60   ;;  %v5058_v63 = vsel %vm2762_vm7, %v5026_v58, %v4568_v52  ;;  %v4961_v57 = vsel %vm2597_vm4, %v4929_v51, %v12828_v3  ;;  %v4945_v52 = vsel %vm2597_vm4, %v4913_v37, %v12831_v32 }
 0x6fc   : > { %v4993_v5 = vsel %vm2652_vm5, %v4961_v57, %v12829_v53  ;;  %v4977_v35 = vsel %vm2652_vm5, %v4945_v52, %v12832_v14  ;;  %v4960_v42 = vsel %vm2597_vm4, %v4928_v41, %v12835_v24  ;;  %v12841_v57 = vld [vmem:[#allocation269_spill] sm:$0xff]  ;;  %v12842_v53 = vld [vmem:[#allocation7_spill] sm:$0xff] }
 0x6fd   : > { %v4632_v19 = vpop.permute.xlu1 %4631  ;;  %v4664_v48 = vpop.permute.xlu0 %4663  ;;  %v12845_v14 = vld [vmem:[#allocation193_spill] sm:$0xff] }
 0x6fe   : > { %v5090_v50 = vsel %vm2817_vm8, %v5058_v63, %v4664_v48  ;;  %v5074_v15 = vsel %vm2817_vm8, %v5042_v29, %v4632_v19 }
 0x701   : > { %v4470_v33 = vpop.permute.xlu1 %4469  ;;  %v4760_v12 = vpop.permute.xlu0 %4759 }
 0x702   : > { %v5122_v2 = vsel %vm2872_vm9, %v5090_v50, %v4760_v12  ;;  %v5025_v13 = vsel %vm2707_vm6, %v4993_v5, %v4470_v33  ;;  %v12836_v33 = vld [vmem:[#allocation107_spill] sm:$0xff]  ;;  %v4927_v5 = vsel %vm2542_vm3, %v12842_v53, %v12841_v57 }
 0x703   : > { %v4992_v12 = vsel %vm2652_vm5, %v4960_v42, %v12836_v33  ;;  %v12849_v33 = vld [vmem:[#allocation221_spill] sm:$0xff] }
 0x705   : > { %v4856_v61 = vpop.permute.xlu1 %4855  ;;  %v4728_v31 = vpop.permute.xlu0 %4727 }
 0x706   : > { %v5154_v43 = vsel %vm2927_vm10, %v5122_v2, %v4856_v61  ;;  %v5106_v8 = vsel %vm2872_vm9, %v5074_v15, %v4728_v31 }
 0x707   : > { %5672 = vmatprep.subr.msk.mxu1 %vm2998_vm11, %v5154_v43 }
 0x709   : > { %v4566_v1 = vpop.permute.xlu1 %4565  ;;  %v4438_v6 = vpop.permute.xlu0 %4437 }
 0x70a   : > { %v5057_v62 = vsel %vm2762_vm7, %v5025_v13, %v4566_v1  ;;  %v5009_v60 = vsel %vm2707_vm6, %v4977_v35, %v4438_v6  ;;  %v4944_v1 = vsel %vm2597_vm4, %v4912_v0, %v12839_v30  ;;  %v12840_v6 = vld [vmem:[#allocation18_spill] sm:$0xff]  ;;  %v12846_v35 = vld [vmem:[#allocation172_spill] sm:$0xff] }
 0x70b   : > { %v4976_v10 = vsel %vm2652_vm5, %v4944_v1, %v12840_v6  ;;  %v12844_v13 = vld [vmem:[#allocation226_spill] sm:$0xff]  ;;  %v12853_v6 = vld [vmem:[#allocation313_spill] sm:$0xff] }
 0x70d   : > { %v4534_v25 = vpop.permute.xlu1 %4533  ;;  %v4824_v22 = vpop.permute.xlu0 %4823 }
 0x70e   : > { %v5138_v44 = vsel %vm2927_vm10, %v5106_v8, %v4824_v22  ;;  %v5041_v4 = vsel %vm2762_vm7, %v5009_v60, %v4534_v25 }
 0x70f   : > { %5673 = vmatpush3.xpose.msk.msra.mxu1 %vm2998_vm11, %v5138_v44 }
 0x711   : > { %v4630_v47 = vpop.permute.xlu1 %4629  ;;  %v4662_v17 = vpop.permute.xlu0 %4661 }
 0x712   : > { %v5089_v36 = vsel %vm2817_vm8, %v5057_v62, %v4662_v17  ;;  %v5073_v49 = vsel %vm2817_vm8, %v5041_v4, %v4630_v47  ;;  %v12848_v4 = vld [vmem:[#allocation272_spill] sm:$0xff] }
 0x715   : > { %v4468_v27 = vpop.permute.xlu1 %4467  ;;  %v4758_v7 = vpop.permute.xlu0 %4757 }
 0x716   : > { %v5121_v34 = vsel %vm2872_vm9, %v5089_v36, %v4758_v7  ;;  %v5024_v50 = vsel %vm2707_vm6, %v4992_v12, %v4468_v27  ;;  %v12843_v27 = vld [vmem:[#allocation324_spill] sm:$0xff]  ;;  %v12850_v12 = vld [vmem:[#allocation118_spill] sm:$0xff] }
 0x717   : > { %v4959_v7 = vsel %vm2597_vm4, %v4927_v5, %v12843_v27 }
 0x718   : > { %v4991_v62 = vsel %vm2652_vm5, %v4959_v7, %v12844_v13  ;;  %v12857_v13 = vld [vmem:[#allocation316_spill] sm:$0xff] }
 0x719   : > { %v4854_v40 = vpop.permute.xlu1 %4853  ;;  %v4726_v39 = vpop.permute.xlu0 %4725 }
 0x71a   : > { %v5153_v20 = vsel %vm2927_vm10, %v5121_v34, %v4854_v40  ;;  %v5105_v9 = vsel %vm2872_vm9, %v5073_v49, %v4726_v39 }
 0x71b   : > { %5674 = vmatprep.subr.msk.mxu1 %vm2998_vm11, %v5153_v20 }
 0x71d   : > { %v4564_v11 = vpop.permute.xlu1 %4563  ;;  %v4436_v21 = vpop.permute.xlu0 %4435 }
 0x71e   : > { %v5056_v2 = vsel %vm2762_vm7, %v5024_v50, %v4564_v11  ;;  %v5008_v8 = vsel %vm2707_vm6, %v4976_v10, %v4436_v21  ;;  %v4911_v11 = vsel %vm2542_vm3, %v12846_v35, %v12845_v14  ;;  %v12847_v21 = vld [vmem:[#allocation20_spill] sm:$0xff]  ;;  %v12854_v10 = vld [vmem:[#allocation66_spill] sm:$0xff] }
 0x71f   : > { %v4943_v60 = vsel %vm2597_vm4, %v4911_v11, %v12847_v21  ;;  %v12864_v35 = vld [vmem:[#allocation106_spill] sm:$0xff] }
 0x720   : > { %v4975_v49 = vsel %vm2652_vm5, %v4943_v60, %v12848_v4 }
 0x721   : > { %v4532_v23 = vpop.permute.xlu1 %4531  ;;  %v4822_v54 = vpop.permute.xlu0 %4821 }
 0x722   : > { %v5137_v19 = vsel %vm2927_vm10, %v5105_v9, %v4822_v54  ;;  %v5040_v25 = vsel %vm2762_vm7, %v5008_v8, %v4532_v23 }
 0x723   : > { %5675 = vmatpush3.xpose.msk.msra.mxu1 %vm2998_vm11, %v5137_v19 }
 0x725   : > { %v4628_v48 = vpop.permute.xlu1 %4627  ;;  %v4660_v18 = vpop.permute.xlu0 %4659 }
 0x726   : > { %v5088_v61 = vsel %vm2817_vm8, %v5056_v2, %v4660_v18  ;;  %v5072_v22 = vsel %vm2817_vm8, %v5040_v25, %v4628_v48  ;;  %v12852_v2 = vld [vmem:[#allocation367_spill] sm:$0xff] }
 0x727   : > { %v12856_v25 = vld [vmem:[#allocation227_spill] sm:$0xff] }
 0x729   : > { %v4466_v58 = vpop.permute.xlu1 %4465  ;;  %v4756_v63 = vpop.permute.xlu0 %4755 }
 0x72a   : > { %v5120_v31 = vsel %vm2872_vm9, %v5088_v61, %v4756_v63  ;;  %v5023_v40 = vsel %vm2707_vm6, %v4991_v62, %v4466_v58  ;;  %v4926_v58 = vsel %vm2542_vm3, %v12850_v12, %v12849_v33  ;;  %v12851_v63 = vld [vmem:[#allocation163_spill] sm:$0xff] }
 0x72b   : > { %v4958_v50 = vsel %vm2597_vm4, %v4926_v58, %v12851_v63  ;;  %v12858_v62 = vld [vmem:[#allocation67_spill] sm:$0xff] }
 0x72c   : > { %v4990_v61 = vsel %vm2652_vm5, %v4958_v50, %v12852_v2 }
 0x72d   : > { %v4852_v43 = vpop.permute.xlu1 %4851  ;;  %v4724_v46 = vpop.permute.xlu0 %4723 }
 0x72e   : > { %v5152_v55 = vsel %vm2927_vm10, %v5120_v31, %v4852_v43  ;;  %v5104_v44 = vsel %vm2872_vm9, %v5072_v22, %v4724_v46 }
 0x72f   : > { %5676 = vmatprep.subr.msk.mxu1 %vm2998_vm11, %v5152_v55 }
 0x731   : > { %v4562_v29 = vpop.permute.xlu1 %4561  ;;  %v4434_v15 = vpop.permute.xlu0 %4433 }
 0x732   : > { %v5055_v39 = vsel %vm2762_vm7, %v5023_v40, %v4562_v29  ;;  %v5007_v54 = vsel %vm2707_vm6, %v4975_v49, %v4434_v15  ;;  %v4910_v29 = vsel %vm2542_vm3, %v12854_v10, %v12853_v6  ;;  %v12855_v15 = vld [vmem:[#allocation319_spill] sm:$0xff] }
 0x733   : > { %v4942_v8 = vsel %vm2597_vm4, %v4910_v29, %v12855_v15  ;;  %v12860_v40 = vld [vmem:[#allocation3_spill] sm:$0xff] }
 0x734   : > { %v4974_v22 = vsel %vm2652_vm5, %v4942_v8, %v12856_v25 }
 0x735   : > { %v4530_v47 = vpop.permute.xlu1 %4529  ;;  %v4820_v17 = vpop.permute.xlu0 %4819 }
 0x736   : > { %v5136_v26 = vsel %vm2927_vm10, %v5104_v44, %v4820_v17  ;;  %v5039_v19 = vsel %vm2762_vm7, %v5007_v54, %v4530_v47 }
 0x737   : > { %5677 = vmatpush3.xpose.msk.msra.mxu1 %vm2998_vm11, %v5136_v26 }
 0x739   : > { %v4626_v51 = vpop.permute.xlu1 %4625  ;;  %v4658_v3 = vpop.permute.xlu0 %4657 }
 0x73a   : > { %v5087_v20 = vsel %vm2817_vm8, %v5055_v39, %v4658_v3  ;;  %v5071_v48 = vsel %vm2817_vm8, %v5039_v19, %v4626_v51 }
 0x73d   : > { %v4464_v36 = vpop.permute.xlu1 %4463  ;;  %v4754_v34 = vpop.permute.xlu0 %4753 }
 0x73e   : > { %v5119_v59 = vsel %vm2872_vm9, %v5087_v20, %v4754_v34  ;;  %v5022_v46 = vsel %vm2707_vm6, %v4990_v61, %v4464_v36  ;;  %v4909_v36 = vsel %vm2542_vm3, %v12858_v62, %v12857_v13  ;;  %v12859_v34 = vld [vmem:[#allocation218_spill] sm:$0xff] }
 0x73f   : > { %v4925_v39 = vsel %vm2542_vm3, %v12860_v40, %v12859_v34  ;;  %v12861_v20 = vld [vmem:[#allocation322_spill] sm:$0xff] }
 0x741   : > { %v4850_v37 = vpop.permute.xlu1 %4849  ;;  %v4722_v32 = vpop.permute.xlu0 %4721 }
 0x742   : > { %v5151_v52 = vsel %vm2927_vm10, %v5119_v59, %v4850_v37  ;;  %v5103_v18 = vsel %vm2872_vm9, %v5071_v48, %v4722_v32  ;;  %v4941_v59 = vsel %vm2597_vm4, %v4909_v36, %v12861_v20  ;;  %v12862_v37 = vld [vmem:[#allocation58_spill] sm:$0xff] }
 0x743   : > { %5678 = vmatprep.subr.msk.mxu1 %vm2998_vm11, %v5151_v52  ;;  %v4957_v32 = vsel %vm2597_vm4, %v4925_v39, %v12862_v37  ;;  %v12863_v52 = vld [vmem:[#allocation14_spill] sm:$0xff] }
 0x744   : > { %v4973_v14 = vsel %vm2652_vm5, %v4941_v59, %v12863_v52  ;;  %v4989_v11 = vsel %vm2652_vm5, %v4957_v32, %v12864_v35 }
 0x745   : > { %v4560_v9 = vpop.permute.xlu1 %4559  ;;  %v4432_v23 = vpop.permute.xlu0 %4431 }
 0x746   : > { %v5054_v55 = vsel %vm2762_vm7, %v5022_v46, %v4560_v9  ;;  %v5006_v17 = vsel %vm2707_vm6, %v4974_v22, %v4432_v23 }
 0x749   : > { %v4528_v56 = vpop.permute.xlu1 %4527  ;;  %v4818_v28 = vpop.permute.xlu0 %4817 }
 0x74a   : > { %v5135_v41 = vsel %vm2927_vm10, %v5103_v18, %v4818_v28  ;;  %v5038_v26 = vsel %vm2762_vm7, %v5006_v17, %v4528_v56 }
 0x74b   : > { %5679 = vmatpush3.xpose.msk.msra.mxu1 %vm2998_vm11, %v5135_v41 }
 0x74d   : > { %v4624_v24 = vpop.permute.xlu1 %4623  ;;  %v4656_v42 = vpop.permute.xlu0 %4655 }
 0x74e   : > { %v5086_v45 = vsel %vm2817_vm8, %v5054_v55, %v4656_v42  ;;  %v5070_v51 = vsel %vm2817_vm8, %v5038_v26, %v4624_v24 }
 0x751   : > { %v4462_v31 = vpop.permute.xlu1 %4461  ;;  %v4752_v43 = vpop.permute.xlu0 %4751 }
 0x752   : > { %v5118_v16 = vsel %vm2872_vm9, %v5086_v45, %v4752_v43  ;;  %v5021_v4 = vsel %vm2707_vm6, %v4989_v11, %v4462_v31 }
 0x755   : > { %v4848_v0 = vpop.permute.xlu1 %4847  ;;  %v4720_v30 = vpop.permute.xlu0 %4719 }
 0x756   : > { %v5150_v1 = vsel %vm2927_vm10, %v5118_v16, %v4848_v0  ;;  %v5102_v3 = vsel %vm2872_vm9, %v5070_v51, %v4720_v30 }
 0x757   : > { %5680 = vmatprep.subr.msk.mxu1 %vm2998_vm11, %v5150_v1 }
 0x759   : > { %v4558_v44 = vpop.permute.xlu1 %4557  ;;  %v4430_v47 = vpop.permute.xlu0 %4429 }
 0x75a   : > { %v5005_v49 = vsel %vm2707_vm6, %v4973_v14, %v4430_v47  ;;  %v5053_v9 = vsel %vm2762_vm7, %v5021_v4, %v4558_v44 }
 0x75d   : > { %v4526_v57 = vpop.permute.xlu1 %4525  ;;  %v4816_v53 = vpop.permute.xlu0 %4815 }
 0x75e   : > { %v5134_v5 = vsel %vm2927_vm10, %v5102_v3, %v4816_v53  ;;  %v5037_v23 = vsel %vm2762_vm7, %v5005_v49, %v4526_v57 }
 0x75f   : > { %5681 = vmatpush3.xpose.msk.msra.mxu1 %vm2998_vm11, %v5134_v5 }
 0x761   : > { %v4622_v27 = vpop.permute.xlu1 %4621  ;;  %v4654_v7 = vpop.permute.xlu0 %4653 }
 0x762   : > { %v5069_v54 = vsel %vm2817_vm8, %v5037_v23, %v4622_v27  ;;  %v5085_v19 = vsel %vm2817_vm8, %v5053_v9, %v4654_v7 }
 0x765   : > { %v4718_v21 = vpop.permute.xlu1 %4717  ;;  %v4750_v60 = vpop.permute.xlu0 %4749 }
 0x766   : > { %v5101_v48 = vsel %vm2872_vm9, %v5069_v54, %v4718_v21  ;;  %v5117_v18 = vsel %vm2872_vm9, %v5085_v19, %v4750_v60 }
 0x769   : > { %v4814_v56 = vpop.permute.xlu1 %4813  ;;  %v4846_v28 = vpop.permute.xlu0 %4845 }
 0x76a   : > { %v5133_v41 = vsel %vm2927_vm10, %v5101_v48, %v4814_v56  ;;  %v5149_v24 = vsel %vm2927_vm10, %v5117_v18, %v4846_v28 }
 0x76b   : > { %5682 = vmatprep.subr.msk.mxu1 %vm2998_vm11, %v5149_v24 }
 0x76c   : > { %5683 = vmatpush3.xpose.msk.msra.mxu1 %vm2998_vm11, %v5133_v41 }
 0x76f   : > { %5685 = vmatmul.mubr.msk.f32.vlgmr.msra.gmra.mxu1 %vm2998_vm11, %v10918_v38 }
 0x776   : > { %v5170_v42 = vpop.permute.xlu0 %5169 }
 0x82f   : > { %v5337_v33 = vpop.f32.mrf.mxu1 }
 0x830   : > { %v5338_v12 = vadd.f32 %v5337_v33, %v5170_v42 }
 0x831   : > { %v5339_v58 = vpop.f32.mrf.mxu1 }
 0x832   : > { %v5342_v63 = vmax.f32 %v5338_v12, 0.0  ;;  %v5340_v50 = vadd.f32 %v5339_v58, %v5170_v42 }
 0x834   : > { %5344 = vst [vmem:[%s321_s30] sm:$0xff] %v5342_v63  ;;  %v5343_v2 = vmax.f32 %v5340_v50, 0.0 }
 0x836   : > { %5345 = vst [vmem:[%s321_s30 + $0x8] sm:$0xff] %v5343_v2 }
 0x837 PF: > { %s16_s23 = sadd.s32 1, %s5845_s23   ;;  %s12865_s21 = smov %s5841_s22 }
 0x838   : > { %p13_p5 = scmp.ge.s32.totalorder %s16_s23, 4   ;;  %s12866_s22 = smov %s12868_s24 }
 0x83a   :  { %15 = sbr.rel (!%p13_p5) target bundleno = 2 (0x2), region = 77 }

</bundles_post_ra>
